<compile_context>
chip_gen: v5e
topology: v5e:2x2
jax: 0.10.0
libtpu: 0.0.40
codegen_flags: <defaults>
</compile_context>

<pallas_src>
import functools

import jax
import jax.numpy as jnp
from jax.experimental import pallas as pl
from jax.experimental.pallas import tpu as pltpu

VMEM_LIMIT_BYTES = 32 * 1024 * 1024  # safe on v5e/v6e/v7x for these block sizes


def _cparams(n_grid_axes):
    return pltpu.CompilerParams(
        dimension_semantics=("parallel",) * n_grid_axes,
        vmem_limit_bytes=VMEM_LIMIT_BYTES,
    )


def _silu(y):
    return y * jax.nn.sigmoid(y)


def _bcast_spec(shape):
    """Full-array block that is identical for every grid step (weights, affines)."""
    nd = len(shape)
    return pl.BlockSpec(tuple(shape), lambda n, _nd=nd: (0,) * _nd)


# ---------------------------------------------------------------------------
# Kernel 1 (per sample): stem conv (one K=27 matmul) + BN + SiLU
#   -> MBConv block 1: dw3x3/s1 + BN + SiLU, SE gate, 1x1 proj + BN, residual
#   -> MBConv block 2 expansion: 1x1 + BN + SiLU
# ---------------------------------------------------------------------------

def _front_kernel(patch_ref,
                  stem_w_ref, stem_scale_ref, stem_shift_ref,
                  dw_w_ref, dw_scale_ref, dw_shift_ref,
                  se_w1_ref, se_b1_ref, se_w2_ref, se_b2_ref,
                  proj_w_ref, proj_scale_ref, proj_shift_ref,
                  exp_w_ref, exp_scale_ref, exp_shift_ref,
                  o_ref, pad_ref, *, Ho, Wo):
    C1 = dw_w_ref.shape[1]          # block-1 channels (== stem out channels)
    Ce = exp_w_ref.shape[1]         # block-2 expanded channels
    M = Ho * Wo

    # ---- stem: single (M, 27) @ (27, C1) MXU pass + folded BN + SiLU ------
    x0 = jnp.dot(patch_ref[0], stem_w_ref[...], preferred_element_type=jnp.float32)
    x0 = _silu(x0 * stem_scale_ref[...] + stem_shift_ref[...])          # (M, C1)

    # ---- block 1 depthwise 3x3 / s1 ('same' zero pad via VMEM scratch) ----
    # Scratch layout: interior stored at rows [1:Ho+1], cols [8:Wo+8] so the
    # vector store is sublane-aligned; zero border supplies the conv padding.
    pad_ref[...] = jnp.zeros_like(pad_ref)
    pad_ref[1:Ho + 1, 8:Wo + 8, :] = x0.reshape(Ho, Wo, C1)
    xp = pad_ref[...]
    acc = None
    for di in range(3):
        for dj in range(3):
            tap = xp[di:di + Ho, 7 + dj:7 + dj + Wo, :]
            term = tap * dw_w_ref[di * 3 + dj:di * 3 + dj + 1, :]
            acc = term if acc is None else acc + term
    y = _silu(acc * dw_scale_ref[...] + dw_shift_ref[...])              # (Ho, Wo, C1)
    y2d = y.reshape(M, C1)

    # ---- squeeze-excite gate (all in-VMEM) ---------------------------------
    pooled = jnp.sum(y2d, axis=0, keepdims=True) * (1.0 / M)            # (1, C1)
    s = _silu(jnp.dot(pooled.astype(jnp.bfloat16), se_w1_ref[...],
                      preferred_element_type=jnp.float32) + se_b1_ref[...])
    gate = jax.nn.sigmoid(jnp.dot(s.astype(jnp.bfloat16), se_w2_ref[...],
                                  preferred_element_type=jnp.float32) + se_b2_ref[...])

    # ---- 1x1 projection + folded BN + residual -----------------------------
    g = y2d * gate
    z = jnp.dot(g.astype(jnp.bfloat16), proj_w_ref[...],
                preferred_element_type=jnp.float32)
    x1 = z * proj_scale_ref[...] + proj_shift_ref[...] + x0             # (M, C1)

    # ---- block 2 expansion 1x1 + folded BN + SiLU --------------------------
    e = jnp.dot(x1.astype(jnp.bfloat16), exp_w_ref[...],
                preferred_element_type=jnp.float32)
    e = _silu(e * exp_scale_ref[...] + exp_shift_ref[...])              # (M, Ce)
    o_ref[0] = e.reshape(Ho, Wo, Ce).astype(o_ref.dtype)


# ---------------------------------------------------------------------------
# Kernel 2 (per sample): MBConv block 2 dw3x3/s2 (from phase-split inputs)
#   + BN + SiLU, SE gate, 1x1 proj + BN, head 1x1 + BN + SiLU, GAP, classifier
# ---------------------------------------------------------------------------

def _back_kernel(ee_ref, eo_ref, oe_ref, oo_ref,
                 dw_w_ref, dw_scale_ref, dw_shift_ref,
                 se_w1_ref, se_b1_ref, se_w2_ref, se_b2_ref,
                 proj_w_ref, proj_scale_ref, proj_shift_ref,
                 head_w_ref, head_scale_ref, head_shift_ref,
                 fc_w_ref, fc_b_ref,
                 o_ref, *, Ho, Wo):
    M = Ho * Wo
    Ce = dw_w_ref.shape[1]

    phases = ((ee_ref[0].astype(jnp.float32), eo_ref[0].astype(jnp.float32)),
              (oe_ref[0].astype(jnp.float32), oo_ref[0].astype(jnp.float32)))
    acc = None
    for di in range(3):
        for dj in range(3):
            ph = phases[di % 2][dj % 2]
            r0, c0 = di // 2, dj // 2
            term = (ph[r0:r0 + Ho, c0:c0 + Wo, :]
                    * dw_w_ref[di * 3 + dj:di * 3 + dj + 1, :])
            acc = term if acc is None else acc + term
    y = _silu(acc * dw_scale_ref[...] + dw_shift_ref[...])              # (Ho, Wo, Ce)
    y2d = y.reshape(M, Ce)

    pooled = jnp.sum(y2d, axis=0, keepdims=True) * (1.0 / M)            # (1, Ce)
    s = _silu(jnp.dot(pooled.astype(jnp.bfloat16), se_w1_ref[...],
                      preferred_element_type=jnp.float32) + se_b1_ref[...])
    gate = jax.nn.sigmoid(jnp.dot(s.astype(jnp.bfloat16), se_w2_ref[...],
                                  preferred_element_type=jnp.float32) + se_b2_ref[...])
    g = y2d * gate

    z = jnp.dot(g.astype(jnp.bfloat16), proj_w_ref[...],
                preferred_element_type=jnp.float32)
    z = z * proj_scale_ref[...] + proj_shift_ref[...]                   # (M, Cp)

    h = jnp.dot(z.astype(jnp.bfloat16), head_w_ref[...],
                preferred_element_type=jnp.float32)
    h = _silu(h * head_scale_ref[...] + head_shift_ref[...])            # (M, Ch)
    hp = jnp.sum(h, axis=0, keepdims=True) * (1.0 / M)                  # (1, Ch)

    logits = jnp.dot(hp.astype(jnp.bfloat16), fc_w_ref[...],
                     preferred_element_type=jnp.float32) + fc_b_ref[...]
    o_ref[0] = logits.astype(o_ref.dtype)


# ---------------------------------------------------------------------------
# Parameters (deterministic synthetic init, BN folded into scale/shift)
# ---------------------------------------------------------------------------

def init_params(key, num_classes=10):
    keys = iter(jax.random.split(key, 64))

    def nxt():
        return next(keys)

    def w(shape, s=0.1):
        return jax.random.normal(nxt(), shape, jnp.float32) * s

    def bn(c):
        gamma = 1.0 + 0.1 * jax.random.normal(nxt(), (c,), jnp.float32)
        beta = 0.1 * jax.random.normal(nxt(), (c,), jnp.float32)
        mean = 0.1 * jax.random.normal(nxt(), (c,), jnp.float32)
        var = jnp.abs(jax.random.normal(nxt(), (c,), jnp.float32)) + 1.0
        scale = gamma / jnp.sqrt(var + 1e-5)
        shift = beta - mean * scale
        return scale, shift

    p = {}
    # Stem: 3x3 conv, stride 2, 3 -> 16, BN, SiLU (taps stored as (9, 3, 16))
    p["stem_w"] = w((3, 3, 3, 16)).reshape(9, 3, 16)
    p["stem_scale"], p["stem_shift"] = bn(16)
    # Block 1: MBConv (expand=1), C=16, stride 1, SE r=4, residual
    p["b1_dw"] = w((3, 3, 16)).reshape(9, 16)
    p["b1_dw_scale"], p["b1_dw_shift"] = bn(16)
    p["b1_se_w1"], p["b1_se_b1"] = w((16, 4)), w((4,))
    p["b1_se_w2"], p["b1_se_b2"] = w((4, 16)), w((16,))
    p["b1_proj_w"] = w((16, 16))
    p["b1_proj_scale"], p["b1_proj_shift"] = bn(16)
    # Block 2: MBConv (expand=4: 16->64), dw stride 2, SE r=16, project -> 24
    p["b2_exp_w"] = w((16, 64))
    p["b2_exp_scale"], p["b2_exp_shift"] = bn(64)
    p["b2_dw"] = w((3, 3, 64)).reshape(9, 64)
    p["b2_dw_scale"], p["b2_dw_shift"] = bn(64)
    p["b2_se_w1"], p["b2_se_b1"] = w((64, 16)), w((16,))
    p["b2_se_w2"], p["b2_se_b2"] = w((16, 64)), w((64,))
    p["b2_proj_w"] = w((64, 24))
    p["b2_proj_scale"], p["b2_proj_shift"] = bn(24)
    # Head: 1x1 conv 24 -> 64, BN, SiLU
    p["head_w"] = w((24, 64))
    p["head_scale"], p["head_shift"] = bn(64)
    # Classifier: Linear 64 -> num_classes
    p["fc_w"] = w((64, num_classes))
    p["fc_b"] = w((num_classes,))
    return p


# ---------------------------------------------------------------------------
# Forward pass (two fused pallas_calls + cheap wrapper-side layout plumbing)
# ---------------------------------------------------------------------------

def efficientnet_forward(params, x_nchw):
    p = params
    N, Cin, H, W = x_nchw.shape
    Ho, Wo = H // 2, W // 2          # stem output spatial
    H2, W2 = Ho // 2, Wo // 2        # block-2 output spatial
    C1 = p["b1_dw"].shape[1]
    Ce = p["b2_exp_w"].shape[1]
    num_classes = p["fc_b"].shape[0]
    bf16 = lambda a: a.astype(jnp.bfloat16)

    x = jnp.transpose(x_nchw, (0, 2, 3, 1)).astype(jnp.float32)  # NCHW -> NHWC

    # Stem im2col in the wrapper so the stem is a single K=27 MXU pass in-kernel.
    xp = jnp.pad(x, ((0, 0), (1, 1), (1, 1), (0, 0)))
    taps = [xp[:, di:di + H:2, dj:dj + W:2, :]
            for di in range(3) for dj in range(3)]
    patches = jnp.stack(taps, axis=3).reshape(N, Ho * Wo, 9 * Cin)
    patches = patches.astype(jnp.bfloat16)

    front_args = [
        bf16(p["stem_w"].reshape(9 * Cin, C1)),
        p["stem_scale"].reshape(1, C1), p["stem_shift"].reshape(1, C1),
        p["b1_dw"],
        p["b1_dw_scale"].reshape(1, C1), p["b1_dw_shift"].reshape(1, C1),
        bf16(p["b1_se_w1"]), p["b1_se_b1"].reshape(1, -1),
        bf16(p["b1_se_w2"]), p["b1_se_b2"].reshape(1, C1),
        bf16(p["b1_proj_w"]),
        p["b1_proj_scale"].reshape(1, C1), p["b1_proj_shift"].reshape(1, C1),
        bf16(p["b2_exp_w"]),
        p["b2_exp_scale"].reshape(1, Ce), p["b2_exp_shift"].reshape(1, Ce),
    ]
    front = pl.pallas_call(
        functools.partial(_front_kernel, Ho=Ho, Wo=Wo),
        out_shape=jax.ShapeDtypeStruct((N, Ho, Wo, Ce), jnp.bfloat16),
        grid=(N,),
        in_specs=([pl.BlockSpec((1, Ho * Wo, 9 * Cin), lambda n: (n, 0, 0))]
                  + [_bcast_spec(a.shape) for a in front_args]),
        out_specs=pl.BlockSpec((1, Ho, Wo, Ce), lambda n: (n, 0, 0, 0)),
        scratch_shapes=[pltpu.VMEM((Ho + 2, Wo + 16, C1), jnp.float32)],
        compiler_params=_cparams(1),
    )(patches, *front_args)

    # Stride-2 phase split of the expanded features (pure layout plumbing in XLA).
    ep = jnp.pad(front, ((0, 0), (1, 1), (1, 1), (0, 0)))
    ee = ep[:, 0::2, 0::2, :]
    eo = ep[:, 0::2, 1::2, :]
    oe = ep[:, 1::2, 0::2, :]
    oo = ep[:, 1::2, 1::2, :]

    back_args = [
        p["b2_dw"],
        p["b2_dw_scale"].reshape(1, Ce), p["b2_dw_shift"].reshape(1, Ce),
        bf16(p["b2_se_w1"]), p["b2_se_b1"].reshape(1, -1),
        bf16(p["b2_se_w2"]), p["b2_se_b2"].reshape(1, Ce),
        bf16(p["b2_proj_w"]),
        p["b2_proj_scale"].reshape(1, -1), p["b2_proj_shift"].reshape(1, -1),
        bf16(p["head_w"]),
        p["head_scale"].reshape(1, -1), p["head_shift"].reshape(1, -1),
        bf16(p["fc_w"]), p["fc_b"].reshape(1, -1),
    ]
    ph_spec = pl.BlockSpec((1, H2 + 1, W2 + 1, Ce), lambda n: (n, 0, 0, 0))
    logits = pl.pallas_call(
        functools.partial(_back_kernel, Ho=H2, Wo=W2),
        out_shape=jax.ShapeDtypeStruct((N, 1, num_classes), jnp.float32),
        grid=(N,),
        in_specs=[ph_spec, ph_spec, ph_spec, ph_spec]
                 + [_bcast_spec(a.shape) for a in back_args],
        out_specs=pl.BlockSpec((1, 1, num_classes), lambda n: (n, 0, 0)),
        compiler_params=_cparams(1),
    )(ee, eo, oe, oo, *back_args)
    return logits.reshape(N, num_classes)


# ---------------------------------------------------------------------------

if __name__ == "__main__":
    key = jax.random.PRNGKey(0)
    pkey, xkey = jax.random.split(key)
    params = init_params(pkey, num_classes=10)

    # Small NCHW input (PyTorch convention); EfficientNet expects 3 channels.
    x = jax.random.normal(xkey, (2, 3, 32, 32), jnp.float32)

    fwd = jax.jit(efficientnet_forward)
    logits = fwd(params, x)
    jax.block_until_ready(logits)

    assert logits.shape == (2, 10) and logits.dtype == jnp.float32
    print("KERNEL_OK")
</pallas_src>

<mosaic_0001>
module attributes {stable_mosaic.version = 11 : i64} {
  func.func @_front_kernel(%arg0: i32, %arg1: memref<1x256x27xbf16, #tpu.memory_space<vmem>>, %arg2: memref<27x16xbf16, #tpu.memory_space<vmem>>, %arg3: memref<1x16xf32, #tpu.memory_space<vmem>>, %arg4: memref<1x16xf32, #tpu.memory_space<vmem>>, %arg5: memref<9x16xf32, #tpu.memory_space<vmem>>, %arg6: memref<1x16xf32, #tpu.memory_space<vmem>>, %arg7: memref<1x16xf32, #tpu.memory_space<vmem>>, %arg8: memref<16x4xbf16, #tpu.memory_space<vmem>>, %arg9: memref<1x4xf32, #tpu.memory_space<vmem>>, %arg10: memref<4x16xbf16, #tpu.memory_space<vmem>>, %arg11: memref<1x16xf32, #tpu.memory_space<vmem>>, %arg12: memref<16x16xbf16, #tpu.memory_space<vmem>>, %arg13: memref<1x16xf32, #tpu.memory_space<vmem>>, %arg14: memref<1x16xf32, #tpu.memory_space<vmem>>, %arg15: memref<16x64xbf16, #tpu.memory_space<vmem>>, %arg16: memref<1x64xf32, #tpu.memory_space<vmem>>, %arg17: memref<1x64xf32, #tpu.memory_space<vmem>>, %arg18: memref<1x16x16x64xbf16, #tpu.memory_space<vmem>>, %arg19: memref<18x32x16xf32, #tpu.memory_space<vmem>>) attributes {dimension_semantics = [#tpu.dimension_semantics<parallel>], iteration_bounds = array<i64: 2>, scalar_prefetch = 0 : i64, scratch_operands = 1 : i64, tpu.core_type = #tpu.core_type<tc>, window_params = [{transform_indices = @transform_0, window_bounds = array<i64: 1, 256, 27>}, {pipeline_mode = #tpu.pipeline_mode<synchronous>, transform_indices = @transform_1, window_bounds = array<i64: 27, 16>}, {pipeline_mode = #tpu.pipeline_mode<synchronous>, transform_indices = @transform_2, window_bounds = array<i64: 1, 16>}, {pipeline_mode = #tpu.pipeline_mode<synchronous>, transform_indices = @transform_3, window_bounds = array<i64: 1, 16>}, {pipeline_mode = #tpu.pipeline_mode<synchronous>, transform_indices = @transform_4, window_bounds = array<i64: 9, 16>}, {pipeline_mode = #tpu.pipeline_mode<synchronous>, transform_indices = @transform_5, window_bounds = array<i64: 1, 16>}, {pipeline_mode = #tpu.pipeline_mode<synchronous>, transform_indices = @transform_6, window_bounds = array<i64: 1, 16>}, {pipeline_mode = #tpu.pipeline_mode<synchronous>, transform_indices = @transform_7, window_bounds = array<i64: 16, 4>}, {pipeline_mode = #tpu.pipeline_mode<synchronous>, transform_indices = @transform_8, window_bounds = array<i64: 1, 4>}, {pipeline_mode = #tpu.pipeline_mode<synchronous>, transform_indices = @transform_9, window_bounds = array<i64: 4, 16>}, {pipeline_mode = #tpu.pipeline_mode<synchronous>, transform_indices = @transform_10, window_bounds = array<i64: 1, 16>}, {pipeline_mode = #tpu.pipeline_mode<synchronous>, transform_indices = @transform_11, window_bounds = array<i64: 16, 16>}, {pipeline_mode = #tpu.pipeline_mode<synchronous>, transform_indices = @transform_12, window_bounds = array<i64: 1, 16>}, {pipeline_mode = #tpu.pipeline_mode<synchronous>, transform_indices = @transform_13, window_bounds = array<i64: 1, 16>}, {pipeline_mode = #tpu.pipeline_mode<synchronous>, transform_indices = @transform_14, window_bounds = array<i64: 16, 64>}, {pipeline_mode = #tpu.pipeline_mode<synchronous>, transform_indices = @transform_15, window_bounds = array<i64: 1, 64>}, {pipeline_mode = #tpu.pipeline_mode<synchronous>, transform_indices = @transform_16, window_bounds = array<i64: 1, 64>}, {transform_indices = @transform_17, window_bounds = array<i64: 1, 16, 16, 64>}]} {
    %c0 = arith.constant 0 : index
    %c0_0 = arith.constant 0 : index
    %c0_1 = arith.constant 0 : index
    %0 = vector.load %arg1[%c0, %c0_0, %c0_1] : memref<1x256x27xbf16, #tpu.memory_space<vmem>>, vector<1x256x27xbf16>
    %1 = vector.shape_cast %0 : vector<1x256x27xbf16> to vector<256x27xbf16>
    %c0_2 = arith.constant 0 : index
    %c0_3 = arith.constant 0 : index
    %2 = vector.load %arg2[%c0_2, %c0_3] : memref<27x16xbf16, #tpu.memory_space<vmem>>, vector<27x16xbf16>
    %cst = arith.constant dense<0.000000e+00> : vector<256x16xf32>
    %3 = tpu.matmul %1, %2, %cst {dimension_numbers = #tpu.dot_dimension_numbers<[1], [0], [0], [1], [0, 0, 1, 1], [], []>} : vector<256x27xbf16>, vector<27x16xbf16>, vector<256x16xf32> -> vector<256x16xf32>
    %c0_4 = arith.constant 0 : index
    %c0_5 = arith.constant 0 : index
    %4 = vector.load %arg3[%c0_4, %c0_5] : memref<1x16xf32, #tpu.memory_space<vmem>>, vector<1x16xf32>
    %5 = vector.broadcast %4 : vector<1x16xf32> to vector<256x16xf32>
    %6 = arith.mulf %3, %5 : vector<256x16xf32>
    %c0_6 = arith.constant 0 : index
    %c0_7 = arith.constant 0 : index
    %7 = vector.load %arg4[%c0_6, %c0_7] : memref<1x16xf32, #tpu.memory_space<vmem>>, vector<1x16xf32>
    %8 = vector.broadcast %7 : vector<1x16xf32> to vector<256x16xf32>
    %9 = arith.addf %6, %8 : vector<256x16xf32>
    %10 = arith.negf %9 : vector<256x16xf32>
    %11 = math.exp %10 : vector<256x16xf32>
    %cst_8 = arith.constant 1.000000e+00 : f32
    %12 = vector.broadcast %cst_8 : f32 to vector<256x16xf32>
    %13 = arith.addf %12, %11 : vector<256x16xf32>
    %14 = arith.divf %12, %13 : vector<256x16xf32>
    %15 = arith.mulf %9, %14 : vector<256x16xf32>
    %cst_9 = arith.constant 0.000000e+00 : f32
    %16 = vector.broadcast %cst_9 : f32 to vector<18x32x16xf32>
    %c0_10 = arith.constant 0 : index
    %c0_11 = arith.constant 0 : index
    %c0_12 = arith.constant 0 : index
    %17 = vector.load %arg19[%c0_10, %c0_11, %c0_12] : memref<18x32x16xf32, #tpu.memory_space<vmem>>, vector<18x32x16xf32>
    tpu.vector_store %arg19[%c0_10, %c0_11, %c0_12], %16 {strides = array<i32>} : memref<18x32x16xf32, #tpu.memory_space<vmem>>, vector<18x32x16xf32>,
    %18 = vector.shape_cast %15 : vector<256x16xf32> to vector<16x16x16xf32>
    %c1 = arith.constant 1 : index
    %c8 = arith.constant 8 : index
    %c0_13 = arith.constant 0 : index
    %19 = vector.load %arg19[%c1, %c8, %c0_13] : memref<18x32x16xf32, #tpu.memory_space<vmem>>, vector<16x16x16xf32>
    tpu.vector_store %arg19[%c1, %c8, %c0_13], %18 {strides = array<i32>} : memref<18x32x16xf32, #tpu.memory_space<vmem>>, vector<16x16x16xf32>,
    %c0_14 = arith.constant 0 : index
    %c0_15 = arith.constant 0 : index
    %c0_16 = arith.constant 0 : index
    %20 = vector.load %arg19[%c0_14, %c0_15, %c0_16] : memref<18x32x16xf32, #tpu.memory_space<vmem>>, vector<18x32x16xf32>
    %21 = vector.extract_strided_slice %20 {offsets = [0, 7, 0], sizes = [16, 16, 16], strides = [1, 1, 1]} : vector<18x32x16xf32> to vector<16x16x16xf32>
    %c0_17 = arith.constant 0 : index
    %c0_18 = arith.constant 0 : index
    %22 = vector.load %arg5[%c0_17, %c0_18] : memref<9x16xf32, #tpu.memory_space<vmem>>, vector<1x16xf32>
    %23 = vector.shape_cast %22 : vector<1x16xf32> to vector<1x1x16xf32>
    %24 = vector.broadcast %23 : vector<1x1x16xf32> to vector<16x16x16xf32>
    %25 = arith.mulf %21, %24 : vector<16x16x16xf32>
    %26 = vector.extract_strided_slice %20 {offsets = [0, 8, 0], sizes = [16, 16, 16], strides = [1, 1, 1]} : vector<18x32x16xf32> to vector<16x16x16xf32>
    %c1_19 = arith.constant 1 : index
    %c0_20 = arith.constant 0 : index
    %27 = vector.load %arg5[%c1_19, %c0_20] : memref<9x16xf32, #tpu.memory_space<vmem>>, vector<1x16xf32>
    %28 = vector.shape_cast %27 : vector<1x16xf32> to vector<1x1x16xf32>
    %29 = vector.broadcast %28 : vector<1x1x16xf32> to vector<16x16x16xf32>
    %30 = arith.mulf %26, %29 : vector<16x16x16xf32>
    %31 = arith.addf %25, %30 : vector<16x16x16xf32>
    %32 = vector.extract_strided_slice %20 {offsets = [0, 9, 0], sizes = [16, 16, 16], strides = [1, 1, 1]} : vector<18x32x16xf32> to vector<16x16x16xf32>
    %c2 = arith.constant 2 : index
    %c0_21 = arith.constant 0 : index
    %33 = vector.load %arg5[%c2, %c0_21] : memref<9x16xf32, #tpu.memory_space<vmem>>, vector<1x16xf32>
    %34 = vector.shape_cast %33 : vector<1x16xf32> to vector<1x1x16xf32>
    %35 = vector.broadcast %34 : vector<1x1x16xf32> to vector<16x16x16xf32>
    %36 = arith.mulf %32, %35 : vector<16x16x16xf32>
    %37 = arith.addf %31, %36 : vector<16x16x16xf32>
    %38 = vector.extract_strided_slice %20 {offsets = [1, 7, 0], sizes = [16, 16, 16], strides = [1, 1, 1]} : vector<18x32x16xf32> to vector<16x16x16xf32>
    %c3 = arith.constant 3 : index
    %c0_22 = arith.constant 0 : index
    %39 = vector.load %arg5[%c3, %c0_22] : memref<9x16xf32, #tpu.memory_space<vmem>>, vector<1x16xf32>
    %40 = vector.shape_cast %39 : vector<1x16xf32> to vector<1x1x16xf32>
    %41 = vector.broadcast %40 : vector<1x1x16xf32> to vector<16x16x16xf32>
    %42 = arith.mulf %38, %41 : vector<16x16x16xf32>
    %43 = arith.addf %37, %42 : vector<16x16x16xf32>
    %44 = vector.extract_strided_slice %20 {offsets = [1, 8, 0], sizes = [16, 16, 16], strides = [1, 1, 1]} : vector<18x32x16xf32> to vector<16x16x16xf32>
    %c4 = arith.constant 4 : index
    %c0_23 = arith.constant 0 : index
    %45 = vector.load %arg5[%c4, %c0_23] : memref<9x16xf32, #tpu.memory_space<vmem>>, vector<1x16xf32>
    %46 = vector.shape_cast %45 : vector<1x16xf32> to vector<1x1x16xf32>
    %47 = vector.broadcast %46 : vector<1x1x16xf32> to vector<16x16x16xf32>
    %48 = arith.mulf %44, %47 : vector<16x16x16xf32>
    %49 = arith.addf %43, %48 : vector<16x16x16xf32>
    %50 = vector.extract_strided_slice %20 {offsets = [1, 9, 0], sizes = [16, 16, 16], strides = [1, 1, 1]} : vector<18x32x16xf32> to vector<16x16x16xf32>
    %c5 = arith.constant 5 : index
    %c0_24 = arith.constant 0 : index
    %51 = vector.load %arg5[%c5, %c0_24] : memref<9x16xf32, #tpu.memory_space<vmem>>, vector<1x16xf32>
    %52 = vector.shape_cast %51 : vector<1x16xf32> to vector<1x1x16xf32>
    %53 = vector.broadcast %52 : vector<1x1x16xf32> to vector<16x16x16xf32>
    %54 = arith.mulf %50, %53 : vector<16x16x16xf32>
    %55 = arith.addf %49, %54 : vector<16x16x16xf32>
    %56 = vector.extract_strided_slice %20 {offsets = [2, 7, 0], sizes = [16, 16, 16], strides = [1, 1, 1]} : vector<18x32x16xf32> to vector<16x16x16xf32>
    %c6 = arith.constant 6 : index
    %c0_25 = arith.constant 0 : index
    %57 = vector.load %arg5[%c6, %c0_25] : memref<9x16xf32, #tpu.memory_space<vmem>>, vector<1x16xf32>
    %58 = vector.shape_cast %57 : vector<1x16xf32> to vector<1x1x16xf32>
    %59 = vector.broadcast %58 : vector<1x1x16xf32> to vector<16x16x16xf32>
    %60 = arith.mulf %56, %59 : vector<16x16x16xf32>
    %61 = arith.addf %55, %60 : vector<16x16x16xf32>
    %62 = vector.extract_strided_slice %20 {offsets = [2, 8, 0], sizes = [16, 16, 16], strides = [1, 1, 1]} : vector<18x32x16xf32> to vector<16x16x16xf32>
    %c7 = arith.constant 7 : index
    %c0_26 = arith.constant 0 : index
    %63 = vector.load %arg5[%c7, %c0_26] : memref<9x16xf32, #tpu.memory_space<vmem>>, vector<1x16xf32>
    %64 = vector.shape_cast %63 : vector<1x16xf32> to vector<1x1x16xf32>
    %65 = vector.broadcast %64 : vector<1x1x16xf32> to vector<16x16x16xf32>
    %66 = arith.mulf %62, %65 : vector<16x16x16xf32>
    %67 = arith.addf %61, %66 : vector<16x16x16xf32>
    %68 = vector.extract_strided_slice %20 {offsets = [2, 9, 0], sizes = [16, 16, 16], strides = [1, 1, 1]} : vector<18x32x16xf32> to vector<16x16x16xf32>
    %c8_27 = arith.constant 8 : index
    %c0_28 = arith.constant 0 : index
    %69 = vector.load %arg5[%c8_27, %c0_28] : memref<9x16xf32, #tpu.memory_space<vmem>>, vector<1x16xf32>
    %70 = vector.shape_cast %69 : vector<1x16xf32> to vector<1x1x16xf32>
    %71 = vector.broadcast %70 : vector<1x1x16xf32> to vector<16x16x16xf32>
    %72 = arith.mulf %68, %71 : vector<16x16x16xf32>
    %73 = arith.addf %67, %72 : vector<16x16x16xf32>
    %c0_29 = arith.constant 0 : index
    %c0_30 = arith.constant 0 : index
    %74 = vector.load %arg6[%c0_29, %c0_30] : memref<1x16xf32, #tpu.memory_space<vmem>>, vector<1x16xf32>
    %75 = vector.shape_cast %74 : vector<1x16xf32> to vector<1x1x16xf32>
    %76 = vector.broadcast %75 : vector<1x1x16xf32> to vector<16x16x16xf32>
    %77 = arith.mulf %73, %76 : vector<16x16x16xf32>
    %c0_31 = arith.constant 0 : index
    %c0_32 = arith.constant 0 : index
    %78 = vector.load %arg7[%c0_31, %c0_32] : memref<1x16xf32, #tpu.memory_space<vmem>>, vector<1x16xf32>
    %79 = vector.shape_cast %78 : vector<1x16xf32> to vector<1x1x16xf32>
    %80 = vector.broadcast %79 : vector<1x1x16xf32> to vector<16x16x16xf32>
    %81 = arith.addf %77, %80 : vector<16x16x16xf32>
    %82 = arith.negf %81 : vector<16x16x16xf32>
    %83 = math.exp %82 : vector<16x16x16xf32>
    %cst_33 = arith.constant 1.000000e+00 : f32
    %84 = vector.broadcast %cst_33 : f32 to vector<16x16x16xf32>
    %85 = arith.addf %84, %83 : vector<16x16x16xf32>
    %86 = arith.divf %84, %85 : vector<16x16x16xf32>
    %87 = arith.mulf %81, %86 : vector<16x16x16xf32>
    %88 = vector.shape_cast %87 : vector<16x16x16xf32> to vector<256x16xf32>
    %cst_34 = arith.constant dense<0.000000e+00> : vector<16xf32>
    %89 = vector.multi_reduction <add>, %88, %cst_34 [0] : vector<256x16xf32> to vector<16xf32>
    %90 = vector.shape_cast %89 : vector<16xf32> to vector<1x16xf32>
    %cst_35 = arith.constant 3.906250e-03 : f32
    %91 = vector.broadcast %cst_35 : f32 to vector<1x16xf32>
    %92 = arith.mulf %90, %91 : vector<1x16xf32>
    %93 = arith.truncf %92 : vector<1x16xf32> to vector<1x16xbf16>
    %c0_36 = arith.constant 0 : index
    %c0_37 = arith.constant 0 : index
    %94 = vector.load %arg8[%c0_36, %c0_37] : memref<16x4xbf16, #tpu.memory_space<vmem>>, vector<16x4xbf16>
    %cst_38 = arith.constant dense<0.000000e+00> : vector<1x4xf32>
    %95 = tpu.matmul %93, %94, %cst_38 {dimension_numbers = #tpu.dot_dimension_numbers<[1], [0], [0], [1], [0, 0, 1, 1], [], []>} : vector<1x16xbf16>, vector<16x4xbf16>, vector<1x4xf32> -> vector<1x4xf32>
    %c0_39 = arith.constant 0 : index
    %c0_40 = arith.constant 0 : index
    %96 = vector.load %arg9[%c0_39, %c0_40] : memref<1x4xf32, #tpu.memory_space<vmem>>, vector<1x4xf32>
    %97 = arith.addf %95, %96 : vector<1x4xf32>
    %98 = arith.negf %97 : vector<1x4xf32>
    %99 = math.exp %98 : vector<1x4xf32>
    %cst_41 = arith.constant 1.000000e+00 : f32
    %100 = vector.broadcast %cst_41 : f32 to vector<1x4xf32>
    %101 = arith.addf %100, %99 : vector<1x4xf32>
    %102 = arith.divf %100, %101 : vector<1x4xf32>
    %103 = arith.mulf %97, %102 : vector<1x4xf32>
    %104 = arith.truncf %103 : vector<1x4xf32> to vector<1x4xbf16>
    %c0_42 = arith.constant 0 : index
    %c0_43 = arith.constant 0 : index
    %105 = vector.load %arg10[%c0_42, %c0_43] : memref<4x16xbf16, #tpu.memory_space<vmem>>, vector<4x16xbf16>
    %cst_44 = arith.constant dense<0.000000e+00> : vector<1x16xf32>
    %106 = tpu.matmul %104, %105, %cst_44 {dimension_numbers = #tpu.dot_dimension_numbers<[1], [0], [0], [1], [0, 0, 1, 1], [], []>} : vector<1x4xbf16>, vector<4x16xbf16>, vector<1x16xf32> -> vector<1x16xf32>
    %c0_45 = arith.constant 0 : index
    %c0_46 = arith.constant 0 : index
    %107 = vector.load %arg11[%c0_45, %c0_46] : memref<1x16xf32, #tpu.memory_space<vmem>>, vector<1x16xf32>
    %108 = arith.addf %106, %107 : vector<1x16xf32>
    %109 = arith.negf %108 : vector<1x16xf32>
    %110 = math.exp %109 : vector<1x16xf32>
    %cst_47 = arith.constant 1.000000e+00 : f32
    %111 = vector.broadcast %cst_47 : f32 to vector<1x16xf32>
    %112 = arith.addf %111, %110 : vector<1x16xf32>
    %113 = arith.divf %111, %112 : vector<1x16xf32>
    %114 = vector.broadcast %113 : vector<1x16xf32> to vector<256x16xf32>
    %115 = arith.mulf %88, %114 : vector<256x16xf32>
    %116 = arith.truncf %115 : vector<256x16xf32> to vector<256x16xbf16>
    %c0_48 = arith.constant 0 : index
    %c0_49 = arith.constant 0 : index
    %117 = vector.load %arg12[%c0_48, %c0_49] : memref<16x16xbf16, #tpu.memory_space<vmem>>, vector<16x16xbf16>
    %cst_50 = arith.constant dense<0.000000e+00> : vector<256x16xf32>
    %118 = tpu.matmul %116, %117, %cst_50 {dimension_numbers = #tpu.dot_dimension_numbers<[1], [0], [0], [1], [0, 0, 1, 1], [], []>} : vector<256x16xbf16>, vector<16x16xbf16>, vector<256x16xf32> -> vector<256x16xf32>
    %c0_51 = arith.constant 0 : index
    %c0_52 = arith.constant 0 : index
    %119 = vector.load %arg13[%c0_51, %c0_52] : memref<1x16xf32, #tpu.memory_space<vmem>>, vector<1x16xf32>
    %120 = vector.broadcast %119 : vector<1x16xf32> to vector<256x16xf32>
    %121 = arith.mulf %118, %120 : vector<256x16xf32>
    %c0_53 = arith.constant 0 : index
    %c0_54 = arith.constant 0 : index
    %122 = vector.load %arg14[%c0_53, %c0_54] : memref<1x16xf32, #tpu.memory_space<vmem>>, vector<1x16xf32>
    %123 = vector.broadcast %122 : vector<1x16xf32> to vector<256x16xf32>
    %124 = arith.addf %121, %123 : vector<256x16xf32>
    %125 = arith.addf %124, %15 : vector<256x16xf32>
    %126 = arith.truncf %125 : vector<256x16xf32> to vector<256x16xbf16>
    %c0_55 = arith.constant 0 : index
    %c0_56 = arith.constant 0 : index
    %127 = vector.load %arg15[%c0_55, %c0_56] : memref<16x64xbf16, #tpu.memory_space<vmem>>, vector<16x64xbf16>
    %cst_57 = arith.constant dense<0.000000e+00> : vector<256x64xf32>
    %128 = tpu.matmul %126, %127, %cst_57 {dimension_numbers = #tpu.dot_dimension_numbers<[1], [0], [0], [1], [0, 0, 1, 1], [], []>} : vector<256x16xbf16>, vector<16x64xbf16>, vector<256x64xf32> -> vector<256x64xf32>
    %c0_58 = arith.constant 0 : index
    %c0_59 = arith.constant 0 : index
    %129 = vector.load %arg16[%c0_58, %c0_59] : memref<1x64xf32, #tpu.memory_space<vmem>>, vector<1x64xf32>
    %130 = vector.broadcast %129 : vector<1x64xf32> to vector<256x64xf32>
    %131 = arith.mulf %128, %130 : vector<256x64xf32>
    %c0_60 = arith.constant 0 : index
    %c0_61 = arith.constant 0 : index
    %132 = vector.load %arg17[%c0_60, %c0_61] : memref<1x64xf32, #tpu.memory_space<vmem>>, vector<1x64xf32>
    %133 = vector.broadcast %132 : vector<1x64xf32> to vector<256x64xf32>
    %134 = arith.addf %131, %133 : vector<256x64xf32>
    %135 = arith.negf %134 : vector<256x64xf32>
    %136 = math.exp %135 : vector<256x64xf32>
    %cst_62 = arith.constant 1.000000e+00 : f32
    %137 = vector.broadcast %cst_62 : f32 to vector<256x64xf32>
    %138 = arith.addf %137, %136 : vector<256x64xf32>
    %139 = arith.divf %137, %138 : vector<256x64xf32>
    %140 = arith.mulf %134, %139 : vector<256x64xf32>
    %141 = vector.shape_cast %140 : vector<256x64xf32> to vector<16x16x64xf32>
    %142 = arith.truncf %141 : vector<16x16x64xf32> to vector<16x16x64xbf16>
    %c0_63 = arith.constant 0 : index
    %c0_64 = arith.constant 0 : index
    %c0_65 = arith.constant 0 : index
    %c0_66 = arith.constant 0 : index
    %143 = vector.load %arg18[%c0_63, %c0_64, %c0_65, %c0_66] : memref<1x16x16x64xbf16, #tpu.memory_space<vmem>>, vector<1x16x16x64xbf16>
    %144 = vector.shape_cast %143 : vector<1x16x16x64xbf16> to vector<16x16x64xbf16>
    %145 = vector.shape_cast %142 : vector<16x16x64xbf16> to vector<1x16x16x64xbf16>
    tpu.vector_store %arg18[%c0_63, %c0_64, %c0_65, %c0_66], %145 {strides = array<i32>} : memref<1x16x16x64xbf16, #tpu.memory_space<vmem>>, vector<1x16x16x64xbf16>,
    return
  }
  func.func @transform_0(%arg0: i32) -> (i32, i32, i32) {
    %c0_i32 = arith.constant 0 : i32
    %c0_i32_0 = arith.constant 0 : i32
    %c0_i32_1 = arith.constant 0 : i32
    return %arg0, %c0_i32, %c0_i32_0 : i32, i32, i32
  }
  func.func @transform_1(%arg0: i32) -> (i32, i32) {
    %c0_i32 = arith.constant 0 : i32
    %c0_i32_0 = arith.constant 0 : i32
    %c0_i32_1 = arith.constant 0 : i32
    return %c0_i32, %c0_i32_0 : i32, i32
  }
  func.func @transform_2(%arg0: i32) -> (i32, i32) {
    %c0_i32 = arith.constant 0 : i32
    %c0_i32_0 = arith.constant 0 : i32
    %c0_i32_1 = arith.constant 0 : i32
    return %c0_i32, %c0_i32_0 : i32, i32
  }
  func.func @transform_3(%arg0: i32) -> (i32, i32) {
    %c0_i32 = arith.constant 0 : i32
    %c0_i32_0 = arith.constant 0 : i32
    %c0_i32_1 = arith.constant 0 : i32
    return %c0_i32, %c0_i32_0 : i32, i32
  }
  func.func @transform_4(%arg0: i32) -> (i32, i32) {
    %c0_i32 = arith.constant 0 : i32
    %c0_i32_0 = arith.constant 0 : i32
    %c0_i32_1 = arith.constant 0 : i32
    return %c0_i32, %c0_i32_0 : i32, i32
  }
  func.func @transform_5(%arg0: i32) -> (i32, i32) {
    %c0_i32 = arith.constant 0 : i32
    %c0_i32_0 = arith.constant 0 : i32
    %c0_i32_1 = arith.constant 0 : i32
    return %c0_i32, %c0_i32_0 : i32, i32
  }
  func.func @transform_6(%arg0: i32) -> (i32, i32) {
    %c0_i32 = arith.constant 0 : i32
    %c0_i32_0 = arith.constant 0 : i32
    %c0_i32_1 = arith.constant 0 : i32
    return %c0_i32, %c0_i32_0 : i32, i32
  }
  func.func @transform_7(%arg0: i32) -> (i32, i32) {
    %c0_i32 = arith.constant 0 : i32
    %c0_i32_0 = arith.constant 0 : i32
    %c0_i32_1 = arith.constant 0 : i32
    return %c0_i32, %c0_i32_0 : i32, i32
  }
  func.func @transform_8(%arg0: i32) -> (i32, i32) {
    %c0_i32 = arith.constant 0 : i32
    %c0_i32_0 = arith.constant 0 : i32
    %c0_i32_1 = arith.constant 0 : i32
    return %c0_i32, %c0_i32_0 : i32, i32
  }
  func.func @transform_9(%arg0: i32) -> (i32, i32) {
    %c0_i32 = arith.constant 0 : i32
    %c0_i32_0 = arith.constant 0 : i32
    %c0_i32_1 = arith.constant 0 : i32
    return %c0_i32, %c0_i32_0 : i32, i32
  }
  func.func @transform_10(%arg0: i32) -> (i32, i32) {
    %c0_i32 = arith.constant 0 : i32
    %c0_i32_0 = arith.constant 0 : i32
    %c0_i32_1 = arith.constant 0 : i32
    return %c0_i32, %c0_i32_0 : i32, i32
  }
  func.func @transform_11(%arg0: i32) -> (i32, i32) {
    %c0_i32 = arith.constant 0 : i32
    %c0_i32_0 = arith.constant 0 : i32
    %c0_i32_1 = arith.constant 0 : i32
    return %c0_i32, %c0_i32_0 : i32, i32
  }
  func.func @transform_12(%arg0: i32) -> (i32, i32) {
    %c0_i32 = arith.constant 0 : i32
    %c0_i32_0 = arith.constant 0 : i32
    %c0_i32_1 = arith.constant 0 : i32
    return %c0_i32, %c0_i32_0 : i32, i32
  }
  func.func @transform_13(%arg0: i32) -> (i32, i32) {
    %c0_i32 = arith.constant 0 : i32
    %c0_i32_0 = arith.constant 0 : i32
    %c0_i32_1 = arith.constant 0 : i32
    return %c0_i32, %c0_i32_0 : i32, i32
  }
  func.func @transform_14(%arg0: i32) -> (i32, i32) {
    %c0_i32 = arith.constant 0 : i32
    %c0_i32_0 = arith.constant 0 : i32
    %c0_i32_1 = arith.constant 0 : i32
    return %c0_i32, %c0_i32_0 : i32, i32
  }
  func.func @transform_15(%arg0: i32) -> (i32, i32) {
    %c0_i32 = arith.constant 0 : i32
    %c0_i32_0 = arith.constant 0 : i32
    %c0_i32_1 = arith.constant 0 : i32
    return %c0_i32, %c0_i32_0 : i32, i32
  }
  func.func @transform_16(%arg0: i32) -> (i32, i32) {
    %c0_i32 = arith.constant 0 : i32
    %c0_i32_0 = arith.constant 0 : i32
    %c0_i32_1 = arith.constant 0 : i32
    return %c0_i32, %c0_i32_0 : i32, i32
  }
  func.func @transform_17(%arg0: i32) -> (i32, i32, i32, i32) {
    %c0_i32 = arith.constant 0 : i32
    %c0_i32_0 = arith.constant 0 : i32
    %c0_i32_1 = arith.constant 0 : i32
    %c0_i32_2 = arith.constant 0 : i32
    return %arg0, %c0_i32, %c0_i32_0, %c0_i32_1 : i32, i32, i32, i32
  }
}

module attributes {stable_mosaic.version = 11 : i64} {
  func.func @_back_kernel(%arg0: i32, %arg1: memref<1x9x9x64xbf16, #tpu.memory_space<vmem>>, %arg2: memref<1x9x9x64xbf16, #tpu.memory_space<vmem>>, %arg3: memref<1x9x9x64xbf16, #tpu.memory_space<vmem>>, %arg4: memref<1x9x9x64xbf16, #tpu.memory_space<vmem>>, %arg5: memref<9x64xf32, #tpu.memory_space<vmem>>, %arg6: memref<1x64xf32, #tpu.memory_space<vmem>>, %arg7: memref<1x64xf32, #tpu.memory_space<vmem>>, %arg8: memref<64x16xbf16, #tpu.memory_space<vmem>>, %arg9: memref<1x16xf32, #tpu.memory_space<vmem>>, %arg10: memref<16x64xbf16, #tpu.memory_space<vmem>>, %arg11: memref<1x64xf32, #tpu.memory_space<vmem>>, %arg12: memref<64x24xbf16, #tpu.memory_space<vmem>>, %arg13: memref<1x24xf32, #tpu.memory_space<vmem>>, %arg14: memref<1x24xf32, #tpu.memory_space<vmem>>, %arg15: memref<24x64xbf16, #tpu.memory_space<vmem>>, %arg16: memref<1x64xf32, #tpu.memory_space<vmem>>, %arg17: memref<1x64xf32, #tpu.memory_space<vmem>>, %arg18: memref<64x10xbf16, #tpu.memory_space<vmem>>, %arg19: memref<1x10xf32, #tpu.memory_space<vmem>>, %arg20: memref<1x1x10xf32, #tpu.memory_space<vmem>>) attributes {dimension_semantics = [#tpu.dimension_semantics<parallel>], iteration_bounds = array<i64: 2>, scalar_prefetch = 0 : i64, scratch_operands = 0 : i64, tpu.core_type = #tpu.core_type<tc>, window_params = [{transform_indices = @transform_0, window_bounds = array<i64: 1, 9, 9, 64>}, {transform_indices = @transform_1, window_bounds = array<i64: 1, 9, 9, 64>}, {transform_indices = @transform_2, window_bounds = array<i64: 1, 9, 9, 64>}, {transform_indices = @transform_3, window_bounds = array<i64: 1, 9, 9, 64>}, {pipeline_mode = #tpu.pipeline_mode<synchronous>, transform_indices = @transform_4, window_bounds = array<i64: 9, 64>}, {pipeline_mode = #tpu.pipeline_mode<synchronous>, transform_indices = @transform_5, window_bounds = array<i64: 1, 64>}, {pipeline_mode = #tpu.pipeline_mode<synchronous>, transform_indices = @transform_6, window_bounds = array<i64: 1, 64>}, {pipeline_mode = #tpu.pipeline_mode<synchronous>, transform_indices = @transform_7, window_bounds = array<i64: 64, 16>}, {pipeline_mode = #tpu.pipeline_mode<synchronous>, transform_indices = @transform_8, window_bounds = array<i64: 1, 16>}, {pipeline_mode = #tpu.pipeline_mode<synchronous>, transform_indices = @transform_9, window_bounds = array<i64: 16, 64>}, {pipeline_mode = #tpu.pipeline_mode<synchronous>, transform_indices = @transform_10, window_bounds = array<i64: 1, 64>}, {pipeline_mode = #tpu.pipeline_mode<synchronous>, transform_indices = @transform_11, window_bounds = array<i64: 64, 24>}, {pipeline_mode = #tpu.pipeline_mode<synchronous>, transform_indices = @transform_12, window_bounds = array<i64: 1, 24>}, {pipeline_mode = #tpu.pipeline_mode<synchronous>, transform_indices = @transform_13, window_bounds = array<i64: 1, 24>}, {pipeline_mode = #tpu.pipeline_mode<synchronous>, transform_indices = @transform_14, window_bounds = array<i64: 24, 64>}, {pipeline_mode = #tpu.pipeline_mode<synchronous>, transform_indices = @transform_15, window_bounds = array<i64: 1, 64>}, {pipeline_mode = #tpu.pipeline_mode<synchronous>, transform_indices = @transform_16, window_bounds = array<i64: 1, 64>}, {pipeline_mode = #tpu.pipeline_mode<synchronous>, transform_indices = @transform_17, window_bounds = array<i64: 64, 10>}, {pipeline_mode = #tpu.pipeline_mode<synchronous>, transform_indices = @transform_18, window_bounds = array<i64: 1, 10>}, {transform_indices = @transform_19, window_bounds = array<i64: 1, 1, 10>}]} {
    %c0 = arith.constant 0 : index
    %c0_0 = arith.constant 0 : index
    %c0_1 = arith.constant 0 : index
    %c0_2 = arith.constant 0 : index
    %0 = vector.load %arg1[%c0, %c0_0, %c0_1, %c0_2] : memref<1x9x9x64xbf16, #tpu.memory_space<vmem>>, vector<1x9x9x64xbf16>
    %1 = vector.shape_cast %0 : vector<1x9x9x64xbf16> to vector<9x9x64xbf16>
    %2 = arith.extf %1 : vector<9x9x64xbf16> to vector<9x9x64xf32>
    %c0_3 = arith.constant 0 : index
    %c0_4 = arith.constant 0 : index
    %c0_5 = arith.constant 0 : index
    %c0_6 = arith.constant 0 : index
    %3 = vector.load %arg2[%c0_3, %c0_4, %c0_5, %c0_6] : memref<1x9x9x64xbf16, #tpu.memory_space<vmem>>, vector<1x9x9x64xbf16>
    %4 = vector.shape_cast %3 : vector<1x9x9x64xbf16> to vector<9x9x64xbf16>
    %5 = arith.extf %4 : vector<9x9x64xbf16> to vector<9x9x64xf32>
    %c0_7 = arith.constant 0 : index
    %c0_8 = arith.constant 0 : index
    %c0_9 = arith.constant 0 : index
    %c0_10 = arith.constant 0 : index
    %6 = vector.load %arg3[%c0_7, %c0_8, %c0_9, %c0_10] : memref<1x9x9x64xbf16, #tpu.memory_space<vmem>>, vector<1x9x9x64xbf16>
    %7 = vector.shape_cast %6 : vector<1x9x9x64xbf16> to vector<9x9x64xbf16>
    %8 = arith.extf %7 : vector<9x9x64xbf16> to vector<9x9x64xf32>
    %c0_11 = arith.constant 0 : index
    %c0_12 = arith.constant 0 : index
    %c0_13 = arith.constant 0 : index
    %c0_14 = arith.constant 0 : index
    %9 = vector.load %arg4[%c0_11, %c0_12, %c0_13, %c0_14] : memref<1x9x9x64xbf16, #tpu.memory_space<vmem>>, vector<1x9x9x64xbf16>
    %10 = vector.shape_cast %9 : vector<1x9x9x64xbf16> to vector<9x9x64xbf16>
    %11 = arith.extf %10 : vector<9x9x64xbf16> to vector<9x9x64xf32>
    %12 = vector.extract_strided_slice %2 {offsets = [0, 0, 0], sizes = [8, 8, 64], strides = [1, 1, 1]} : vector<9x9x64xf32> to vector<8x8x64xf32>
    %c0_15 = arith.constant 0 : index
    %c0_16 = arith.constant 0 : index
    %13 = vector.load %arg5[%c0_15, %c0_16] : memref<9x64xf32, #tpu.memory_space<vmem>>, vector<1x64xf32>
    %14 = vector.shape_cast %13 : vector<1x64xf32> to vector<1x1x64xf32>
    %15 = vector.broadcast %14 : vector<1x1x64xf32> to vector<8x8x64xf32>
    %16 = arith.mulf %12, %15 : vector<8x8x64xf32>
    %17 = vector.extract_strided_slice %5 {offsets = [0, 0, 0], sizes = [8, 8, 64], strides = [1, 1, 1]} : vector<9x9x64xf32> to vector<8x8x64xf32>
    %c1 = arith.constant 1 : index
    %c0_17 = arith.constant 0 : index
    %18 = vector.load %arg5[%c1, %c0_17] : memref<9x64xf32, #tpu.memory_space<vmem>>, vector<1x64xf32>
    %19 = vector.shape_cast %18 : vector<1x64xf32> to vector<1x1x64xf32>
    %20 = vector.broadcast %19 : vector<1x1x64xf32> to vector<8x8x64xf32>
    %21 = arith.mulf %17, %20 : vector<8x8x64xf32>
    %22 = arith.addf %16, %21 : vector<8x8x64xf32>
    %23 = vector.extract_strided_slice %2 {offsets = [0, 1, 0], sizes = [8, 8, 64], strides = [1, 1, 1]} : vector<9x9x64xf32> to vector<8x8x64xf32>
    %c2 = arith.constant 2 : index
    %c0_18 = arith.constant 0 : index
    %24 = vector.load %arg5[%c2, %c0_18] : memref<9x64xf32, #tpu.memory_space<vmem>>, vector<1x64xf32>
    %25 = vector.shape_cast %24 : vector<1x64xf32> to vector<1x1x64xf32>
    %26 = vector.broadcast %25 : vector<1x1x64xf32> to vector<8x8x64xf32>
    %27 = arith.mulf %23, %26 : vector<8x8x64xf32>
    %28 = arith.addf %22, %27 : vector<8x8x64xf32>
    %29 = vector.extract_strided_slice %8 {offsets = [0, 0, 0], sizes = [8, 8, 64], strides = [1, 1, 1]} : vector<9x9x64xf32> to vector<8x8x64xf32>
    %c3 = arith.constant 3 : index
    %c0_19 = arith.constant 0 : index
    %30 = vector.load %arg5[%c3, %c0_19] : memref<9x64xf32, #tpu.memory_space<vmem>>, vector<1x64xf32>
    %31 = vector.shape_cast %30 : vector<1x64xf32> to vector<1x1x64xf32>
    %32 = vector.broadcast %31 : vector<1x1x64xf32> to vector<8x8x64xf32>
    %33 = arith.mulf %29, %32 : vector<8x8x64xf32>
    %34 = arith.addf %28, %33 : vector<8x8x64xf32>
    %35 = vector.extract_strided_slice %11 {offsets = [0, 0, 0], sizes = [8, 8, 64], strides = [1, 1, 1]} : vector<9x9x64xf32> to vector<8x8x64xf32>
    %c4 = arith.constant 4 : index
    %c0_20 = arith.constant 0 : index
    %36 = vector.load %arg5[%c4, %c0_20] : memref<9x64xf32, #tpu.memory_space<vmem>>, vector<1x64xf32>
    %37 = vector.shape_cast %36 : vector<1x64xf32> to vector<1x1x64xf32>
    %38 = vector.broadcast %37 : vector<1x1x64xf32> to vector<8x8x64xf32>
    %39 = arith.mulf %35, %38 : vector<8x8x64xf32>
    %40 = arith.addf %34, %39 : vector<8x8x64xf32>
    %41 = vector.extract_strided_slice %8 {offsets = [0, 1, 0], sizes = [8, 8, 64], strides = [1, 1, 1]} : vector<9x9x64xf32> to vector<8x8x64xf32>
    %c5 = arith.constant 5 : index
    %c0_21 = arith.constant 0 : index
    %42 = vector.load %arg5[%c5, %c0_21] : memref<9x64xf32, #tpu.memory_space<vmem>>, vector<1x64xf32>
    %43 = vector.shape_cast %42 : vector<1x64xf32> to vector<1x1x64xf32>
    %44 = vector.broadcast %43 : vector<1x1x64xf32> to vector<8x8x64xf32>
    %45 = arith.mulf %41, %44 : vector<8x8x64xf32>
    %46 = arith.addf %40, %45 : vector<8x8x64xf32>
    %47 = vector.extract_strided_slice %2 {offsets = [1, 0, 0], sizes = [8, 8, 64], strides = [1, 1, 1]} : vector<9x9x64xf32> to vector<8x8x64xf32>
    %c6 = arith.constant 6 : index
    %c0_22 = arith.constant 0 : index
    %48 = vector.load %arg5[%c6, %c0_22] : memref<9x64xf32, #tpu.memory_space<vmem>>, vector<1x64xf32>
    %49 = vector.shape_cast %48 : vector<1x64xf32> to vector<1x1x64xf32>
    %50 = vector.broadcast %49 : vector<1x1x64xf32> to vector<8x8x64xf32>
    %51 = arith.mulf %47, %50 : vector<8x8x64xf32>
    %52 = arith.addf %46, %51 : vector<8x8x64xf32>
    %53 = vector.extract_strided_slice %5 {offsets = [1, 0, 0], sizes = [8, 8, 64], strides = [1, 1, 1]} : vector<9x9x64xf32> to vector<8x8x64xf32>
    %c7 = arith.constant 7 : index
    %c0_23 = arith.constant 0 : index
    %54 = vector.load %arg5[%c7, %c0_23] : memref<9x64xf32, #tpu.memory_space<vmem>>, vector<1x64xf32>
    %55 = vector.shape_cast %54 : vector<1x64xf32> to vector<1x1x64xf32>
    %56 = vector.broadcast %55 : vector<1x1x64xf32> to vector<8x8x64xf32>
    %57 = arith.mulf %53, %56 : vector<8x8x64xf32>
    %58 = arith.addf %52, %57 : vector<8x8x64xf32>
    %59 = vector.extract_strided_slice %2 {offsets = [1, 1, 0], sizes = [8, 8, 64], strides = [1, 1, 1]} : vector<9x9x64xf32> to vector<8x8x64xf32>
    %c8 = arith.constant 8 : index
    %c0_24 = arith.constant 0 : index
    %60 = vector.load %arg5[%c8, %c0_24] : memref<9x64xf32, #tpu.memory_space<vmem>>, vector<1x64xf32>
    %61 = vector.shape_cast %60 : vector<1x64xf32> to vector<1x1x64xf32>
    %62 = vector.broadcast %61 : vector<1x1x64xf32> to vector<8x8x64xf32>
    %63 = arith.mulf %59, %62 : vector<8x8x64xf32>
    %64 = arith.addf %58, %63 : vector<8x8x64xf32>
    %c0_25 = arith.constant 0 : index
    %c0_26 = arith.constant 0 : index
    %65 = vector.load %arg6[%c0_25, %c0_26] : memref<1x64xf32, #tpu.memory_space<vmem>>, vector<1x64xf32>
    %66 = vector.shape_cast %65 : vector<1x64xf32> to vector<1x1x64xf32>
    %67 = vector.broadcast %66 : vector<1x1x64xf32> to vector<8x8x64xf32>
    %68 = arith.mulf %64, %67 : vector<8x8x64xf32>
    %c0_27 = arith.constant 0 : index
    %c0_28 = arith.constant 0 : index
    %69 = vector.load %arg7[%c0_27, %c0_28] : memref<1x64xf32, #tpu.memory_space<vmem>>, vector<1x64xf32>
    %70 = vector.shape_cast %69 : vector<1x64xf32> to vector<1x1x64xf32>
    %71 = vector.broadcast %70 : vector<1x1x64xf32> to vector<8x8x64xf32>
    %72 = arith.addf %68, %71 : vector<8x8x64xf32>
    %73 = arith.negf %72 : vector<8x8x64xf32>
    %74 = math.exp %73 : vector<8x8x64xf32>
    %cst = arith.constant 1.000000e+00 : f32
    %75 = vector.broadcast %cst : f32 to vector<8x8x64xf32>
    %76 = arith.addf %75, %74 : vector<8x8x64xf32>
    %77 = arith.divf %75, %76 : vector<8x8x64xf32>
    %78 = arith.mulf %72, %77 : vector<8x8x64xf32>
    %79 = vector.shape_cast %78 : vector<8x8x64xf32> to vector<64x64xf32>
    %cst_29 = arith.constant dense<0.000000e+00> : vector<64xf32>
    %80 = vector.multi_reduction <add>, %79, %cst_29 [0] : vector<64x64xf32> to vector<64xf32>
    %81 = vector.shape_cast %80 : vector<64xf32> to vector<1x64xf32>
    %cst_30 = arith.constant 1.562500e-02 : f32
    %82 = vector.broadcast %cst_30 : f32 to vector<1x64xf32>
    %83 = arith.mulf %81, %82 : vector<1x64xf32>
    %84 = arith.truncf %83 : vector<1x64xf32> to vector<1x64xbf16>
    %c0_31 = arith.constant 0 : index
    %c0_32 = arith.constant 0 : index
    %85 = vector.load %arg8[%c0_31, %c0_32] : memref<64x16xbf16, #tpu.memory_space<vmem>>, vector<64x16xbf16>
    %cst_33 = arith.constant dense<0.000000e+00> : vector<1x16xf32>
    %86 = tpu.matmul %84, %85, %cst_33 {dimension_numbers = #tpu.dot_dimension_numbers<[1], [0], [0], [1], [0, 0, 1, 1], [], []>} : vector<1x64xbf16>, vector<64x16xbf16>, vector<1x16xf32> -> vector<1x16xf32>
    %c0_34 = arith.constant 0 : index
    %c0_35 = arith.constant 0 : index
    %87 = vector.load %arg9[%c0_34, %c0_35] : memref<1x16xf32, #tpu.memory_space<vmem>>, vector<1x16xf32>
    %88 = arith.addf %86, %87 : vector<1x16xf32>
    %89 = arith.negf %88 : vector<1x16xf32>
    %90 = math.exp %89 : vector<1x16xf32>
    %cst_36 = arith.constant 1.000000e+00 : f32
    %91 = vector.broadcast %cst_36 : f32 to vector<1x16xf32>
    %92 = arith.addf %91, %90 : vector<1x16xf32>
    %93 = arith.divf %91, %92 : vector<1x16xf32>
    %94 = arith.mulf %88, %93 : vector<1x16xf32>
    %95 = arith.truncf %94 : vector<1x16xf32> to vector<1x16xbf16>
    %c0_37 = arith.constant 0 : index
    %c0_38 = arith.constant 0 : index
    %96 = vector.load %arg10[%c0_37, %c0_38] : memref<16x64xbf16, #tpu.memory_space<vmem>>, vector<16x64xbf16>
    %cst_39 = arith.constant dense<0.000000e+00> : vector<1x64xf32>
    %97 = tpu.matmul %95, %96, %cst_39 {dimension_numbers = #tpu.dot_dimension_numbers<[1], [0], [0], [1], [0, 0, 1, 1], [], []>} : vector<1x16xbf16>, vector<16x64xbf16>, vector<1x64xf32> -> vector<1x64xf32>
    %c0_40 = arith.constant 0 : index
    %c0_41 = arith.constant 0 : index
    %98 = vector.load %arg11[%c0_40, %c0_41] : memref<1x64xf32, #tpu.memory_space<vmem>>, vector<1x64xf32>
    %99 = arith.addf %97, %98 : vector<1x64xf32>
    %100 = arith.negf %99 : vector<1x64xf32>
    %101 = math.exp %100 : vector<1x64xf32>
    %cst_42 = arith.constant 1.000000e+00 : f32
    %102 = vector.broadcast %cst_42 : f32 to vector<1x64xf32>
    %103 = arith.addf %102, %101 : vector<1x64xf32>
    %104 = arith.divf %102, %103 : vector<1x64xf32>
    %105 = vector.broadcast %104 : vector<1x64xf32> to vector<64x64xf32>
    %106 = arith.mulf %79, %105 : vector<64x64xf32>
    %107 = arith.truncf %106 : vector<64x64xf32> to vector<64x64xbf16>
    %c0_43 = arith.constant 0 : index
    %c0_44 = arith.constant 0 : index
    %108 = vector.load %arg12[%c0_43, %c0_44] : memref<64x24xbf16, #tpu.memory_space<vmem>>, vector<64x24xbf16>
    %cst_45 = arith.constant dense<0.000000e+00> : vector<64x24xf32>
    %109 = tpu.matmul %107, %108, %cst_45 {dimension_numbers = #tpu.dot_dimension_numbers<[1], [0], [0], [1], [0, 0, 1, 1], [], []>} : vector<64x64xbf16>, vector<64x24xbf16>, vector<64x24xf32> -> vector<64x24xf32>
    %c0_46 = arith.constant 0 : index
    %c0_47 = arith.constant 0 : index
    %110 = vector.load %arg13[%c0_46, %c0_47] : memref<1x24xf32, #tpu.memory_space<vmem>>, vector<1x24xf32>
    %111 = vector.broadcast %110 : vector<1x24xf32> to vector<64x24xf32>
    %112 = arith.mulf %109, %111 : vector<64x24xf32>
    %c0_48 = arith.constant 0 : index
    %c0_49 = arith.constant 0 : index
    %113 = vector.load %arg14[%c0_48, %c0_49] : memref<1x24xf32, #tpu.memory_space<vmem>>, vector<1x24xf32>
    %114 = vector.broadcast %113 : vector<1x24xf32> to vector<64x24xf32>
    %115 = arith.addf %112, %114 : vector<64x24xf32>
    %116 = arith.truncf %115 : vector<64x24xf32> to vector<64x24xbf16>
    %c0_50 = arith.constant 0 : index
    %c0_51 = arith.constant 0 : index
    %117 = vector.load %arg15[%c0_50, %c0_51] : memref<24x64xbf16, #tpu.memory_space<vmem>>, vector<24x64xbf16>
    %cst_52 = arith.constant dense<0.000000e+00> : vector<64x64xf32>
    %118 = tpu.matmul %116, %117, %cst_52 {dimension_numbers = #tpu.dot_dimension_numbers<[1], [0], [0], [1], [0, 0, 1, 1], [], []>} : vector<64x24xbf16>, vector<24x64xbf16>, vector<64x64xf32> -> vector<64x64xf32>
    %c0_53 = arith.constant 0 : index
    %c0_54 = arith.constant 0 : index
    %119 = vector.load %arg16[%c0_53, %c0_54] : memref<1x64xf32, #tpu.memory_space<vmem>>, vector<1x64xf32>
    %120 = vector.broadcast %119 : vector<1x64xf32> to vector<64x64xf32>
    %121 = arith.mulf %118, %120 : vector<64x64xf32>
    %c0_55 = arith.constant 0 : index
    %c0_56 = arith.constant 0 : index
    %122 = vector.load %arg17[%c0_55, %c0_56] : memref<1x64xf32, #tpu.memory_space<vmem>>, vector<1x64xf32>
    %123 = vector.broadcast %122 : vector<1x64xf32> to vector<64x64xf32>
    %124 = arith.addf %121, %123 : vector<64x64xf32>
    %125 = arith.negf %124 : vector<64x64xf32>
    %126 = math.exp %125 : vector<64x64xf32>
    %cst_57 = arith.constant 1.000000e+00 : f32
    %127 = vector.broadcast %cst_57 : f32 to vector<64x64xf32>
    %128 = arith.addf %127, %126 : vector<64x64xf32>
    %129 = arith.divf %127, %128 : vector<64x64xf32>
    %130 = arith.mulf %124, %129 : vector<64x64xf32>
    %cst_58 = arith.constant dense<0.000000e+00> : vector<64xf32>
    %131 = vector.multi_reduction <add>, %130, %cst_58 [0] : vector<64x64xf32> to vector<64xf32>
    %132 = vector.shape_cast %131 : vector<64xf32> to vector<1x64xf32>
    %cst_59 = arith.constant 1.562500e-02 : f32
    %133 = vector.broadcast %cst_59 : f32 to vector<1x64xf32>
    %134 = arith.mulf %132, %133 : vector<1x64xf32>
    %135 = arith.truncf %134 : vector<1x64xf32> to vector<1x64xbf16>
    %c0_60 = arith.constant 0 : index
    %c0_61 = arith.constant 0 : index
    %136 = vector.load %arg18[%c0_60, %c0_61] : memref<64x10xbf16, #tpu.memory_space<vmem>>, vector<64x10xbf16>
    %cst_62 = arith.constant dense<0.000000e+00> : vector<1x10xf32>
    %137 = tpu.matmul %135, %136, %cst_62 {dimension_numbers = #tpu.dot_dimension_numbers<[1], [0], [0], [1], [0, 0, 1, 1], [], []>} : vector<1x64xbf16>, vector<64x10xbf16>, vector<1x10xf32> -> vector<1x10xf32>
    %c0_63 = arith.constant 0 : index
    %c0_64 = arith.constant 0 : index
    %138 = vector.load %arg19[%c0_63, %c0_64] : memref<1x10xf32, #tpu.memory_space<vmem>>, vector<1x10xf32>
    %139 = arith.addf %137, %138 : vector<1x10xf32>
    %c0_65 = arith.constant 0 : index
    %c0_66 = arith.constant 0 : index
    %c0_67 = arith.constant 0 : index
    %140 = vector.load %arg20[%c0_65, %c0_66, %c0_67] : memref<1x1x10xf32, #tpu.memory_space<vmem>>, vector<1x1x10xf32>
    %141 = vector.shape_cast %140 : vector<1x1x10xf32> to vector<1x10xf32>
    %142 = vector.shape_cast %139 : vector<1x10xf32> to vector<1x1x10xf32>
    tpu.vector_store %arg20[%c0_65, %c0_66, %c0_67], %142 {strides = array<i32>} : memref<1x1x10xf32, #tpu.memory_space<vmem>>, vector<1x1x10xf32>,
    return
  }
  func.func @transform_0(%arg0: i32) -> (i32, i32, i32, i32) {
    %c0_i32 = arith.constant 0 : i32
    %c0_i32_0 = arith.constant 0 : i32
    %c0_i32_1 = arith.constant 0 : i32
    %c0_i32_2 = arith.constant 0 : i32
    return %arg0, %c0_i32, %c0_i32_0, %c0_i32_1 : i32, i32, i32, i32
  }
  func.func @transform_1(%arg0: i32) -> (i32, i32, i32, i32) {
    %c0_i32 = arith.constant 0 : i32
    %c0_i32_0 = arith.constant 0 : i32
    %c0_i32_1 = arith.constant 0 : i32
    %c0_i32_2 = arith.constant 0 : i32
    return %arg0, %c0_i32, %c0_i32_0, %c0_i32_1 : i32, i32, i32, i32
  }
  func.func @transform_2(%arg0: i32) -> (i32, i32, i32, i32) {
    %c0_i32 = arith.constant 0 : i32
    %c0_i32_0 = arith.constant 0 : i32
    %c0_i32_1 = arith.constant 0 : i32
    %c0_i32_2 = arith.constant 0 : i32
    return %arg0, %c0_i32, %c0_i32_0, %c0_i32_1 : i32, i32, i32, i32
  }
  func.func @transform_3(%arg0: i32) -> (i32, i32, i32, i32) {
    %c0_i32 = arith.constant 0 : i32
    %c0_i32_0 = arith.constant 0 : i32
    %c0_i32_1 = arith.constant 0 : i32
    %c0_i32_2 = arith.constant 0 : i32
    return %arg0, %c0_i32, %c0_i32_0, %c0_i32_1 : i32, i32, i32, i32
  }
  func.func @transform_4(%arg0: i32) -> (i32, i32) {
    %c0_i32 = arith.constant 0 : i32
    %c0_i32_0 = arith.constant 0 : i32
    %c0_i32_1 = arith.constant 0 : i32
    return %c0_i32, %c0_i32_0 : i32, i32
  }
  func.func @transform_5(%arg0: i32) -> (i32, i32) {
    %c0_i32 = arith.constant 0 : i32
    %c0_i32_0 = arith.constant 0 : i32
    %c0_i32_1 = arith.constant 0 : i32
    return %c0_i32, %c0_i32_0 : i32, i32
  }
  func.func @transform_6(%arg0: i32) -> (i32, i32) {
    %c0_i32 = arith.constant 0 : i32
    %c0_i32_0 = arith.constant 0 : i32
    %c0_i32_1 = arith.constant 0 : i32
    return %c0_i32, %c0_i32_0 : i32, i32
  }
  func.func @transform_7(%arg0: i32) -> (i32, i32) {
    %c0_i32 = arith.constant 0 : i32
    %c0_i32_0 = arith.constant 0 : i32
    %c0_i32_1 = arith.constant 0 : i32
    return %c0_i32, %c0_i32_0 : i32, i32
  }
  func.func @transform_8(%arg0: i32) -> (i32, i32) {
    %c0_i32 = arith.constant 0 : i32
    %c0_i32_0 = arith.constant 0 : i32
    %c0_i32_1 = arith.constant 0 : i32
    return %c0_i32, %c0_i32_0 : i32, i32
  }
  func.func @transform_9(%arg0: i32) -> (i32, i32) {
    %c0_i32 = arith.constant 0 : i32
    %c0_i32_0 = arith.constant 0 : i32
    %c0_i32_1 = arith.constant 0 : i32
    return %c0_i32, %c0_i32_0 : i32, i32
  }
  func.func @transform_10(%arg0: i32) -> (i32, i32) {
    %c0_i32 = arith.constant 0 : i32
    %c0_i32_0 = arith.constant 0 : i32
    %c0_i32_1 = arith.constant 0 : i32
    return %c0_i32, %c0_i32_0 : i32, i32
  }
  func.func @transform_11(%arg0: i32) -> (i32, i32) {
    %c0_i32 = arith.constant 0 : i32
    %c0_i32_0 = arith.constant 0 : i32
    %c0_i32_1 = arith.constant 0 : i32
    return %c0_i32, %c0_i32_0 : i32, i32
  }
  func.func @transform_12(%arg0: i32) -> (i32, i32) {
    %c0_i32 = arith.constant 0 : i32
    %c0_i32_0 = arith.constant 0 : i32
    %c0_i32_1 = arith.constant 0 : i32
    return %c0_i32, %c0_i32_0 : i32, i32
  }
  func.func @transform_13(%arg0: i32) -> (i32, i32) {
    %c0_i32 = arith.constant 0 : i32
    %c0_i32_0 = arith.constant 0 : i32
    %c0_i32_1 = arith.constant 0 : i32
    return %c0_i32, %c0_i32_0 : i32, i32
  }
  func.func @transform_14(%arg0: i32) -> (i32, i32) {
    %c0_i32 = arith.constant 0 : i32
    %c0_i32_0 = arith.constant 0 : i32
    %c0_i32_1 = arith.constant 0 : i32
    return %c0_i32, %c0_i32_0 : i32, i32
  }
  func.func @transform_15(%arg0: i32) -> (i32, i32) {
    %c0_i32 = arith.constant 0 : i32
    %c0_i32_0 = arith.constant 0 : i32
    %c0_i32_1 = arith.constant 0 : i32
    return %c0_i32, %c0_i32_0 : i32, i32
  }
  func.func @transform_16(%arg0: i32) -> (i32, i32) {
    %c0_i32 = arith.constant 0 : i32
    %c0_i32_0 = arith.constant 0 : i32
    %c0_i32_1 = arith.constant 0 : i32
    return %c0_i32, %c0_i32_0 : i32, i32
  }
  func.func @transform_17(%arg0: i32) -> (i32, i32) {
    %c0_i32 = arith.constant 0 : i32
    %c0_i32_0 = arith.constant 0 : i32
    %c0_i32_1 = arith.constant 0 : i32
    return %c0_i32, %c0_i32_0 : i32, i32
  }
  func.func @transform_18(%arg0: i32) -> (i32, i32) {
    %c0_i32 = arith.constant 0 : i32
    %c0_i32_0 = arith.constant 0 : i32
    %c0_i32_1 = arith.constant 0 : i32
    return %c0_i32, %c0_i32_0 : i32, i32
  }
  func.func @transform_19(%arg0: i32) -> (i32, i32, i32) {
    %c0_i32 = arith.constant 0 : i32
    %c0_i32_0 = arith.constant 0 : i32
    %c0_i32_1 = arith.constant 0 : i32
    return %arg0, %c0_i32, %c0_i32_0 : i32, i32, i32
  }
}

</mosaic_0001>

<bundles_post_ra>
// kernel: efficientnet_forward.3
= control target key start
LH: loop header
LB: loop body
LE: loop exit
PB: predicated region body
PF: predicated region fallthrough
CT: control target
= control target key end

     0   :  { %s3451_s0 = inlined_call_operand.vmem [shape: bf16[2,9,9,64], index: 0, kind: input, shape index: {}]   ;;  %s3452_s1 = inlined_call_operand.vmem [shape: bf16[2,9,9,64], index: 1, kind: input, shape index: {}]   ;;  %s3453_s2 = inlined_call_operand.vmem [shape: bf16[2,9,9,64], index: 2, kind: input, shape index: {}]   ;;  %s3454_s3 = inlined_call_operand.vmem [shape: bf16[2,9,9,64], index: 3, kind: input, shape index: {}]   ;;  %s3455_s4 = inlined_call_operand.vmem [shape: f32[9,64], index: 4, kind: input, shape index: {}]   ;;  %s3456_s5 = inlined_call_operand.vmem [shape: f32[1,64], index: 5, kind: input, shape index: {}]   ;;  %s3457_s6 = inlined_call_operand.vmem [shape: f32[1,64], index: 6, kind: input, shape index: {}]   ;;  %s3458_s7 = inlined_call_operand.vmem [shape: bf16[64,16], index: 7, kind: input, shape index: {}]   ;;  %s3459_s8 = inlined_call_operand.vmem [shape: f32[1,16], index: 8, kind: input, shape index: {}]   ;;  %s3460_s9 = inlined_call_operand.vmem [shape: bf16[16,64], index: 9, kind: input, shape index: {}]   ;;  %s3461_s10 = inlined_call_operand.vmem [shape: f32[1,64], index: 10, kind: input, shape index: {}]   ;;  %s3462_s11 = inlined_call_operand.vmem [shape: bf16[64,24], index: 11, kind: input, shape index: {}]   ;;  %s3463_s12 = inlined_call_operand.vmem [shape: f32[1,24], index: 12, kind: input, shape index: {}]   ;;  %s3464_s13 = inlined_call_operand.vmem [shape: f32[1,24], index: 13, kind: input, shape index: {}]   ;;  %s3465_s14 = inlined_call_operand.vmem [shape: bf16[24,64], index: 14, kind: input, shape index: {}]   ;;  %s3466_s15 = inlined_call_operand.vmem [shape: f32[1,64], index: 15, kind: input, shape index: {}]   ;;  %s3467_s16 = inlined_call_operand.vmem [shape: f32[1,64], index: 16, kind: input, shape index: {}]   ;;  %s3468_s17 = inlined_call_operand.vmem [shape: bf16[64,10], index: 17, kind: input, shape index: {}]   ;;  %s3469_s18 = inlined_call_operand.vmem [shape: f32[1,10], index: 18, kind: input, shape index: {}]   ;;  %s3470_s19 = inlined_call_operand.hbm [shape: f32[2,1,10], index: 19, kind: output, shape index: {}]  }
   0x1   :  { %3511 = sst [smem:[#allocation36_spill]] %s3451_s0 }
   0x2   :  { %3512 = sst [smem:[#allocation37_spill]] %s3452_s1 }
   0x3   :  { %3513 = sst [smem:[#allocation38_spill]] %s3453_s2 }
   0x4   :  { %3514 = sst [smem:[#allocation39_spill]] %s3454_s3 }
   0x5   :  { %3515 = sst [smem:[#allocation40_spill]] %s3455_s4 }
   0x6   :  { %24 = vsyncpa [#allocation3], 0 }
   0x7   :  { %26 = vsyncpa [#allocation3 + $0x1], 0  ;;  %s2349_s0 = smov 0   ;;  %s2351_s30 = smov 0  }
   0x8   :  { %s2353_s20 = smov 0   ;;  %s2355_s21 = smov 0  }
   0x9 LB: > { %3516 = sst [smem:[#allocation5_spill]] %s2235_s0  ;;  %s2370_s1 = sadd.s32 4294967295, %s2247_s21   ;;  %s2247_s21 = sphi %s2355_s21, %s3692_s21   ;;  %s2243_s20 = sphi %s2353_s20, %s3694_s20   ;;  %s2239_s30 = sphi %s2351_s30, %s3696_s30   ;;  %s2235_s0 = sphi %s2349_s0, %s3695_s0  }
   0xa   : > { %3517 = sst [smem:[#allocation6_spill]] %s2243_s20  ;;  %s1943_s22 = sadd.s32 4294967294, %s2247_s21  }
   0xb   : > { %3518 = sst [smem:[#allocation7_spill]] %s2247_s21  ;;  %s2374_s2 = sadd.s32 1, %s2247_s21  }
   0xc   : > { %3519 = sst [smem:[#allocation8_spill]] %s2374_s2  ;;  %s458_s23 = sadd.s32 1, %s2243_s20 }
   0xd   : > { %s455_s24 = ssub.s32 %s2247_s21, %s2374_s2  ;;  %p468_p0 = scmp.ne.s32.totalorder %s2243_s20, %s2239_s30 }
   0xe   : > { %p456_p1 = scmp.eq.s32.totalorder %s455_s24, 0  ;;  %p469_p2 = scmp.eq.s32.totalorder %s2370_s1, 1 }
   0xf   : > { %p474_p3 = scmp.ne.s32.totalorder %s2239_s30, %s2235_s0  ;;  %p475_p4 = scmp.eq.s32.totalorder %s1943_s22, 1 }
  0x10   : > { %s2385_s25 = scalar_select %p456_p1, %s2243_s20, %s458_s23  }
  0x11   : > { %p2387_p5 = por %p469_p2, %p468_p0  ;;  %p2391_p6 = por %p475_p4, %p474_p3 }
  0x12   : > { %3520 = sst [smem:[#allocation9_spill]] %s2385_s25  ;;  %p1946_p7 = scmp.ge.s32.totalorder %s2247_s21, 1 }
  0x13   : > { %s3522_s26 = scalar_select %p2391_p6, 1, 0 }
  0x14   : > { %p570_p8 = scmp.lt.s32.totalorder %s2247_s21, 3 }
  0x15   : > { %3523 = sst [smem:[#allocation10_spill]] %s3522_s26 }
  0x16   : > { %p571_p9 = pnand %p1946_p7, %p570_p8 }
  0x18   : > { %574 = sbr.rel (%p571_p9) target bundleno = 1029 (0x405), region = 96 }
  0x1d   : > { %v2041_v0 = vld [vmem:[%s3458_s7 + $0x18] sm:$0xff]  ;;  %p640_p10 = scmp.lt.s32.totalorder %s2370_s1, 1  ;;  %v2040_v1 = vld [vmem:[%s3458_s7 + $0x10] sm:$0xff]  ;;  %v2039_v2 = vld [vmem:[%s3458_s7 + $0x8] sm:$0xff]  ;;  %s3524_s4 = sld [smem:[#allocation40_spill]]  ;;  %vm825_vm0 = vcmask 1046528  }
  0x1e   : > { %1334 = vmatpush.bf16.msra.mxu0 %v2041_v0  ;;  %s3525_s0 = sld [smem:[#allocation36_spill]]  ;;  %v2038_v7 = vld [vmem:[%s3458_s7] sm:$0xff]  ;;  %s638_s27 = sand.u32 1, %s2239_s30  }
  0x1f   : > { %s641_s23 = scalar_select %p640_p10, %s2370_s1, 1 }
  0x20   : > { %s3529_s29 = sld [smem:[#allocation37_spill]] }
  0x21   : > { %s2408_s20 = smul.u32 72, %s641_s23  ;;  %s3539_s28 = sld [smem:[#allocation38_spill]] }
  0x22   : > { %1335 = vmatpush.bf16.msra.mxu0 %v2040_v1  ;;  %s3548_s26 = sld [smem:[#allocation39_spill]] }
  0x23   : > { %v2413_v3 = vld [vmem:[%s3524_s4] ss:$0 sm:$0xff]  ;;  %v2508_v41 = vld [vmem:[%s3524_s4 + $0x1] ss:$0 sm:$0xff] }
  0x24   : > { %s2419_s21 = scalar_lea.vmem %s3525_s0, %s2408_s20 }
  0x25   : > { %v2422_v4 = vld [vmem:[%s2419_s21] sm:$0xf]  ;;  %v2425_v5 = vld [vmem:[%s2419_s21 + $0x4] sm:$0x1]  ;;  %v663_v6 = vld [vmem:[%s2419_s21 + $0x8] sm:$0xf] }
  0x26   : > { %v2432_v8 = vld [vmem:[%s2419_s21 + $0xc] sm:$0x1]  ;;  %v665_v9 = vld [vmem:[%s2419_s21 + $0x10] sm:$0xf]  ;;  %v2436_v10 = vld [vmem:[%s2419_s21 + $0x14] sm:$0x1]  ;;  %v3478_v11 = vunpack.c.l.bf16 %v2422_v4  ;;  %v2439_v12 = vunpack.c.l.bf16 %v663_v6  ;;  %1336 = vmatpush.bf16.msra.mxu0 %v2039_v2  ;;  %s2455_s22 = scalar_lea.vmem %s3529_s29, %s2408_s20 }
  0x27   : > { %3526 = vst [vmem:[#allocation11_spill] sm:$0xff] %v2432_v8  ;;  %v667_v13 = vld [vmem:[%s2419_s21 + $0x18] sm:$0xf]  ;;  %v2443_v14 = vld [vmem:[%s2419_s21 + $0x1c] sm:$0x1]  ;;  %v2448_v18 = vunpack.c.l.bf16 %v665_v9  ;;  %s2514_s2 = scalar_lea.vmem %s3539_s28, %s2408_s20  ;;  %s2205_s28 = scalar_lea.hbm %s3470_s19, 2 }
  0x28   : > { %3527 = vst [vmem:[#allocation12_spill] sm:$0xff] %v2436_v10  ;;  %v669_v15 = vld [vmem:[%s2419_s21 + $0x20] sm:$0xf]  ;;  %v2458_v20 = vld [vmem:[%s2419_s21 + $0x24] sm:$0x1]  ;;  %v2464_v23 = vunpack.c.l.bf16 %v667_v13  ;;  %v2472_v26 = vmul.f32 %v2413_v3, %v3478_v11  ;;  %v2485_v33 = vmul.f32 %v2413_v3, %v2439_v12  ;;  %s2595_s29 = scalar_lea.vmem %s3548_s26, %s2408_s20  ;;  %s639_s26 = scalar_lea.vmem [#allocation2], %s638_s27 }
  0x29   : > { %3528 = vst [vmem:[#allocation13_spill] sm:$0xff] %v2443_v14  ;;  %v671_v21 = vld [vmem:[%s2419_s21 + $0x28] sm:$0xf]  ;;  %v2462_v22 = vld [vmem:[%s2419_s21 + $0x2c] sm:$0x1]  ;;  %v2467_v25 = vunpack.c.l.bf16 %v669_v15  ;;  %v2503_v40 = vmul.f32 %v2413_v3, %v2448_v18 }
  0x2a   : > { %3530 = vst [vmem:[#allocation14_spill] sm:$0xff] %v2458_v20  ;;  %v673_v27 = vld [vmem:[%s2419_s21 + $0x30] sm:$0xf]  ;;  %v2476_v28 = vld [vmem:[%s2419_s21 + $0x34] sm:$0x1]  ;;  %v2480_v31 = vunpack.c.l.bf16 %v671_v21  ;;  %v2528_v48 = vmul.f32 %v2413_v3, %v2464_v23  ;;  %1337 = vmatpush.bf16.msra.mxu0 %v2038_v7 }
  0x2b   : > { %3531 = vst [vmem:[#allocation15_spill] sm:$0xff] %v2462_v22  ;;  %v675_v29 = vld [vmem:[%s2419_s21 + $0x38] sm:$0xf]  ;;  %v2488_v34 = vld [vmem:[%s2419_s21 + $0x3c] sm:$0x1]  ;;  %v2496_v37 = vunpack.c.l.bf16 %v673_v27  ;;  %v2543_v55 = vmul.f32 %v2413_v3, %v2467_v25 }
  0x2c   : > { %3532 = vst [vmem:[#allocation16_spill] sm:$0xff] %v2467_v25  ;;  %v2491_v35 = vld [vmem:[%s2419_s21 + $0x40] sm:$0xf]  ;;  %v2494_v36 = vld [vmem:[%s2419_s21 + $0x44] sm:$0x1]  ;;  %v2499_v39 = vunpack.c.l.bf16 %v675_v29  ;;  %v2559_v62 = vmul.f32 %v2413_v3, %v2480_v31 }
  0x2d   : > { %3533 = vst [vmem:[#allocation17_spill] sm:$0xff] %v2476_v28  ;;  %v697_v45 = vld [vmem:[%s2455_s22] sm:$0xf]  ;;  %v2521_v46 = vld [vmem:[%s2455_s22 + $0x8] sm:$0xf]  ;;  %v2575_v9 = vmul.f32 %v2413_v3, %v2496_v37 }
  0x2e   : > { %3534 = vst [vmem:[#allocation18_spill] sm:$0xff] %v2480_v31  ;;  %v2524_v47 = vld [vmem:[%s2455_s22 + $0x10] sm:$0xf]  ;;  %v2531_v49 = vld [vmem:[%s2455_s22 + $0x18] sm:$0xf]  ;;  %v706_v52 = vunpack.c.l.bf16 %v697_v45  ;;  %v3477_v53 = vunpack.c.l.bf16 %v2521_v46  ;;  %v772_v44 = vmul.f32 %v2413_v3, %v2499_v39 }
  0x2f   : > { %3535 = vst [vmem:[#allocation19_spill] sm:$0xff] %v2491_v35  ;;  %v2534_v50 = vld [vmem:[%s2455_s22 + $0x20] sm:$0xf]  ;;  %v2537_v51 = vld [vmem:[%s2455_s22 + $0x28] sm:$0xf]  ;;  %v3479_v54 = vunpack.c.l.bf16 %v2524_v47  ;;  %v3482_v59 = vunpack.c.l.bf16 %v2531_v49 }
  0x30   : > { %3536 = vst [vmem:[#allocation20_spill] sm:$0xff] %v2494_v36  ;;  %v2546_v56 = vld [vmem:[%s2455_s22 + $0x30] sm:$0xf]  ;;  %v2549_v57 = vld [vmem:[%s2455_s22 + $0x38] sm:$0xf]  ;;  %v775_v42 = vmul.f32 %v2508_v41, %v706_v52  ;;  %v776_v3 = vmul.f32 %v2508_v41, %v3477_v53  ;;  %v3555_v63 = vunpack.c.l.bf16 %v2537_v51 }
  0x31   : > { %3537 = vst [vmem:[#allocation21_spill] sm:$0xff] %v2496_v37  ;;  %v2552_v58 = vld [vmem:[%s2455_s22 + $0x40] sm:$0xf]  ;;  %v2568_v6 = vld [vmem:[%s2514_s2 + $0x4] sm:$0x1]  ;;  %v777_v29 = vmul.f32 %v2508_v41, %v3479_v54  ;;  %v778_v19 = vmul.f32 %v2508_v41, %v3482_v59  ;;  %s1840_s22 = scalar_lea.sflag [#allocation3], %s638_s27 }
  0x32   : > { %3538 = vst [vmem:[#allocation22_spill] sm:$0xff] %v2499_v39  ;;  %v2565_v2 = vld [vmem:[%s2514_s2] sm:$0xf]  ;;  %v2571_v7 = vld [vmem:[%s2514_s2 + $0x8] sm:$0xf]  ;;  %v780_v36 = vmul.f32 %v2508_v41, %v3555_v63 }
  0x33   : > { %3540 = vst [vmem:[#allocation23_spill] sm:$0xff] %v2521_v46  ;;  %v2578_v13 = vld [vmem:[%s2514_s2 + $0xc] sm:$0x1]  ;;  %v2581_v15 = vld [vmem:[%s2514_s2 + $0x10] sm:$0xf]  ;;  %v3557_v46 = vunpack.c.l.bf16 %v2549_v57  ;;  %v785_v63 = vadd.f32 %v777_v29, %v2503_v40  ;;  %v3565_v29 = vunpack.c.l.bf16 %v2476_v28 }
  0x34   : > { %3541 = vst [vmem:[#allocation24_spill] sm:$0xff] %v2524_v47  ;;  %v2584_v21 = vld [vmem:[%s2514_s2 + $0x14] sm:$0x1]  ;;  %v2598_v1 = vld [vmem:[%s2514_s2 + $0x18] sm:$0xf] }
  0x35   : > { %3542 = vst [vmem:[#allocation25_spill] sm:$0xff] %v2531_v49  ;;  %v2601_v43 = vld [vmem:[%s2514_s2 + $0x1c] sm:$0x1]  ;;  %v2604_v27 = vld [vmem:[%s2514_s2 + $0x20] sm:$0xf]  ;;  %v782_v35 = vmul.f32 %v2508_v41, %v3557_v46 }
  0x36   : > { %3543 = vst [vmem:[#allocation26_spill] sm:$0xff] %v2534_v50  ;;  %v2611_v38 = vld [vmem:[%s2514_s2 + $0x24] sm:$0x1]  ;;  %v2614_v32 = vld [vmem:[%s2514_s2 + $0x28] sm:$0xf] }
  0x37   : > { %3544 = vst [vmem:[#allocation27_spill] sm:$0xff] %v2537_v51  ;;  %v2617_v30 = vld [vmem:[%s2514_s2 + $0x2c] sm:$0x1]  ;;  %v2626_v45 = vld [vmem:[%s2514_s2 + $0x30] sm:$0xf]  ;;  %v784_v51 = vadd.f32 %v776_v3, %v2485_v33  ;;  %v3560_v33 = vunpack.c.l.bf16 %v2432_v8 }
  0x38   : > { %3545 = vst [vmem:[#allocation28_spill] sm:$0xff] %v2546_v56  ;;  %v2629_v52 = vld [vmem:[%s2514_s2 + $0x34] sm:$0x1]  ;;  %v2632_v17 = vld [vmem:[%s2514_s2 + $0x38] sm:$0xf] }
  0x39   : > { %3546 = vst [vmem:[#allocation29_spill] sm:$0xff] %v2549_v57  ;;  %v2641_v53 = vld [vmem:[%s2514_s2 + $0x3c] sm:$0x1]  ;;  %v2647_v24 = vld [vmem:[%s2595_s29] sm:$0xf]  ;;  %s1848_s2 = scalar_lea.hbm %s3470_s19, %s2370_s1 }
  0x3a   : > { %3547 = vst [vmem:[#allocation30_spill] sm:$0xff] %v2552_v58  ;;  %v2650_v16 = vld [vmem:[%s2595_s29 + $0x8] sm:$0xf]  ;;  %v2100_v54 = vld [vmem:[%s3524_s4 + $0x2] ss:$0 sm:$0xff]  ;;  %v3554_v58 = vunpack.c.l.bf16 %v2534_v50  ;;  %v786_v50 = vadd.f32 %v778_v19, %v2528_v48  ;;  %s1852_s20 = sshll.u32 %s1848_s2, 4  ;;  %s1853_s20 = int_to_ptr.hbm [resolvable:$true] %s1852_s20 }
  0x3b   : > { %3549 = vst [vmem:[#allocation31_spill] sm:$0xff] %v2601_v43  ;;  %v2660_v61 = vld [vmem:[%s2595_s29 + $0x10] sm:$0xf]  ;;  %v2663_v0 = vld [vmem:[%s2595_s29 + $0x18] sm:$0xf]  ;;  %v790_v43 = vadd.f32 %v782_v35, %v772_v44  ;;  %v796_v40 = vmul.f32 %v2100_v54, %v3560_v33  ;;  %v797_v19 = vmul.f32 %v2100_v54, %v2448_v18  ;;  %v3562_v35 = vunpack.c.l.bf16 %v2443_v14  ;;  %s2199_s23 = sshra.s32 %s1853_s20, 4  ;;  %s2200_s23 = int_to_ptr.hbm [resolvable:$true] %s2199_s23 }
  0x3c   : > { %3550 = vst [vmem:[#allocation32_spill] sm:$0xff] %v2611_v38  ;;  %v2666_v60 = vld [vmem:[%s2595_s29 + $0x20] sm:$0xf]  ;;  %v779_v59 = vmul.f32 %v2508_v41, %v3554_v58  ;;  %v2674_v49 = vld [vmem:[%s2595_s29 + $0x28] sm:$0xf]  ;;  %v806_v3 = vmul.f32 %v2100_v54, %v3565_v29  ;;  %s2201_s24 = scalar_lea.hbm %s2200_s23, 1  ;;  %p2206_p0 = scmp.lt.s32.totalorder %s2200_s23, %s3470_s19 }
  0x3d   : > { %3551 = vst [vmem:[#allocation33_spill] sm:$0xff] %v2617_v30  ;;  %v2677_v47 = vld [vmem:[%s2595_s29 + $0x30] sm:$0xf]  ;;  %v2680_v11 = vld [vmem:[%s2595_s29 + $0x38] sm:$0xf]  ;;  %v3556_v30 = vunpack.c.l.bf16 %v2546_v56  ;;  %s1850_s29 = sshll.u32 %s639_s26, 4  ;;  %p2202_p11 = scmp.ne.s32.totalorder %s2200_s23, %s2201_s24  ;;  %s1851_s29 = int_to_ptr.vmem [resolvable:$true] %s1850_s29 }
  0x3e   : > { %3552 = vst [vmem:[#allocation34_spill] sm:$0xff] %v2629_v52  ;;  %v787_v58 = vadd.f32 %v779_v59, %v2543_v55  ;;  %v788_v52 = vadd.f32 %v780_v36, %v2559_v62  ;;  %v799_v36 = vmul.f32 %v2100_v54, %v2464_v23  ;;  %v803_v55 = vmul.f32 %v2100_v54, %v2480_v31  ;;  %p2207_p1 = scmp.lt.s32.totalorder %s2205_s28, %s2201_s24 }
  0x3f   : > { %3553 = vst [vmem:[#allocation35_spill] sm:$0xff] %v2641_v53  ;;  %v781_v38 = vmul.f32 %v2508_v41, %v3556_v30  ;;  %v783_v53 = vadd.f32 %v775_v42, %v2472_v26  ;;  %v3558_v30 = vunpack.c.l.bf16 %v2422_v4  ;;  %v3559_v41 = vunpack.c.l.bf16 %v2425_v5  ;;  %p2203_p12 = pnand %p2202_p11, %p2387_p5 }
  0x40   : > { %v795_v26 = vmul.f32 %v2100_v54, %v2439_v12  ;;  %v3561_v42 = vunpack.c.l.bf16 %v2436_v10  ;;  %v801_v4 = vmul.f32 %v2100_v54, %v2467_v25  ;;  %v3563_v5 = vunpack.c.l.bf16 %v2458_v20  ;;  %p2208_p2 = por %p2207_p1, %p2206_p0 }
  0x41   : > { %v789_v56 = vadd.f32 %v781_v38, %v2575_v9  ;;  %v793_v57 = vmul.f32 %v2100_v54, %v3558_v30  ;;  %v794_v46 = vmul.f32 %v2100_v54, %v3559_v41  ;;  %v800_v38 = vmul.f32 %v2100_v54, %v3562_v35  ;;  %p2204_p13 = pneg %p2203_p12 }
  0x42   : > { %v798_v48 = vmul.f32 %v2100_v54, %v3561_v42  ;;  %v802_v44 = vmul.f32 %v2100_v54, %v3563_v5  ;;  %v3564_v59 = vunpack.c.l.bf16 %v2462_v22  ;;  %v805_v9 = vmul.f32 %v2100_v54, %v2496_v37 }
  0x43   : > { %v807_v30 = vmul.f32 %v2100_v54, %v2499_v39  ;;  %v3566_v41 = vunpack.c.l.bf16 %v2488_v34  ;;  %v826_v42 = vrot.slane %v793_v57, 1  ;;  %v827_v35 = vrot.slane %v794_v46, 1  ;;  %p2209_p3 = pnand %p2208_p2, %p2204_p13 }
  0x44   : > { %v804_v62 = vmul.f32 %v2100_v54, %v3564_v59  ;;  %v829_v14 = vrot.slane %v795_v26, 1  ;;  %v830_v20 = vrot.slane %v796_v40, 1  ;;  %v832_v5 = vrot.slane %v797_v19, 1  ;;  %v2101_v40 = vld [vmem:[%s3524_s4 + $0x3] ss:$0 sm:$0xff] }
  0x45   : > { %v808_v33 = vmul.f32 %v2100_v54, %v3566_v41  ;;  %v833_v10 = vrot.slane %v798_v48, 1  ;;  %v835_v8 = vrot.slane %v799_v36, 1  ;;  %v828_v22 = vsel %vm825_vm0, %v826_v42, %v827_v35 }
  0x46   : > { %v836_v59 = vrot.slane %v800_v38, 1  ;;  %v838_v31 = vrot.slane %v801_v4, 1  ;;  %v839_v37 = vrot.slane %v802_v44, 1  ;;  %v831_v28 = vsel %vm825_vm0, %v829_v14, %v830_v20 }
  0x47   : > { %v834_v29 = vsel %vm825_vm0, %v832_v5, %v833_v10  ;;  %v841_v39 = vrot.slane %v803_v55, 1  ;;  %v842_v25 = vrot.slane %v804_v62, 1  ;;  %v844_v46 = vrot.slane %v805_v9, 1 }
  0x48   : > { %v837_v54 = vsel %vm825_vm0, %v835_v8, %v836_v59  ;;  %v840_v57 = vsel %vm825_vm0, %v838_v31, %v839_v37  ;;  %v845_v26 = vrot.slane %v806_v3, 1  ;;  %v847_v48 = vrot.slane %v807_v30, 1 }
  0x49   : > { %v843_v19 = vsel %vm825_vm0, %v841_v39, %v842_v25  ;;  %v848_v36 = vrot.slane %v808_v33, 1  ;;  %v858_v38 = vadd.f32 %v828_v22, %v783_v53  ;;  %v859_v10 = vadd.f32 %v831_v28, %v784_v51  ;;  %v2102_v28 = vld [vmem:[%s3524_s4 + $0x4] ss:$0 sm:$0xff] }
  0x4a   : > { %v846_v14 = vsel %vm825_vm0, %v844_v46, %v845_v26  ;;  %v860_v20 = vadd.f32 %v834_v29, %v785_v63  ;;  %v861_v4 = vadd.f32 %v837_v54, %v786_v50  ;;  %v862_v44 = vadd.f32 %v840_v57, %v787_v58 }
  0x4b   : > { %v849_v8 = vsel %vm825_vm0, %v847_v48, %v848_v36  ;;  %v863_v31 = vadd.f32 %v843_v19, %v788_v52  ;;  %v864_v37 = vadd.f32 %v846_v14, %v789_v56  ;;  %v3567_v62 = vunpack.c.l.bf16 %v2565_v2 }
  0x4c   : > { %v865_v55 = vadd.f32 %v849_v8, %v790_v43  ;;  %v3568_v3 = vunpack.c.l.bf16 %v2571_v7  ;;  %v3569_v39 = vunpack.c.l.bf16 %v2581_v15  ;;  %v3570_v50 = vunpack.c.l.bf16 %v2598_v1 }
  0x4d   : > { %v868_v9 = vmul.f32 %v2101_v40, %v3567_v62  ;;  %v3571_v53 = vunpack.c.l.bf16 %v2604_v27  ;;  %v3572_v43 = vunpack.c.l.bf16 %v2614_v32  ;;  %v3573_v58 = vunpack.c.l.bf16 %v2626_v45 }
  0x4e   : > { %v869_v25 = vmul.f32 %v2101_v40, %v3568_v3  ;;  %v870_v22 = vmul.f32 %v2101_v40, %v3569_v39  ;;  %v871_v51 = vmul.f32 %v2101_v40, %v3570_v50  ;;  %v3574_v30 = vunpack.c.l.bf16 %v2632_v17 }
  0x4f   : > { %v872_v56 = vmul.f32 %v2101_v40, %v3571_v53  ;;  %v873_v52 = vmul.f32 %v2101_v40, %v3572_v43  ;;  %v874_v63 = vmul.f32 %v2101_v40, %v3573_v58  ;;  %v876_v33 = vadd.f32 %v868_v9, %v858_v38 }
  0x50   : > { %v875_v41 = vmul.f32 %v2101_v40, %v3574_v30  ;;  %v877_v42 = vadd.f32 %v869_v25, %v859_v10  ;;  %v878_v35 = vadd.f32 %v870_v22, %v860_v20  ;;  %v879_v5 = vadd.f32 %v871_v51, %v861_v4  ;;  %v2103_v40 = vld [vmem:[%s3524_s4 + $0x5] ss:$0 sm:$0xff] }
  0x51   : > { %v880_v59 = vadd.f32 %v872_v56, %v862_v44  ;;  %v881_v29 = vadd.f32 %v873_v52, %v863_v31  ;;  %v882_v54 = vadd.f32 %v874_v63, %v864_v37  ;;  %v3575_v46 = vunpack.c.l.bf16 %v2647_v24 }
  0x52   : > { %v883_v57 = vadd.f32 %v875_v41, %v865_v55  ;;  %v3576_v19 = vunpack.c.l.bf16 %v2650_v16  ;;  %v3577_v36 = vunpack.c.l.bf16 %v2660_v61  ;;  %v3578_v38 = vunpack.c.l.bf16 %v2663_v0 }
  0x53   : > { %v886_v26 = vmul.f32 %v2102_v28, %v3575_v46  ;;  %v3579_v20 = vunpack.c.l.bf16 %v2666_v60  ;;  %v3580_v8 = vunpack.c.l.bf16 %v2674_v49  ;;  %v3581_v44 = vunpack.c.l.bf16 %v2677_v47 }
  0x54   : > { %v887_v48 = vmul.f32 %v2102_v28, %v3576_v19  ;;  %v888_v14 = vmul.f32 %v2102_v28, %v3577_v36  ;;  %v889_v10 = vmul.f32 %v2102_v28, %v3578_v38  ;;  %v3582_v31 = vunpack.c.l.bf16 %v2680_v11 }
  0x55   : > { %v890_v4 = vmul.f32 %v2102_v28, %v3579_v20  ;;  %v891_v24 = vmul.f32 %v2102_v28, %v3580_v8  ;;  %v892_v16 = vmul.f32 %v2102_v28, %v3581_v44  ;;  %v894_v37 = vadd.f32 %v886_v26, %v876_v33 }
  0x56   : > { %v893_v61 = vmul.f32 %v2102_v28, %v3582_v31  ;;  %v895_v55 = vadd.f32 %v887_v48, %v877_v42  ;;  %v896_v62 = vadd.f32 %v888_v14, %v878_v35  ;;  %v897_v9 = vadd.f32 %v889_v10, %v879_v5 }
  0x57   : > { %v898_v3 = vadd.f32 %v890_v4, %v880_v59  ;;  %v899_v25 = vadd.f32 %v891_v24, %v881_v29  ;;  %v900_v0 = vadd.f32 %v892_v16, %v882_v54  ;;  %v3583_v60 = vunpack.c.l.bf16 %v2565_v2  ;;  %v3590_v2 = vld [vmem:[#allocation31_spill] sm:$0xff] }
  0x58   : > { %v901_v39 = vadd.f32 %v893_v61, %v883_v57  ;;  %v3584_v49 = vunpack.c.l.bf16 %v2568_v6  ;;  %v3585_v47 = vunpack.c.l.bf16 %v2571_v7  ;;  %v3586_v11 = vunpack.c.l.bf16 %v2578_v13  ;;  %v3593_v7 = vld [vmem:[#allocation32_spill] sm:$0xff] }
  0x59   : > { %v904_v22 = vmul.f32 %v2103_v40, %v3583_v60  ;;  %v3587_v53 = vunpack.c.l.bf16 %v2581_v15  ;;  %v3588_v43 = vunpack.c.l.bf16 %v2584_v21  ;;  %v3589_v58 = vunpack.c.l.bf16 %v2598_v1  ;;  %v3596_v15 = vld [vmem:[#allocation33_spill] sm:$0xff]  ;;  %v3599_v1 = vld [vmem:[#allocation34_spill] sm:$0xff] }
  0x5a   : > { %v905_v50 = vmul.f32 %v2103_v40, %v3584_v49  ;;  %v906_v51 = vmul.f32 %v2103_v40, %v3585_v47  ;;  %v907_v28 = vmul.f32 %v2103_v40, %v3586_v11  ;;  %v3591_v30 = vunpack.c.l.bf16 %v3590_v2  ;;  %v2104_v47 = vld [vmem:[%s3524_s4 + $0x6] ss:$0 sm:$0xff] }
  0x5b   : > { %v908_v56 = vmul.f32 %v2103_v40, %v3587_v53  ;;  %v909_v52 = vmul.f32 %v2103_v40, %v3588_v43  ;;  %v910_v63 = vmul.f32 %v2103_v40, %v3589_v58  ;;  %v3592_v6 = vunpack.c.l.bf16 %v2604_v27  ;;  %v3602_v27 = vld [vmem:[#allocation35_spill] sm:$0xff] }
  0x5c   : > { %v911_v41 = vmul.f32 %v2103_v40, %v3591_v30  ;;  %v3594_v42 = vunpack.c.l.bf16 %v3593_v7  ;;  %v3595_v13 = vunpack.c.l.bf16 %v2614_v32  ;;  %v3597_v59 = vunpack.c.l.bf16 %v3596_v15 }
  0x5d   : > { %v912_v33 = vmul.f32 %v2103_v40, %v3592_v6  ;;  %v3598_v21 = vunpack.c.l.bf16 %v2626_v45  ;;  %v3600_v57 = vunpack.c.l.bf16 %v3599_v1  ;;  %v3601_v26 = vunpack.c.l.bf16 %v2632_v17 }
  0x5e   : > { %v913_v35 = vmul.f32 %v2103_v40, %v3594_v42  ;;  %v914_v5 = vmul.f32 %v2103_v40, %v3595_v13  ;;  %v915_v29 = vmul.f32 %v2103_v40, %v3597_v59  ;;  %v3603_v48 = vunpack.c.l.bf16 %v3602_v27  ;;  %v3606_v13 = vld [vmem:[#allocation21_spill] sm:$0xff] }
  0x5f   : > { %v916_v54 = vmul.f32 %v2103_v40, %v3598_v21  ;;  %v917_v46 = vmul.f32 %v2103_v40, %v3600_v57  ;;  %v918_v19 = vmul.f32 %v2103_v40, %v3601_v26  ;;  %v936_v14 = vrot.slane %v904_v22, 1 }
  0x60   : > { %v919_v36 = vmul.f32 %v2103_v40, %v3603_v48  ;;  %v937_v38 = vrot.slane %v905_v50, 1  ;;  %v939_v10 = vrot.slane %v906_v51, 1  ;;  %v940_v32 = vrot.slane %v907_v28, 1 }
  0x61   : > { %v942_v20 = vrot.slane %v908_v56, 1  ;;  %v943_v4 = vrot.slane %v909_v52, 1  ;;  %v945_v8 = vrot.slane %v910_v63, 1  ;;  %v946_v45 = vrot.slane %v911_v41, 1 }
  0x62   : > { %v938_v24 = vsel %vm825_vm0, %v936_v14, %v937_v38  ;;  %v948_v44 = vrot.slane %v912_v33, 1  ;;  %v949_v16 = vrot.slane %v913_v35, 1  ;;  %v941_v31 = vsel %vm825_vm0, %v939_v10, %v940_v32  ;;  %v3604_v35 = vld [vmem:[#allocation16_spill] sm:$0xff]  ;;  %v3614_v10 = vld [vmem:[#allocation25_spill] sm:$0xff] }
  0x63   : > { %v944_v17 = vsel %vm825_vm0, %v942_v20, %v943_v4  ;;  %v951_v61 = vrot.slane %v914_v5, 1  ;;  %v952_v60 = vrot.slane %v915_v29, 1  ;;  %v947_v40 = vsel %vm825_vm0, %v945_v8, %v946_v45  ;;  %v2106_v4 = vld [vmem:[%s3524_s4 + $0x8] ss:$0 sm:$0xff]  ;;  %v3616_v8 = vld [vmem:[#allocation26_spill] sm:$0xff] }
  0x64   : > { %v950_v22 = vsel %vm825_vm0, %v948_v44, %v949_v16  ;;  %v954_v49 = vrot.slane %v916_v54, 1  ;;  %v955_v50 = vrot.slane %v917_v46, 1  ;;  %v957_v11 = vrot.slane %v918_v19, 1  ;;  %v3610_v19 = vld [vmem:[#allocation23_spill] sm:$0xff] }
  0x65   : > { %v953_v51 = vsel %vm825_vm0, %v951_v61, %v952_v60  ;;  %v958_v28 = vrot.slane %v919_v36, 1  ;;  %v968_v53 = vadd.f32 %v938_v24, %v894_v37  ;;  %v969_v43 = vadd.f32 %v941_v31, %v895_v55  ;;  %v2105_v37 = vld [vmem:[%s3524_s4 + $0x7] ss:$0 sm:$0xff]  ;;  %v3612_v36 = vld [vmem:[#allocation24_spill] sm:$0xff] }
  0x66   : > { %v956_v56 = vsel %vm825_vm0, %v954_v49, %v955_v50  ;;  %v970_v52 = vadd.f32 %v944_v17, %v896_v62  ;;  %v971_v58 = vadd.f32 %v947_v40, %v897_v9  ;;  %v972_v2 = vadd.f32 %v950_v22, %v898_v3  ;;  %v3605_v62 = vld [vmem:[#allocation18_spill] sm:$0xff]  ;;  %v3618_v44 = vld [vmem:[#allocation27_spill] sm:$0xff]  ;;  %v3620_v17 = vld [vmem:[#allocation28_spill] sm:$0xff] }
  0x67   : > { %v959_v63 = vsel %vm825_vm0, %v957_v11, %v958_v28  ;;  %v973_v30 = vadd.f32 %v953_v51, %v899_v25  ;;  %v974_v41 = vadd.f32 %v956_v56, %v900_v0  ;;  %v978_v33 = vmul.f32 %v2104_v47, %v2439_v12  ;;  %v3607_v3 = vld [vmem:[#allocation22_spill] sm:$0xff]  ;;  %v3608_v0 = vld [vmem:[#allocation19_spill] sm:$0xff]  ;;  %v3622_v40 = vld [vmem:[#allocation29_spill] sm:$0xff] }
  0x68   : > { %v975_v6 = vadd.f32 %v959_v63, %v901_v39  ;;  %v979_v7 = vmul.f32 %v2104_v47, %v2448_v18  ;;  %v980_v42 = vmul.f32 %v2104_v47, %v2464_v23  ;;  %v981_v55 = vmul.f32 %v2104_v47, %v3604_v35  ;;  %v3624_v50 = vld [vmem:[#allocation30_spill] sm:$0xff] }
  0x69   : > { %v982_v9 = vmul.f32 %v2104_v47, %v3605_v62  ;;  %v983_v5 = vmul.f32 %v2104_v47, %v3606_v13  ;;  %v984_v25 = vmul.f32 %v2104_v47, %v3607_v3  ;;  %v3609_v39 = vunpack.c.l.bf16 %v3608_v0 }
  0x6a   : > { %v986_v59 = vadd.f32 %v978_v33, %v968_v53  ;;  %v987_v29 = vadd.f32 %v979_v7, %v969_v43  ;;  %v988_v21 = vadd.f32 %v980_v42, %v970_v52  ;;  %v989_v54 = vadd.f32 %v981_v55, %v971_v58  ;;  %v3628_v7 = vld [vmem:[#allocation12_spill] sm:$0xff] }
  0x6b   : > { %v985_v15 = vmul.f32 %v2104_v47, %v3609_v39  ;;  %v990_v1 = vadd.f32 %v982_v9, %v972_v2  ;;  %v991_v57 = vadd.f32 %v983_v5, %v973_v30  ;;  %v992_v46 = vadd.f32 %v984_v25, %v974_v41  ;;  %v3626_v30 = vld [vmem:[#allocation11_spill] sm:$0xff]  ;;  %v3630_v9 = vld [vmem:[#allocation13_spill] sm:$0xff] }
  0x6c   : > { %v3611_v27 = vunpack.c.l.bf16 %v3610_v19  ;;  %v3613_v14 = vunpack.c.l.bf16 %v3612_v36  ;;  %v3615_v32 = vunpack.c.l.bf16 %v3614_v10  ;;  %v3617_v24 = vunpack.c.l.bf16 %v3616_v8  ;;  %v3640_v36 = vld [vmem:[#allocation20_spill] sm:$0xff] }
  0x6d   : > { %v993_v26 = vadd.f32 %v985_v15, %v975_v6  ;;  %v3619_v16 = vunpack.c.l.bf16 %v3618_v44  ;;  %v3621_v61 = vunpack.c.l.bf16 %v3620_v17  ;;  %v3623_v22 = vunpack.c.l.bf16 %v3622_v40  ;;  %v3632_v15 = vld [vmem:[#allocation14_spill] sm:$0xff] }
  0x6e   : > { %v996_v48 = vmul.f32 %v2105_v37, %v3611_v27  ;;  %v997_v38 = vmul.f32 %v2105_v37, %v3613_v14  ;;  %v998_v20 = vmul.f32 %v2105_v37, %v3615_v32  ;;  %v999_v45 = vmul.f32 %v2105_v37, %v3617_v24 }
  0x6f   : > { %v1000_v31 = vmul.f32 %v2105_v37, %v3619_v16  ;;  %v1001_v60 = vmul.f32 %v2105_v37, %v3621_v61  ;;  %v1002_v49 = vmul.f32 %v2105_v37, %v3623_v22  ;;  %v3625_v47 = vunpack.c.l.bf16 %v3624_v50  ;;  %v2107_v22 = vld [vmem:[%s3456_s5] ss:$0 sm:$0xff] }
  0x70   : > { %v1004_v11 = vadd.f32 %v996_v48, %v986_v59  ;;  %v1005_v28 = vadd.f32 %v997_v38, %v987_v29  ;;  %v1006_v53 = vadd.f32 %v998_v20, %v988_v21  ;;  %v1007_v56 = vadd.f32 %v999_v45, %v989_v54  ;;  %v3634_v21 = vld [vmem:[#allocation15_spill] sm:$0xff] }
  0x71   : > { %v1003_v51 = vmul.f32 %v2105_v37, %v3625_v47  ;;  %v1008_v43 = vadd.f32 %v1000_v31, %v990_v1  ;;  %v1009_v52 = vadd.f32 %v1001_v60, %v991_v57  ;;  %v1010_v58 = vadd.f32 %v1002_v49, %v992_v46  ;;  %v3636_v57 = vld [vmem:[#allocation17_spill] sm:$0xff] }
  0x72   : > { %v1014_v2 = vmul.f32 %v2106_v4, %v2439_v12  ;;  %v3627_v41 = vunpack.c.l.bf16 %v3626_v30  ;;  %v1016_v33 = vmul.f32 %v2106_v4, %v2448_v18  ;;  %v3629_v42 = vunpack.c.l.bf16 %v3628_v7 }
  0x73   : > { %v1011_v63 = vadd.f32 %v1003_v51, %v993_v26  ;;  %v1018_v37 = vmul.f32 %v2106_v4, %v2464_v23  ;;  %v3631_v5 = vunpack.c.l.bf16 %v3630_v9  ;;  %v1020_v39 = vmul.f32 %v2106_v4, %v3604_v35 }
  0x74   : > { %v1015_v6 = vmul.f32 %v2106_v4, %v3627_v41  ;;  %v1017_v55 = vmul.f32 %v2106_v4, %v3629_v42  ;;  %v3633_v59 = vunpack.c.l.bf16 %v3632_v15  ;;  %v1022_v12 = vmul.f32 %v2106_v4, %v3605_v62 }
  0x75   : > { %v1019_v25 = vmul.f32 %v2106_v4, %v3631_v5  ;;  %v3635_v54 = vunpack.c.l.bf16 %v3634_v21  ;;  %v1024_v18 = vmul.f32 %v2106_v4, %v3606_v13  ;;  %v3637_v46 = vunpack.c.l.bf16 %v3636_v57 }
  0x76   : > { %v1021_v29 = vmul.f32 %v2106_v4, %v3633_v59  ;;  %v1026_v23 = vmul.f32 %v2106_v4, %v3607_v3  ;;  %v3638_v19 = vunpack.c.l.bf16 %v2488_v34  ;;  %v3639_v35 = vunpack.c.l.bf16 %v3608_v0 }
  0x77   : > { %v1023_v1 = vmul.f32 %v2106_v4, %v3635_v54  ;;  %v1025_v26 = vmul.f32 %v2106_v4, %v3637_v46  ;;  %v3641_v14 = vunpack.c.l.bf16 %v3640_v36  ;;  %v1046_v62 = vrot.slane %v1014_v2, 1 }
  0x78   : > { %v1027_v27 = vmul.f32 %v2106_v4, %v3638_v19  ;;  %v1028_v48 = vmul.f32 %v2106_v4, %v3639_v35  ;;  %v1047_v10 = vrot.slane %v1015_v6, 1  ;;  %v1049_v32 = vrot.slane %v1016_v33, 1  ;;  %v2108_v33 = vld [vmem:[%s3457_s6] ss:$0 sm:$0xff] }
  0x79   : > { %v1029_v38 = vmul.f32 %v2106_v4, %v3641_v14  ;;  %v1050_v20 = vrot.slane %v1017_v55, 1  ;;  %v1052_v8 = vrot.slane %v1018_v37, 1  ;;  %v1053_v13 = vrot.slane %v1019_v25, 1 }
  0x7a   : > { %v1055_v24 = vrot.slane %v1020_v39, 1  ;;  %v1048_v45 = vsel %vm825_vm0, %v1046_v62, %v1047_v10  ;;  %v1056_v44 = vrot.slane %v1021_v29, 1  ;;  %v1058_v3 = vrot.slane %v1022_v12, 1 }
  0x7b   : > { %v1059_v16 = vrot.slane %v1023_v1, 1  ;;  %v1051_v34 = vsel %vm825_vm0, %v1049_v32, %v1050_v20  ;;  %v1054_v0 = vsel %vm825_vm0, %v1052_v8, %v1053_v13  ;;  %v1061_v31 = vrot.slane %v1024_v18, 1 }
  0x7c   : > { %v1062_v17 = vrot.slane %v1025_v26, 1  ;;  %v1057_v4 = vsel %vm825_vm0, %v1055_v24, %v1056_v44  ;;  %v1064_v60 = vrot.slane %v1026_v23, 1  ;;  %v1065_v40 = vrot.slane %v1027_v27, 1 }
  0x7d   : > { %v1060_v61 = vsel %vm825_vm0, %v1058_v3, %v1059_v16  ;;  %v1067_v50 = vrot.slane %v1028_v48, 1  ;;  %v1068_v47 = vrot.slane %v1029_v38, 1  ;;  %v1078_v51 = vadd.f32 %v1048_v45, %v1004_v11 }
  0x7e   : > { %v1063_v49 = vsel %vm825_vm0, %v1061_v31, %v1062_v17  ;;  %v1066_v2 = vsel %vm825_vm0, %v1064_v60, %v1065_v40  ;;  %v1079_v30 = vadd.f32 %v1051_v34, %v1005_v28  ;;  %v1080_v41 = vadd.f32 %v1054_v0, %v1006_v53 }
  0x7f   : > { %v1081_v6 = vadd.f32 %v1057_v4, %v1007_v56  ;;  %v1069_v7 = vsel %vm825_vm0, %v1067_v50, %v1068_v47  ;;  %v1082_v42 = vadd.f32 %v1060_v61, %v1008_v43  ;;  %v1083_v55 = vadd.f32 %v1063_v49, %v1009_v52 }
  0x80   : > { %v1084_v37 = vadd.f32 %v1066_v2, %v1010_v58  ;;  %v1085_v9 = vadd.f32 %v1069_v7, %v1011_v63  ;;  %v1090_v5 = vmul.f32 %v2107_v22, %v1078_v51  ;;  %v1091_v25 = vmul.f32 %v2107_v22, %v1079_v30 }
  0x81   : > { %v1092_v39 = vmul.f32 %v2107_v22, %v1080_v41  ;;  %v1093_v15 = vmul.f32 %v2107_v22, %v1081_v6  ;;  %v1094_v11 = vmul.f32 %v2107_v22, %v1082_v42  ;;  %v1095_v59 = vmul.f32 %v2107_v22, %v1083_v55 }
  0x82   : > { %v1096_v29 = vmul.f32 %v2107_v22, %v1084_v37  ;;  %v1097_v28 = vmul.f32 %v2107_v22, %v1085_v9  ;;  %v2891_v53 = vadd.f32 %v2108_v33, %v1090_v5  ;;  %v2893_v56 = vadd.f32 %v2108_v33, %v1091_v25 }
  0x83   : > { %v2895_v12 = vadd.f32 %v2108_v33, %v1092_v39  ;;  %v2897_v21 = vadd.f32 %v2108_v33, %v1093_v15  ;;  %v2899_v43 = vadd.f32 %v2108_v33, %v1094_v11  ;;  %v2901_v52 = vadd.f32 %v2108_v33, %v1095_v59 }
  0x84   : > { %v1951_v58 = vmul.f32 -1.442695, %v2891_v53  ;;  %v1952_v63 = vmul.f32 -1.442695, %v2893_v56  ;;  %v2906_v1 = vadd.f32 %v2108_v33, %v1096_v29  ;;  %v2909_v57 = vadd.f32 %v2108_v33, %v1097_v28 }
  0x85   : > { %v1953_v54 = vmul.f32 -1.442695, %v2895_v12  ;;  %v1954_v18 = vmul.f32 -1.442695, %v2897_v21  ;;  %v1955_v46 = vmul.f32 -1.442695, %v2899_v43 }
  0x86   : > { %2113 = vpow2.f32 %v1951_v58  ;;  %v1956_v26 = vmul.f32 -1.442695, %v2901_v52  ;;  %v1957_v23 = vmul.f32 -1.442695, %v2906_v1  ;;  %v1958_v19 = vmul.f32 -1.442695, %v2909_v57 }
  0x87   : > { %2115 = vpow2.f32 %v1952_v63  ;;  %vm1270_vm0 = vcmask 523264  }
  0x88   : > { %2117 = vpow2.f32 %v1953_v54 }
  0x89   : > { %2119 = vpow2.f32 %v1954_v18 }
  0x8a   : > { %2121 = vpow2.f32 %v1955_v46 }
  0x8b   : > { %2123 = vpow2.f32 %v1956_v26 }
  0x8c   : > { %v2114_v27 = vpop.eup %2113  ;;  %2125 = vpow2.f32 %v1957_v23 }
  0x8d   : > { %v2116_v35 = vpop.eup %2115  ;;  %v1134_v48 = vadd.f32 1.0, %v2114_v27  ;;  %2127 = vpow2.f32 %v1958_v19 }
  0x8e   : > { %v2118_v36 = vpop.eup %2117  ;;  %v2915_v14 = vadd.f32 1.0, %v2116_v35 }
  0x8f   : > { %v2120_v38 = vpop.eup %2119  ;;  %v2917_v62 = vadd.f32 1.0, %v2118_v36  ;;  %2129 = vrcp.f32 %v1134_v48  ;;  %v1153_v13 = vand.u32 2147483648, %v1134_v48  ;;  %vm1147_vm1 = vweird.f32 %v1134_v48 }
  0x90   : > { %v2122_v10 = vpop.eup %2121  ;;  %v2919_v32 = vadd.f32 1.0, %v2120_v38  ;;  %2131 = vrcp.f32 %v2915_v14  ;;  %v1151_v45 = vand.u32 2147483647, %v1134_v48  ;;  %vm1162_vm2 = vweird.f32 %v2915_v14 }
  0x91   : > { %v2124_v20 = vpop.eup %2123  ;;  %v2922_v8 = vadd.f32 1.0, %v2122_v10  ;;  %2133 = vrcp.f32 %v2917_v62  ;;  %v1168_v44 = vand.u32 2147483648, %v2915_v14  ;;  %v1166_v34 = vand.u32 2147483647, %v2915_v14 }
  0x92   : > { %v2126_v24 = vpop.eup %2125  ;;  %v2927_v16 = vadd.f32 1.0, %v2124_v20  ;;  %v1183_v0 = vand.u32 2147483648, %v2917_v62  ;;  %2135 = vrcp.f32 %v2919_v32  ;;  %v2934_v17 = vor.u32 1.1754944e-38, %v1153_v13 }
  0x93   : > { %v2128_v3 = vpop.eup %2127  ;;  %vm1177_vm3 = vweird.f32 %v2917_v62  ;;  %v1181_v4 = vand.u32 2147483647, %v2917_v62  ;;  %2137 = vrcp.f32 %v2922_v8  ;;  %v2941_v60 = vadd.f32 1.0, %v2126_v24 }
  0x94   : > { %v1196_v22 = vand.u32 2147483647, %v2919_v32  ;;  %v1198_v49 = vand.u32 2147483648, %v2919_v32  ;;  %v2946_v50 = vadd.f32 1.0, %v2128_v3  ;;  %vm2948_vm4 = vcmp.eq.f32.partialorder %v1151_v45, 8.507059e+37 }
  0x95   : > { %v2932_v31 = vpop.eup %2129  ;;  %v1169_v2 = vor.u32 1.1754944e-38, %v1168_v44  ;;  %vm1192_vm5 = vweird.f32 %v2919_v32  ;;  %vm2958_vm7 = vcmp.eq.f32.partialorder %v1166_v34, 8.507059e+37  ;;  %v1184_v33 = vor.u32 1.1754944e-38, %v1183_v0 }
  0x96   : > { %v2939_v61 = vpop.eup %2131  ;;  %v1143_v40 = vmul.f32 %v2932_v31, %v1134_v48  ;;  %vm1148_vm6 = vweird.f32 %v2932_v31  ;;  %2139 = vrcp.f32 %v2927_v16  ;;  %vm2966_vm9 = vcmp.eq.f32.partialorder %v1181_v4, 8.507059e+37 }
  0x97   : > { %v1158_v51 = vmul.f32 %v2939_v61, %v2915_v14  ;;  %v2955_v30 = vpop.eup %2133  ;;  %vm1163_vm8 = vweird.f32 %v2939_v61  ;;  %vm2972_vm11 = vcmp.eq.f32.partialorder %v1196_v22, 8.507059e+37  ;;  %v1199_v25 = vor.u32 1.1754944e-38, %v1198_v49  ;;  %vm2984_vm13 = vmor %vm1147_vm1, %vm1148_vm6 }
  0x98   : > { %v1144_v41 = vsub.f32 1.0, %v1143_v40  ;;  %v1173_v42 = vmul.f32 %v2955_v30, %v2917_v62  ;;  %v2136_v37 = vpop.eup %2135  ;;  %v1211_v39 = vand.u32 2147483647, %v2922_v8  ;;  %vm1178_vm12 = vweird.f32 %v2955_v30  ;;  %vm2996_vm14 = vmor %vm1162_vm2, %vm1163_vm8 }
  0x99   : > { %v1159_v7 = vsub.f32 1.0, %v1158_v51  ;;  %v2138_v15 = vpop.eup %2137  ;;  %v1188_v29 = vmul.f32 %v2136_v37, %v2919_v32  ;;  %v1213_v54 = vand.u32 2147483648, %v2922_v8  ;;  %v1226_v18 = vand.u32 2147483647, %v2927_v16  ;;  %vm3003_vm1 = vmor %vm1177_vm3, %vm1178_vm12 }
  0x9a   : > { %v1145_v9 = vmul.f32 %v2932_v31, %v1144_v41  ;;  %v1174_v59 = vsub.f32 1.0, %v1173_v42  ;;  %v1203_v63 = vmul.f32 %v2138_v15, %v2922_v8  ;;  %vm1193_vm15 = vweird.f32 %v2136_v37 }
  0x9b   : > { %v1160_v11 = vmul.f32 %v2939_v61, %v1159_v7  ;;  %v1189_v19 = vsub.f32 1.0, %v1188_v29  ;;  %vm1208_vm6 = vweird.f32 %v2138_v15  ;;  %vm1222_vm10 = vweird.f32 %v2927_v16  ;;  %vm3022_vm3 = vmor %vm1192_vm5, %vm1193_vm15  ;;  %v2044_v29 = vld [vmem:[%s3462_s11 + $0x8] sm:$0xff] }
  0x9c   : > { %v1146_v28 = vadd.f32 %v2932_v31, %v1145_v9  ;;  %v1175_v23 = vmul.f32 %v2955_v30, %v1174_v59  ;;  %v2140_v27 = vpop.eup %2139  ;;  %v1204_v48 = vsub.f32 1.0, %v1203_v63  ;;  %2141 = vrcp.f32 %v2941_v60 }
  0x9d   : > { %v1161_v46 = vadd.f32 %v2939_v61, %v1160_v11  ;;  %v1190_v38 = vmul.f32 %v2136_v37, %v1189_v19  ;;  %vm3013_vm2 = vcmp.eq.f32.partialorder %v1211_v39, 8.507059e+37  ;;  %v1214_v24 = vor.u32 1.1754944e-38, %v1213_v54 }
  0x9e   : > { %v1150_v36 = vsel %vm2984_vm13, %v2932_v31, %v1146_v28  ;;  %v1176_v14 = vadd.f32 %v2955_v30, %v1175_v23  ;;  %v1205_v13 = vmul.f32 %v2138_v15, %v1204_v48  ;;  %v1218_v45 = vmul.f32 %v2140_v27, %v2927_v16 }
  0x9f   : > { %v1165_v62 = vsel %vm2996_vm14, %v2939_v61, %v1161_v46  ;;  %v1191_v3 = vadd.f32 %v2136_v37, %v1190_v38  ;;  %vm3660_vm8 = vweird.f32 %v2922_v8  ;;  %vm3036_vm13 = vcmp.eq.f32.partialorder %v1226_v18, 8.507059e+37 }
  0xa0   : > { %v1180_v44 = vsel %vm3003_vm1, %v2955_v30, %v1176_v14  ;;  %vm3032_vm12 = vmor %vm3660_vm8, %vm1208_vm6  ;;  %v1228_v0 = vand.u32 2147483648, %v2927_v16  ;;  %v1155_v31 = vsel %vm2948_vm4, %v2934_v17, %v1150_v36  ;;  %v1206_v4 = vadd.f32 %v2138_v15, %v1205_v13 }
  0xa1   : > { %v1219_v61 = vsub.f32 1.0, %v1218_v45  ;;  %vm1223_vm5 = vweird.f32 %v2140_v27  ;;  %v1170_v8 = vsel %vm2958_vm7, %v1169_v2, %v1165_v62  ;;  %v1195_v40 = vsel %vm3022_vm3, %v2136_v37, %v1191_v3 }
  0xa2   : > { %v1241_v22 = vand.u32 2147483647, %v2941_v60  ;;  %2143 = vrcp.f32 %v2946_v50  ;;  %v2142_v49 = vpop.eup %2141  ;;  %v1185_v51 = vsel %vm2966_vm9, %v1184_v33, %v1180_v44  ;;  %v1200_v17 = vsel %vm2972_vm11, %v1199_v25, %v1195_v40  ;;  %vm3060_vm4 = vmor %vm1222_vm10, %vm1223_vm5 }
  0xa3   : > { %v1210_v47 = vsel %vm3032_vm12, %v2138_v15, %v1206_v4  ;;  %v1220_v30 = vmul.f32 %v2140_v27, %v1219_v61  ;;  %v1229_v6 = vor.u32 1.1754944e-38, %v1228_v0  ;;  %v1233_v7 = vmul.f32 %v2142_v49, %v2941_v60 }
  0xa4   : > { %v1215_v2 = vsel %vm3013_vm2, %v1214_v24, %v1210_v47  ;;  %vm1237_vm7 = vweird.f32 %v2941_v60  ;;  %v1243_v42 = vand.u32 2147483648, %v2941_v60  ;;  %v3068_v55 = vmul.f32 %v1155_v31, %v2891_v53 }
  0xa5   : > { %v1221_v33 = vadd.f32 %v2140_v27, %v1220_v30  ;;  %v3071_v37 = vmul.f32 %v1170_v8, %v2893_v56  ;;  %v1234_v9 = vsub.f32 1.0, %v1233_v7  ;;  %vm1238_vm9 = vweird.f32 %v2142_v49 }
  0xa6   : > { %v3074_v16 = vmul.f32 %v1185_v51, %v2895_v12  ;;  %v3077_v5 = vmul.f32 %v1200_v17, %v2897_v21  ;;  %vm3081_vm10 = vcmp.eq.f32.partialorder %v1241_v22, 8.507059e+37  ;;  %v3086_v53 = vmul.f32 %v1215_v2, %v2899_v43  ;;  %vm3098_vm11 = vmor %vm1237_vm7, %vm1238_vm9  ;;  %v2042_v22 = vld [vmem:[%s3460_s9] sm:$0xff] }
  0xa7   : > { %v1225_v25 = vsel %vm3060_vm4, %v2140_v27, %v1221_v33  ;;  %v1271_v56 = vsel %vm1270_vm0, %v3068_v55, 0.0  ;;  %v1235_v11 = vmul.f32 %v2142_v49, %v1234_v9  ;;  %v1272_v21 = vsel %vm1270_vm0, %v3071_v37, 0.0  ;;  %1384 = vmatpush.bf16.msra.mxu1 %v2042_v22 }
  0xa8   : > { %v2144_v15 = vpop.eup %2143  ;;  %v1230_v12 = vsel %vm3036_vm13, %v1229_v6, %v1225_v25  ;;  %v1274_v59 = vsel %vm1270_vm0, %v3074_v16, 0.0  ;;  %v1244_v43 = vor.u32 1.1754944e-38, %v1243_v42  ;;  %vm1252_vm14 = vweird.f32 %v2946_v50 }
  0xa9   : > { %v1248_v28 = vmul.f32 %v2144_v15, %v2946_v50  ;;  %v1273_v58 = vadd.f32 %v1272_v21, %v1271_v56  ;;  %v1236_v63 = vadd.f32 %v2142_v49, %v1235_v11  ;;  %v1258_v54 = vand.u32 2147483648, %v2946_v50  ;;  %v2046_v21 = vld [vmem:[%s3462_s11 + $0x18] sm:$0xff] }
  0xaa   : > { %v3106_v18 = vmul.f32 %v1230_v12, %v2901_v52  ;;  %v1276_v46 = vsel %vm1270_vm0, %v3077_v5, 0.0  ;;  %vm1253_vm15 = vweird.f32 %v2144_v15  ;;  %v1256_v26 = vand.u32 2147483647, %v2946_v50  ;;  %1470 = vmatpush.bf16.msrb.mxu0 %v2046_v21  ;;  %2052 = vmatpush.bf16.msra.mxu2 %v2046_v21 }
  0xab   : > { %v1249_v60 = vsub.f32 1.0, %v1248_v28  ;;  %v1275_v23 = vadd.f32 %v1274_v59, %v1273_v58  ;;  %v1240_v19 = vsel %vm3098_vm11, %v2142_v49, %v1236_v63  ;;  %v1278_v27 = vsel %vm1270_vm0, %v3086_v53, 0.0  ;;  %vm1254_vm1 = vmor %vm1252_vm14, %vm1253_vm15  ;;  %v2045_v59 = vld [vmem:[%s3462_s11 + $0x10] sm:$0xff]  ;;  %v2043_v28 = vld [vmem:[%s3462_s11] sm:$0xff] }
  0xac   : > { %v1245_v35 = vsel %vm3081_vm10, %v1244_v43, %v1240_v19  ;;  %v1259_v36 = vor.u32 1.1754944e-38, %v1258_v54  ;;  %v1280_v38 = vsel %vm1270_vm0, %v3106_v18, 0.0  ;;  %vm1257_vm6 = vcmp.eq.f32.partialorder %v1256_v26, 8.507059e+37  ;;  %v1366_v43 = vld [vmem:[%s3461_s10] sm:$0x1] }
  0xad   : > { %v1250_v48 = vmul.f32 %v2144_v15, %v1249_v60  ;;  %v1277_v52 = vadd.f32 %v1276_v46, %v1275_v23  ;;  %v3120_v14 = vmul.f32 %v1245_v35, %v2906_v1  ;;  %vm1373_vm13 = vcmask 130048  }
  0xae   : > { %1471 = vmatpush.bf16.msrb.mxu0 %v2045_v59  ;;  %2053 = vmatpush.bf16.msra.mxu2 %v2045_v59  ;;  %vm1548_vm10 = vcmask 1043456   ;;  %vm1535_vm11 = vcmask 195584  }
  0xaf   : > { %v1251_v10 = vadd.f32 %v2144_v15, %v1250_v48  ;;  %v1279_v62 = vadd.f32 %v1278_v27, %v1277_v52  ;;  %v1282_v20 = vsel %vm1270_vm0, %v3120_v14, 0.0 }
  0xb1   : > { %v1255_v13 = vsel %vm1254_vm1, %v2144_v15, %v1251_v10  ;;  %v1281_v24 = vadd.f32 %v1280_v38, %v1279_v62 }
  0xb2   : > { %v1260_v45 = vsel %vm1257_vm6, %v1259_v36, %v1255_v13  ;;  %1472 = vmatpush.bf16.msrb.mxu0 %v2044_v29  ;;  %2054 = vmatpush.bf16.msra.mxu2 %v2044_v29 }
  0xb3   : > { %v3127_v44 = vmul.f32 %v1260_v45, %v2909_v57  ;;  %v1283_v50 = vadd.f32 %v1282_v20, %v1281_v24  ;;  %v1302_v57 = vld [vmem:[%s3459_s8] sm:$0x1] }
  0xb5   : > { %v1284_v1 = vsel %vm1270_vm0, %v3127_v44, 0.0 }
  0xb6   : > { %v1285_v3 = vadd.f32 %v1284_v1, %v1283_v50  ;;  %1473 = vmatpush.bf16.msrb.mxu0 %v2043_v28  ;;  %2055 = vmatpush.bf16.msra.mxu2 %v2043_v28 }
  0xb8   : > { %v1286_v34 = vrot.slane %v1285_v3, 4 }
  0xba   : > { %v1287_v32 = vadd.f32 %v1286_v34, %v1285_v3 }
  0xbc   : > { %v1288_v0 = vrot.slane %v1287_v32, 2 }
  0xbe   : > { %v1289_v31 = vadd.f32 %v1288_v0, %v1287_v32 }
  0xc0   : > { %v1290_v4 = vrot.slane %v1289_v31, 1 }
  0xc2   : > { %v1291_v61 = vadd.f32 %v1290_v4, %v1289_v31 }
  0xc4   : > { %v1292_v8 = vmul.f32 0.015625, %v1291_v61 }
  0xc6   : > { %v1293_v40 = vpack.c.bf16 %v1292_v8, %v1292_v8 }
  0xc8   : > { %1975 = vmatmul.msk.bf16.vlgmr.msra.gmra.mxu0 %vm1270_vm0, %v1293_v40  ;;  %v2110_v40 = vld [vmem:[%s3464_s13] ss:$0 sm:$0xff] }
 0x145   : > { %v1339_v49 = vpop.f32.mrf.mxu0 }
 0x146   : > { %v1340_v51 = vadd.f32 %v1339_v49, %v1302_v57 }
 0x148   : > { %v1976_v17 = vmul.f32 -1.442695, %v1340_v51 }
 0x14a   : > { %2145 = vpow2.f32 %v1976_v17 }
 0x14d   : > { %v1341_v47 = vpop.f32.mrf.mxu0 }
 0x150   : > { %v2146_v30 = vpop.eup %2145 }
 0x151   : > { %v1346_v2 = vadd.f32 1.0, %v2146_v30 }
 0x153   : > { %2147 = vrcp.f32 %v1346_v2  ;;  %v1358_v33 = vand.u32 2147483648, %v1346_v2  ;;  %v1356_v9 = vand.u32 2147483647, %v1346_v2  ;;  %vm1352_vm3 = vweird.f32 %v1346_v2 }
 0x155   : > { %v1359_v39 = vor.u32 1.1754944e-38, %v1358_v33  ;;  %vm1357_vm12 = vcmp.eq.f32.partialorder %v1356_v9, 8.507059e+37 }
 0x159   : > { %v2148_v41 = vpop.eup %2147 }
 0x15a   : > { %v1348_v6 = vmul.f32 %v2148_v41, %v1346_v2  ;;  %vm1353_vm2 = vweird.f32 %v2148_v41 }
 0x15b   : > { %vm1354_vm8 = vmor %vm1352_vm3, %vm1353_vm2 }
 0x15c   : > { %v1349_v7 = vsub.f32 1.0, %v1348_v6 }
 0x15e   : > { %v1350_v42 = vmul.f32 %v2148_v41, %v1349_v7 }
 0x160   : > { %v1351_v25 = vadd.f32 %v2148_v41, %v1350_v42 }
 0x162   : > { %v1355_v56 = vsel %vm1354_vm8, %v2148_v41, %v1351_v25 }
 0x163   : > { %v1360_v15 = vsel %vm1357_vm12, %v1359_v39, %v1355_v56 }
 0x164   : > { %v1362_v12 = vmul.f32 %v1360_v15, %v1340_v51 }
 0x166   : > { %v1363_v11 = vpack.c.bf16 %v1362_v12, %v1362_v12 }
 0x168   : > { %1981 = vmatmul.msk.bf16.vlgmr.msra.gmra.mxu1 %vm1373_vm13, %v1363_v11 }
 0x1e5   : > { %v1386_v58 = vpop.f32.mrf.mxu1 }
 0x1e6   : > { %v1387_v63 = vadd.f32 %v1386_v58, %v1366_v43 }
 0x1e8   : > { %v1982_v54 = vmul.f32 -1.442695, %v1387_v63  ;;  %v3184_v63 = vld [vmem:[%s3466_s15] ss:$0 sm:$0xff] }
 0x1ea   : > { %2149 = vpow2.f32 %v1982_v54 }
 0x1ed   : > { %v1388_v46 = vpop.f32.mrf.mxu1 }
 0x1ee   : > { %v3190_v46 = vld [vmem:[%s3467_s16] ss:$0 sm:$0xff] }
 0x1f0   : > { %v2150_v60 = vpop.eup %2149 }
 0x1f1   : > { %v1393_v26 = vadd.f32 1.0, %v2150_v60 }
 0x1f3   : > { %2151 = vrcp.f32 %v1393_v26  ;;  %v1405_v35 = vand.u32 2147483648, %v1393_v26  ;;  %v1403_v52 = vand.u32 2147483647, %v1393_v26  ;;  %vm1399_vm4 = vweird.f32 %v1393_v26 }
 0x1f5   : > { %v1406_v38 = vor.u32 1.1754944e-38, %v1405_v35  ;;  %vm1404_vm9 = vcmp.eq.f32.partialorder %v1403_v52, 8.507059e+37 }
 0x1f9   : > { %v2152_v23 = vpop.eup %2151 }
 0x1fa   : > { %v1395_v19 = vmul.f32 %v2152_v23, %v1393_v26  ;;  %vm1400_vm5 = vweird.f32 %v2152_v23 }
 0x1fb   : > { %vm1401_vm7 = vmor %vm1399_vm4, %vm1400_vm5 }
 0x1fc   : > { %v1396_v27 = vsub.f32 1.0, %v1395_v19 }
 0x1fe   : > { %v1397_v48 = vmul.f32 %v2152_v23, %v1396_v27 }
 0x200   : > { %v1398_v36 = vadd.f32 %v2152_v23, %v1397_v48 }
 0x202   : > { %v1402_v10 = vsel %vm1401_vm7, %v2152_v23, %v1398_v36 }
 0x203   : > { %v1407_v62 = vsel %vm1404_vm9, %v1406_v38, %v1402_v10 }
 0x204   : > { %v1409_v20 = vperm.slane %v1407_v62, 0 }
 0x206   : > { %v1410_v13 = vmul.f32 %v1409_v20, %v3068_v55  ;;  %v1411_v24 = vmul.f32 %v1409_v20, %v3071_v37  ;;  %v1412_v45 = vmul.f32 %v1409_v20, %v3074_v16  ;;  %v1413_v50 = vmul.f32 %v1409_v20, %v3077_v5  ;;  %v1525_v5 = vld [vmem:[%s3465_s14 + $0x8] sm:$0xf] }
 0x207   : > { %v1414_v34 = vmul.f32 %v1409_v20, %v3086_v53  ;;  %v1415_v32 = vmul.f32 %v1409_v20, %v3106_v18  ;;  %v1416_v55 = vmul.f32 %v1409_v20, %v3120_v14  ;;  %v1417_v37 = vmul.f32 %v1409_v20, %v3127_v44  ;;  %v2047_v18 = vld [vmem:[%s3465_s14] sm:$0xff] }
 0x208   : > { %v1418_v1 = vpack.c.bf16 %v1411_v24, %v1410_v13  ;;  %v1419_v3 = vpack.c.bf16 %v1413_v50, %v1412_v45  ;;  %v1531_v31 = vunpack.c.l.b16 %v1525_v5  ;;  %v2109_v44 = vld [vmem:[%s3463_s12] ss:$0 sm:$0xff] }
 0x209   : > { %v1420_v0 = vpack.c.bf16 %v1415_v32, %v1414_v34  ;;  %v1421_v16 = vpack.c.bf16 %v1417_v37, %v1416_v55 }
 0x20a   : > { %1999 = vmatmul.msk.bf16.vlgmr.msrb.gmra.mxu0 %vm1270_vm0, %v1418_v1  ;;  %2000 = vmatmul.msk.bf16.vlgmr.msra.gmra.mxu2 %vm1270_vm0, %v1419_v3  ;;  %v1533_v4 = vpack.c.b16 %v1531_v31, %v1531_v31 }
 0x20c   : > { %v1550_v53 = vsel %vm1548_vm10, %v1533_v4, 0 }
 0x20d   : > { %1558 = vmatpush.bf16.msrb.mxu1 %v1550_v53  ;;  %2056 = vmatpush.bf16.msra.mxu3 %v1550_v53 }
 0x211   : > { %1559 = vmatpush.bf16.msrb.mxu1 %v2047_v18  ;;  %2057 = vmatpush.bf16.msra.mxu3 %v2047_v18 }
 0x21a   : > { %2001 = vmatmul.msk.bf16.gmra.mxu2 %vm1270_vm0, %v1420_v0 }
 0x22a   : > { %2002 = vmatmul.msk.bf16.gmra.mxu2 %vm1270_vm0, %v1421_v16 }
 0x287   : > { %v1475_v14 = vpop.f32.mrf.mxu0 }
 0x288   : > { %v1499_v8 = vmul.f32 %v2109_v44, %v1475_v14 }
 0x28a   : > { %v1511_v49 = vadd.f32 %v2110_v40, %v1499_v8 }
 0x28d   : > { %v1480_v61 = vpop.f32.mrf.mxu2 }
 0x28e   : > { %v1501_v17 = vmul.f32 %v2109_v44, %v1480_v61 }
 0x28f   : > { %v1477_v57 = vpop.f32.mrf.mxu0 }
 0x290   : > { %v1500_v22 = vmul.f32 %v2109_v44, %v1477_v57  ;;  %v1513_v41 = vadd.f32 %v2110_v40, %v1501_v17 }
 0x292   : > { %v1512_v51 = vadd.f32 %v2110_v40, %v1500_v22 }
 0x294   : > { %v1519_v47 = vpack.c.bf16 %v1512_v51, %v1511_v49 }
 0x295   : > { %v1482_v30 = vpop.f32.mrf.mxu2 }
 0x296   : > { %v1502_v2 = vmul.f32 %v2109_v44, %v1482_v30  ;;  %2007 = vmatmul.msk.bf16.vlgmr.msrb.gmra.mxu1 %vm1535_vm11, %v1519_v47 }
 0x298   : > { %v1514_v6 = vadd.f32 %v2110_v40, %v1502_v2 }
 0x29a   : > { %v1520_v7 = vpack.c.bf16 %v1514_v6, %v1513_v41 }
 0x29c   : > { %2008 = vmatmul.msk.bf16.vlgmr.msra.gmra.mxu3 %vm1535_vm11, %v1520_v7 }
 0x29d   : > { %v1485_v33 = vpop.f32.mrf.mxu2 }
 0x29e   : > { %v1503_v42 = vmul.f32 %v2109_v44, %v1485_v33 }
 0x2a0   : > { %v1515_v39 = vadd.f32 %v2110_v40, %v1503_v42 }
 0x2a5   : > { %v1487_v9 = vpop.f32.mrf.mxu2 }
 0x2a6   : > { %v1504_v25 = vmul.f32 %v2109_v44, %v1487_v9 }
 0x2a8   : > { %v1516_v56 = vadd.f32 %v2110_v40, %v1504_v25 }
 0x2aa   : > { %v1521_v15 = vpack.c.bf16 %v1516_v56, %v1515_v39 }
 0x2ac   : > { %2009 = vmatmul.msk.bf16.gmra.mxu3 %vm1535_vm11, %v1521_v15 }
 0x2ad   : > { %v1490_v12 = vpop.f32.mrf.mxu2 }
 0x2ae   : > { %v1505_v11 = vmul.f32 %v2109_v44, %v1490_v12 }
 0x2b0   : > { %v1517_v29 = vadd.f32 %v2110_v40, %v1505_v11 }
 0x2b5   : > { %v1492_v21 = vpop.f32.mrf.mxu2 }
 0x2b6   : > { %v1506_v59 = vmul.f32 %v2109_v44, %v1492_v21 }
 0x2b8   : > { %v1518_v43 = vadd.f32 %v2110_v40, %v1506_v59 }
 0x2ba   : > { %v1522_v28 = vpack.c.bf16 %v1518_v43, %v1517_v29 }
 0x2bc   : > { %2010 = vmatmul.msk.bf16.gmra.mxu3 %vm1535_vm11, %v1522_v28 }
 0x313   : > { %v1561_v58 = vpop.f32.mrf.mxu1 }
 0x314   : > { %v1585_v54 = vmul.f32 %v3184_v63, %v1561_v58 }
 0x316   : > { %v3193_v26 = vadd.f32 %v3190_v46, %v1585_v54 }
 0x318   : > { %v2011_v35 = vmul.f32 -1.442695, %v3193_v26 }
 0x31a   : > { %2153 = vpow2.f32 %v2011_v35 }
 0x31b   : > { %v1563_v60 = vpop.f32.mrf.mxu1 }
 0x31c   : > { %v1586_v23 = vmul.f32 %v3184_v63, %v1563_v60 }
 0x31e   : > { %v3199_v48 = vadd.f32 %v3190_v46, %v1586_v23 }
 0x31f   : > { %v1566_v19 = vpop.f32.mrf.mxu3 }
 0x320   : > { %v1587_v27 = vmul.f32 %v3184_v63, %v1566_v19  ;;  %v2012_v36 = vmul.f32 -1.442695, %v3199_v48  ;;  %v2154_v13 = vpop.eup %2153 }
 0x321   : > { %v3211_v45 = vadd.f32 1.0, %v2154_v13 }
 0x322   : > { %v3202_v52 = vadd.f32 %v3190_v46, %v1587_v27  ;;  %2155 = vpow2.f32 %v2012_v36 }
 0x323   : > { %v1646_v56 = vand.u32 2147483647, %v3211_v45  ;;  %vm1642_vm15 = vweird.f32 %v3211_v45  ;;  %v1648_v28 = vand.u32 2147483648, %v3211_v45 }
 0x324   : > { %v2013_v38 = vmul.f32 -1.442695, %v3202_v52 }
 0x325   : > { %vm3280_vm6 = vcmp.eq.f32.partialorder %v1646_v56, 8.507059e+37  ;;  %v1649_v13 = vor.u32 1.1754944e-38, %v1648_v28 }
 0x326   : > { %2157 = vpow2.f32 %v2013_v38 }
 0x327   : > { %v1568_v10 = vpop.f32.mrf.mxu3 }
 0x328   : > { %v1588_v62 = vmul.f32 %v3184_v63, %v1568_v10  ;;  %v2156_v50 = vpop.eup %2155 }
 0x329   : > { %v3215_v32 = vadd.f32 1.0, %v2156_v50 }
 0x32a   : > { %v3208_v20 = vadd.f32 %v3190_v46, %v1588_v62 }
 0x32b   : > { %v1663_v60 = vand.u32 2147483648, %v3215_v32  ;;  %vm1657_vm8 = vweird.f32 %v3215_v32 }
 0x32c   : > { %v2014_v24 = vmul.f32 -1.442695, %v3208_v20  ;;  %v2158_v3 = vpop.eup %2157 }
 0x32d   : > { %v3220_v55 = vadd.f32 1.0, %v2158_v3  ;;  %v2051_v3 = vld [vmem:[%s3468_s17 + $0x18] sm:$0xff] }
 0x32e   : > { %2159 = vpow2.f32 %v2014_v24  ;;  %1828 = vmatpush.bf16.msra.mxu1 %v2051_v3 }
 0x32f   : > { %v1571_v1 = vpop.f32.mrf.mxu3  ;;  %2161 = vrcp.f32 %v3211_v45  ;;  %v1678_v24 = vand.u32 2147483648, %v3220_v55  ;;  %vm1672_vm13 = vweird.f32 %v3220_v55  ;;  %v1676_v50 = vand.u32 2147483647, %v3220_v55 }
 0x330   : > { %v1589_v34 = vmul.f32 %v3184_v63, %v1571_v1  ;;  %2163 = vrcp.f32 %v3215_v32 }
 0x331   : > { %2165 = vrcp.f32 %v3220_v55  ;;  %vm1677_vm7 = vcmp.eq.f32.partialorder %v1676_v50, 8.507059e+37 }
 0x332   : > { %v3218_v0 = vadd.f32 %v3190_v46, %v1589_v34 }
 0x334   : > { %v2015_v37 = vmul.f32 -1.442695, %v3218_v0  ;;  %v2160_v16 = vpop.eup %2159 }
 0x335   : > { %v3225_v31 = vpop.eup %2161  ;;  %v3228_v53 = vadd.f32 1.0, %v2160_v16  ;;  %v1664_v16 = vor.u32 1.1754944e-38, %v1663_v60 }
 0x336   : > { %2167 = vpow2.f32 %v2015_v37  ;;  %v1638_v14 = vmul.f32 %v3225_v31, %v3211_v45  ;;  %v3235_v44 = vpop.eup %2163  ;;  %vm1643_vm14 = vweird.f32 %v3225_v31 }
 0x337   : > { %v1573_v5 = vpop.f32.mrf.mxu3  ;;  %v3238_v8 = vpop.eup %2165  ;;  %2169 = vrcp.f32 %v3228_v53  ;;  %v1653_v51 = vmul.f32 %v3235_v44, %v3215_v32  ;;  %vm3272_vm1 = vmor %vm1642_vm15, %vm1643_vm14  ;;  %vm1658_vm2 = vweird.f32 %v3235_v44  ;;  %vm1687_vm10 = vweird.f32 %v3228_v53 }
 0x338   : > { %v1590_v4 = vmul.f32 %v3184_v63, %v1573_v5  ;;  %v1639_v57 = vsub.f32 1.0, %v1638_v14  ;;  %v1668_v47 = vmul.f32 %v3238_v8, %v3220_v55  ;;  %vm1673_vm3 = vweird.f32 %v3238_v8  ;;  %vm3300_vm12 = vmor %vm1657_vm8, %vm1658_vm2 }
 0x339   : > { %v1654_v6 = vsub.f32 1.0, %v1653_v51  ;;  %vm3319_vm5 = vmor %vm1672_vm13, %vm1673_vm3  ;;  %v1679_v14 = vor.u32 1.1754944e-38, %v1678_v24 }
 0x33a   : > { %v3231_v18 = vadd.f32 %v3190_v46, %v1590_v4  ;;  %v1640_v2 = vmul.f32 %v3225_v31, %v1639_v57  ;;  %v1669_v42 = vsub.f32 1.0, %v1668_v47 }
 0x33b   : > { %v1655_v12 = vmul.f32 %v3235_v44, %v1654_v6 }
 0x33c   : > { %v2016_v61 = vmul.f32 -1.442695, %v3231_v18  ;;  %v2168_v40 = vpop.eup %2167  ;;  %v1641_v39 = vadd.f32 %v3225_v31, %v1640_v2  ;;  %v1670_v21 = vmul.f32 %v3238_v8, %v1669_v42 }
 0x33d   : > { %v3241_v22 = vadd.f32 1.0, %v2168_v40  ;;  %v3253_v41 = vpop.eup %2169  ;;  %v1656_v19 = vadd.f32 %v3235_v44, %v1655_v12 }
 0x33e   : > { %2171 = vpow2.f32 %v2016_v61  ;;  %v1683_v11 = vmul.f32 %v3253_v41, %v3228_v53  ;;  %v1645_v58 = vsel %vm3272_vm1, %v3225_v31, %v1641_v39  ;;  %v1671_v35 = vadd.f32 %v3238_v8, %v1670_v21 }
 0x33f   : > { %v1576_v49 = vpop.f32.mrf.mxu3  ;;  %2173 = vrcp.f32 %v3241_v22  ;;  %v1650_v34 = vsel %vm3280_vm6, %v1649_v13, %v1645_v58  ;;  %v1693_v61 = vand.u32 2147483648, %v3228_v53  ;;  %vm1688_vm9 = vweird.f32 %v3253_v41 }
 0x340   : > { %v1591_v17 = vmul.f32 %v3184_v63, %v1576_v49  ;;  %v1684_v27 = vsub.f32 1.0, %v1683_v11  ;;  %v1675_v5 = vsel %vm3319_vm5, %v3238_v8, %v1671_v35  ;;  %v1757_v40 = vmul.f32 %v1650_v34, %v3193_v26  ;;  %v2050_v49 = vld [vmem:[%s3468_s17 + $0x10] sm:$0xff]  ;;  %vm3348_vm15 = vmor %vm1687_vm10, %vm1688_vm9 }
 0x341   : > { %v1680_v51 = vsel %vm1677_vm7, %v1679_v14, %v1675_v5  ;;  %v1708_v26 = vand.u32 2147483648, %v3241_v22  ;;  %1829 = vmatpush.bf16.msra.mxu1 %v2050_v49  ;;  %v1694_v42 = vor.u32 1.1754944e-38, %v1693_v61  ;;  %vm1702_vm1 = vweird.f32 %v3241_v22 }
 0x342   : > { %v3250_v30 = vadd.f32 %v3190_v46, %v1591_v17  ;;  %v1685_v37 = vmul.f32 %v3253_v41, %v1684_v27  ;;  %v1759_v56 = vmul.f32 %v1680_v51, %v3202_v52 }
 0x344   : > { %v2017_v7 = vmul.f32 -1.442695, %v3250_v30  ;;  %v2172_v33 = vpop.eup %2171  ;;  %v1686_v8 = vadd.f32 %v3253_v41, %v1685_v37 }
 0x345   : > { %v3256_v9 = vadd.f32 1.0, %v2172_v33  ;;  %v3258_v25 = vpop.eup %2173 }
 0x346   : > { %2175 = vpow2.f32 %v2017_v7  ;;  %v1698_v59 = vmul.f32 %v3258_v25, %v3241_v22  ;;  %vm1703_vm11 = vweird.f32 %v3258_v25  ;;  %v1690_v11 = vsel %vm3348_vm15, %v3253_v41, %v1686_v8  ;;  %v2048_v41 = vld [vmem:[%s3468_s17] sm:$0xff] }
 0x347   : > { %v1578_v15 = vpop.f32.mrf.mxu3  ;;  %2177 = vrcp.f32 %v3256_v9  ;;  %vm3364_vm6 = vmor %vm1702_vm1, %vm1703_vm11  ;;  %v1723_v43 = vand.u32 2147483648, %v3256_v9  ;;  %vm1717_vm3 = vweird.f32 %v3256_v9  ;;  %v1721_v28 = vand.u32 2147483647, %v3256_v9 }
 0x348   : > { %v1592_v29 = vmul.f32 %v3184_v63, %v1578_v15  ;;  %v1699_v36 = vsub.f32 1.0, %v1698_v59  ;;  %v1706_v15 = vand.u32 2147483647, %v3241_v22  ;;  %vm1837_vm1 = vcmask 73728  }
 0x349   : > { %v1724_v35 = vor.u32 1.1754944e-38, %v1723_v43  ;;  %vm1722_vm7 = vcmp.eq.f32.partialorder %v1721_v28, 8.507059e+37 }
 0x34a   : > { %v3286_v23 = vadd.f32 %v3190_v46, %v1592_v29  ;;  %v1661_v46 = vand.u32 2147483647, %v3215_v32  ;;  %v1660_v32 = vsel %vm3300_vm12, %v3235_v44, %v1656_v19  ;;  %v1700_v31 = vmul.f32 %v3258_v25, %v1699_v36 }
 0x34b   : > { %v1691_v44 = vand.u32 2147483647, %v3228_v53  ;;  %v1709_v29 = vor.u32 1.1754944e-38, %v1708_v26  ;;  %vm1707_vm12 = vcmp.eq.f32.partialorder %v1706_v15, 8.507059e+37 }
 0x34c   : > { %v2176_v63 = vpop.eup %2175  ;;  %v2018_v10 = vmul.f32 -1.442695, %v3286_v23  ;;  %vm1662_vm4 = vcmp.eq.f32.partialorder %v1661_v46, 8.507059e+37  ;;  %v1701_v2 = vadd.f32 %v3258_v25, %v1700_v31 }
 0x34d   : > { %v3292_v38 = vadd.f32 1.0, %v2176_v63  ;;  %v3295_v62 = vpop.eup %2177  ;;  %v1665_v57 = vsel %vm1662_vm4, %v1664_v16, %v1660_v32  ;;  %vm3342_vm14 = vcmp.eq.f32.partialorder %v1691_v44, 8.507059e+37 }
 0x34e   : > { %v1713_v1 = vmul.f32 %v3295_v62, %v3256_v9  ;;  %v1758_v7 = vmul.f32 %v1665_v57, %v3199_v48  ;;  %v2049_v48 = vld [vmem:[%s3468_s17 + $0x8] sm:$0xff]  ;;  %vm1718_vm2 = vweird.f32 %v3295_v62  ;;  %v1705_v59 = vsel %vm3364_vm6, %v3258_v25, %v1701_v2 }
 0x34f   : > { %2179 = vrcp.f32 %v3292_v38  ;;  %1830 = vmatpush.bf16.msra.mxu1 %v2049_v48  ;;  %v1695_v54 = vsel %vm3342_vm14, %v1694_v42, %v1690_v11  ;;  %vm3382_vm13 = vmor %vm1717_vm3, %vm1718_vm2  ;;  %vm1732_vm5 = vweird.f32 %v3292_v38  ;;  %v1738_v60 = vand.u32 2147483648, %v3292_v38 }
 0x350   : > { %2181 = vpow2.f32 %v2018_v10  ;;  %v1714_v4 = vsub.f32 1.0, %v1713_v1  ;;  %v1710_v63 = vsel %vm1707_vm12, %v1709_v29, %v1705_v59  ;;  %v1736_v27 = vand.u32 2147483647, %v3292_v38 }
 0x351   : > { %v1766_v10 = vsel %vm1270_vm0, %v1758_v7, 0.0  ;;  %v1760_v13 = vmul.f32 %v1695_v54, %v3208_v20  ;;  %v1739_v50 = vor.u32 1.1754944e-38, %v1738_v60  ;;  %v1768_v1 = vsel %vm1270_vm0, %v1759_v56, 0.0 }
 0x352   : > { %v1715_v17 = vmul.f32 %v3295_v62, %v1714_v4  ;;  %vm1737_vm9 = vcmp.eq.f32.partialorder %v1736_v27, 8.507059e+37 }
 0x353   : > { %1831 = vmatpush.bf16.msra.mxu1 %v2048_v41  ;;  %v1770_v20 = vsel %vm1270_vm0, %v1760_v13, 0.0 }
 0x354   : > { %v1716_v21 = vadd.f32 %v3295_v62, %v1715_v17 }
 0x355   : > { %v2180_v47 = vpop.eup %2179 }
 0x356   : > { %v2182_v6 = vpop.eup %2181  ;;  %v1728_v39 = vmul.f32 %v2180_v47, %v3292_v38  ;;  %vm1733_vm8 = vweird.f32 %v2180_v47  ;;  %v1720_v19 = vsel %vm3382_vm13, %v3295_v62, %v1716_v21  ;;  %v1761_v62 = vmul.f32 %v1710_v63, %v3218_v0 }
 0x357   : > { %v3354_v12 = vadd.f32 1.0, %v2182_v6  ;;  %vm3392_vm4 = vmor %vm1732_vm5, %vm1733_vm8  ;;  %v1725_v45 = vsel %vm1722_vm7, %v1724_v35, %v1720_v19  ;;  %v1765_v38 = vsel %vm1270_vm0, %v1757_v40, 0.0 }
 0x358   : > { %v1729_v22 = vsub.f32 1.0, %v1728_v39  ;;  %v1767_v34 = vadd.f32 %v1766_v10, %v1765_v38  ;;  %v1762_v55 = vmul.f32 %v1725_v45, %v3231_v18  ;;  %v1772_v5 = vsel %vm1270_vm0, %v1761_v62, 0.0 }
 0x359   : > { %2183 = vrcp.f32 %v3354_v12  ;;  %v1753_v0 = vand.u32 2147483648, %v3354_v12  ;;  %v1751_v14 = vand.u32 2147483647, %v3354_v12  ;;  %vm1747_vm11 = vweird.f32 %v3354_v12 }
 0x35a   : > { %v1730_v58 = vmul.f32 %v2180_v47, %v1729_v22  ;;  %v1769_v16 = vadd.f32 %v1768_v1, %v1767_v34  ;;  %v1774_v61 = vsel %vm1270_vm0, %v1762_v55, 0.0 }
 0x35b   : > { %v1754_v18 = vor.u32 1.1754944e-38, %v1753_v0  ;;  %vm1752_vm15 = vcmp.eq.f32.partialorder %v1751_v14, 8.507059e+37 }
 0x35c   : > { %v1731_v9 = vadd.f32 %v2180_v47, %v1730_v58  ;;  %v1771_v44 = vadd.f32 %v1770_v20, %v1769_v16 }
 0x35e   : > { %v1735_v46 = vsel %vm3392_vm4, %v2180_v47, %v1731_v9  ;;  %v1773_v57 = vadd.f32 %v1772_v5, %v1771_v44 }
 0x35f   : > { %v2184_v24 = vpop.eup %2183  ;;  %v1740_v32 = vsel %vm1737_vm9, %v1739_v50, %v1735_v46 }
 0x360   : > { %v1743_v3 = vmul.f32 %v2184_v24, %v3354_v12  ;;  %v1763_v31 = vmul.f32 %v1740_v32, %v3250_v30  ;;  %vm1748_vm10 = vweird.f32 %v2184_v24  ;;  %v1775_v8 = vadd.f32 %v1774_v61, %v1773_v57 }
 0x361   : > { %vm1749_vm14 = vmor %vm1747_vm11, %vm1748_vm10 }
 0x362   : > { %v1744_v37 = vsub.f32 1.0, %v1743_v3  ;;  %v1776_v49 = vsel %vm1270_vm0, %v1763_v31, 0.0 }
 0x363   : > { %v1777_v47 = vadd.f32 %v1776_v49, %v1775_v8 }
 0x364   : > { %v1745_v4 = vmul.f32 %v2184_v24, %v1744_v37 }
 0x366   : > { %v1746_v40 = vadd.f32 %v2184_v24, %v1745_v4 }
 0x368   : > { %v1750_v51 = vsel %vm1749_vm14, %v2184_v24, %v1746_v40 }
 0x369   : > { %v1755_v30 = vsel %vm1752_vm15, %v1754_v18, %v1750_v51 }
 0x36a   : > { %v1764_v17 = vmul.f32 %v1755_v30, %v3286_v23  ;;  %v1796_v23 = vld [vmem:[%s3469_s18] sm:$0x1] }
 0x36c   : > { %v1778_v2 = vsel %vm1270_vm0, %v1764_v17, 0.0 }
 0x36d   : > { %v1779_v26 = vadd.f32 %v1778_v2, %v1777_v47 }
 0x36f   : > { %v1780_v6 = vrot.slane %v1779_v26, 4 }
 0x371   : > { %v1781_v7 = vadd.f32 %v1780_v6, %v1779_v26 }
 0x373   : > { %v1782_v33 = vrot.slane %v1781_v7, 2 }
 0x375   : > { %v1783_v42 = vadd.f32 %v1782_v33, %v1781_v7 }
 0x377   : > { %v1784_v39 = vrot.slane %v1783_v42, 1 }
 0x379   : > { %v1785_v56 = vadd.f32 %v1784_v39, %v1783_v42 }
 0x37b   : > { %v1786_v53 = vmul.f32 0.015625, %v1785_v56 }
 0x37d   : > { %v1787_v15 = vpack.c.bf16 %v1786_v53, %v1786_v53 }
 0x37f   : > { %2035 = vmatmul.msk.bf16.vlgmr.msra.gmra.mxu1 %vm1270_vm0, %v1787_v15 }
 0x3fc   : > { %v1833_v12 = vpop.f32.mrf.mxu1 }
 0x3fd   : > { %v1834_v48 = vadd.f32 %v1833_v12, %v1796_v23 }
 0x3ff   : > { %1838 = vst.msk [vmem:[%s639_s26] sm:$0x1] %vm1837_vm1, %v1834_v48 }
 0x400   : > { %2212 = shalt.err (!%p2209_p3)
}
 0x401   : > { %2059 = dma.vmem_to_hbm [thread:$0]  (%p2387_p5), %s1851_s29, 16, %s1853_s20, %s1840_s22  }
 0x404   : > { %v1835_v11 = vpop.f32.mrf.mxu1 }
 0x405 PF: > { %s3689_s27 = sld [smem:[#allocation7_spill]] }
 0x406   : > { %s3690_s0 = sld [smem:[#allocation5_spill]] }
 0x40b   : > { %p2065_p4 = scmp.ge.s32.totalorder %s3689_s27, 2 }
 0x40c   : > { %s1864_s4 = sand.u32 1, %s3690_s0  }
 0x40d   : > { %p2062_p7 = pnand %p2065_p4, %p2391_p6  ;;  %s1865_s1 = scalar_lea.sflag [#allocation3], %s1864_s4 }
 0x40f   : > { %p2063_p8 = pneg %p2062_p7 }
 0x411   : > { %2230 = dma.done.wait (%p2063_p8), %s1865_s1, 16  }
 0x412   : > { %2232 = vsyncadd (%p2063_p8), %s1865_s1, 4294967280  ;;  %s3692_s21 = sld [smem:[#allocation8_spill]]  ;;  %s3695_s0 = smov %s2239_s30 }
 0x413   : > { %s3693_s23 = sld [smem:[#allocation6_spill]] }
 0x414   : > { %s3694_s20 = sld [smem:[#allocation9_spill]] }
 0x418   : > { %p29_p9 = scmp.ge.s32.totalorder %s3692_s21, 4  }
 0x419   : > { %s3696_s30 = smov %s3693_s23 }
 0x41a   :  { %31 = sbr.rel (!%p29_p9) target bundleno = 9 (0x9), region = 140 }
 0x41f   :  { %1870 = vsyncpa [#allocation3], 1 }
 0x420   :  { %1872 = vsyncpa [#allocation3 + $0x1], 1 }

// kernel: efficientnet_forward.2
= control target key start
LH: loop header
LB: loop body
LE: loop exit
PB: predicated region body
PF: predicated region fallthrough
CT: control target
= control target key end

     0   :  { %s6995_s24 = smov 0   ;;  %s12982_s0 = inlined_call_operand.vmem [shape: bf16[2,256,27], index: 0, kind: input, shape index: {}]   ;;  %s12983_s1 = inlined_call_operand.vmem [shape: bf16[27,16], index: 1, kind: input, shape index: {}]   ;;  %s12984_s2 = inlined_call_operand.vmem [shape: f32[1,16], index: 2, kind: input, shape index: {}]   ;;  %s12985_s3 = inlined_call_operand.vmem [shape: f32[1,16], index: 3, kind: input, shape index: {}]   ;;  %s12986_s4 = inlined_call_operand.vmem [shape: f32[9,16], index: 4, kind: input, shape index: {}]   ;;  %s12987_s5 = inlined_call_operand.vmem [shape: f32[1,16], index: 5, kind: input, shape index: {}]   ;;  %s12988_s6 = inlined_call_operand.vmem [shape: f32[1,16], index: 6, kind: input, shape index: {}]   ;;  %s12989_s7 = inlined_call_operand.vmem [shape: bf16[16,4], index: 7, kind: input, shape index: {}]   ;;  %s12990_s8 = inlined_call_operand.vmem [shape: f32[1,4], index: 8, kind: input, shape index: {}]   ;;  %s12991_s9 = inlined_call_operand.vmem [shape: bf16[4,16], index: 9, kind: input, shape index: {}]   ;;  %s12992_s10 = inlined_call_operand.vmem [shape: f32[1,16], index: 10, kind: input, shape index: {}]   ;;  %s12993_s11 = inlined_call_operand.vmem [shape: bf16[16,16], index: 11, kind: input, shape index: {}]   ;;  %s12994_s12 = inlined_call_operand.vmem [shape: f32[1,16], index: 12, kind: input, shape index: {}]   ;;  %s12995_s13 = inlined_call_operand.vmem [shape: f32[1,16], index: 13, kind: input, shape index: {}]   ;;  %s12996_s14 = inlined_call_operand.vmem [shape: bf16[16,64], index: 14, kind: input, shape index: {}]   ;;  %s12997_s15 = inlined_call_operand.vmem [shape: f32[1,64], index: 15, kind: input, shape index: {}]   ;;  %s12998_s16 = inlined_call_operand.vmem [shape: f32[1,64], index: 16, kind: input, shape index: {}]   ;;  %s12999_s17 = inlined_call_operand.vmem [shape: bf16[2,16,16,64], index: 17, kind: output, shape index: {}]  }
   0x1   :  { %13245 = sst [smem:[#allocation123_spill]] %s12982_s0 }
   0x2   :  { %13246 = sst [smem:[#allocation124_spill]] %s12983_s1 }
   0x3 LB: > { %s6086_s25 = sadd.s32 4294967295, %s6901_s24   ;;  %p6090_p0 = scmp.ge.s32.totalorder %s6901_s24, 1  ;;  %s6901_s24 = sphi %s6995_s24, %s27_s24  }
   0x4   : > { %p487_p1 = scmp.lt.s32.totalorder %s6901_s24, 3 }
   0x6   : > { %p488_p2 = pnand %p6090_p0, %p487_p1 }
   0x8   : > { %491 = sbr.rel (%p488_p2) target bundleno = 1801 (0x709), region = 88 }
   0xd   : > { %s13247_s28 = sld [smem:[#allocation124_spill]]  ;;  %vm726_vm0 = vcmask 1044480   ;;  %vm727_vm1 = vcmask 1045504   ;;  %p539_p3 = scmp.lt.s32.totalorder %s6086_s25, 1  ;;  %v6903_v3 = vmov 65535   ;;  %vm677_vm2 = vcmask 220160  }
   0xe   : > { %v728_v4 = vsel %vm726_vm0, 4294967295, %v6903_v3  ;;  %s13248_s21 = sld [smem:[#allocation123_spill]]  ;;  %vm13241_vm3 = vcmask 130048   ;;  %v6904_v19 = vmov 0.0   ;;  %v7050_v20 = vld [vmem:[%s12984_s2] ss:$0 sm:$0xff] }
   0xf   : > { %v729_v5 = vsel %vm727_vm1, %v728_v4, 0  ;;  %s14143_s25 = smov (!%p539_p3, %s6086_s25), 1  ;;  %1535 = vst.msk [vmem:[#allocation2] sm:$0xff] %vm13241_vm3, %v6904_v19  ;;  %v7059_v21 = vld [vmem:[%s12985_s3] ss:$0 sm:$0xff] }
  0x10   : > { %s6345_s19 = sshll.u32 %s14143_s25, 7  ;;  %1536 = vst.msk [vmem:[#allocation2 + $0x8] sm:$0xff] %vm13241_vm3, %v6904_v19 }
  0x11   : > { %1537 = vst.msk [vmem:[#allocation2 + $0x10] sm:$0xff] %vm13241_vm3, %v6904_v19  ;;  %s12631_s26 = scalar_lea.vmem %s12999_s17, %s6345_s19 }
  0x12   : > { %1539 = vst.msk [vmem:[#allocation2 + $0x20] sm:$0xff] %vm13241_vm3, %v6904_v19 }
  0x13   : > { %v6165_v0 = vld [vmem:[%s13247_s28 + $0x8] sm:$0xf]  ;;  %v6364_v1 = vld [vmem:[%s13247_s28 + $0x8] sm:$0x30]  ;;  %v6363_v7 = vld [vmem:[%s13247_s28] sm:$0xff]  ;;  %1540 = vst.msk [vmem:[#allocation2 + $0x28] sm:$0xff] %vm13241_vm3, %v6904_v19 }
  0x14   : > { %v6166_v2 = vor.u32 %v6364_v1, %v6165_v0  ;;  %s7021_s22 = scalar_lea.vmem %s13248_s21, %s6345_s19  ;;  %1543 = vst.msk [vmem:[#allocation2 + $0x40] sm:$0xff] %vm13241_vm3, %v6904_v19 }
  0x15   : > { %v6347_v8 = vld [vmem:[%s7021_s22] sm:$0xff]  ;;  %v6348_v9 = vld [vmem:[%s7021_s22 + $0x8] sm:$0xff]  ;;  %v6349_v10 = vld [vmem:[%s7021_s22 + $0x10] sm:$0xff]  ;;  %1538 = vst.msk [vmem:[#allocation2 + $0x18] sm:$0xff] %vm13241_vm3, %v6904_v19 }
  0x16   : > { %v731_v6 = vand.u32 %v6166_v2, %v729_v5  ;;  %v6350_v11 = vld [vmem:[%s7021_s22 + $0x18] sm:$0xff]  ;;  %v6360_v12 = vld [vmem:[%s7021_s22 + $0x68] sm:$0xff]  ;;  %v6351_v13 = vld [vmem:[%s7021_s22 + $0x20] sm:$0xff]  ;;  %1541 = vst.msk [vmem:[#allocation2 + $0x30] sm:$0xff] %vm13241_vm3, %v6904_v19 }
  0x17   : > { %v6361_v14 = vld [vmem:[%s7021_s22 + $0x70] sm:$0xff]  ;;  %v6352_v15 = vld [vmem:[%s7021_s22 + $0x28] sm:$0xff]  ;;  %v6362_v16 = vld [vmem:[%s7021_s22 + $0x78] sm:$0xff]  ;;  %1542 = vst.msk [vmem:[#allocation2 + $0x38] sm:$0xff] %vm13241_vm3, %v6904_v19 }
  0x18   : > { %739 = vmatpush.bf16.msra.mxu0 %v731_v6  ;;  %6368 = vmatpush.bf16.msra.mxu2 %v731_v6  ;;  %v6353_v17 = vld [vmem:[%s7021_s22 + $0x30] sm:$0xff]  ;;  %v6354_v18 = vld [vmem:[%s7021_s22 + $0x38] sm:$0xff]  ;;  %v6355_v22 = vld [vmem:[%s7021_s22 + $0x40] sm:$0xff]  ;;  %1544 = vst.msk [vmem:[#allocation2 + $0x48] sm:$0xff] %vm13241_vm3, %v6904_v19 }
  0x19   : > { %1545 = vst.msk [vmem:[#allocation2 + $0x50] sm:$0xff] %vm13241_vm3, %v6904_v19  ;;  %v6356_v32 = vld [vmem:[%s7021_s22 + $0x48] sm:$0xff]  ;;  %v6357_v60 = vld [vmem:[%s7021_s22 + $0x50] sm:$0xff] }
  0x1a   : > { %1546 = vst.msk [vmem:[#allocation2 + $0x58] sm:$0xff] %vm13241_vm3, %v6904_v19 }
  0x1b   : > { %1547 = vst.msk [vmem:[#allocation2 + $0x60] sm:$0xff] %vm13241_vm3, %v6904_v19 }
  0x1c   : > { %740 = vmatpush.bf16.msra.mxu0 %v6363_v7  ;;  %6369 = vmatpush.bf16.msra.mxu2 %v6363_v7  ;;  %1548 = vst.msk [vmem:[#allocation2 + $0x68] sm:$0xff] %vm13241_vm3, %v6904_v19 }
  0x1d   : > { %1549 = vst.msk [vmem:[#allocation2 + $0x70] sm:$0xff] %vm13241_vm3, %v6904_v19 }
  0x1e   : > { %1550 = vst.msk [vmem:[#allocation2 + $0x78] sm:$0xff] %vm13241_vm3, %v6904_v19 }
  0x1f   : > { %6167 = vmatmul.msk.bf16.vlgmr.msra.gmra.mxu0 %vm677_vm2, %v6347_v8  ;;  %6180 = vmatmul.msk.bf16.vlgmr.msra.gmra.mxu2 %vm677_vm2, %v6360_v12  ;;  %1551 = vst.msk [vmem:[#allocation2 + $0x80] sm:$0xff] %vm13241_vm3, %v6904_v19 }
  0x20   : > { %1552 = vst.msk [vmem:[#allocation2 + $0x88] sm:$0xff] %vm13241_vm3, %v6904_v19 }
  0x21   : > { %1553 = vst.msk [vmem:[#allocation2 + $0x90] sm:$0xff] %vm13241_vm3, %v6904_v19 }
  0x22   : > { %1554 = vst.msk [vmem:[#allocation2 + $0x98] sm:$0xff] %vm13241_vm3, %v6904_v19 }
  0x23   : > { %1555 = vst.msk [vmem:[#allocation2 + $0xa0] sm:$0xff] %vm13241_vm3, %v6904_v19 }
  0x24   : > { %1556 = vst.msk [vmem:[#allocation2 + $0xa8] sm:$0xff] %vm13241_vm3, %v6904_v19 }
  0x25   : > { %1557 = vst.msk [vmem:[#allocation2 + $0xb0] sm:$0xff] %vm13241_vm3, %v6904_v19 }
  0x26   : > { %1558 = vst.msk [vmem:[#allocation2 + $0xb8] sm:$0xff] %vm13241_vm3, %v6904_v19 }
  0x27   : > { %1559 = vst.msk [vmem:[#allocation2 + $0xc0] sm:$0xff] %vm13241_vm3, %v6904_v19 }
  0x28   : > { %1560 = vst.msk [vmem:[#allocation2 + $0xc8] sm:$0xff] %vm13241_vm3, %v6904_v19 }
  0x29   : > { %1561 = vst.msk [vmem:[#allocation2 + $0xd0] sm:$0xff] %vm13241_vm3, %v6904_v19 }
  0x2a   : > { %1562 = vst.msk [vmem:[#allocation2 + $0xd8] sm:$0xff] %vm13241_vm3, %v6904_v19 }
  0x2b   : > { %1563 = vst.msk [vmem:[#allocation2 + $0xe0] sm:$0xff] %vm13241_vm3, %v6904_v19 }
  0x2c   : > { %1564 = vst.msk [vmem:[#allocation2 + $0xe8] sm:$0xff] %vm13241_vm3, %v6904_v19 }
  0x2d   : > { %1565 = vst.msk [vmem:[#allocation2 + $0xf0] sm:$0xff] %vm13241_vm3, %v6904_v19 }
  0x2e   : > { %1566 = vst.msk [vmem:[#allocation2 + $0xf8] sm:$0xff] %vm13241_vm3, %v6904_v19 }
  0x2f   : > { %6168 = vmatmul.msk.bf16.gmra.mxu0 %vm677_vm2, %v6348_v9  ;;  %6181 = vmatmul.msk.bf16.gmra.mxu2 %vm677_vm2, %v6361_v14  ;;  %1567 = vst.msk [vmem:[#allocation2 + $0x100] sm:$0xff] %vm13241_vm3, %v6904_v19 }
  0x30   : > { %1568 = vst.msk [vmem:[#allocation2 + $0x108] sm:$0xff] %vm13241_vm3, %v6904_v19 }
  0x31   : > { %1569 = vst.msk [vmem:[#allocation2 + $0x110] sm:$0xff] %vm13241_vm3, %v6904_v19 }
  0x32   : > { %1570 = vst.msk [vmem:[#allocation2 + $0x118] sm:$0xff] %vm13241_vm3, %v6904_v19 }
  0x33   : > { %1571 = vst.msk [vmem:[#allocation2 + $0x120] sm:$0xff] %vm13241_vm3, %v6904_v19 }
  0x34   : > { %1572 = vst.msk [vmem:[#allocation2 + $0x128] sm:$0xff] %vm13241_vm3, %v6904_v19 }
  0x35   : > { %1573 = vst.msk [vmem:[#allocation2 + $0x130] sm:$0xff] %vm13241_vm3, %v6904_v19 }
  0x36   : > { %1574 = vst.msk [vmem:[#allocation2 + $0x138] sm:$0xff] %vm13241_vm3, %v6904_v19 }
  0x37   : > { %1575 = vst.msk [vmem:[#allocation2 + $0x140] sm:$0xff] %vm13241_vm3, %v6904_v19 }
  0x38   : > { %1576 = vst.msk [vmem:[#allocation2 + $0x148] sm:$0xff] %vm13241_vm3, %v6904_v19 }
  0x39   : > { %1577 = vst.msk [vmem:[#allocation2 + $0x150] sm:$0xff] %vm13241_vm3, %v6904_v19 }
  0x3a   : > { %1578 = vst.msk [vmem:[#allocation2 + $0x158] sm:$0xff] %vm13241_vm3, %v6904_v19 }
  0x3b   : > { %1579 = vst.msk [vmem:[#allocation2 + $0x160] sm:$0xff] %vm13241_vm3, %v6904_v19 }
  0x3c   : > { %1580 = vst.msk [vmem:[#allocation2 + $0x168] sm:$0xff] %vm13241_vm3, %v6904_v19 }
  0x3d   : > { %1581 = vst.msk [vmem:[#allocation2 + $0x170] sm:$0xff] %vm13241_vm3, %v6904_v19 }
  0x3e   : > { %1582 = vst.msk [vmem:[#allocation2 + $0x178] sm:$0xff] %vm13241_vm3, %v6904_v19 }
  0x3f   : > { %6169 = vmatmul.msk.bf16.gmra.mxu0 %vm677_vm2, %v6349_v10  ;;  %6182 = vmatmul.msk.bf16.gmra.mxu2 %vm677_vm2, %v6362_v16  ;;  %1583 = vst.msk [vmem:[#allocation2 + $0x180] sm:$0xff] %vm13241_vm3, %v6904_v19 }
  0x40   : > { %1584 = vst.msk [vmem:[#allocation2 + $0x188] sm:$0xff] %vm13241_vm3, %v6904_v19 }
  0x41   : > { %1585 = vst.msk [vmem:[#allocation2 + $0x190] sm:$0xff] %vm13241_vm3, %v6904_v19 }
  0x42   : > { %1586 = vst.msk [vmem:[#allocation2 + $0x198] sm:$0xff] %vm13241_vm3, %v6904_v19 }
  0x43   : > { %1587 = vst.msk [vmem:[#allocation2 + $0x1a0] sm:$0xff] %vm13241_vm3, %v6904_v19 }
  0x44   : > { %1588 = vst.msk [vmem:[#allocation2 + $0x1a8] sm:$0xff] %vm13241_vm3, %v6904_v19 }
  0x45   : > { %1589 = vst.msk [vmem:[#allocation2 + $0x1b0] sm:$0xff] %vm13241_vm3, %v6904_v19 }
  0x46   : > { %1590 = vst.msk [vmem:[#allocation2 + $0x1b8] sm:$0xff] %vm13241_vm3, %v6904_v19 }
  0x47   : > { %1591 = vst.msk [vmem:[#allocation2 + $0x1c0] sm:$0xff] %vm13241_vm3, %v6904_v19 }
  0x48   : > { %1592 = vst.msk [vmem:[#allocation2 + $0x1c8] sm:$0xff] %vm13241_vm3, %v6904_v19 }
  0x49   : > { %1593 = vst.msk [vmem:[#allocation2 + $0x1d0] sm:$0xff] %vm13241_vm3, %v6904_v19 }
  0x4a   : > { %1594 = vst.msk [vmem:[#allocation2 + $0x1d8] sm:$0xff] %vm13241_vm3, %v6904_v19 }
  0x4b   : > { %1595 = vst.msk [vmem:[#allocation2 + $0x1e0] sm:$0xff] %vm13241_vm3, %v6904_v19 }
  0x4c   : > { %1596 = vst.msk [vmem:[#allocation2 + $0x1e8] sm:$0xff] %vm13241_vm3, %v6904_v19 }
  0x4d   : > { %1597 = vst.msk [vmem:[#allocation2 + $0x1f0] sm:$0xff] %vm13241_vm3, %v6904_v19 }
  0x4e   : > { %1598 = vst.msk [vmem:[#allocation2 + $0x1f8] sm:$0xff] %vm13241_vm3, %v6904_v19 }
  0x4f   : > { %6170 = vmatmul.msk.bf16.gmra.mxu0 %vm677_vm2, %v6350_v11  ;;  %1599 = vst.msk [vmem:[#allocation2 + $0x200] sm:$0xff] %vm13241_vm3, %v6904_v19 }
  0x50   : > { %1600 = vst.msk [vmem:[#allocation2 + $0x208] sm:$0xff] %vm13241_vm3, %v6904_v19 }
  0x51   : > { %1601 = vst.msk [vmem:[#allocation2 + $0x210] sm:$0xff] %vm13241_vm3, %v6904_v19 }
  0x52   : > { %1602 = vst.msk [vmem:[#allocation2 + $0x218] sm:$0xff] %vm13241_vm3, %v6904_v19 }
  0x53   : > { %1603 = vst.msk [vmem:[#allocation2 + $0x220] sm:$0xff] %vm13241_vm3, %v6904_v19 }
  0x54   : > { %1604 = vst.msk [vmem:[#allocation2 + $0x228] sm:$0xff] %vm13241_vm3, %v6904_v19 }
  0x55   : > { %1605 = vst.msk [vmem:[#allocation2 + $0x230] sm:$0xff] %vm13241_vm3, %v6904_v19 }
  0x56   : > { %1606 = vst.msk [vmem:[#allocation2 + $0x238] sm:$0xff] %vm13241_vm3, %v6904_v19 }
  0x5f   : > { %6171 = vmatmul.msk.bf16.gmra.mxu0 %vm677_vm2, %v6351_v13 }
  0x6f   : > { %6172 = vmatmul.msk.bf16.gmra.mxu0 %vm677_vm2, %v6352_v15 }
  0x7f   : > { %6173 = vmatmul.msk.bf16.gmra.mxu0 %vm677_vm2, %v6353_v17 }
  0x8f   : > { %6174 = vmatmul.msk.bf16.gmra.mxu0 %vm677_vm2, %v6354_v18 }
  0x9c   : > { %v742_v23 = vpop.f32.mrf.mxu0 }
  0x9d   : > { %v826_v24 = vmul.f32 %v7050_v20, %v742_v23 }
  0x9f   : > { %v7072_v25 = vadd.f32 %v7059_v21, %v826_v24  ;;  %6175 = vmatmul.msk.bf16.gmra.mxu0 %vm677_vm2, %v6355_v22 }
  0xa1   : > { %v6183_v26 = vmul.f32 -1.442695, %v7072_v25 }
  0xa3   : > { %6399 = vpow2.f32 %v6183_v26 }
  0xa4   : > { %v744_v27 = vpop.f32.mrf.mxu0 }
  0xa5   : > { %v827_v28 = vmul.f32 %v7050_v20, %v744_v27 }
  0xa7   : > { %v7098_v29 = vadd.f32 %v7059_v21, %v827_v28 }
  0xa9   : > { %v6400_v30 = vpop.eup %6399  ;;  %v6184_v33 = vmul.f32 -1.442695, %v7098_v29 }
  0xaa   : > { %v990_v31 = vadd.f32 1.0, %v6400_v30 }
  0xac   : > { %6401 = vrcp.f32 %v990_v31  ;;  %v747_v34 = vpop.f32.mrf.mxu0  ;;  %v1033_v44 = vand.u32 2147483648, %v990_v31  ;;  %v1031_v46 = vand.u32 2147483647, %v990_v31  ;;  %vm1027_vm5 = vweird.f32 %v990_v31 }
  0xad   : > { %v828_v35 = vmul.f32 %v7050_v20, %v747_v34  ;;  %6403 = vpow2.f32 %v6184_v33 }
  0xae   : > { %v1034_v52 = vor.u32 1.1754944e-38, %v1033_v44  ;;  %vm1032_vm7 = vcmp.eq.f32.partialorder %v1031_v46, 8.507059e+37 }
  0xaf   : > { %v7118_v36 = vadd.f32 %v7059_v21, %v828_v35  ;;  %6176 = vmatmul.msk.bf16.gmra.mxu0 %vm677_vm2, %v6356_v32  ;;  %v7373_v35 = vld [vmem:[#allocation2 + $0x20] sm:$0xff] }
  0xb1   : > { %v6185_v37 = vmul.f32 -1.442695, %v7118_v36 }
  0xb2   : > { %v6402_v38 = vpop.eup %6401 }
  0xb3   : > { %v1023_v39 = vmul.f32 %v6402_v38, %v990_v31  ;;  %6405 = vpow2.f32 %v6185_v37  ;;  %v6404_v43 = vpop.eup %6403  ;;  %vm1028_vm4 = vweird.f32 %v6402_v38 }
  0xb4   : > { %v749_v40 = vpop.f32.mrf.mxu0  ;;  %v7146_v50 = vadd.f32 1.0, %v6404_v43  ;;  %vm1029_vm6 = vmor %vm1027_vm5, %vm1028_vm4 }
  0xb5   : > { %v1024_v41 = vsub.f32 1.0, %v1023_v39  ;;  %v829_v42 = vmul.f32 %v7050_v20, %v749_v40 }
  0xb6   : > { %vm1042_vm9 = vweird.f32 %v7146_v50  ;;  %v1048_v15 = vand.u32 2147483648, %v7146_v50  ;;  %v1046_v16 = vand.u32 2147483647, %v7146_v50 }
  0xb7   : > { %v1025_v45 = vmul.f32 %v6402_v38, %v1024_v41  ;;  %v7140_v47 = vadd.f32 %v7059_v21, %v829_v42 }
  0xb8   : > { %v1049_v30 = vor.u32 1.1754944e-38, %v1048_v15  ;;  %vm1047_vm0 = vcmp.eq.f32.partialorder %v1046_v16, 8.507059e+37  ;;  %v7353_v16 = vld [vmem:[%s12986_s4 + $0x2] ss:$0 sm:$0xff] }
  0xb9   : > { %v6406_v48 = vpop.eup %6405  ;;  %v1026_v49 = vadd.f32 %v6402_v38, %v1025_v45  ;;  %v6186_v51 = vmul.f32 -1.442695, %v7140_v47 }
  0xba   : > { %v7153_v54 = vadd.f32 1.0, %v6406_v48 }
  0xbb   : > { %v1030_v53 = vsel %vm1029_vm6, %v6402_v38, %v1026_v49  ;;  %6407 = vpow2.f32 %v6186_v51 }
  0xbc   : > { %v1035_v55 = vsel %vm1032_vm7, %v1034_v52, %v1030_v53  ;;  %v752_v56 = vpop.f32.mrf.mxu0  ;;  %6409 = vrcp.f32 %v7146_v50  ;;  %v1061_v18 = vand.u32 2147483647, %v7153_v54  ;;  %v1063_v23 = vand.u32 2147483648, %v7153_v54 }
  0xbd   : > { %v7158_v57 = vmul.f32 %v1035_v55, %v7072_v25  ;;  %v830_v58 = vmul.f32 %v7050_v20, %v752_v56  ;;  %6411 = vrcp.f32 %v7153_v54  ;;  %vm1057_vm13 = vweird.f32 %v7153_v54 }
  0xbe   : > { %vm1062_vm4 = vcmp.eq.f32.partialorder %v1061_v18, 8.507059e+37  ;;  %v1064_v38 = vor.u32 1.1754944e-38, %v1063_v23  ;;  %v1640_v18 = vld [vmem:[#allocation2] sm:$0xff]  ;;  %v1643_v23 = vld [vmem:[#allocation2 + $0x18] sm:$0xff] }
  0xbf   : > { %13249 = vst [vmem:[#allocation3_spill] sm:$0xff] %v7158_v57  ;;  %v7170_v59 = vadd.f32 %v7059_v21, %v830_v58  ;;  %6177 = vmatmul.msk.bf16.gmra.mxu0 %vm677_vm2, %v6357_v60  ;;  %v6358_v58 = vld [vmem:[%s7021_s22 + $0x58] sm:$0xff] }
  0xc0   : > { %1608 = vst.msk [vmem:[#allocation2 + $0x28] sm:$0xff] %vm13241_vm3, %v7158_v57 }
  0xc1   : > { %v6408_v61 = vpop.eup %6407  ;;  %v6187_v62 = vmul.f32 -1.442695, %v7170_v59 }
  0xc2   : > { %v7180_v63 = vadd.f32 1.0, %v6408_v61  ;;  %v7183_v0 = vpop.eup %6409 }
  0xc3   : > { %v7190_v1 = vpop.eup %6411  ;;  %v1038_v2 = vmul.f32 %v7183_v0, %v7146_v50  ;;  %vm1043_vm8 = vweird.f32 %v7183_v0 }
  0xc4   : > { %6413 = vrcp.f32 %v7180_v63  ;;  %v1053_v3 = vmul.f32 %v7190_v1, %v7153_v54  ;;  %vm1058_vm10 = vweird.f32 %v7190_v1  ;;  %vm7248_vm11 = vmor %vm1042_vm9, %vm1043_vm8  ;;  %v1076_v27 = vand.u32 2147483647, %v7180_v63  ;;  %v754_v33 = vpop.f32.mrf.mxu0 }
  0xc5   : > { %6415 = vpow2.f32 %v6187_v62  ;;  %v1039_v5 = vsub.f32 1.0, %v1038_v2  ;;  %v1078_v28 = vand.u32 2147483648, %v7180_v63  ;;  %vm7267_vm14 = vmor %vm1057_vm13, %vm1058_vm10  ;;  %vm1072_vm15 = vweird.f32 %v7180_v63 }
  0xc6   : > { %v1054_v8 = vsub.f32 1.0, %v1053_v3  ;;  %vm1077_vm6 = vcmp.eq.f32.partialorder %v1076_v27, 8.507059e+37  ;;  %v831_v43 = vmul.f32 %v7050_v20, %v754_v33  ;;  %v7366_v33 = vld [vmem:[%s12986_s4 + $0x3] ss:$0 sm:$0xff] }
  0xc7   : > { %v1040_v10 = vmul.f32 %v7183_v0, %v1039_v5  ;;  %v1079_v41 = vor.u32 1.1754944e-38, %v1078_v28 }
  0xc8   : > { %v1055_v12 = vmul.f32 %v7190_v1, %v1054_v8  ;;  %v867_v53 = vadd.f32 %v7059_v21, %v831_v43 }
  0xc9   : > { %v1041_v14 = vadd.f32 %v7183_v0, %v1040_v10 }
  0xca   : > { %v7206_v4 = vpop.eup %6413  ;;  %v1056_v17 = vadd.f32 %v7190_v1, %v1055_v12  ;;  %v6188_v56 = vmul.f32 -1.442695, %v867_v53  ;;  %v1641_v12 = vld [vmem:[#allocation2 + $0x8] sm:$0xff] }
  0xcb   : > { %v6416_v6 = vpop.eup %6415  ;;  %v1068_v7 = vmul.f32 %v7206_v4, %v7180_v63  ;;  %vm1073_vm12 = vweird.f32 %v7206_v4  ;;  %v1045_v26 = vsel %vm7248_vm11, %v7183_v0, %v1041_v14  ;;  %v7347_v14 = vld [vmem:[%s12986_s4] ss:$0 sm:$0xff] }
  0xcc   : > { %v7221_v11 = vadd.f32 1.0, %v6416_v6  ;;  %v1060_v34 = vsel %vm7267_vm14, %v7190_v1, %v1056_v17  ;;  %vm7280_vm5 = vmor %vm1072_vm15, %vm1073_vm12  ;;  %v1050_v37 = vsel %vm1047_vm0, %v1049_v30, %v1045_v26  ;;  %v757_v60 = vpop.f32.mrf.mxu0  ;;  %v1975_v26 = vmul.f32 %v7353_v16, %v1641_v12 }
  0xcd   : > { %v1069_v9 = vsub.f32 1.0, %v1068_v7  ;;  %v1065_v44 = vsel %vm1062_vm4, %v1064_v38, %v1060_v34  ;;  %v7301_v49 = vmul.f32 %v1050_v37, %v7098_v29  ;;  %v832_v61 = vmul.f32 %v7050_v20, %v757_v60  ;;  %v7371_v34 = vld [vmem:[%s12986_s4 + $0x4] ss:$0 sm:$0xff]  ;;  %v7375_v37 = vld [vmem:[#allocation2 + $0x28] sm:$0xff] }
  0xce   : > { %6417 = vrcp.f32 %v7221_v11  ;;  %v1093_v42 = vand.u32 2147483648, %v7221_v11  ;;  %v1091_v46 = vand.u32 2147483647, %v7221_v11  ;;  %vm1087_vm8 = vweird.f32 %v7221_v11 }
  0xcf   : > { %v1070_v13 = vmul.f32 %v7206_v4, %v1069_v9  ;;  %13256 = vst [vmem:[#allocation4_spill] sm:$0xff] %v7301_v49  ;;  %v7307_v51 = vmul.f32 %v1065_v44, %v7118_v36  ;;  %6419 = vpow2.f32 %v6188_v56  ;;  %6178 = vmatmul.msk.bf16.gmra.mxu0 %vm677_vm2, %v6358_v58  ;;  %v7332_v63 = vadd.f32 %v7059_v21, %v832_v61  ;;  %v7338_v9 = vld [vmem:[%s12986_s4 + $0x1] ss:$0 sm:$0xff]  ;;  %v7395_v58 = vld [vmem:[#allocation2 + $0x38] sm:$0xff]  ;;  %v7401_v61 = vld [vmem:[%s12986_s4 + $0x6] ss:$0 sm:$0xff] }
  0xd0   : > { %v1094_v52 = vor.u32 1.1754944e-38, %v1093_v42  ;;  %vm1092_vm10 = vcmp.eq.f32.partialorder %v1091_v46, 8.507059e+37  ;;  %1609 = vst.msk [vmem:[#allocation2 + $0x30] sm:$0xff] %vm13241_vm3, %v7301_v49  ;;  %v1764_v15 = vmul.f32 %v7338_v9, %v1641_v12  ;;  %v1977_v30 = vmul.f32 %v7353_v16, %v1643_v23  ;;  %v6359_v56 = vld [vmem:[%s7021_s22 + $0x60] sm:$0xff] }
  0xd1   : > { %v1071_v24 = vadd.f32 %v7206_v4, %v1070_v13  ;;  %13257 = vst [vmem:[#allocation5_spill] sm:$0xff] %v7307_v51  ;;  %v6189_v1 = vmul.f32 -1.442695, %v7332_v63  ;;  %v1642_v13 = vld [vmem:[#allocation2 + $0x10] sm:$0xff]  ;;  %vm1828_vm15 = vcmask 1046528   ;;  %v1715_v38 = vmul.f32 %v7347_v14, %v1641_v12 }
  0xd2   : > { %1610 = vst.msk [vmem:[#allocation2 + $0x48] sm:$0xff] %vm13241_vm3, %v7307_v51  ;;  %v1765_v22 = vmul.f32 %v7338_v9, %v1642_v13  ;;  %v1976_v28 = vmul.f32 %v7353_v16, %v1642_v13  ;;  %v2074_v43 = vrot.slane %v1977_v30, 2  ;;  %v2249_v46 = vmul.f32 %v7366_v33, %v7373_v35 }
  0xd3   : > { %v1075_v39 = vsel %vm7280_vm5, %v7206_v4, %v1071_v24  ;;  %v1714_v24 = vmul.f32 %v7347_v14, %v1640_v18 }
  0xd4   : > { %v6418_v25 = vpop.eup %6417  ;;  %v1080_v48 = vsel %vm1077_vm6, %v1079_v41, %v1075_v39  ;;  %v1830_v27 = vrot.slane %v1765_v22, 1  ;;  %v1716_v39 = vmul.f32 %v7347_v14, %v1642_v13  ;;  %v2072_v42 = vrot.slane %v1976_v28, 2  ;;  %v759_v44 = vpop.f32.mrf.mxu0 }
  0xd5   : > { %v1083_v32 = vmul.f32 %v6418_v25, %v7221_v11  ;;  %vm1088_vm7 = vweird.f32 %v6418_v25  ;;  %v7313_v29 = vmul.f32 %v1080_v48, %v7140_v47  ;;  %v6420_v47 = vpop.eup %6419  ;;  %v2347_v48 = vmul.f32 %v7371_v34, %v7375_v37 }
  0xd6   : > { %vm1089_vm9 = vmor %vm1087_vm8, %vm1088_vm7  ;;  %v995_v19 = vadd.f32 1.0, %v6420_v47  ;;  %v833_v18 = vmul.f32 %v7050_v20, %v759_v44  ;;  %v7427_v22 = vmul.f32 %v7338_v9, %v7375_v37 }
  0xd7   : > { %v1084_v40 = vsub.f32 1.0, %v1083_v32  ;;  %13258 = vst [vmem:[#allocation6_spill] sm:$0xff] %v7313_v29  ;;  %v2071_v32 = vrot.slane %v1975_v26, 2  ;;  %v2250_v26 = vmul.f32 %v7366_v33, %v7375_v37 }
  0xd8   : > { %1611 = vst.msk [vmem:[#allocation2 + $0x50] sm:$0xff] %vm13241_vm3, %v7313_v29  ;;  %6421 = vrcp.f32 %v995_v19  ;;  %v1108_v3 = vand.u32 2147483648, %v995_v19  ;;  %v1106_v4 = vand.u32 2147483647, %v995_v19  ;;  %vm1102_vm12 = vweird.f32 %v995_v19 }
  0xd9   : > { %v1085_v45 = vmul.f32 %v6418_v25, %v1084_v40  ;;  %6423 = vpow2.f32 %v6189_v1  ;;  %v2073_v47 = vsel %vm727_vm1, %v2071_v32, %v2072_v42  ;;  %v7421_v12 = vld [vmem:[#allocation2 + $0x48] sm:$0xff]  ;;  %v7440_v44 = vadd.f32 %v7059_v21, %v833_v18 }
  0xda   : > { %v1109_v6 = vor.u32 1.1754944e-38, %v1108_v3  ;;  %vm1107_vm14 = vcmp.eq.f32.partialorder %v1106_v4, 8.507059e+37 }
  0xdb   : > { %v1086_v50 = vadd.f32 %v6418_v25, %v1085_v45 }
  0xdc   : > { %v762_v30 = vpop.f32.mrf.mxu0 }
  0xdd   : > { %v1090_v54 = vsel %vm1089_vm9, %v6418_v25, %v1086_v50  ;;  %v1829_v25 = vrot.slane %v1764_v15, 1 }
  0xde   : > { %v1095_v55 = vsel %vm1092_vm10, %v1094_v52, %v1090_v54  ;;  %v7387_v52 = vld [vmem:[%s12986_s4 + $0x5] ss:$0 sm:$0xff]  ;;  %v1927_v54 = vadd.f32 %v1830_v27, %v1716_v39 }
  0xdf   : > { %v7320_v36 = vmul.f32 %v1095_v55, %v7170_v59  ;;  %v6422_v59 = vpop.eup %6421  ;;  %v1925_v31 = vadd.f32 %v1829_v25, %v1714_v24  ;;  %v1831_v41 = vsel %vm1828_vm15, %v1829_v25, %v1830_v27  ;;  %6179 = vmatmul.msk.bf16.gmra.mxu0 %vm677_vm2, %v6359_v56 }
  0xe0   : > { %v1098_v62 = vmul.f32 %v6422_v59, %v995_v19  ;;  %vm1103_vm11 = vweird.f32 %v6422_v59  ;;  %v6424_v11 = vpop.eup %6423  ;;  %v1926_v50 = vadd.f32 %v1831_v41, %v1715_v38  ;;  %v2075_v19 = vsel %vm727_vm1, %v2072_v42, %v2074_v43  ;;  %v7437_v42 = vld [vmem:[#allocation2 + $0x50] sm:$0xff] }
  0xe1   : > { %13259 = vst [vmem:[#allocation7_spill] sm:$0xff] %v7320_v36  ;;  %vm1104_vm13 = vmor %vm1102_vm12, %vm1103_vm11  ;;  %v7355_v17 = vadd.f32 1.0, %v6424_v11  ;;  %v2199_v45 = vadd.f32 %v2071_v32, %v1925_v31  ;;  %v2201_v3 = vadd.f32 %v2075_v19, %v1927_v54  ;;  %v1717_v54 = vmul.f32 %v7347_v14, %v7373_v35 }
  0xe2   : > { %1612 = vst.msk [vmem:[#allocation2 + $0x68] sm:$0xff] %vm13241_vm3, %v7320_v36  ;;  %v1099_v0 = vsub.f32 1.0, %v1098_v62  ;;  %v2200_v1 = vadd.f32 %v2073_v47, %v1926_v50  ;;  %v834_v50 = vmul.f32 %v7050_v20, %v762_v30 }
  0xe3   : > { %6425 = vrcp.f32 %v7355_v17  ;;  %v2297_v60 = vadd.f32 %v2249_v46, %v2199_v45  ;;  %v1123_v11 = vand.u32 2147483648, %v7355_v17  ;;  %v1121_v15 = vand.u32 2147483647, %v7355_v17  ;;  %v7446_v46 = vld [vmem:[%s12986_s4 + $0x8] ss:$0 sm:$0xff] }
  0xe4   : > { %v1100_v2 = vmul.f32 %v6422_v59, %v1099_v0  ;;  %v7405_v0 = vld [vmem:[#allocation2 + $0x40] sm:$0xff]  ;;  %vm1117_vm0 = vweird.f32 %v7355_v17 }
  0xe5   : > { %v2831_v24 = vmul.f32 %v7401_v61, %v7405_v0  ;;  %v1124_v39 = vor.u32 1.1754944e-38, %v1123_v11  ;;  %vm1122_vm5 = vcmp.eq.f32.partialorder %v1121_v15, 8.507059e+37  ;;  %v3140_v11 = vmul.f32 %v7446_v46, %v7437_v42 }
  0xe6   : > { %v1101_v5 = vadd.f32 %v6422_v59, %v1100_v2  ;;  %v2557_v2 = vmul.f32 %v7387_v52, %v7375_v37 }
  0xe8   : > { %v1105_v7 = vsel %vm1104_vm13, %v6422_v59, %v1101_v5  ;;  %v2411_v59 = vrot.slane %v2347_v48, 1  ;;  %v2653_v27 = vrot.slane %v2557_v2, 2  ;;  %v7462_v2 = vmul.f32 %v7353_v16, %v7375_v37 }
  0xe9   : > { %v1110_v8 = vsel %vm1107_vm14, %v1109_v6, %v1105_v7  ;;  %v6426_v40 = vpop.eup %6425  ;;  %v2559_v7 = vmul.f32 %v7387_v52, %v7395_v58 }
  0xea   : > { %v7340_v10 = vmul.f32 %v1110_v8, %v867_v53  ;;  %v7389_v53 = vld [vmem:[#allocation2 + $0x30] sm:$0xff]  ;;  %v1113_v55 = vmul.f32 %v6426_v40, %v7355_v17  ;;  %v7418_v8 = vld [vmem:[%s12986_s4 + $0x7] ss:$0 sm:$0xff]  ;;  %vm1118_vm2 = vweird.f32 %v6426_v40  ;;  %v2507_v23 = vadd.f32 %v2411_v59, %v2297_v60  ;;  %v7455_v60 = vld [vmem:[#allocation2 + $0x58] sm:$0xff] }
  0xeb   : > { %v2348_v62 = vmul.f32 %v7371_v34, %v7389_v53  ;;  %v2251_v5 = vmul.f32 %v7366_v33, %v7389_v53  ;;  %v2558_v6 = vmul.f32 %v7387_v52, %v7389_v53  ;;  %v2656_v32 = vrot.slane %v2559_v7, 2  ;;  %vm1119_vm4 = vmor %vm1117_vm0, %vm1118_vm2 }
  0xec   : > { %13260 = vst [vmem:[#allocation8_spill] sm:$0xff] %v7340_v10  ;;  %v1114_v4 = vsub.f32 1.0, %v1113_v55  ;;  %v2929_v38 = vmul.f32 %v7418_v8, %v7421_v12  ;;  %v2781_v45 = vadd.f32 %v2653_v27, %v2507_v23  ;;  %v2298_v55 = vadd.f32 %v2250_v26, %v2200_v1 }
  0xed   : > { %1613 = vst.msk [vmem:[#allocation2 + $0x70] sm:$0xff] %vm13241_vm3, %v7340_v10  ;;  %v2412_v25 = vrot.slane %v2348_v62, 1  ;;  %v2299_v31 = vadd.f32 %v2251_v5, %v2201_v3  ;;  %v2654_v41 = vrot.slane %v2558_v6, 2  ;;  %v6190_v62 = vmul.f32 -1.442695, %v7440_v44 }
  0xee   : > { %v1115_v13 = vmul.f32 %v6426_v40, %v1114_v4  ;;  %v2993_v19 = vrot.slane %v2929_v38, 1  ;;  %v3139_v1 = vmul.f32 %v7446_v46, %v7421_v12  ;;  %v2833_v4 = vmul.f32 %v7401_v61, %v7437_v42 }
  0xef   : > { %v2413_v17 = vsel %vm1828_vm15, %v2411_v59, %v2412_v25  ;;  %v2509_v47 = vadd.f32 %v2412_v25, %v2299_v31  ;;  %v2930_v59 = vmul.f32 %v7418_v8, %v7437_v42  ;;  %v2657_v3 = vsel %vm727_vm1, %v2654_v41, %v2656_v32 }
  0xf0   : > { %v1116_v28 = vadd.f32 %v6426_v40, %v1115_v13  ;;  %v2508_v35 = vadd.f32 %v2413_v17, %v2298_v55  ;;  %v7472_v5 = vadd.f32 %v7059_v21, %v834_v50  ;;  %v2655_v7 = vsel %vm727_vm1, %v2653_v27, %v2654_v41 }
  0xf1   : > { %v3141_v13 = vmul.f32 %v7446_v46, %v7455_v60  ;;  %v2783_v15 = vadd.f32 %v2657_v3, %v2509_v47  ;;  %6427 = vpow2.f32 %v6190_v62  ;;  %v1767_v23 = vmul.f32 %v7338_v9, %v7389_v53 }
  0xf2   : > { %v1120_v43 = vsel %vm1119_vm4, %v6426_v40, %v1116_v28  ;;  %v1832_v40 = vrot.slane %v7427_v22, 1  ;;  %v2994_v22 = vrot.slane %v2930_v59, 1  ;;  %v2832_v25 = vmul.f32 %v7401_v61, %v7421_v12 }
  0xf3   : > { %v1125_v48 = vsel %vm1122_vm5, %v1124_v39, %v1120_v43  ;;  %v2076_v26 = vrot.slane %v7462_v2, 2  ;;  %v3235_v27 = vrot.slane %v3139_v1, 2  ;;  %v2881_v28 = vadd.f32 %v2833_v4, %v2783_v15 }
  0xf4   : > { %v7453_v56 = vmul.f32 %v1125_v48, %v7332_v63  ;;  %v2879_v63 = vadd.f32 %v2831_v24, %v2781_v45  ;;  %v1928_v6 = vadd.f32 %v1832_v40, %v1717_v54  ;;  %v2782_v24 = vadd.f32 %v2655_v7, %v2508_v35  ;;  %v7492_v45 = vld [vmem:[%s12987_s5] ss:$0 sm:$0xff]  ;;  %v764_v35 = vpop.f32.mrf.mxu0 }
  0xf5   : > { %v6191_v30 = vmul.f32 -1.442695, %v7472_v5  ;;  %v2252_v31 = vmul.f32 %v7366_v33, %v7405_v0  ;;  %v3236_v32 = vrot.slane %v3140_v11, 2  ;;  %v3238_v38 = vrot.slane %v3141_v13, 2  ;;  %v1652_v7 = vld [vmem:[#allocation2 + $0x60] sm:$0xff] }
  0xf6   : > { %13261 = vst [vmem:[#allocation9_spill] sm:$0xff] %v7453_v56  ;;  %v3089_v18 = vadd.f32 %v2993_v19, %v2879_v63  ;;  %v2202_v39 = vadd.f32 %v2076_v26, %v1928_v6  ;;  %v1980_v41 = vmul.f32 %v7353_v16, %v7395_v58  ;;  %v2995_v17 = vsel %vm1828_vm15, %v2993_v19, %v2994_v22  ;;  %v7514_v6 = vld [vmem:[%s12988_s6] ss:$0 sm:$0xff] }
  0xf7   : > { %1614 = vst.msk [vmem:[#allocation2 + $0x88] sm:$0xff] %vm13241_vm3, %v7453_v56  ;;  %v1833_v48 = vrot.slane %v1767_v23, 1  ;;  %v1979_v50 = vmul.f32 %v7353_v16, %v7389_v53  ;;  %v7499_v54 = vmul.f32 %v7371_v34, %v7421_v12  ;;  %v2880_v55 = vadd.f32 %v2832_v25, %v2782_v24  ;;  %v6428_v47 = vpop.eup %6427 }
  0xf8   : > { %v3363_v43 = vadd.f32 %v3235_v27, %v3089_v18  ;;  %v7503_v58 = vmul.f32 %v7338_v9, %v7421_v12  ;;  %v3091_v59 = vadd.f32 %v2994_v22, %v2881_v28  ;;  %6429 = vpow2.f32 %v6191_v30 }
  0xf9   : > { %v1720_v62 = vmul.f32 %v7347_v14, %v7405_v0  ;;  %v3090_v19 = vadd.f32 %v2995_v17, %v2880_v55  ;;  %v3239_v2 = vsel %vm727_vm1, %v3236_v32, %v3238_v38  ;;  %v1718_v3 = vmul.f32 %v7347_v14, %v7375_v37 }
  0xfa   : > { %v2300_v63 = vadd.f32 %v2252_v31, %v2202_v39  ;;  %v2079_v1 = vrot.slane %v1980_v41, 2  ;;  %v3415_v4 = vmul.f32 %v7492_v45, %v3363_v43  ;;  %v1834_v11 = vsel %vm1828_vm15, %v1832_v40, %v1833_v48 }
  0xfb   : > { %v2077_v0 = vrot.slane %v1979_v50, 2  ;;  %v13004_v13 = vrot.slane %v7499_v54, 1  ;;  %v7518_v15 = vadd.f32 1.0, %v6428_v47  ;;  %v13003_v18 = vrot.slane %v7503_v58, 1 }
  0xfc   : > { %v3237_v37 = vsel %vm727_vm1, %v3235_v27, %v3236_v32  ;;  %v3365_v22 = vadd.f32 %v3239_v2, %v3091_v59  ;;  %v835_v23 = vmul.f32 %v7050_v20, %v764_v35  ;;  %v1719_v24 = vmul.f32 %v7347_v14, %v7389_v53  ;;  %v7535_v27 = vld [vmem:[#allocation2 + $0x68] sm:$0xff] }
  0xfd   : > { %v7527_v25 = vmul.f32 %v7387_v52, %v7421_v12  ;;  %v3364_v40 = vadd.f32 %v3237_v37, %v3090_v19  ;;  %v7530_v28 = vmul.f32 %v7366_v33, %v1652_v7  ;;  %v1929_v31 = vadd.f32 %v1834_v11, %v1718_v3 }
  0xfe   : > { %v6430_v30 = vpop.eup %6429  ;;  %v7533_v38 = vadd.f32 %v7514_v6, %v3415_v4  ;;  %v2834_v20 = vmul.f32 %v7401_v61, %v1652_v7  ;;  %v7540_v53 = vmul.f32 %v7353_v16, %v7455_v60  ;;  %v1930_v32 = vadd.f32 %v1833_v48, %v1719_v24 }
  0xff   : > { %v7544_v39 = vmul.f32 %v7353_v16, %v7421_v12  ;;  %v2510_v41 = vadd.f32 %v13004_v13, %v2300_v63  ;;  %6431 = vrcp.f32 %v7518_v15  ;;  %v2078_v43 = vsel %vm727_vm1, %v2076_v26, %v2077_v0 }
 0x100   : > { %v1931_v17 = vadd.f32 %v13003_v18, %v1720_v62  ;;  %v3417_v50 = vmul.f32 %v7492_v45, %v3365_v22  ;;  %v7554_v55 = vadd.f32 %v7059_v21, %v835_v23  ;;  %v13001_v48 = vrot.slane %v7527_v25, 2 }
 0x101   : > { %v3416_v47 = vmul.f32 %v7492_v45, %v3364_v40  ;;  %v7560_v59 = vmul.f32 %v7418_v8, %v7535_v27  ;;  %v7562_v19 = vadd.f32 1.0, %v6430_v30  ;;  %v2080_v26 = vsel %vm727_vm1, %v2077_v0, %v2079_v1 }
 0x102   : > { %v2203_v2 = vadd.f32 %v2078_v43, %v1929_v31  ;;  %v2253_v62 = vmul.f32 %v7366_v33, %v7421_v12  ;;  %v6215_v35 = vmul.f32 -1.442695, %v7533_v38  ;;  %v13002_v21 = vrot.slane %v7544_v39, 2 }
 0x103   : > { %v2784_v3 = vadd.f32 %v13001_v48, %v2510_v41  ;;  %v7572_v63 = vmul.f32 %v7347_v14, %v1652_v7  ;;  %v7577_v11 = vmul.f32 %v7347_v14, %v7421_v12  ;;  %v7580_v1 = vadd.f32 %v7514_v6, %v3417_v50 }
 0x104   : > { %6433 = vrcp.f32 %v7562_v19  ;;  %v6192_v0 = vmul.f32 -1.442695, %v7554_v55  ;;  %v2204_v22 = vadd.f32 %v2080_v26, %v1930_v32  ;;  %v7586_v23 = vadd.f32 %v13002_v21, %v1931_v17 }
 0x105   : > { %v6432_v37 = vpop.eup %6431  ;;  %v7589_v7 = vadd.f32 %v7514_v6, %v3416_v47  ;;  %v13005_v24 = vrot.slane %v7560_v59, 1  ;;  %v2301_v12 = vadd.f32 %v2253_v62, %v2203_v2  ;;  %6435 = vpow2.f32 %v6215_v35 }
 0x106   : > { %v2350_v40 = vmul.f32 %v7371_v34, %v7437_v42  ;;  %v1128_v30 = vmul.f32 %v6432_v37, %v7518_v15  ;;  %v7597_v31 = vmul.f32 %v7347_v14, %v7437_v42  ;;  %v7601_v32 = vmul.f32 %v7338_v9, %v7437_v42 }
 0x107   : > { %v2882_v41 = vadd.f32 %v2834_v20, %v2784_v3  ;;  %v7605_v43 = vmul.f32 %v7446_v46, %v7535_v27  ;;  %v7609_v17 = vmul.f32 %v7353_v16, %v7437_v42  ;;  %v6217_v50 = vmul.f32 -1.442695, %v7580_v1 }
 0x108   : > { %v1129_v47 = vsub.f32 1.0, %v1128_v30  ;;  %6437 = vpow2.f32 %v6192_v0  ;;  %v2254_v26 = vmul.f32 %v7366_v33, %v7437_v42  ;;  %v6216_v2 = vmul.f32 -1.442695, %v7589_v7 }
 0x109   : > { %v3092_v20 = vadd.f32 %v13005_v24, %v2882_v41  ;;  %v1138_v62 = vand.u32 2147483648, %v7518_v15  ;;  %v2415_v3 = vrot.slane %v2350_v40, 1  ;;  %vm1133_vm6 = vweird.f32 %v6432_v37 }
 0x10a   : > { %v6434_v35 = vpop.eup %6433  ;;  %v1130_v4 = vmul.f32 %v6432_v37, %v1129_v47  ;;  %v1136_v48 = vand.u32 2147483647, %v7518_v15  ;;  %v7622_v0 = vmul.f32 %v7387_v52, %v7437_v42  ;;  %v13010_v30 = vrot.slane %v7605_v43, 2 }
 0x10b   : > { %v1143_v18 = vmul.f32 %v6434_v35, %v7562_v19  ;;  %v6436_v13 = vpop.eup %6435  ;;  %6439 = vpow2.f32 %v6217_v50  ;;  %vm1132_vm7 = vweird.f32 %v7518_v15  ;;  %v1139_v47 = vor.u32 1.1754944e-38, %v1138_v62 }
 0x10c   : > { %v1131_v24 = vadd.f32 %v6432_v37, %v1130_v4  ;;  %6441 = vpow2.f32 %v6216_v2  ;;  %v3366_v40 = vadd.f32 %v13010_v30, %v3092_v20  ;;  %vm1134_vm8 = vmor %vm1132_vm7, %vm1133_vm6  ;;  %v2302_v56 = vadd.f32 %v2254_v26, %v2204_v22 }
 0x10d   : > { %v1144_v21 = vsub.f32 1.0, %v1143_v18  ;;  %v13262_v10 = vrot.slane %v7499_v54, 1  ;;  %vm1137_vm9 = vcmp.eq.f32.partialorder %v1136_v48, 8.507059e+37  ;;  %v7633_v41 = vadd.f32 1.0, %v6436_v13  ;;  %v7644_v48 = vld [vmem:[#allocation2 + $0x70] sm:$0xff] }
 0x10e   : > { %v6438_v42 = vpop.eup %6437  ;;  %v1135_v29 = vsel %vm1134_vm8, %v6432_v37, %v1131_v24  ;;  %v1153_v15 = vand.u32 2147483648, %v7562_v19  ;;  %v2562_v2 = vmul.f32 %v7387_v52, %v7455_v60  ;;  %vm1148_vm10 = vweird.f32 %v6434_v35 }
 0x10f   : > { %v2416_v36 = vsel %vm1828_vm15, %v13262_v10, %v2415_v3  ;;  %v1140_v4 = vsel %vm1137_vm9, %v1139_v47, %v1135_v29  ;;  %v1145_v50 = vmul.f32 %v6434_v35, %v1144_v21  ;;  %v1151_v18 = vand.u32 2147483647, %v7562_v19 }
 0x110   : > { %v7639_v20 = vmul.f32 %v1140_v4, %v7440_v44  ;;  %v2659_v54 = vrot.slane %v7622_v0, 2  ;;  %v3418_v10 = vmul.f32 %v7492_v45, %v3366_v40  ;;  %v7646_v29 = vadd.f32 1.0, %v6438_v42 }
 0x111   : > { %v1146_v13 = vadd.f32 %v6434_v35, %v1145_v50  ;;  %v6440_v21 = vpop.eup %6439  ;;  %v13264_v37 = vrot.slane %v7601_v32, 1  ;;  %v13265_v60 = vrot.slane %v7503_v58, 1  ;;  %v2512_v22 = vadd.f32 %v2415_v3, %v2302_v56  ;;  %v767_v3 = vpop.f32.mrf.mxu0 }
 0x112   : > { %13263 = vst [vmem:[#allocation10_spill] sm:$0xff] %v7639_v20  ;;  %v7655_v24 = vmul.f32 %v7338_v9, %v7535_v27  ;;  %vm1147_vm11 = vweird.f32 %v7562_v19  ;;  %v6442_v26 = vpop.eup %6441  ;;  %6443 = vrcp.f32 %v7633_v41  ;;  %v7663_v62 = vmul.f32 %v7371_v34, %v7535_v27 }
 0x113   : > { %v1837_v44 = vsel %vm1828_vm15, %v13265_v60, %v13264_v37  ;;  %1615 = vst.msk [vmem:[#allocation2 + $0x90] sm:$0xff] %vm13241_vm3, %v7639_v20  ;;  %v2511_v58 = vadd.f32 %v2416_v36, %v2301_v12  ;;  %vm1149_vm12 = vmor %vm1147_vm11, %vm1148_vm10  ;;  %v1154_v56 = vor.u32 1.1754944e-38, %v1153_v15  ;;  %v2661_v0 = vrot.slane %v2562_v2, 2  ;;  %v7696_v37 = vld [vmem:[#allocation2 + $0x78] sm:$0xff] }
 0x114   : > { %v7668_v40 = vmul.f32 %v7418_v8, %v7644_v48  ;;  %v1150_v47 = vsel %vm1149_vm12, %v6434_v35, %v1146_v13  ;;  %vm1152_vm13 = vcmp.eq.f32.partialorder %v1151_v18, 8.507059e+37  ;;  %v7670_v19 = vadd.f32 1.0, %v6440_v21 }
 0x115   : > { %v7673_v42 = vadd.f32 %v7514_v6, %v3418_v10  ;;  %v1155_v4 = vsel %vm1152_vm13, %v1154_v56, %v1150_v47  ;;  %6445 = vrcp.f32 %v7646_v29  ;;  %v7676_v36 = vadd.f32 1.0, %v6442_v26 }
 0x116   : > { %v1932_v12 = vadd.f32 %v1837_v44, %v7577_v11  ;;  %v7681_v50 = vmul.f32 %v7353_v16, %v7535_v27  ;;  %v7684_v15 = vmul.f32 %v1155_v4, %v7472_v5  ;;  %v13014_v35 = vrot.slane %v7655_v24, 1 }
 0x117   : > { %v13267_v2 = vrot.slane %v7609_v17, 2  ;;  %v13268_v18 = vrot.slane %v7544_v39, 2  ;;  %v13013_v13 = vrot.slane %v7663_v62, 1  ;;  %v13269_v21 = vrot.slane %v7527_v25, 2 }
 0x118   : > { %13266 = vst [vmem:[#allocation11_spill] sm:$0xff] %v7684_v15  ;;  %v2835_v5 = vmul.f32 %v7401_v61, %v7535_v27  ;;  %v2662_v44 = vsel %vm727_vm1, %v2659_v54, %v2661_v0  ;;  %v2997_v26 = vrot.slane %v7668_v40, 1  ;;  %v7704_v39 = vpop.eup %6443  ;;  %6447 = vrcp.f32 %v7670_v19 }
 0x119   : > { %v2083_v10 = vsel %vm727_vm1, %v13268_v18, %v13267_v2  ;;  %v2660_v11 = vsel %vm727_vm1, %v13269_v21, %v2659_v54  ;;  %1616 = vst.msk [vmem:[#allocation2 + $0xa8] sm:$0xff] %vm13241_vm3, %v7684_v15  ;;  %v6218_v25 = vmul.f32 -1.442695, %v7673_v42  ;;  %v2836_v56 = vmul.f32 %v7401_v61, %v7644_v48 }
 0x11a   : > { %v2785_v60 = vadd.f32 %v2660_v11, %v2511_v58  ;;  %v7713_v58 = vld [vmem:[%s12984_s2] ss:$0 sm:$0xff]  ;;  %6449 = vrcp.f32 %v7676_v36  ;;  %v2303_v0 = vadd.f32 %v7530_v28, %v7586_v23  ;;  %v3143_v40 = vmul.f32 %v7446_v46, %v7644_v48 }
 0x11b   : > { %v836_v54 = vmul.f32 %v7713_v58, %v767_v3  ;;  %v3144_v47 = vmul.f32 %v7446_v46, %v7696_v37  ;;  %v7723_v4 = vpop.eup %6445  ;;  %v1934_v2 = vadd.f32 %v13014_v35, %v7572_v63  ;;  %v2206_v18 = vadd.f32 %v2083_v10, %v1932_v12  ;;  %v7743_v12 = vld [vmem:[%s12985_s3] ss:$0 sm:$0xff]  ;;  %v769_v10 = vpop.f32.mrf.mxu0 }
 0x11c   : > { %v7730_v3 = vmul.f32 %v7387_v52, %v7535_v27  ;;  %v2786_v21 = vadd.f32 %v2662_v44, %v2512_v22  ;;  %v13017_v28 = vrot.slane %v7681_v50, 2  ;;  %v2256_v23 = vmul.f32 %v7366_v33, %v7535_v27 }
 0x11d   : > { %v2513_v11 = vadd.f32 %v13013_v13, %v2303_v0  ;;  %v13270_v30 = vrot.slane %v7560_v59, 1  ;;  %v2883_v20 = vadd.f32 %v2835_v5, %v2785_v60  ;;  %6451 = vpow2.f32 %v6218_v25 }
 0x11e   : > { %v2884_v63 = vadd.f32 %v2836_v56, %v2786_v21  ;;  %v7746_v22 = vadd.f32 %v7743_v12, %v836_v54  ;;  %v3708_v44 = vmul.f32 %v7704_v39, %v7633_v41  ;;  %v3241_v0 = vrot.slane %v3143_v40, 2 }
 0x11f   : > { %v2998_v15 = vsel %vm1828_vm15, %v13270_v30, %v2997_v26  ;;  %v3243_v13 = vrot.slane %v3144_v47, 2  ;;  %v1158_v59 = vmul.f32 %v7723_v4, %v7646_v29  ;;  %v7752_v30 = vpop.eup %6447  ;;  %v13271_v60 = vrot.slane %v7601_v32, 1 }
 0x120   : > { %v7759_v25 = vmul.f32 %v7347_v14, %v7535_v27  ;;  %v13018_v56 = vrot.slane %v7730_v3, 2  ;;  %v3093_v54 = vadd.f32 %v2998_v15, %v2883_v20  ;;  %v7762_v21 = vpop.eup %6449  ;;  %v3718_v40 = vand.u32 2147483648, %v7633_v41 }
 0x121   : > { %v1933_v5 = vadd.f32 %v13271_v60, %v7597_v31  ;;  %v7767_v47 = vadd.f32 %v13017_v28, %v1934_v2  ;;  %v13272_v35 = vrot.slane %v7540_v53, 2  ;;  %v13273_v32 = vrot.slane %v7609_v17, 2  ;;  %v7786_v28 = vld [vmem:[#allocation2 + $0x80] sm:$0xff] }
 0x122   : > { %v837_v27 = vmul.f32 %v7713_v58, %v769_v10  ;;  %v7775_v60 = vadd.f32 %v2256_v23, %v2206_v18  ;;  %v7779_v20 = vadd.f32 %v13018_v56, %v2513_v11  ;;  %v3094_v15 = vadd.f32 %v2997_v26, %v2884_v63 }
 0x123   : > { %v2085_v31 = vsel %vm727_vm1, %v13273_v32, %v13272_v35  ;;  %v6193_v51 = vmul.f32 -1.442695, %v7746_v22  ;;  %v3709_v49 = vsub.f32 1.0, %v3708_v44  ;;  %v13274_v2 = vrot.slane %v7605_v43, 2  ;;  %v6452_v10 = vpop.eup %6451 }
 0x124   : > { %v3244_v17 = vsel %vm727_vm1, %v3241_v0, %v3243_v13  ;;  %v1159_v35 = vsub.f32 1.0, %v1158_v59  ;;  %v3723_v18 = vmul.f32 %v7762_v21, %v7676_v36  ;;  %v3738_v23 = vmul.f32 %v7752_v30, %v7670_v19 }
 0x125   : > { %v3242_v53 = vsel %vm727_vm1, %v13274_v2, %v3241_v0  ;;  %v7792_v26 = vadd.f32 %v2085_v31, %v1933_v5  ;;  %vm3712_vm14 = vweird.f32 %v7633_v41  ;;  %v3716_v43 = vand.u32 2147483647, %v7633_v41 }
 0x126   : > { %v3367_v11 = vadd.f32 %v3242_v53, %v3093_v54  ;;  %v7796_v63 = vor.u32 1.1754944e-38, %v3718_v40  ;;  %v7799_v13 = vadd.f32 %v7743_v12, %v837_v27  ;;  %v3368_v44 = vadd.f32 %v3244_v17, %v3094_v15 }
 0x127   : > { %v2258_v0 = vmul.f32 %v7366_v33, %v7786_v28  ;;  %v7805_v59 = vmul.f32 %v7401_v61, %v7786_v28  ;;  %6453 = vpow2.f32 %v6193_v51  ;;  %v3710_v5 = vmul.f32 %v7704_v39, %v3709_v49 }
 0x128   : > { %vm3713_vm2 = vweird.f32 %v7704_v39  ;;  %v7809_v54 = vadd.f32 1.0, %v6452_v10  ;;  %v1160_v40 = vmul.f32 %v7723_v4, %v1159_v35  ;;  %v3724_v32 = vsub.f32 1.0, %v3723_v18 }
 0x129   : > { %v3739_v31 = vsub.f32 1.0, %v3738_v23  ;;  %v3419_v27 = vmul.f32 %v7492_v45, %v3367_v11  ;;  %v1168_v15 = vand.u32 2147483648, %v7646_v29  ;;  %vm3742_vm0 = vweird.f32 %v7670_v19  ;;  %vm7843_vm10 = vmor %vm3712_vm14, %vm3713_vm2 }
 0x12a   : > { %vm1163_vm4 = vweird.f32 %v7723_v4  ;;  %v1166_v51 = vand.u32 2147483647, %v7646_v29  ;;  %v6194_v49 = vmul.f32 -1.442695, %v7799_v13  ;;  %vm7818_vm5 = vcmp.eq.f32.partialorder %v3716_v43, 8.507059e+37 }
 0x12b   : > { %vm3727_vm6 = vweird.f32 %v7676_v36  ;;  %v3731_v53 = vand.u32 2147483647, %v7676_v36  ;;  %v3733_v17 = vand.u32 2147483648, %v7676_v36  ;;  %v3420_v35 = vmul.f32 %v7492_v45, %v3368_v44 }
 0x12c   : > { %v3711_v10 = vadd.f32 %v7704_v39, %v3710_v5  ;;  %6455 = vrcp.f32 %v7809_v54  ;;  %v1161_v18 = vadd.f32 %v7723_v4, %v1160_v40  ;;  %vm1162_vm7 = vweird.f32 %v7646_v29 }
 0x12d   : > { %v6454_v23 = vpop.eup %6453  ;;  %v3725_v11 = vmul.f32 %v7762_v21, %v3724_v32  ;;  %v3740_v43 = vmul.f32 %v7752_v30, %v3739_v31  ;;  %v7833_v56 = vadd.f32 %v7514_v6, %v3419_v27  ;;  %vm1164_vm8 = vmor %vm1162_vm7, %vm1163_vm4  ;;  %v1169_v44 = vor.u32 1.1754944e-38, %v1168_v15 }
 0x12e   : > { %v3746_v5 = vand.u32 2147483647, %v7670_v19  ;;  %v1165_v57 = vsel %vm1164_vm8, %v7723_v4, %v1161_v18  ;;  %vm1167_vm9 = vcmp.eq.f32.partialorder %v1166_v51, 8.507059e+37  ;;  %6457 = vpow2.f32 %v6194_v49 }
 0x12f   : > { %v3748_v40 = vand.u32 2147483648, %v7670_v19  ;;  %v7850_v32 = vmul.f32 %v7338_v9, %v7644_v48  ;;  %v7853_v31 = vadd.f32 %v7514_v6, %v3420_v35  ;;  %v1170_v4 = vsel %vm1167_vm9, %v1169_v44, %v1165_v57 }
 0x130   : > { %v3715_v27 = vsel %vm7843_vm10, %v7704_v39, %v3711_v10  ;;  %vm3743_vm11 = vweird.f32 %v7752_v30  ;;  %v7860_v41 = vmul.f32 %v1170_v4, %v7554_v55  ;;  %v7862_v15 = vadd.f32 1.0, %v6454_v23  ;;  %v807_v4 = vpop.f32.mrf.mxu2 }
 0x131   : > { %v3726_v51 = vadd.f32 %v7762_v21, %v3725_v11  ;;  %vm3728_vm12 = vweird.f32 %v7762_v21  ;;  %v3741_v9 = vadd.f32 %v7752_v30, %v3740_v43  ;;  %v6219_v49 = vmul.f32 -1.442695, %v7833_v56  ;;  %vm7882_vm14 = vmor %vm3742_vm0, %vm3743_vm11 }
 0x132   : > { %13279 = vst [vmem:[#allocation12_spill] sm:$0xff] %v7860_v41  ;;  %v7868_v57 = vpop.eup %6455  ;;  %vm7870_vm13 = vcmp.eq.f32.partialorder %v3731_v53, 8.507059e+37  ;;  %v3734_v39 = vor.u32 1.1754944e-38, %v3733_v17  ;;  %v7875_v55 = vadd.f32 %v2258_v0, %v7767_v47  ;;  %6459 = vrcp.f32 %v7862_v15  ;;  %v7895_v17 = vld [vmem:[#allocation2 + $0x88] sm:$0xff]  ;;  %vm7904_vm0 = vmor %vm3727_vm6, %vm3728_vm12 }
 0x133   : > { %1617 = vst.msk [vmem:[#allocation2 + $0xb0] sm:$0xff] %vm13241_vm3, %v7860_v41  ;;  %vm7886_vm2 = vcmp.eq.f32.partialorder %v3746_v5, 8.507059e+37  ;;  %v3749_v18 = vor.u32 1.1754944e-38, %v3748_v40  ;;  %v7892_v47 = vmul.f32 %v7353_v16, %v7644_v48  ;;  %v6220_v0 = vmul.f32 -1.442695, %v7853_v31 }
 0x134   : > { %v6458_v23 = vpop.eup %6457  ;;  %v3720_v19 = vsel %vm7818_vm5, %v7796_v63, %v3715_v27  ;;  %v1839_v43 = vrot.slane %v7850_v32, 1  ;;  %v2257_v44 = vmul.f32 %v7366_v33, %v7644_v48  ;;  %v2352_v5 = vmul.f32 %v7371_v34, %v7644_v48 }
 0x135   : > { %v3730_v63 = vsel %vm7904_vm0, %v7762_v21, %v3726_v51  ;;  %v3745_v36 = vsel %vm7882_vm14, %v7752_v30, %v3741_v9  ;;  %v3753_v2 = vmul.f32 %v7868_v57, %v7809_v54  ;;  %6461 = vpow2.f32 %v6219_v49 }
 0x136   : > { %v1725_v29 = vmul.f32 %v7347_v14, %v7644_v48  ;;  %v7925_v40 = vmul.f32 %v7347_v14, %v7786_v28  ;;  %v2885_v32 = vadd.f32 %v7805_v59, %v7779_v20  ;;  %v7931_v21 = vmul.f32 %v7418_v8, %v7895_v17 }
 0x137   : > { %v13022_v30 = vrot.slane %v7892_v47, 2  ;;  %6463 = vpow2.f32 %v6220_v0  ;;  %v852_v27 = vmul.f32 %v7713_v58, %v807_v4  ;;  %v7935_v51 = vadd.f32 1.0, %v6458_v23 }
 0x138   : > { %v7937_v9 = vpop.eup %6459  ;;  %v7940_v14 = vmul.f32 %v3720_v19, %v7533_v38  ;;  %v3735_v28 = vsel %vm7870_vm13, %v3734_v39, %v3730_v63  ;;  %v3750_v8 = vsel %vm7886_vm2, %v3749_v18, %v3745_v36  ;;  %v2305_v20 = vadd.f32 %v2257_v44, %v7792_v26 }
 0x139   : > { %v3754_v59 = vsub.f32 1.0, %v3753_v2  ;;  %v13289_v49 = vrot.slane %v7655_v24, 1  ;;  %v2418_v0 = vrot.slane %v2352_v5, 1  ;;  %v7952_v23 = vmul.f32 %v7387_v52, %v7644_v48 }
 0x13a   : > { %13288 = vst [vmem:[#allocation13_spill] sm:$0xff] %v7940_v14  ;;  %v3761_v38 = vand.u32 2147483647, %v7809_v54  ;;  %v3763_v35 = vand.u32 2147483648, %v7809_v54  ;;  %v13021_v39 = vrot.slane %v7931_v21, 1  ;;  %v1173_v53 = vmul.f32 %v7937_v9, %v7862_v15 }
 0x13b   : > { %v1840_v10 = vsel %vm1828_vm15, %v13289_v49, %v1839_v43  ;;  %v6462_v26 = vpop.eup %6461  ;;  %v7960_v18 = vmul.f32 %v3735_v28, %v7589_v7  ;;  %v7963_v24 = vmul.f32 %v3750_v8, %v7580_v1  ;;  %v7966_v19 = vadd.f32 %v7743_v12, %v852_v27  ;;  %v772_v49 = vpop.f32.mrf.mxu0 }
 0x13c   : > { %6465 = vrcp.f32 %v7935_v51  ;;  %vm3757_vm4 = vweird.f32 %v7809_v54  ;;  %v7971_v11 = vadd.f32 %v1839_v43, %v1725_v29  ;;  %v7975_v44 = vmul.f32 %v7446_v46, %v7895_v17  ;;  %v809_v8 = vpop.f32.mrf.mxu2 }
 0x13d   : > { %13290 = vst [vmem:[#allocation14_spill] sm:$0xff] %v7960_v18  ;;  %v6464_v7 = vpop.eup %6463  ;;  %v3755_v5 = vmul.f32 %v7868_v57, %v3754_v59  ;;  %v13292_v1 = vrot.slane %v7663_v62, 1  ;;  %v7981_v36 = vadd.f32 %v2418_v0, %v2305_v20  ;;  %v2664_v2 = vrot.slane %v7952_v23, 2 }
 0x13e   : > { %13291 = vst [vmem:[#allocation15_spill] sm:$0xff] %v7963_v24  ;;  %v3764_v4 = vor.u32 1.1754944e-38, %v3763_v35  ;;  %v7984_v27 = vadd.f32 1.0, %v6462_v26  ;;  %v3095_v43 = vadd.f32 %v13021_v39, %v2885_v32  ;;  %v1174_v29 = vsub.f32 1.0, %v1173_v53 }
 0x13f   : > { %v2419_v63 = vsel %vm1828_vm15, %v13292_v1, %v2418_v0  ;;  %vm7990_vm5 = vcmp.eq.f32.partialorder %v3761_v38, 8.507059e+37  ;;  %v1935_v62 = vadd.f32 %v1840_v10, %v7759_v25  ;;  %v6209_v20 = vmul.f32 -1.442695, %v7966_v19 }
 0x140   : > { %vm3758_vm6 = vweird.f32 %v7868_v57  ;;  %v7997_v0 = vadd.f32 1.0, %v6464_v7  ;;  %v13020_v32 = vrot.slane %v7975_v44, 2  ;;  %v1183_v35 = vand.u32 2147483648, %v7862_v15 }
 0x141   : > { %v3756_v38 = vadd.f32 %v7868_v57, %v3755_v5  ;;  %v1175_v26 = vmul.f32 %v7937_v9, %v1174_v29  ;;  %vm1178_vm7 = vweird.f32 %v7937_v9  ;;  %v1181_v25 = vand.u32 2147483647, %v7862_v15  ;;  %vm8016_vm8 = vmor %vm3757_vm4, %vm3758_vm6 }
 0x142   : > { %v8001_v53 = vpop.eup %6465  ;;  %6467 = vrcp.f32 %v7984_v27  ;;  %v3369_v10 = vadd.f32 %v13020_v32, %v3095_v43  ;;  %v1986_v7 = vmul.f32 %v7353_v16, %v7696_v37  ;;  %v2565_v1 = vmul.f32 %v7387_v52, %v7696_v37 }
 0x143   : > { %v1176_v29 = vadd.f32 %v7937_v9, %v1175_v26  ;;  %vm1177_vm9 = vweird.f32 %v7862_v15  ;;  %6469 = vpow2.f32 %v6209_v20  ;;  %v853_v43 = vmul.f32 %v7713_v58, %v809_v8 }
 0x144   : > { %6471 = vrcp.f32 %v7997_v0  ;;  %v13297_v16 = vrot.slane %v7681_v50, 2  ;;  %vm1179_vm10 = vmor %vm1177_vm9, %vm1178_vm7  ;;  %v1184_v54 = vor.u32 1.1754944e-38, %v1183_v35  ;;  %v1188_v48 = vmul.f32 %v8001_v53, %v7935_v51 }
 0x145   : > { %v3760_v15 = vsel %vm8016_vm8, %v7868_v57, %v3756_v38  ;;  %v1180_v8 = vsel %vm1179_vm10, %v7937_v9, %v1176_v29  ;;  %vm1182_vm11 = vcmp.eq.f32.partialorder %v1181_v25, 8.507059e+37  ;;  %v2514_v26 = vadd.f32 %v2419_v63, %v7775_v60 }
 0x146   : > { %v2088_v37 = vsel %vm727_vm1, %v13297_v16, %v13022_v30  ;;  %v2089_v28 = vrot.slane %v1986_v7, 2  ;;  %v1185_v50 = vsel %vm1182_vm11, %v1184_v54, %v1180_v8  ;;  %v1189_v32 = vsub.f32 1.0, %v1188_v48 }
 0x147   : > { %v8034_v20 = vadd.f32 %v2088_v37, %v1935_v62  ;;  %v3421_v16 = vmul.f32 %v7492_v45, %v3369_v10  ;;  %v2666_v35 = vrot.slane %v2565_v1, 2  ;;  %v8040_v39 = vmul.f32 %v1185_v50, %v7746_v22 }
 0x148   : > { %v8043_v30 = vadd.f32 %v7743_v12, %v853_v43  ;;  %v8045_v57 = vpop.eup %6467  ;;  %v3765_v9 = vsel %vm7990_vm5, %v3764_v4, %v3760_v15  ;;  %v1190_v62 = vmul.f32 %v8001_v53, %v1189_v32  ;;  %v1198_v60 = vand.u32 2147483648, %v7935_v51  ;;  %v774_v32 = vpop.f32.mrf.mxu0  ;;  %v8105_v43 = vld [vmem:[%s12986_s4 + $0x2] ss:$0 sm:$0xff] }
 0x149   : > { %13298 = vst [vmem:[#allocation16_spill] sm:$0xff] %v8040_v39  ;;  %v838_v48 = vmul.f32 %v7713_v58, %v772_v49  ;;  %v6470_v63 = vpop.eup %6469  ;;  %v13299_v45 = vrot.slane %v7730_v3, 2  ;;  %vm1193_vm12 = vweird.f32 %v8001_v53  ;;  %v1196_v4 = vand.u32 2147483647, %v7935_v51 }
 0x14a   : > { %1618 = vst.msk [vmem:[#allocation2 + $0xc8] sm:$0xff] %vm13241_vm3, %v8040_v39  ;;  %v6210_v59 = vmul.f32 -1.442695, %v8043_v30  ;;  %v8062_v38 = vpop.eup %6471  ;;  %v13300_v25 = vrot.slane %v7892_v47, 2  ;;  %v8069_v10 = vadd.f32 1.0, %v6470_v63  ;;  %v1191_v7 = vadd.f32 %v8001_v53, %v1190_v62 }
 0x14b   : > { %v2665_v22 = vsel %vm727_vm1, %v13299_v45, %v2664_v2  ;;  %v8073_v1 = vmul.f32 %v3765_v9, %v7673_v42  ;;  %v8076_v5 = vadd.f32 %v7514_v6, %v3421_v16  ;;  %v2667_v29 = vsel %vm727_vm1, %v2664_v2, %v2666_v35  ;;  %v8192_v16 = vld [vmem:[#allocation2 + $0xa0] sm:$0xff] }
 0x14c   : > { %v8064_v49 = vadd.f32 %v2665_v22, %v2514_v26  ;;  %v2090_v3 = vsel %vm727_vm1, %v13300_v25, %v2089_v28  ;;  %vm1192_vm13 = vweird.f32 %v7935_v51  ;;  %v3768_v47 = vmul.f32 %v8045_v57, %v7984_v27  ;;  %v8096_v51 = vld [vmem:[%s12986_s4 + $0x1] ss:$0 sm:$0xff] }
 0x14d   : > { %13301 = vst [vmem:[#allocation17_spill] sm:$0xff] %v8073_v1  ;;  %6473 = vrcp.f32 %v8069_v10  ;;  %vm1194_vm14 = vmor %vm1192_vm13, %vm1193_vm12  ;;  %v1199_v28 = vor.u32 1.1754944e-38, %v1198_v60  ;;  %v8088_v42 = vadd.f32 %v7743_v12, %v838_v48  ;;  %v3783_v6 = vmul.f32 %v8062_v38, %v7997_v0 }
 0x14e   : > { %v1195_v23 = vsel %vm1194_vm14, %v8001_v53, %v1191_v7  ;;  %vm1197_vm2 = vcmp.eq.f32.partialorder %v1196_v4, 8.507059e+37  ;;  %6475 = vpow2.f32 %v6210_v59  ;;  %13302 = vst [vmem:[#allocation18_spill] sm:$0xff] %v8096_v51  ;;  %v8100_v2 = vmul.f32 %v8096_v51, %v7895_v17  ;;  %v8236_v4 = vld [vmem:[%s12986_s4 + $0x3] ss:$0 sm:$0xff] }
 0x14f   : > { %v8109_v37 = vmul.f32 %v8105_v43, %v7895_v17  ;;  %v2259_v53 = vmul.f32 %v7366_v33, %v7895_v17  ;;  %v1200_v54 = vsel %vm1197_vm2, %v1199_v28, %v1195_v23  ;;  %v8115_v15 = vmul.f32 %v7371_v34, %v7895_v17 }
 0x150   : > { %v8119_v8 = vmul.f32 %v7387_v52, %v7895_v17  ;;  %v6221_v26 = vmul.f32 -1.442695, %v8076_v5  ;;  %v8123_v50 = vmul.f32 %v1200_v54, %v7799_v13  ;;  %v8127_v35 = vadd.f32 %v2090_v3, %v7971_v11  ;;  %v8136_v52 = vld [vmem:[%s12986_s4] ss:$0 sm:$0xff]  ;;  %v777_v59 = vpop.f32.mrf.mxu0 }
 0x151   : > { %v8130_v33 = vadd.f32 %v2667_v29, %v7981_v36  ;;  %v6195_v34 = vmul.f32 -1.442695, %v8088_v42  ;;  %v3769_v9 = vsub.f32 1.0, %v3768_v47  ;;  %v3784_v62 = vsub.f32 1.0, %v3783_v6 }
 0x152   : > { %13303 = vst [vmem:[#allocation19_spill] sm:$0xff] %v8123_v50  ;;  %v8140_v13 = vmul.f32 %v8136_v52, %v7895_v17  ;;  %v8144_v11 = vmul.f32 %v7401_v61, %v7895_v17  ;;  %v13024_v60 = vrot.slane %v8100_v2, 1  ;;  %v13026_v48 = vrot.slane %v8109_v37, 2 }
 0x153   : > { %1619 = vst.msk [vmem:[#allocation2 + $0xd0] sm:$0xff] %vm13241_vm3, %v8123_v50  ;;  %v8148_v36 = vpop.eup %6473  ;;  %v8153_v63 = vadd.f32 %v2259_v53, %v8034_v20  ;;  %v839_v45 = vmul.f32 %v7713_v58, %v774_v32  ;;  %v13023_v61 = vrot.slane %v8115_v15, 1  ;;  %v13025_v17 = vrot.slane %v8119_v8, 2 }
 0x154   : > { %v6476_v22 = vpop.eup %6475  ;;  %6477 = vpow2.f32 %v6221_v26  ;;  %v3778_v25 = vand.u32 2147483648, %v7984_v27  ;;  %vm3787_vm0 = vweird.f32 %v7997_v0  ;;  %v3791_v3 = vand.u32 2147483647, %v7997_v0 }
 0x155   : > { %6479 = vpow2.f32 %v6195_v34  ;;  %v3770_v20 = vmul.f32 %v8045_v57, %v3769_v9  ;;  %vm3772_vm4 = vweird.f32 %v7984_v27  ;;  %v3785_v32 = vmul.f32 %v8062_v38, %v3784_v62 }
 0x156   : > { %v3793_v7 = vand.u32 2147483648, %v7997_v0  ;;  %v1413_v29 = vmul.f32 %v8148_v36, %v8069_v10  ;;  %v1423_v47 = vand.u32 2147483648, %v8069_v10  ;;  %v8169_v28 = vadd.f32 1.0, %v6476_v22 }
 0x157   : > { %v8172_v6 = vadd.f32 %v7743_v12, %v839_v45  ;;  %v840_v23 = vmul.f32 %v7713_v58, %v777_v59  ;;  %vm1417_vm5 = vweird.f32 %v8069_v10  ;;  %vm1418_vm6 = vweird.f32 %v8148_v36  ;;  %v1659_v59 = vld [vmem:[#allocation2 + $0x98] sm:$0xff] }
 0x158   : > { %v1414_v53 = vsub.f32 1.0, %v1413_v29  ;;  %v1421_v54 = vand.u32 2147483647, %v8069_v10  ;;  %v3779_v26 = vor.u32 1.1754944e-38, %v3778_v25  ;;  %v1937_v34 = vadd.f32 %v13024_v60, %v7925_v40  ;;  %vm8198_vm9 = vmor %vm1417_vm5, %vm1418_vm6 }
 0x159   : > { %v2516_v9 = vadd.f32 %v13023_v61, %v7875_v55  ;;  %6481 = vrcp.f32 %v8169_v28  ;;  %v3786_v45 = vadd.f32 %v8062_v38, %v3785_v32  ;;  %vm3788_vm7 = vweird.f32 %v8062_v38 }
 0x15a   : > { %v6478_v62 = vpop.eup %6477  ;;  %vm8187_vm8 = vcmp.eq.f32.partialorder %v3791_v3, 8.507059e+37  ;;  %v1415_v25 = vmul.f32 %v8148_v36, %v1414_v53  ;;  %v3794_v40 = vor.u32 1.1754944e-38, %v3793_v7  ;;  %v1424_v32 = vor.u32 1.1754944e-38, %v1423_v47  ;;  %vm8217_vm12 = vmor %vm3787_vm0, %vm3788_vm7 }
 0x15b   : > { %v6480_v29 = vpop.eup %6479  ;;  %v6196_v3 = vmul.f32 -1.442695, %v8172_v6  ;;  %v8204_v61 = vadd.f32 %v7743_v12, %v840_v23  ;;  %v3771_v53 = vadd.f32 %v8045_v57, %v3770_v20  ;;  %vm3773_vm10 = vweird.f32 %v8045_v57 }
 0x15c   : > { %v1416_v7 = vadd.f32 %v8148_v36, %v1415_v25  ;;  %vm8209_vm11 = vcmp.eq.f32.partialorder %v1421_v54, 8.507059e+37  ;;  %v2211_v47 = vadd.f32 %v13026_v48, %v1937_v34  ;;  %v2790_v20 = vadd.f32 %v13025_v17, %v2516_v9  ;;  %v812_v25 = vpop.f32.mrf.mxu2  ;;  %vm8249_vm13 = vmor %vm3772_vm4, %vm3773_vm10 }
 0x15d   : > { %v8225_v23 = vadd.f32 1.0, %v6478_v62  ;;  %v8228_v54 = vmul.f32 %v7446_v46, %v1659_v59  ;;  %v3790_v0 = vsel %vm8217_vm12, %v8062_v38, %v3786_v45  ;;  %v2261_v34 = vmul.f32 %v8236_v4, %v8192_v16  ;;  %v8256_v45 = vld [vmem:[%s12986_s4 + $0x6] ss:$0 sm:$0xff] }
 0x15e   : > { %v1420_v9 = vsel %vm8198_vm9, %v8148_v36, %v1416_v7  ;;  %v8243_v62 = vadd.f32 1.0, %v6480_v29  ;;  %v2840_v55 = vmul.f32 %v8256_v45, %v8192_v16  ;;  %6483 = vpow2.f32 %v6196_v3 }
 0x15f   : > { %v6482_v46 = vpop.eup %6481  ;;  %v1425_v36 = vsel %vm8209_vm11, %v1424_v32, %v1420_v9  ;;  %v6197_v29 = vmul.f32 -1.442695, %v8204_v61  ;;  %v3775_v7 = vsel %vm8249_vm13, %v8045_v57, %v3771_v53  ;;  %v854_v48 = vmul.f32 %v7713_v58, %v812_v25  ;;  %v8289_v53 = vld [vmem:[#allocation2 + $0x90] sm:$0xff] }
 0x160   : > { %v8267_v10 = vmul.f32 %v1425_v36, %v7966_v19  ;;  %v1428_v17 = vmul.f32 %v6482_v46, %v8169_v28  ;;  %v3795_v39 = vsel %vm8187_vm8, %v3794_v40, %v3790_v0  ;;  %6485 = vrcp.f32 %v8225_v23 }
 0x161   : > { %vm1432_vm14 = vweird.f32 %v8169_v28  ;;  %v1438_v60 = vand.u32 2147483648, %v8169_v28  ;;  %vm1433_vm2 = vweird.f32 %v6482_v46  ;;  %v1436_v19 = vand.u32 2147483647, %v8169_v28  ;;  %v8330_v28 = vld [vmem:[%s12986_s4 + $0x7] ss:$0 sm:$0xff] }
 0x162   : > { %13314 = vst [vmem:[#allocation20_spill] sm:$0xff] %v8267_v10  ;;  %v1429_v57 = vsub.f32 1.0, %v1428_v17  ;;  %6487 = vrcp.f32 %v8243_v62  ;;  %v13315_v32 = vand.u32 2147483647, %v7984_v27  ;;  %v8284_v22 = vadd.f32 %v8144_v11, %v8064_v49  ;;  %v8303_v49 = vld [vmem:[%s12986_s4 + $0x5] ss:$0 sm:$0xff]  ;;  %vm8311_vm4 = vmor %vm1432_vm14, %vm1433_vm2 }
 0x163   : > { %1634 = vst.msk [vmem:[#allocation2 + $0x1c8] sm:$0xff] %vm13241_vm3, %v8267_v10  ;;  %v8287_v40 = vmul.f32 %v8105_v43, %v1659_v59  ;;  %6489 = vpow2.f32 %v6197_v29  ;;  %v8293_v0 = vadd.f32 %v7743_v12, %v854_v48  ;;  %v8296_v27 = vmul.f32 %v3795_v39, %v7853_v31  ;;  %v8395_v10 = vpop.f32.mrf.mxu0 }
 0x164   : > { %vm3777_vm0 = vcmp.eq.f32.partialorder %v13315_v32, 8.507059e+37  ;;  %v1430_v25 = vmul.f32 %v6482_v46, %v1429_v57  ;;  %v6484_v9 = vpop.eup %6483  ;;  %v8298_v38 = vadd.f32 %v2261_v34, %v2211_v47  ;;  %13317 = vst [vmem:[#allocation22_spill] sm:$0xff] %v8303_v49  ;;  %v8306_v11 = vmul.f32 %v8303_v49, %v1659_v59 }
 0x165   : > { %v3780_v3 = vsel %vm3777_vm0, %v3779_v26, %v3775_v7  ;;  %13316 = vst [vmem:[#allocation21_spill] sm:$0xff] %v8296_v27  ;;  %v1439_v26 = vor.u32 1.1754944e-38, %v1438_v60  ;;  %v3808_v31 = vand.u32 2147483648, %v8225_v23  ;;  %v8316_v39 = vadd.f32 %v2840_v55, %v2790_v20  ;;  %v814_v7 = vpop.f32.mrf.mxu2 }
 0x166   : > { %13318 = vst [vmem:[#allocation23_spill] sm:$0xff] %v8306_v11  ;;  %v1431_v47 = vadd.f32 %v6482_v46, %v1430_v25  ;;  %vm8318_vm5 = vcmp.eq.f32.partialorder %v1436_v19, 8.507059e+37  ;;  %v8322_v36 = vpop.eup %6485  ;;  %v8325_v59 = vmul.f32 %v3780_v3, %v7833_v56  ;;  %v8334_v29 = vmul.f32 %v8330_v28, %v8289_v53 }
 0x167   : > { %13324 = vst [vmem:[#allocation25_spill] sm:$0xff] %v8330_v28  ;;  %v8338_v20 = vmul.f32 %v8136_v52, %v8192_v16  ;;  %v6211_v57 = vmul.f32 -1.442695, %v8293_v0  ;;  %v8344_v19 = vadd.f32 1.0, %v6484_v9  ;;  %v855_v32 = vmul.f32 %v7713_v58, %v814_v7 }
 0x168   : > { %13323 = vst [vmem:[#allocation24_spill] sm:$0xff] %v8325_v59  ;;  %v6488_v60 = vpop.eup %6487  ;;  %v1435_v56 = vsel %vm8311_vm4, %v6482_v46, %v1431_v47  ;;  %v8353_v48 = vor.u32 1.1754944e-38, %v3808_v31  ;;  %v3798_v9 = vmul.f32 %v8322_v36, %v8225_v23  ;;  %v2839_v47 = vmul.f32 %v8256_v45, %v8289_v53 }
 0x169   : > { %v6490_v3 = vpop.eup %6489  ;;  %v1440_v16 = vsel %vm8318_vm5, %v1439_v26, %v1435_v56  ;;  %v1203_v55 = vmul.f32 %v6488_v60, %v8243_v62  ;;  %6491 = vpow2.f32 %v6211_v57  ;;  %v3000_v26 = vrot.slane %v8334_v29, 1  ;;  %v8375_v56 = vld [vmem:[%s12986_s4 + $0x8] ss:$0 sm:$0xff] }
 0x16a   : > { %v8356_v46 = vmul.f32 %v1440_v16, %v8043_v30  ;;  %6493 = vrcp.f32 %v8344_v19  ;;  %v1213_v31 = vand.u32 2147483648, %v8243_v62  ;;  %v8368_v30 = vadd.f32 %v7743_v12, %v855_v32  ;;  %13326 = vst [vmem:[#allocation27_spill] sm:$0xff] %v8375_v56 }
 0x16b   : > { %v1204_v7 = vsub.f32 1.0, %v1203_v55  ;;  %v8370_v34 = vadd.f32 1.0, %v6490_v3  ;;  %v3146_v55 = vmul.f32 %v8375_v56, %v8289_v53  ;;  %vm1208_vm6 = vweird.f32 %v6488_v60 }
 0x16c   : > { %13325 = vst [vmem:[#allocation26_spill] sm:$0xff] %v8356_v46  ;;  %v1211_v29 = vand.u32 2147483647, %v8243_v62  ;;  %v8382_v16 = vmul.f32 %v8136_v52, %v8289_v53  ;;  %v8386_v32 = vmul.f32 %v8096_v51, %v8289_v53  ;;  %v6212_v3 = vmul.f32 -1.442695, %v8368_v30 }
 0x16d   : > { %1635 = vst.msk [vmem:[#allocation2 + $0x1d0] sm:$0xff] %vm13241_vm3, %v8356_v46  ;;  %v1205_v57 = vmul.f32 %v6488_v60, %v1204_v7  ;;  %6495 = vrcp.f32 %v8370_v34  ;;  %v3799_v25 = vsub.f32 1.0, %v3798_v9  ;;  %v8392_v17 = vmul.f32 %v8105_v43, %v8289_v53 }
 0x16e   : > { %vm1207_vm7 = vweird.f32 %v8243_v62  ;;  %v2887_v50 = vadd.f32 %v2839_v47, %v8130_v33  ;;  %v13327_v41 = vrot.slane %v7931_v21, 1  ;;  %v1214_v1 = vor.u32 1.1754944e-38, %v1213_v31  ;;  %v8409_v21 = vld [vmem:[%s12986_s4 + $0x4] ss:$0 sm:$0xff] }
 0x16f   : > { %v1206_v7 = vadd.f32 %v6488_v60, %v1205_v57  ;;  %v6492_v46 = vpop.eup %6491  ;;  %vm1209_vm8 = vmor %vm1207_vm7, %vm1208_vm6  ;;  %6497 = vpow2.f32 %v6212_v3  ;;  %vm3803_vm9 = vweird.f32 %v8322_v36  ;;  %v3246_v24 = vrot.slane %v3146_v55, 2 }
 0x170   : > { %v3001_v27 = vsel %vm1828_vm15, %v13327_v41, %v3000_v26  ;;  %v6494_v9 = vpop.eup %6493  ;;  %vm1212_vm10 = vcmp.eq.f32.partialorder %v1211_v29, 8.507059e+37  ;;  %v8402_v57 = vadd.f32 1.0, %v6492_v46  ;;  %v2260_v62 = vmul.f32 %v8236_v4, %v8289_v53 }
 0x171   : > { %v1210_v14 = vsel %vm1209_vm8, %v6488_v60, %v1206_v7  ;;  %v8413_v41 = vmul.f32 %v8409_v21, %v8289_v53  ;;  %v1218_v47 = vmul.f32 %v6494_v9, %v8344_v19  ;;  %vm3802_vm11 = vweird.f32 %v8225_v23 }
 0x172   : > { %v1215_v33 = vsel %vm1212_vm10, %v1214_v1, %v1210_v14  ;;  %v8419_v60 = vmul.f32 %v8303_v49, %v8289_v53  ;;  %v3096_v46 = vadd.f32 %v3001_v27, %v8284_v22  ;;  %6499 = vrcp.f32 %v8402_v57  ;;  %vm8482_vm0 = vmor %vm3802_vm11, %vm3803_vm9 }
 0x173   : > { %v8423_v31 = vmul.f32 %v1215_v33, %v8088_v42  ;;  %v8426_v55 = vpop.eup %6495  ;;  %v3097_v1 = vadd.f32 %v3000_v26, %v2887_v50  ;;  %v1219_v3 = vsub.f32 1.0, %v1218_v47  ;;  %v3800_v7 = vmul.f32 %v8322_v36, %v3799_v25 }
 0x174   : > { %v13329_v53 = vrot.slane %v8228_v54, 2  ;;  %v1228_v42 = vand.u32 2147483648, %v8344_v19  ;;  %v1233_v22 = vmul.f32 %v8426_v55, %v8370_v34  ;;  %v13330_v33 = vrot.slane %v7975_v44, 2  ;;  %v817_v44 = vpop.f32.mrf.mxu2 }
 0x175   : > { %13328 = vst [vmem:[#allocation28_spill] sm:$0xff] %v8423_v31  ;;  %v6498_v27 = vpop.eup %6497  ;;  %v1220_v26 = vmul.f32 %v6494_v9, %v1219_v3  ;;  %vm1223_vm12 = vweird.f32 %v6494_v9  ;;  %v1226_v25 = vand.u32 2147483647, %v8344_v19  ;;  %v8444_v54 = vadd.f32 %v2260_v62, %v8127_v35  ;;  %v8455_v3 = vld [vmem:[#allocation2 + $0xa8] sm:$0xff] }
 0x176   : > { %v3249_v18 = vsel %vm727_vm1, %v3246_v24, %v13329_v53  ;;  %1620 = vst.msk [vmem:[#allocation2 + $0xe8] sm:$0xff] %vm13241_vm3, %v8423_v31  ;;  %v3247_v50 = vsel %vm727_vm1, %v13330_v33, %v3246_v24  ;;  %v8446_v53 = vadd.f32 1.0, %v6498_v27  ;;  %v1234_v14 = vsub.f32 1.0, %v1233_v22  ;;  %v8475_v33 = vld [vmem:[%s12987_s5] ss:$0 sm:$0xff] }
 0x177   : > { %v3370_v47 = vadd.f32 %v3247_v50, %v3096_v46  ;;  %v3371_v31 = vadd.f32 %v3249_v18, %v3097_v1  ;;  %v1221_v59 = vadd.f32 %v6494_v9, %v1220_v26  ;;  %vm1222_vm13 = vweird.f32 %v8344_v19  ;;  %v8459_v46 = vpop.f32.mrf.mxu0 }
 0x178   : > { %v8450_v11 = vpop.eup %6499  ;;  %v8453_v24 = vadd.f32 %v8322_v36, %v3800_v7  ;;  %vm1224_vm14 = vmor %vm1222_vm13, %vm1223_vm12  ;;  %v1229_v35 = vor.u32 1.1754944e-38, %v1228_v42  ;;  %6501 = vrcp.f32 %v8446_v53  ;;  %v856_v62 = vmul.f32 %v7713_v58, %v817_v44 }
 0x179   : > { %v1443_v18 = vmul.f32 %v8450_v11, %v8402_v57  ;;  %v1225_v19 = vsel %vm1224_vm14, %v6494_v9, %v1221_v59  ;;  %vm1227_vm2 = vcmp.eq.f32.partialorder %v1226_v25, 8.507059e+37  ;;  %v1235_v1 = vmul.f32 %v8426_v55, %v1234_v14 }
 0x17a   : > { %v13331_v7 = vrot.slane %v8386_v32, 1  ;;  %v13332_v22 = vrot.slane %v8100_v2, 1  ;;  %v3422_v50 = vmul.f32 %v8475_v33, %v3370_v47  ;;  %v1230_v59 = vsel %vm1227_vm2, %v1229_v35, %v1225_v19 }
 0x17b   : > { %v3423_v2 = vmul.f32 %v8475_v33, %v3371_v31  ;;  %v8489_v14 = vmul.f32 %v8096_v51, %v8455_v3  ;;  %v8493_v26 = vmul.f32 %v8330_v28, %v8455_v3  ;;  %v8496_v25 = vmul.f32 %v1230_v59, %v8172_v6 }
 0x17c   : > { %v8469_v27 = vsel %vm1828_vm15, %v13332_v22, %v13331_v7  ;;  %v3805_v47 = vsel %vm8482_vm0, %v8322_v36, %v8453_v24  ;;  %v1444_v44 = vsub.f32 1.0, %v1443_v18  ;;  %v1243_v35 = vand.u32 2147483648, %v8370_v34 }
 0x17d   : > { %13335 = vst [vmem:[#allocation29_spill] sm:$0xff] %v8496_v25  ;;  %v8504_v31 = vadd.f32 %v7743_v12, %v856_v62  ;;  %v1453_v19 = vand.u32 2147483648, %v8402_v57  ;;  %v1236_v7 = vadd.f32 %v8426_v55, %v1235_v1  ;;  %vm1238_vm4 = vweird.f32 %v8426_v55  ;;  %v8523_v62 = vld [vmem:[%s12988_s6] ss:$0 sm:$0xff] }
 0x17e   : > { %1621 = vst.msk [vmem:[#allocation2 + $0xf0] sm:$0xff] %vm13241_vm3, %v8496_v25  ;;  %v1241_v6 = vand.u32 2147483647, %v8370_v34  ;;  %v8512_v22 = vpop.eup %6501  ;;  %v13337_v36 = vand.u32 2147483647, %v8225_v23  ;;  %v8526_v18 = vadd.f32 %v8523_v62, %v3422_v50  ;;  %vm1447_vm6 = vweird.f32 %v8402_v57 }
 0x17f   : > { %13336 = vst [vmem:[#allocation30_spill] sm:$0xff] %v8504_v31  ;;  %vm1448_vm7 = vweird.f32 %v8450_v11  ;;  %v1451_v1 = vand.u32 2147483647, %v8402_v57  ;;  %v8532_v23 = vadd.f32 %v8523_v62, %v3423_v2  ;;  %vm1237_vm8 = vweird.f32 %v8370_v34 }
 0x180   : > { %vm8516_vm5 = vcmp.eq.f32.partialorder %v13337_v36, 8.507059e+37  ;;  %13340 = vst [vmem:[#allocation31_spill] sm:$0xff] %v8526_v18  ;;  %v841_v9 = vmul.f32 %v7713_v58, %v8395_v10  ;;  %v1445_v36 = vmul.f32 %v8450_v11, %v1444_v44  ;;  %v1458_v50 = vmul.f32 %v8512_v22, %v8446_v53  ;;  %vm1239_vm9 = vmor %vm1237_vm8, %vm1238_vm4 }
 0x181   : > { %13341 = vst [vmem:[#allocation32_spill] sm:$0xff] %v8532_v23  ;;  %v1244_v42 = vor.u32 1.1754944e-38, %v1243_v35  ;;  %v6213_v57 = vmul.f32 -1.442695, %v8504_v31  ;;  %v8546_v2 = vmul.f32 %v8375_v56, %v8455_v3  ;;  %vm8548_vm10 = vmor %vm1447_vm6, %vm1448_vm7  ;;  %v1454_v58 = vor.u32 1.1754944e-38, %v1453_v19  ;;  %v8554_v35 = vpop.f32.mrf.mxu0 }
 0x182   : > { %v1240_v10 = vsel %vm1239_vm9, %v8426_v55, %v1236_v7  ;;  %vm1242_vm11 = vcmp.eq.f32.partialorder %v1241_v6, 8.507059e+37  ;;  %v1446_v44 = vadd.f32 %v8450_v11, %v1445_v36  ;;  %vm1452_vm12 = vcmp.eq.f32.partialorder %v1451_v1, 8.507059e+37 }
 0x183   : > { %v1459_v29 = vsub.f32 1.0, %v1458_v50  ;;  %v1245_v59 = vsel %vm1242_vm11, %v1244_v42, %v1240_v10  ;;  %v6222_v25 = vmul.f32 -1.442695, %v8526_v18  ;;  %v13049_v28 = vrot.slane %v8489_v14, 1 }
 0x184   : > { %v8559_v31 = vmul.f32 %v1245_v59, %v8204_v61  ;;  %v8562_v51 = vadd.f32 %v7743_v12, %v841_v9  ;;  %v6223_v55 = vmul.f32 -1.442695, %v8532_v23  ;;  %v13345_v19 = vrot.slane %v8493_v26, 1 }
 0x185   : > { %v1450_v42 = vsel %vm8548_vm10, %v8450_v11, %v1446_v44  ;;  %6503 = vpow2.f32 %v6213_v57  ;;  %v13047_v6 = vrot.slane %v8546_v2, 2  ;;  %vm1462_vm13 = vweird.f32 %v8446_v53  ;;  %v819_v44 = vpop.f32.mrf.mxu2 }
 0x186   : > { %13344 = vst [vmem:[#allocation33_spill] sm:$0xff] %v8559_v31  ;;  %v3098_v7 = vadd.f32 %v13345_v19, %v8316_v39  ;;  %v1455_v1 = vsel %vm1452_vm12, %v1454_v58, %v1450_v42  ;;  %v1468_v61 = vand.u32 2147483648, %v8446_v53  ;;  %v1460_v39 = vmul.f32 %v8512_v22, %v1459_v29 }
 0x187   : > { %1622 = vst.msk [vmem:[#allocation2 + $0x108] sm:$0xff] %vm13241_vm3, %v8559_v31  ;;  %v8577_v12 = vmul.f32 %v1455_v1, %v8293_v0  ;;  %vm1463_vm14 = vweird.f32 %v8512_v22  ;;  %v1466_v11 = vand.u32 2147483647, %v8446_v53  ;;  %v3810_v59 = vsel %vm8516_vm5, %v8353_v48, %v3805_v47 }
 0x188   : > { %6505 = vpow2.f32 %v6222_v25  ;;  %v8587_v9 = vmul.f32 %v8409_v21, %v8455_v3  ;;  %v6198_v36 = vmul.f32 -1.442695, %v8562_v51  ;;  %v13347_v0 = vrot.slane %v8413_v41, 1  ;;  %vm8617_vm2 = vmor %vm1462_vm13, %vm1463_vm14 }
 0x189   : > { %13346 = vst [vmem:[#allocation34_spill] sm:$0xff] %v8577_v12  ;;  %v13348_v50 = vrot.slane %v8115_v15, 1  ;;  %6507 = vpow2.f32 %v6223_v55  ;;  %v1938_v57 = vadd.f32 %v8469_v27, %v8140_v13  ;;  %v3372_v48 = vadd.f32 %v13047_v6, %v3098_v7  ;;  %v8630_v53 = vpop.f32.mrf.mxu0 }
 0x18a   : > { %1636 = vst.msk [vmem:[#allocation2 + $0x1e8] sm:$0xff] %vm13241_vm3, %v8577_v12  ;;  %v13349_v25 = vrot.slane %v8386_v32, 1  ;;  %v13350_v15 = vmov %v13347_v0  ;;  %v8613_v34 = vmul.f32 %v8105_v43, %v8455_v3  ;;  %v1469_v27 = vor.u32 1.1754944e-38, %v1468_v61 }
 0x18b   : > { %v2422_v29 = vsel %vm1828_vm15, %v13348_v50, %v13347_v0  ;;  %v8609_v24 = vadd.f32 %v13350_v15, %v8444_v54  ;;  %v6504_v58 = vpop.eup %6503  ;;  %v13354_v32 = vrot.slane %v8392_v17, 2  ;;  %v13355_v41 = vrot.slane %v8109_v37, 2 }
 0x18c   : > { %v8604_v47 = vadd.f32 %v13349_v25, %v8382_v16  ;;  %v8622_v16 = vmul.f32 %v3810_v59, %v8076_v5  ;;  %v1461_v10 = vadd.f32 %v8512_v22, %v1460_v39  ;;  %vm1467_vm0 = vcmp.eq.f32.partialorder %v1466_v11, 8.507059e+37 }
 0x18d   : > { %v2093_v54 = vsel %vm727_vm1, %v13355_v41, %v13354_v32  ;;  %v1940_v55 = vadd.f32 %v13049_v28, %v8338_v20  ;;  %v13048_v19 = vrot.slane %v8587_v9, 1  ;;  %v2517_v5 = vadd.f32 %v2422_v29, %v8153_v63  ;;  %v8652_v63 = vld [vmem:[%s12984_s2] ss:$0 sm:$0xff] }
 0x18e   : > { %13353 = vst [vmem:[#allocation35_spill] sm:$0xff] %v8622_v16  ;;  %6509 = vpow2.f32 %v6198_v36  ;;  %v2212_v7 = vadd.f32 %v2093_v54, %v1938_v57  ;;  %v2262_v37 = vmul.f32 %v8236_v4, %v8455_v3  ;;  %v3424_v42 = vmul.f32 %v8475_v33, %v3372_v48  ;;  %v6506_v61 = vpop.eup %6505  ;;  %v1664_v32 = vld [vmem:[#allocation2 + $0xc0] sm:$0xff] }
 0x18f   : > { %v1465_v1 = vsel %vm8617_vm2, %v8512_v22, %v1461_v10  ;;  %v8645_v39 = vmul.f32 %v8303_v49, %v8455_v3  ;;  %v8647_v11 = vadd.f32 1.0, %v6504_v58  ;;  %v857_v59 = vmul.f32 %v8652_v63, %v819_v44  ;;  %v6508_v36 = vpop.eup %6507  ;;  %v1663_v58 = vld [vmem:[#allocation2 + $0xb8] sm:$0xff]  ;;  %v8692_v44 = vld [vmem:[%s12985_s3] ss:$0 sm:$0xff] }
 0x190   : > { %v1470_v20 = vsel %vm1467_vm0, %v1469_v27, %v1465_v1  ;;  %v8657_v0 = vmul.f32 %v8136_v52, %v8455_v3  ;;  %v13046_v22 = vrot.slane %v8613_v34, 2  ;;  %v13356_v50 = vrot.slane %v8419_v60, 2 }
 0x191   : > { %v13357_v29 = vrot.slane %v8119_v8, 2  ;;  %v8666_v48 = vmul.f32 %v1470_v20, %v8368_v30  ;;  %v2519_v15 = vadd.f32 %v13048_v19, %v8298_v38  ;;  %v2841_v27 = vmul.f32 %v8256_v45, %v8455_v3 }
 0x192   : > { %v8674_v41 = vadd.f32 1.0, %v6506_v61  ;;  %v2214_v8 = vadd.f32 %v13046_v22, %v1940_v55  ;;  %v8678_v54 = vadd.f32 %v2262_v37, %v2212_v7  ;;  %v8681_v30 = vadd.f32 %v8523_v62, %v3424_v42  ;;  %v13364_v37 = vld [vmem:[#allocation23_spill] sm:$0xff] }
 0x193   : > { %v2670_v57 = vsel %vm727_vm1, %v13357_v29, %v13356_v50  ;;  %13358 = vst [vmem:[#allocation36_spill] sm:$0xff] %v8666_v48  ;;  %v8685_v10 = vadd.f32 1.0, %v6508_v36  ;;  %v13045_v3 = vrot.slane %v8645_v39, 2  ;;  %6511 = vrcp.f32 %v8647_v11 }
 0x194   : > { %v2791_v13 = vadd.f32 %v2670_v57, %v2517_v5  ;;  %13359 = vst [vmem:[#allocation37_spill] sm:$0xff] %v8674_v41  ;;  %v6510_v38 = vpop.eup %6509  ;;  %v8695_v55 = vadd.f32 %v8692_v44, %v857_v59  ;;  %v13362_v62 = vrot.slane %v8287_v40, 2  ;;  %v13363_v5 = vrot.slane %v8392_v17, 2 }
 0x195   : > { %13360 = vst [vmem:[#allocation38_spill] sm:$0xff] %v8681_v30  ;;  %v13365_v42 = vrot.slane %v13364_v37, 2  ;;  %v13366_v1 = vmov %v13356_v50  ;;  %v8708_v20 = vmul.f32 %v8375_v56, %v1663_v58  ;;  %v2264_v36 = vmul.f32 %v8236_v4, %v1664_v32  ;;  %v789_v50 = vpop.f32.mrf.mxu0 }
 0x196   : > { %1637 = vst.msk [vmem:[#allocation2 + $0x1f0] sm:$0xff] %vm13241_vm3, %v8666_v48  ;;  %v2095_v7 = vsel %vm727_vm1, %v13363_v5, %v13362_v62  ;;  %v2793_v59 = vadd.f32 %v13045_v3, %v2519_v15  ;;  %v8713_v40 = vadd.f32 %v2841_v27, %v2791_v13  ;;  %v2843_v17 = vmul.f32 %v8256_v45, %v1664_v32  ;;  %v8726_v5 = vld [vmem:[#allocation2 + $0xb0] sm:$0xff] }
 0x197   : > { %13361 = vst [vmem:[#allocation39_spill] sm:$0xff] %v8685_v10  ;;  %v2672_v61 = vsel %vm727_vm1, %v13366_v1, %v13365_v42  ;;  %v842_v29 = vmul.f32 %v8652_v63, %v8459_v46  ;;  %6513 = vrcp.f32 %v8674_v41  ;;  %v6224_v60 = vmul.f32 -1.442695, %v8681_v30 }
 0x198   : > { %v8721_v57 = vmul.f32 %v8105_v43, %v1663_v58  ;;  %v8723_v62 = vadd.f32 1.0, %v6510_v38  ;;  %6515 = vrcp.f32 %v8685_v10  ;;  %v8729_v15 = vadd.f32 %v2095_v7, %v8604_v47 }
 0x199   : > { %v8732_v13 = vadd.f32 %v2672_v61, %v8609_v24  ;;  %v6214_v46 = vmul.f32 -1.442695, %v8695_v55  ;;  %v8737_v37 = vmul.f32 %v8136_v52, %v1664_v32  ;;  %v8739_v42 = vadd.f32 %v2264_v36, %v2214_v8  ;;  %v6512_v38 = vpop.eup %6511 }
 0x19a   : > { %6517 = vrcp.f32 %v8723_v62  ;;  %v8742_v1 = vadd.f32 %v2843_v17, %v2793_v59  ;;  %v8745_v47 = vmul.f32 %v8303_v49, %v1663_v58  ;;  %v8748_v24 = vadd.f32 %v8692_v44, %v842_v29 }
 0x19b   : > { %13367 = vst [vmem:[#allocation23_spill] sm:$0xff] %v8737_v37  ;;  %6519 = vpow2.f32 %v6214_v46  ;;  %v8752_v7 = vmul.f32 %v8136_v52, %v8726_v5  ;;  %v1473_v8 = vmul.f32 %v6512_v38, %v8647_v11  ;;  %vm1477_vm4 = vweird.f32 %v8647_v11 }
 0x19c   : > { %13368 = vst [vmem:[#allocation40_spill] sm:$0xff] %v8739_v42  ;;  %6521 = vpow2.f32 %v6224_v60  ;;  %v1483_v61 = vand.u32 2147483648, %v8647_v11  ;;  %v6199_v58 = vmul.f32 -1.442695, %v8748_v24  ;;  %v843_v36 = vmul.f32 %v8652_v63, %v8554_v35 }
 0x19d   : > { %13369 = vst [vmem:[#allocation41_spill] sm:$0xff] %v8742_v1  ;;  %v8761_v59 = vpop.eup %6513  ;;  %v1474_v17 = vsub.f32 1.0, %v1473_v8  ;;  %vm1478_vm5 = vweird.f32 %v6512_v38  ;;  %v1481_v52 = vand.u32 2147483647, %v8647_v11  ;;  %v844_v29 = vmul.f32 %v8652_v63, %v8630_v53  ;;  %v792_v60 = vpop.f32.mrf.mxu0  ;;  %v13372_v8 = vld [vmem:[#allocation18_spill] sm:$0xff] }
 0x19e   : > { %13370 = vst [vmem:[#allocation42_spill] sm:$0xff] %v8761_v59  ;;  %v8766_v46 = vpop.eup %6515  ;;  %6523 = vpow2.f32 %v6199_v58  ;;  %v8769_v25 = vadd.f32 %v8692_v44, %v843_v36  ;;  %v845_v32 = vmul.f32 %v8652_v63, %v789_v50  ;;  %v846_v35 = vmul.f32 %v8652_v63, %v792_v60  ;;  %vm8787_vm6 = vmor %vm1477_vm4, %vm1478_vm5 }
 0x19f   : > { %13371 = vst [vmem:[#allocation43_spill] sm:$0xff] %v8766_v46  ;;  %v8775_v22 = vmul.f32 %v13372_v8, %v8726_v5  ;;  %v8779_v6 = vmul.f32 %v8105_v43, %v8726_v5  ;;  %v1475_v53 = vmul.f32 %v6512_v38, %v1474_v17  ;;  %v8782_v27 = vadd.f32 %v8692_v44, %v844_v29 }
 0x1a0   : > { %v6518_v3 = vpop.eup %6517  ;;  %v1484_v36 = vor.u32 1.1754944e-38, %v1483_v61  ;;  %v6200_v8 = vmul.f32 -1.442695, %v8769_v25  ;;  %v8794_v43 = vadd.f32 %v8692_v44, %v845_v32  ;;  %vm1482_vm7 = vcmp.eq.f32.partialorder %v1481_v52, 8.507059e+37 }
 0x1a1   : > { %v6520_v58 = vpop.eup %6519  ;;  %v1248_v60 = vmul.f32 %v6518_v3, %v8723_v62  ;;  %v1476_v29 = vadd.f32 %v6512_v38, %v1475_v53  ;;  %v6201_v11 = vmul.f32 -1.442695, %v8782_v27  ;;  %v8803_v61 = vadd.f32 %v8692_v44, %v846_v35 }
 0x1a2   : > { %v8796_v17 = vpop.eup %6521  ;;  %v8798_v19 = vadd.f32 1.0, %v6520_v58  ;;  %6525 = vpow2.f32 %v6200_v8  ;;  %v6202_v12 = vmul.f32 -1.442695, %v8794_v43  ;;  %v1256_v32 = vand.u32 2147483647, %v8723_v62  ;;  %v13375_v8 = vld [vmem:[#allocation30_spill] sm:$0xff] }
 0x1a3   : > { %v1249_v28 = vsub.f32 1.0, %v1248_v60  ;;  %v1480_v48 = vsel %vm8787_vm6, %v6512_v38, %v1476_v29  ;;  %v1258_v31 = vand.u32 2147483648, %v8723_v62  ;;  %vm1253_vm8 = vweird.f32 %v6518_v3 }
 0x1a4   : > { %6527 = vrcp.f32 %v8798_v19  ;;  %v6524_v52 = vpop.eup %6523  ;;  %v1485_v53 = vsel %vm1482_vm7, %v1484_v36, %v1480_v48  ;;  %v2263_v60 = vmul.f32 %v8236_v4, %v8726_v5  ;;  %v8819_v50 = vmul.f32 %v8409_v21, %v8726_v5  ;;  %v13377_v4 = vld [vmem:[#allocation25_spill] sm:$0xff] }
 0x1a5   : > { %v1250_v58 = vmul.f32 %v6518_v3, %v1249_v28  ;;  %6529 = vpow2.f32 %v6201_v11  ;;  %v8813_v35 = vmul.f32 %v1485_v53, %v13375_v8  ;;  %v8815_v16 = vadd.f32 1.0, %v6524_v52  ;;  %v794_v38 = vpop.f32.mrf.mxu0 }
 0x1a6   : > { %6531 = vpow2.f32 %v6202_v12  ;;  %vm1252_vm9 = vweird.f32 %v8723_v62  ;;  %v6203_v28 = vmul.f32 -1.442695, %v8803_v61  ;;  %v2842_v48 = vmul.f32 %v8256_v45, %v8726_v5 }
 0x1a7   : > { %13376 = vst [vmem:[#allocation18_spill] sm:$0xff] %v8813_v35  ;;  %v1251_v29 = vadd.f32 %v6518_v3, %v1250_v58  ;;  %v2936_v36 = vmul.f32 %v13377_v4, %v8726_v5  ;;  %vm1254_vm10 = vmor %vm1252_vm9, %vm1253_vm8  ;;  %v1259_v12 = vor.u32 1.1754944e-38, %v1258_v31  ;;  %6533 = vrcp.f32 %v8815_v16 }
 0x1a8   : > { %1638 = vst.msk [vmem:[#allocation2 + $0x208] sm:$0xff] %vm13241_vm3, %v8813_v35  ;;  %v6526_v11 = vpop.eup %6525  ;;  %v8832_v52 = vmul.f32 %v8303_v49, %v8726_v5  ;;  %vm1257_vm11 = vcmp.eq.f32.partialorder %v1256_v32, 8.507059e+37  ;;  %6535 = vpow2.f32 %v6203_v28  ;;  %v13057_v45 = vrot.slane %v8775_v22, 1 }
 0x1a9   : > { %v1255_v62 = vsel %vm1254_vm10, %v6518_v3, %v1251_v29  ;;  %v8836_v30 = vadd.f32 1.0, %v6526_v11  ;;  %v8839_v31 = vadd.f32 %v2263_v60, %v8729_v15  ;;  %v8843_v23 = vmul.f32 %v8375_v56, %v8726_v5 }
 0x1aa   : > { %v6528_v53 = vpop.eup %6527  ;;  %v1260_v8 = vsel %vm1257_vm11, %v1259_v12, %v1255_v62  ;;  %v2890_v12 = vadd.f32 %v2842_v48, %v8732_v13  ;;  %v3003_v11 = vrot.slane %v2936_v36, 1  ;;  %vm1492_vm12 = vweird.f32 %v8798_v19 }
 0x1ab   : > { %v6530_v35 = vpop.eup %6529  ;;  %v8846_v3 = vmul.f32 %v1260_v8, %v8562_v51  ;;  %v1488_v32 = vmul.f32 %v6528_v53, %v8798_v19  ;;  %vm1493_vm13 = vweird.f32 %v6528_v53  ;;  %6537 = vrcp.f32 %v8836_v30 }
 0x1ac   : > { %v6532_v29 = vpop.eup %6531  ;;  %v8855_v5 = vadd.f32 1.0, %v6530_v35  ;;  %v13379_v60 = vrot.slane %v8489_v14, 1  ;;  %v1498_v36 = vand.u32 2147483648, %v8798_v19  ;;  %v1496_v28 = vand.u32 2147483647, %v8798_v19  ;;  %vm8891_vm14 = vmor %vm1492_vm12, %vm1493_vm13 }
 0x1ad   : > { %13378 = vst [vmem:[#allocation30_spill] sm:$0xff] %v8846_v3  ;;  %v1489_v15 = vsub.f32 1.0, %v1488_v32  ;;  %v8857_v51 = vpop.eup %6533  ;;  %v8868_v62 = vadd.f32 1.0, %v6532_v29  ;;  %v8870_v8 = vpop.f32.mrf.mxu0  ;;  %v13382_v29 = vrot.slane %v8493_v26, 1  ;;  %v8886_v18 = vadd.f32 %v3003_v11, %v2890_v12 }
 0x1ae   : > { %1623 = vst.msk [vmem:[#allocation2 + $0x110] sm:$0xff] %vm13241_vm3, %v8846_v3  ;;  %v8864_v13 = vsel %vm1828_vm15, %v13379_v60, %v13057_v45  ;;  %v6536_v32 = vpop.eup %6535  ;;  %v1263_v14 = vmul.f32 %v8857_v51, %v8815_v16  ;;  %v13380_v60 = vrot.slane %v8819_v50, 1  ;;  %v13381_v45 = vrot.slane %v8587_v9, 1 }
 0x1af   : > { %v1490_v58 = vmul.f32 %v6528_v53, %v1489_v15  ;;  %v3004_v3 = vsel %vm1828_vm15, %v13382_v29, %v3003_v11  ;;  %v847_v35 = vmul.f32 %v8652_v63, %v794_v38  ;;  %v8897_v9 = vadd.f32 1.0, %v8796_v17 }
 0x1b0   : > { %v8881_v48 = vsel %vm1828_vm15, %v13381_v45, %v13380_v60  ;;  %v1271_v60 = vand.u32 2147483647, %v8815_v16  ;;  %6539 = vrcp.f32 %v8855_v5  ;;  %v1499_v26 = vor.u32 1.1754944e-38, %v1498_v36 }
 0x1b1   : > { %13385 = vst [vmem:[#allocation25_spill] sm:$0xff] %v8897_v9  ;;  %v1491_v45 = vadd.f32 %v6528_v53, %v1490_v58  ;;  %v1264_v12 = vsub.f32 1.0, %v1263_v14  ;;  %6541 = vrcp.f32 %v8868_v62  ;;  %v8902_v11 = vadd.f32 1.0, %v6536_v32  ;;  %v8904_v19 = vpop.eup %6537 }
 0x1b2   : > { %v8907_v29 = vadd.f32 %v3004_v3, %v8713_v40  ;;  %vm1497_vm2 = vcmp.eq.f32.partialorder %v1496_v28, 8.507059e+37  ;;  %v1273_v38 = vand.u32 2147483648, %v8815_v16  ;;  %v1286_v58 = vand.u32 2147483647, %v8836_v30 }
 0x1b3   : > { %v1495_v17 = vsel %vm8891_vm14, %v6528_v53, %v1491_v45  ;;  %v1288_v36 = vand.u32 2147483648, %v8836_v30  ;;  %6543 = vrcp.f32 %v8902_v11  ;;  %v8916_v32 = vadd.f32 %v8692_v44, %v847_v35 }
 0x1b4   : > { %v13387_v14 = vrot.slane %v8708_v20, 2  ;;  %v13388_v40 = vrot.slane %v8843_v23, 2  ;;  %vm1267_vm0 = vweird.f32 %v8815_v16  ;;  %vm8926_vm4 = vcmp.eq.f32.partialorder %v1271_v60, 8.507059e+37 }
 0x1b5   : > { %13386 = vst [vmem:[#allocation44_spill] sm:$0xff] %v8916_v32  ;;  %v1303_v28 = vand.u32 2147483648, %v8855_v5  ;;  %v1500_v15 = vsel %vm1497_vm2, %v1499_v26, %v1495_v17  ;;  %v1265_v45 = vmul.f32 %v8857_v51, %v1264_v12  ;;  %v1278_v35 = vmul.f32 %v8904_v19, %v8836_v30  ;;  %v8935_v46 = vpop.f32.mrf.mxu0 }
 0x1b6   : > { %v8923_v3 = vsel %vm727_vm1, %v13388_v40, %v13387_v14  ;;  %v1301_v20 = vand.u32 2147483647, %v8855_v5  ;;  %v8937_v14 = vpop.eup %6539  ;;  %v1274_v40 = vor.u32 1.1754944e-38, %v1273_v38  ;;  %vm1282_vm5 = vweird.f32 %v8836_v30 }
 0x1b7   : > { %v1316_v60 = vand.u32 2147483647, %v8868_v62  ;;  %v1318_v10 = vand.u32 2147483648, %v8868_v62  ;;  %v8942_v59 = vpop.eup %6541  ;;  %vm1268_vm6 = vweird.f32 %v8857_v51  ;;  %vm8945_vm7 = vcmp.eq.f32.partialorder %v1286_v58, 8.507059e+37 }
 0x1b8   : > { %v1289_v12 = vor.u32 1.1754944e-38, %v1288_v36  ;;  %v6204_v17 = vmul.f32 -1.442695, %v8916_v32  ;;  %v8951_v41 = vmul.f32 %v1500_v15, %v8695_v55  ;;  %vm1297_vm8 = vweird.f32 %v8855_v5  ;;  %vm1269_vm12 = vmor %vm1267_vm0, %vm1268_vm6 }
 0x1b9   : > { %v1304_v38 = vor.u32 1.1754944e-38, %v1303_v28  ;;  %vm1312_vm9 = vweird.f32 %v8868_v62  ;;  %v6544_v1 = vpop.eup %6543  ;;  %v1266_v42 = vadd.f32 %v8857_v51, %v1265_v45  ;;  %v1279_v37 = vsub.f32 1.0, %v1278_v35 }
 0x1ba   : > { %13393 = vst [vmem:[#allocation45_spill] sm:$0xff] %v8951_v41  ;;  %vm1283_vm10 = vweird.f32 %v8904_v19  ;;  %v1293_v58 = vmul.f32 %v8937_v14, %v8855_v5  ;;  %vm8959_vm11 = vcmp.eq.f32.partialorder %v1301_v20, 8.507059e+37  ;;  %vm1298_vm13 = vweird.f32 %v8937_v14 }
 0x1bb   : > { %1639 = vst.msk [vmem:[#allocation2 + $0x210] sm:$0xff] %vm13241_vm3, %v8951_v41  ;;  %v1308_v55 = vmul.f32 %v8942_v59, %v8868_v62  ;;  %vm8972_vm14 = vcmp.eq.f32.partialorder %v1316_v60, 8.507059e+37  ;;  %v1319_v15 = vor.u32 1.1754944e-38, %v1318_v10  ;;  %v1323_v45 = vmul.f32 %v6544_v1, %v8902_v11  ;;  %vm1284_vm6 = vmor %vm1282_vm5, %vm1283_vm10 }
 0x1bc   : > { %v1270_v35 = vsel %vm1269_vm12, %v8857_v51, %v1266_v42  ;;  %v1280_v20 = vmul.f32 %v8904_v19, %v1279_v37  ;;  %v1294_v41 = vsub.f32 1.0, %v1293_v58  ;;  %vm1313_vm2 = vweird.f32 %v8942_v59 }
 0x1bd   : > { %v1275_v16 = vsel %vm8926_vm4, %v1274_v40, %v1270_v35  ;;  %v1309_v32 = vsub.f32 1.0, %v1308_v55  ;;  %v1324_v49 = vsub.f32 1.0, %v1323_v45  ;;  %vm1328_vm0 = vweird.f32 %v6544_v1  ;;  %vm1299_vm4 = vmor %vm1297_vm8, %vm1298_vm13  ;;  %v802_v30 = vpop.f32.mrf.mxu0 }
 0x1be   : > { %v8983_v60 = vmul.f32 %v1275_v16, %v8748_v24  ;;  %v1281_v10 = vadd.f32 %v8904_v19, %v1280_v20  ;;  %v1295_v56 = vmul.f32 %v8937_v14, %v1294_v41  ;;  %v1331_v42 = vand.u32 2147483647, %v8902_v11  ;;  %vm1314_vm10 = vmor %vm1312_vm9, %vm1313_vm2 }
 0x1bf   : > { %v1310_v37 = vmul.f32 %v8942_v59, %v1309_v32  ;;  %v1325_v51 = vmul.f32 %v6544_v1, %v1324_v49  ;;  %v1333_v53 = vand.u32 2147483648, %v8902_v11  ;;  %6545 = vpow2.f32 %v6204_v17 }
 0x1c0   : > { %13398 = vst [vmem:[#allocation46_spill] sm:$0xff] %v8983_v60  ;;  %v1285_v24 = vsel %vm1284_vm6, %v8904_v19, %v1281_v10  ;;  %v1296_v41 = vadd.f32 %v8937_v14, %v1295_v56  ;;  %vm1327_vm5 = vweird.f32 %v8902_v11  ;;  %v848_v49 = vmul.f32 %v8652_v63, %v8870_v8 }
 0x1c1   : > { %1624 = vst.msk [vmem:[#allocation2 + $0x128] sm:$0xff] %vm13241_vm3, %v8983_v60  ;;  %v1290_v32 = vsel %vm8945_vm7, %v1289_v12, %v1285_v24  ;;  %v1311_v40 = vadd.f32 %v8942_v59, %v1310_v37  ;;  %v1326_v56 = vadd.f32 %v6544_v1, %v1325_v51  ;;  %vm1332_vm12 = vcmp.eq.f32.partialorder %v1331_v42, 8.507059e+37  ;;  %vm1329_vm8 = vmor %vm1327_vm5, %vm1328_vm0 }
 0x1c2   : > { %v9013_v5 = vmul.f32 %v1290_v32, %v8769_v25  ;;  %v1300_v11 = vsel %vm1299_vm4, %v8937_v14, %v1296_v41  ;;  %v1334_v8 = vor.u32 1.1754944e-38, %v1333_v53  ;;  %v9018_v19 = vadd.f32 %v8692_v44, %v848_v49 }
 0x1c3   : > { %v1305_v26 = vsel %vm8959_vm11, %v1304_v38, %v1300_v11  ;;  %v1315_v12 = vsel %vm1314_vm10, %v8942_v59, %v1311_v40  ;;  %v1330_v62 = vsel %vm1329_vm8, %v6544_v1, %v1326_v56  ;;  %v849_v17 = vmul.f32 %v8652_v63, %v8935_v46  ;;  %v1665_v1 = vld [vmem:[#allocation2 + $0xc8] sm:$0xff] }
 0x1c4   : > { %13399 = vst [vmem:[#allocation47_spill] sm:$0xff] %v9013_v5  ;;  %v9028_v25 = vmul.f32 %v1305_v26, %v8782_v27  ;;  %v1320_v14 = vsel %vm8972_vm14, %v1319_v15, %v1315_v12  ;;  %v1335_v58 = vsel %vm1332_vm12, %v1334_v8, %v1330_v62  ;;  %v6205_v55 = vmul.f32 -1.442695, %v9018_v19  ;;  %v9132_v26 = vld [vmem:[%s12986_s4 + $0x3] ss:$0 sm:$0xff] }
 0x1c5   : > { %1625 = vst.msk [vmem:[#allocation2 + $0x130] sm:$0xff] %vm13241_vm3, %v9013_v5  ;;  %v6546_v36 = vpop.eup %6545  ;;  %v3374_v59 = vadd.f32 %v8923_v3, %v8886_v18  ;;  %v9036_v38 = vmul.f32 %v1320_v14, %v8794_v43  ;;  %v9039_v46 = vmul.f32 %v1335_v58, %v8803_v61  ;;  %v850_v27 = vmul.f32 %v8652_v63, %v802_v30 }
 0x1c6   : > { %13400 = vst [vmem:[#allocation48_spill] sm:$0xff] %v9028_v25  ;;  %v13403_v28 = vrot.slane %v8775_v22, 1  ;;  %v13404_v45 = vrot.slane %v8843_v23, 2  ;;  %v13405_v35 = vrot.slane %v8546_v2, 2  ;;  %v2676_v18 = vrot.slane %v8745_v47, 2 }
 0x1c7   : > { %13401 = vst [vmem:[#allocation49_spill] sm:$0xff] %v9036_v38  ;;  %v9053_v43 = vadd.f32 1.0, %v6546_v36  ;;  %v13406_v61 = vrot.slane %v8819_v50, 1  ;;  %v1941_v23 = vadd.f32 %v8864_v13, %v8657_v0  ;;  %6547 = vpow2.f32 %v6205_v55  ;;  %v9066_v2 = vld [vmem:[%s12986_s4 + $0x1] ss:$0 sm:$0xff]  ;;  %v9078_v13 = vld [vmem:[#allocation2 + $0xd8] sm:$0xff] }
 0x1c8   : > { %13402 = vst [vmem:[#allocation50_spill] sm:$0xff] %v9039_v46  ;;  %v1942_v15 = vadd.f32 %v13403_v28, %v8752_v7  ;;  %v3252_v20 = vsel %vm727_vm1, %v13405_v35, %v13404_v45  ;;  %v9069_v47 = vmul.f32 %v9066_v2, %v1665_v1  ;;  %v13407_v7 = vrot.slane %v8779_v6, 2  ;;  %v9123_v6 = vld [vmem:[%s12986_s4 + $0x2] ss:$0 sm:$0xff]  ;;  %v13418_v55 = vld [vmem:[#allocation22_spill] sm:$0xff] }
 0x1c9   : > { %1626 = vst.msk [vmem:[#allocation2 + $0x148] sm:$0xff] %vm13241_vm3, %v9028_v25  ;;  %v2521_v3 = vadd.f32 %v13406_v61, %v8839_v31  ;;  %v3373_v22 = vadd.f32 %v3252_v20, %v8907_v29  ;;  %v13408_v50 = vrot.slane %v8613_v34, 2  ;;  %v2520_v0 = vadd.f32 %v8881_v48, %v8678_v54 }
 0x1ca   : > { %1627 = vst.msk [vmem:[#allocation2 + $0x150] sm:$0xff] %vm13241_vm3, %v9036_v38  ;;  %v9083_v29 = vadd.f32 %v8692_v44, %v849_v17  ;;  %6549 = vrcp.f32 %v8897_v9  ;;  %v9087_v16 = vmul.f32 %v8475_v33, %v3374_v59  ;;  %v13410_v34 = vrot.slane %v8832_v52, 2  ;;  %v9577_v9 = vld [vmem:[#allocation2 + $0x140] sm:$0xff] }
 0x1cb   : > { %v2098_v31 = vsel %vm727_vm1, %v13408_v50, %v13407_v7  ;;  %1628 = vst.msk [vmem:[#allocation2 + $0x168] sm:$0xff] %vm13241_vm3, %v9039_v46  ;;  %v13411_v10 = vrot.slane %v8645_v39, 2  ;;  %v9095_v54 = vadd.f32 %v8692_v44, %v850_v27  ;;  %v9098_v48 = vmul.f32 %v8409_v21, %v1665_v1  ;;  %v804_v39 = vpop.f32.mrf.mxu0 }
 0x1cc   : > { %13409 = vst [vmem:[#allocation51_spill] sm:$0xff] %v9087_v16  ;;  %v9101_v37 = vmul.f32 %v13377_v4, %v1665_v1  ;;  %v13412_v51 = vrot.slane %v8721_v57, 2  ;;  %v13413_v53 = vmov %v13407_v7  ;;  %6551 = vrcp.f32 %v9053_v43  ;;  %v13416_v4 = vld [vmem:[#allocation27_spill] sm:$0xff] }
 0x1cd   : > { %v2675_v42 = vsel %vm727_vm1, %v13411_v10, %v13410_v34  ;;  %v9110_v41 = vmul.f32 %v8475_v33, %v3373_v22  ;;  %v2215_v49 = vadd.f32 %v2098_v31, %v1941_v23  ;;  %v13415_v30 = vmov %v13410_v34  ;;  %v6548_v52 = vpop.eup %6547  ;;  %13417 = vst [vmem:[#allocation27_spill] sm:$0xff] %v9132_v26  ;;  %v9174_v31 = vld [vmem:[#allocation2 + $0xe0] sm:$0xff]  ;;  %v13421_v34 = vld [vmem:[#allocation40_spill] sm:$0xff] }
 0x1ce   : > { %v2100_v24 = vsel %vm727_vm1, %v13413_v53, %v13412_v51  ;;  %v2677_v32 = vsel %vm727_vm1, %v13415_v30, %v2676_v18  ;;  %v9117_v40 = vmul.f32 %v13416_v4, %v9078_v13  ;;  %v13076_v57 = vrot.slane %v9069_v47, 1  ;;  %v13422_v51 = vld [vmem:[#allocation41_spill] sm:$0xff]  ;;  %v13423_v18 = vld [vmem:[#allocation44_spill] sm:$0xff]  ;;  %13476 = vst [vmem:[#allocation88_spill] sm:$0xff] %v9577_v9 }
 0x1cf   : > { %13414 = vst [vmem:[#allocation52_spill] sm:$0xff] %v9110_v41  ;;  %v9126_v56 = vmul.f32 %v9123_v6, %v1665_v1  ;;  %v2794_v11 = vadd.f32 %v2675_v42, %v2520_v0  ;;  %v6206_v8 = vmul.f32 -1.442695, %v9083_v29  ;;  %v2265_v12 = vmul.f32 %v9132_v26, %v1665_v1 }
 0x1d0   : > { %v9135_v62 = vadd.f32 %v2100_v24, %v1942_v15  ;;  %v6207_v17 = vmul.f32 -1.442695, %v9095_v54  ;;  %v851_v14 = vmul.f32 %v8652_v63, %v804_v39  ;;  %v13075_v58 = vrot.slane %v9098_v48, 1  ;;  %v9146_v28 = vpop.eup %6549  ;;  %v9151_v15 = vld [vmem:[%s12986_s4] ss:$0 sm:$0xff] }
 0x1d1   : > { %v9141_v36 = vmul.f32 %v13418_v55, %v1665_v1  ;;  %v13074_v59 = vrot.slane %v9101_v37, 1  ;;  %v9144_v27 = vadd.f32 %v2677_v32, %v2521_v3  ;;  %13419 = vst [vmem:[#allocation22_spill] sm:$0xff] %v9146_v28  ;;  %v9154_v45 = vmul.f32 %v9151_v15, %v1665_v1  ;;  %v9159_v63 = vld [vmem:[%s12986_s4 + $0x6] ss:$0 sm:$0xff]  ;;  %v9582_v41 = vld [vmem:[#allocation2 + $0x150] sm:$0xff] }
 0x1d2   : > { %v2844_v35 = vmul.f32 %v9159_v63, %v1665_v1  ;;  %v9163_v20 = vmul.f32 %v13416_v4, %v1665_v1  ;;  %v6552_v61 = vpop.eup %6551  ;;  %v13420_v3 = vld [vmem:[#allocation23_spill] sm:$0xff]  ;;  %v13072_v23 = vrot.slane %v9126_v56, 2  ;;  %v9170_v7 = vadd.f32 1.0, %v6548_v52  ;;  %13478 = vst [vmem:[#allocation90_spill] sm:$0xff] %v9582_v41 }
 0x1d3   : > { %v1943_v22 = vadd.f32 %v13076_v57, %v13420_v3  ;;  %6553 = vpow2.f32 %v6206_v8  ;;  %v9172_v50 = vadd.f32 %v2265_v12, %v2215_v49  ;;  %v1338_v0 = vmul.f32 %v6552_v61, %v9053_v43  ;;  %v9191_v49 = vld [vmem:[#allocation2 + $0xd0] sm:$0xff] }
 0x1d4   : > { %6555 = vpow2.f32 %v6207_v17  ;;  %v9178_v1 = vadd.f32 %v8692_v44, %v851_v14  ;;  %v2522_v10 = vadd.f32 %v13075_v58, %v13421_v34  ;;  %v13071_v42 = vrot.slane %v9141_v36, 2 }
 0x1d5   : > { %v3101_v53 = vadd.f32 %v13074_v59, %v13422_v51  ;;  %6557 = vrcp.f32 %v9170_v7  ;;  %v9188_v24 = vadd.f32 %v2844_v35, %v2794_v11  ;;  %v13073_v39 = vrot.slane %v9163_v20, 2 }
 0x1d6   : > { %v1339_v44 = vsub.f32 1.0, %v1338_v0  ;;  %v6208_v30 = vmul.f32 -1.442695, %v9178_v1  ;;  %v9196_v32 = vadd.f32 %v13072_v23, %v1943_v22  ;;  %v9200_v4 = vmul.f32 %v9132_v26, %v9174_v31 }
 0x1d7   : > { %v9204_v8 = vmul.f32 %v9159_v63, %v9174_v31  ;;  %v1348_v11 = vand.u32 2147483648, %v9053_v43  ;;  %vm1343_vm7 = vweird.f32 %v6552_v61  ;;  %v1346_v12 = vand.u32 2147483647, %v9053_v43 }
 0x1d8   : > { %v1340_v52 = vmul.f32 %v6552_v61, %v1339_v44  ;;  %6559 = vpow2.f32 %v6208_v30  ;;  %v9210_v14 = vadd.f32 %v13071_v42, %v2522_v10  ;;  %v3375_v55 = vadd.f32 %v13073_v39, %v3101_v53 }
 0x1d9   : > { %v6554_v17 = vpop.eup %6553  ;;  %v1734_v35 = vmul.f32 %v9151_v15, %v9191_v49  ;;  %v1777_v3 = vmul.f32 %v9066_v2, %v9191_v49  ;;  %v9220_v0 = vmul.f32 %v9123_v6, %v9191_v49  ;;  %vm1342_vm9 = vweird.f32 %v9053_v43  ;;  %v6365_v43 = vld [vmem:[%s12989_s7] sm:$0xff] }
 0x1da   : > { %v6556_v22 = vpop.eup %6555  ;;  %v1341_v34 = vadd.f32 %v6552_v61, %v1340_v52  ;;  %v9223_v51 = vadd.f32 1.0, %v6554_v17  ;;  %v2266_v53 = vmul.f32 %v9132_v26, %v9191_v49  ;;  %v2358_v44 = vmul.f32 %v8409_v21, %v9191_v49  ;;  %vm1344_vm11 = vmor %vm1342_vm9, %vm1343_vm7  ;;  %v9240_v21 = vld [vmem:[%s12986_s4 + $0x5] ss:$0 sm:$0xff]  ;;  %4726 = vmatpush.bf16.msra.mxu1 %v6365_v43 }
 0x1db   : > { %v6558_v10 = vpop.eup %6557  ;;  %v1349_v30 = vor.u32 1.1754944e-38, %v1348_v11  ;;  %v9230_v42 = vadd.f32 1.0, %v6556_v22  ;;  %vm1347_vm13 = vcmp.eq.f32.partialorder %v1346_v12, 8.507059e+37  ;;  %v1848_v17 = vrot.slane %v1777_v3, 1 }
 0x1dc   : > { %v1345_v23 = vsel %vm1344_vm11, %v6552_v61, %v1341_v34  ;;  %v1353_v52 = vmul.f32 %v6558_v10, %v9170_v7  ;;  %6561 = vrcp.f32 %v9223_v51  ;;  %v9244_v11 = vmul.f32 %v9240_v21, %v9191_v49  ;;  %v9249_v61 = vld [vmem:[%s12986_s4 + $0x7] ss:$0 sm:$0xff] }
 0x1dd   : > { %v2938_v12 = vmul.f32 %v9249_v61, %v9191_v49  ;;  %v1350_v22 = vsel %vm1347_vm13, %v1349_v30, %v1345_v23  ;;  %v2845_v3 = vmul.f32 %v9159_v63, %v9191_v49  ;;  %6563 = vrcp.f32 %v9230_v42 }
 0x1de   : > { %v6560_v34 = vpop.eup %6559  ;;  %v9256_v39 = vmul.f32 %v1350_v22, %v13423_v18  ;;  %v1354_v59 = vsub.f32 1.0, %v1353_v52  ;;  %v9260_v58 = vmul.f32 %v8475_v33, %v3375_v55  ;;  %v2314_v57 = vadd.f32 %v2266_v53, %v9135_v62 }
 0x1df   : > { %v2427_v46 = vrot.slane %v2358_v44, 1  ;;  %v1363_v25 = vand.u32 2147483648, %v9170_v7  ;;  %vm1358_vm14 = vweird.f32 %v6558_v10  ;;  %v1361_v18 = vand.u32 2147483647, %v9170_v7 }
 0x1e0   : > { %13424 = vst [vmem:[#allocation23_spill] sm:$0xff] %v9256_v39  ;;  %v1355_v23 = vmul.f32 %v6558_v10, %v1354_v59  ;;  %v9267_v30 = vadd.f32 1.0, %v6560_v34  ;;  %v13426_v52 = vrot.slane %v9069_v47, 1  ;;  %v3006_v55 = vrot.slane %v2938_v12, 1 }
 0x1e1   : > { %13425 = vst [vmem:[#allocation40_spill] sm:$0xff] %v9260_v58  ;;  %v2893_v44 = vadd.f32 %v2845_v3, %v9144_v27  ;;  %vm1357_vm2 = vweird.f32 %v9170_v7  ;;  %v9279_v59 = vadd.f32 %v1848_v17, %v1734_v35  ;;  %v13427_v47 = vrot.slane %v9098_v48, 1  ;;  %v9292_v27 = vld [vmem:[%s12986_s4 + $0x8] ss:$0 sm:$0xff]  ;;  %v9579_v58 = vld [vmem:[#allocation2 + $0x1e0] sm:$0xff] }
 0x1e2   : > { %1629 = vst.msk [vmem:[#allocation2 + $0x170] sm:$0xff] %vm13241_vm3, %v9256_v39  ;;  %v9272_v43 = vsel %vm1828_vm15, %v13426_v52, %v1848_v17  ;;  %v6562_v53 = vpop.eup %6561  ;;  %v1356_v22 = vadd.f32 %v6558_v10, %v1355_v23  ;;  %6565 = vrcp.f32 %v9267_v30  ;;  %vm1359_vm0 = vmor %vm1357_vm2, %vm1358_vm14  ;;  %v1364_v52 = vor.u32 1.1754944e-38, %v1363_v25 }
 0x1e3   : > { %v9284_v34 = vsel %vm1828_vm15, %v13427_v47, %v2427_v46  ;;  %v1368_v62 = vmul.f32 %v6562_v53, %v9223_v51  ;;  %v6564_v12 = vpop.eup %6563  ;;  %v9287_v33 = vadd.f32 %v2427_v46, %v2314_v57  ;;  %v3152_v7 = vmul.f32 %v9292_v27, %v9191_v49  ;;  %13477 = vst [vmem:[#allocation89_spill] sm:$0xff] %v9579_v58 }
 0x1e4   : > { %v1360_v35 = vsel %vm1359_vm0, %v6558_v10, %v1356_v22  ;;  %vm1362_vm6 = vcmp.eq.f32.partialorder %v1361_v18, 8.507059e+37  ;;  %v13428_v48 = vrot.slane %v9101_v37, 1  ;;  %v1383_v23 = vmul.f32 %v6564_v12, %v9230_v42 }
 0x1e5   : > { %v1365_v25 = vsel %vm1362_vm6, %v1364_v52, %v1360_v35  ;;  %v1369_v3 = vsub.f32 1.0, %v1368_v62  ;;  %v3103_v46 = vadd.f32 %v3006_v55, %v2893_v44  ;;  %v1376_v47 = vand.u32 2147483647, %v9223_v51 }
 0x1e6   : > { %v3007_v17 = vsel %vm1828_vm15, %v13428_v48, %v3006_v55  ;;  %v9301_v57 = vmul.f32 %v1365_v25, %v9018_v19  ;;  %v1378_v39 = vand.u32 2147483648, %v9223_v51  ;;  %vm1373_vm4 = vweird.f32 %v6562_v53 }
 0x1e7   : > { %v1370_v38 = vmul.f32 %v6562_v53, %v1369_v3  ;;  %v1384_v49 = vsub.f32 1.0, %v1383_v23  ;;  %v1391_v10 = vand.u32 2147483647, %v9230_v42  ;;  %v3102_v18 = vadd.f32 %v3007_v17, %v9188_v24  ;;  %v1669_v3 = vld [vmem:[#allocation2 + $0xe8] sm:$0xff] }
 0x1e8   : > { %13429 = vst [vmem:[#allocation41_spill] sm:$0xff] %v9301_v57  ;;  %v6566_v37 = vpop.eup %6565  ;;  %v3256_v22 = vrot.slane %v3152_v7, 2  ;;  %vm1372_vm5 = vweird.f32 %v9223_v51  ;;  %v1393_v19 = vand.u32 2147483648, %v9230_v42  ;;  %vm1388_vm10 = vweird.f32 %v6564_v12 }
 0x1e9   : > { %1630 = vst.msk [vmem:[#allocation2 + $0x188] sm:$0xff] %vm13241_vm3, %v9301_v57  ;;  %v1371_v62 = vadd.f32 %v6562_v53, %v1370_v38  ;;  %v1385_v55 = vmul.f32 %v6564_v12, %v1384_v49  ;;  %v1398_v44 = vmul.f32 %v6566_v37, %v9267_v30  ;;  %v1995_v52 = vmul.f32 %v9123_v6, %v9078_v13  ;;  %vm1374_vm12 = vmor %vm1372_vm5, %vm1373_vm4 }
 0x1ea   : > { %vm1377_vm8 = vcmp.eq.f32.partialorder %v1376_v47, 8.507059e+37  ;;  %v1379_v35 = vor.u32 1.1754944e-38, %v1378_v39  ;;  %vm1387_vm7 = vweird.f32 %v9230_v42  ;;  %vm1392_vm9 = vcmp.eq.f32.partialorder %v1391_v10, 8.507059e+37 }
 0x1eb   : > { %v1375_v24 = vsel %vm1374_vm12, %v6562_v53, %v1371_v62  ;;  %v1386_v7 = vadd.f32 %v6564_v12, %v1385_v55  ;;  %v1399_v48 = vsub.f32 1.0, %v1398_v44  ;;  %vm1389_vm11 = vmor %vm1387_vm7, %vm1388_vm10  ;;  %v1394_v17 = vor.u32 1.1754944e-38, %v1393_v19 }
 0x1ec   : > { %v1380_v51 = vsel %vm1377_vm8, %v1379_v35, %v1375_v24  ;;  %v1406_v38 = vand.u32 2147483647, %v9267_v30  ;;  %v1408_v25 = vand.u32 2147483648, %v9267_v30  ;;  %vm1403_vm13 = vweird.f32 %v6566_v37 }
 0x1ed   : > { %v9318_v23 = vmul.f32 %v1380_v51, %v9083_v29  ;;  %v1390_v49 = vsel %vm1389_vm11, %v6564_v12, %v1386_v7  ;;  %v1400_v47 = vmul.f32 %v6566_v37, %v1399_v48  ;;  %v13431_v42 = vrot.slane %v9163_v20, 2 }
 0x1ee   : > { %v13432_v53 = vrot.slane %v9117_v40, 2  ;;  %v2574_v19 = vmul.f32 %v9240_v21, %v9078_v13  ;;  %v1395_v62 = vsel %vm1392_vm9, %v1394_v17, %v1390_v49  ;;  %vm1402_vm14 = vweird.f32 %v9267_v30 }
 0x1ef   : > { %13430 = vst [vmem:[#allocation44_spill] sm:$0xff] %v9318_v23  ;;  %v3257_v39 = vsel %vm727_vm1, %v13431_v42, %v3256_v22  ;;  %v9333_v29 = vmul.f32 %v1395_v62, %v9095_v54  ;;  %v1401_v12 = vadd.f32 %v6566_v37, %v1400_v47  ;;  %v1778_v20 = vmul.f32 %v9066_v2, %v1669_v3  ;;  %vm1404_vm2 = vmor %vm1402_vm14, %vm1403_vm13 }
 0x1f0   : > { %v3259_v10 = vsel %vm727_vm1, %v3256_v22, %v13432_v53  ;;  %v9328_v55 = vadd.f32 %v3257_v39, %v3102_v18  ;;  %1631 = vst.msk [vmem:[#allocation2 + $0x190] sm:$0xff] %vm13241_vm3, %v9318_v23  ;;  %v1944_v40 = vadd.f32 %v9272_v43, %v9154_v45  ;;  %v2104_v22 = vrot.slane %v1995_v52, 2  ;;  %v9342_v18 = vld [vmem:[%s12986_s4 + $0x4] ss:$0 sm:$0xff]  ;;  %v9353_v43 = vld [vmem:[#allocation2 + $0xf0] sm:$0xff] }
 0x1f1   : > { %13434 = vst [vmem:[#allocation54_spill] sm:$0xff] %v9333_v29  ;;  %v1409_v13 = vor.u32 1.1754944e-38, %v1408_v25  ;;  %v2359_v44 = vmul.f32 %v9342_v18, %v1669_v3  ;;  %v2523_v54 = vadd.f32 %v9284_v34, %v9172_v50  ;;  %v1405_v30 = vsel %vm1404_vm2, %v6566_v37, %v1401_v12 }
 0x1f2   : > { %13433 = vst [vmem:[#allocation53_spill] sm:$0xff] %v9328_v55  ;;  %vm1407_vm0 = vcmp.eq.f32.partialorder %v1406_v38, 8.507059e+37  ;;  %v9349_v35 = vadd.f32 %v3259_v10, %v3103_v46  ;;  %v1735_v45 = vmul.f32 %v9151_v15, %v9174_v31  ;;  %v2681_v52 = vrot.slane %v2574_v19, 2  ;;  %v1672_v46 = vld [vmem:[#allocation2 + $0x100] sm:$0xff]  ;;  %v9627_v55 = vld [vmem:[#allocation2 + $0x168] sm:$0xff] }
 0x1f3   : > { %13435 = vst [vmem:[#allocation55_spill] sm:$0xff] %v9342_v18  ;;  %v1410_v24 = vsel %vm1407_vm0, %v1409_v13, %v1405_v30  ;;  %v13437_v7 = vrot.slane %v9220_v0, 2  ;;  %v13438_v48 = vrot.slane %v9126_v56, 2  ;;  %v2315_v34 = vadd.f32 %v9200_v4, %v9196_v32 }
 0x1f4   : > { %1632 = vst.msk [vmem:[#allocation2 + $0x1a8] sm:$0xff] %vm13241_vm3, %v9333_v29  ;;  %v9363_v37 = vmul.f32 %v9249_v61, %v1669_v3  ;;  %v9366_v51 = vmul.f32 %v1410_v24, %v9178_v1  ;;  %v1850_v31 = vrot.slane %v1778_v20, 1  ;;  %v13440_v17 = vrot.slane %v9244_v11, 2  ;;  %v1673_v24 = vld [vmem:[#allocation2 + $0x108] sm:$0xff] }
 0x1f5   : > { %13436 = vst [vmem:[#allocation56_spill] sm:$0xff] %v9349_v35  ;;  %v2103_v50 = vsel %vm727_vm1, %v13438_v48, %v13437_v7  ;;  %v13441_v38 = vrot.slane %v9141_v36, 2  ;;  %v2894_v56 = vadd.f32 %v9204_v8, %v9210_v14  ;;  %v13442_v49 = vmov %v13437_v7 }
 0x1f6   : > { %13439 = vst [vmem:[#allocation57_spill] sm:$0xff] %v9366_v51  ;;  %v2105_v32 = vsel %vm727_vm1, %v13442_v49, %v2104_v22  ;;  %v2218_v4 = vadd.f32 %v2103_v50, %v1944_v40  ;;  %v2429_v47 = vrot.slane %v2359_v44, 1  ;;  %v1779_v1 = vmul.f32 %v9066_v2, %v9353_v43  ;;  %v1671_v49 = vld [vmem:[#allocation2 + $0xf8] sm:$0xff] }
 0x1f7   : > { %v2680_v25 = vsel %vm727_vm1, %v13441_v38, %v13440_v17  ;;  %1633 = vst.msk [vmem:[#allocation2 + $0x1b0] sm:$0xff] %vm13241_vm3, %v9366_v51  ;;  %v1996_v36 = vmul.f32 %v9123_v6, %v1669_v3  ;;  %v2360_v39 = vmul.f32 %v9342_v18, %v9353_v43  ;;  %v13443_v8 = vmov %v13440_v17 }
 0x1f8   : > { %v2797_v42 = vadd.f32 %v2680_v25, %v2523_v54  ;;  %v2682_v14 = vsel %vm727_vm1, %v13443_v8, %v2681_v52  ;;  %v2270_v0 = vmul.f32 %v9132_v26, %v1672_v46  ;;  %v2575_v53 = vmul.f32 %v9240_v21, %v1669_v3  ;;  %13486 = vst [vmem:[#allocation98_spill] sm:$0xff] %v9627_v55 }
 0x1f9   : > { %v3008_v10 = vrot.slane %v9363_v37, 1  ;;  %v2219_v19 = vadd.f32 %v2105_v32, %v9279_v59  ;;  %v9393_v62 = vmul.f32 %v9159_v63, %v1672_v46  ;;  %v1946_v12 = vadd.f32 %v1850_v31, %v1735_v45 }
 0x1fa   : > { %v2268_v20 = vmul.f32 %v9132_v26, %v1669_v3  ;;  %v2847_v40 = vmul.f32 %v9159_v63, %v1669_v3  ;;  %v9398_v11 = vmul.f32 %v9292_v27, %v1669_v3  ;;  %v2525_v22 = vadd.f32 %v2429_v47, %v2315_v34 }
 0x1fb   : > { %v1851_v13 = vrot.slane %v1779_v1, 1  ;;  %v2798_v44 = vadd.f32 %v2682_v14, %v9287_v33  ;;  %v1738_v54 = vmul.f32 %v9151_v15, %v1672_v46  ;;  %v1736_v30 = vmul.f32 %v9151_v15, %v1669_v3 }
 0x1fc   : > { %13444 = vst [vmem:[#allocation58_spill] sm:$0xff] %v9398_v11  ;;  %v2106_v59 = vrot.slane %v1996_v36, 2  ;;  %v2269_v52 = vmul.f32 %v9132_v26, %v9353_v43  ;;  %v2430_v45 = vrot.slane %v2360_v39, 1  ;;  %v2683_v7 = vrot.slane %v2575_v53, 2 }
 0x1fd   : > { %v3104_v48 = vadd.f32 %v3008_v10, %v2894_v56  ;;  %v1997_v50 = vmul.f32 %v9123_v6, %v9353_v43  ;;  %v2576_v34 = vmul.f32 %v9240_v21, %v9353_v43  ;;  %v2316_v33 = vadd.f32 %v2268_v20, %v2218_v4 }
 0x1fe   : > { %v2220_v37 = vadd.f32 %v2106_v59, %v1946_v12  ;;  %v9409_v17 = vadd.f32 %v2847_v40, %v2797_v42  ;;  %v13081_v3 = vrot.slane %v9398_v11, 2  ;;  %v2799_v46 = vadd.f32 %v2683_v7, %v2525_v22 }
 0x1ff   : > { %v1852_v38 = vsel %vm1828_vm15, %v1850_v31, %v1851_v13  ;;  %v2848_v25 = vmul.f32 %v9159_v63, %v9353_v43  ;;  %v9416_v56 = vmul.f32 %v9066_v2, %v1673_v24  ;;  %v2317_v32 = vadd.f32 %v2269_v52, %v2219_v19 }
 0x200   : > { %13445 = vst [vmem:[#allocation59_spill] sm:$0xff] %v9409_v17  ;;  %v2431_v1 = vsel %vm1828_vm15, %v2429_v47, %v2430_v45  ;;  %v2940_v4 = vmul.f32 %v9249_v61, %v9353_v43  ;;  %v9422_v42 = vmul.f32 %v9342_v18, %v1673_v24  ;;  %v9426_v36 = vadd.f32 %v13081_v3, %v3104_v48 }
 0x201   : > { %v1737_v31 = vmul.f32 %v9151_v15, %v9353_v43  ;;  %v2107_v39 = vrot.slane %v1997_v50, 2  ;;  %v2684_v8 = vrot.slane %v2576_v34, 2  ;;  %v1947_v14 = vadd.f32 %v1852_v38, %v1736_v30 }
 0x202   : > { %13446 = vst [vmem:[#allocation60_spill] sm:$0xff] %v9422_v42  ;;  %v2318_v53 = vadd.f32 %v2270_v0, %v2220_v37  ;;  %v1998_v19 = vmul.f32 %v9123_v6, %v1671_v49  ;;  %v2577_v47 = vmul.f32 %v9240_v21, %v1671_v49  ;;  %v9434_v20 = vmul.f32 %v9292_v27, %v9353_v43 }
 0x203   : > { %13447 = vst [vmem:[#allocation61_spill] sm:$0xff] %v9426_v36  ;;  %v1948_v12 = vadd.f32 %v1851_v13, %v1737_v31  ;;  %v13086_v40 = vrot.slane %v9416_v56, 1  ;;  %v2526_v22 = vadd.f32 %v2431_v1, %v2316_v33  ;;  %v2527_v52 = vadd.f32 %v2430_v45, %v2317_v32  ;;  %v9605_v36 = vld [vmem:[#allocation2 + $0x148] sm:$0xff] }
 0x204   : > { %13448 = vst [vmem:[#allocation62_spill] sm:$0xff] %v9434_v20  ;;  %v2896_v48 = vadd.f32 %v2848_v25, %v2798_v44  ;;  %v3009_v3 = vrot.slane %v2940_v4, 1  ;;  %v13084_v50 = vrot.slane %v9422_v42, 1  ;;  %v9439_v30 = vmul.f32 %v9123_v6, %v1673_v24  ;;  %v1674_v4 = vld [vmem:[#allocation2 + $0x110] sm:$0xff] }
 0x205   : > { %v2108_v0 = vsel %vm727_vm1, %v2106_v59, %v2107_v39  ;;  %v2685_v34 = vsel %vm727_vm1, %v2683_v7, %v2684_v8  ;;  %v9444_v13 = vmul.f32 %v9249_v61, %v1673_v24  ;;  %v9447_v37 = vmul.f32 %v9240_v21, %v1673_v24  ;;  %13481 = vst [vmem:[#allocation93_spill] sm:$0xff] %v9605_v36 }
 0x206   : > { %v2221_v43 = vadd.f32 %v2108_v0, %v1947_v14  ;;  %v2109_v33 = vrot.slane %v1998_v19, 2  ;;  %v2686_v45 = vrot.slane %v2577_v47, 2  ;;  %v1949_v44 = vadd.f32 %v13086_v40, %v1738_v54  ;;  %v9467_v47 = vld [vmem:[#allocation2 + $0x1c8] sm:$0xff] }
 0x207   : > { %13449 = vst [vmem:[#allocation63_spill] sm:$0xff] %v9444_v13  ;;  %v2271_v38 = vmul.f32 %v9132_v26, %v1673_v24  ;;  %v2800_v25 = vadd.f32 %v2685_v34, %v2526_v22  ;;  %v2850_v49 = vmul.f32 %v9159_v63, %v1673_v24  ;;  %v9454_v59 = vsel %vm1828_vm15, %v3008_v10, %v3009_v3 }
 0x208   : > { %13450 = vst [vmem:[#allocation64_spill] sm:$0xff] %v9447_v37  ;;  %v2528_v32 = vadd.f32 %v13084_v50, %v2318_v53  ;;  %v9460_v1 = vmul.f32 %v9292_v27, %v1673_v24  ;;  %v9462_v31 = vadd.f32 %v3009_v3, %v2896_v48  ;;  %v13085_v54 = vrot.slane %v9439_v30, 2 }
 0x209   : > { %13451 = vst [vmem:[#allocation65_spill] sm:$0xff] %v9454_v59  ;;  %v2897_v14 = vadd.f32 %v9393_v62, %v2799_v46  ;;  %v13082_v19 = vrot.slane %v9444_v13, 1  ;;  %v9470_v10 = vmul.f32 %v9151_v15, %v1673_v24  ;;  %v13083_v22 = vrot.slane %v9447_v37, 2 }
 0x20a   : > { %13452 = vst [vmem:[#allocation66_spill] sm:$0xff] %v9460_v1  ;;  %v2110_v53 = vsel %vm727_vm1, %v2107_v39, %v2109_v33  ;;  %v2687_v0 = vsel %vm727_vm1, %v2684_v8, %v2686_v45  ;;  %v9477_v3 = vadd.f32 %v13085_v54, %v1949_v44  ;;  %v9479_v48 = vadd.f32 %v2271_v38, %v2221_v43  ;;  %v9493_v33 = vld [vmem:[#allocation2 + $0x1c0] sm:$0xff]  ;;  %v9614_v1 = vld [vmem:[#allocation2 + $0x170] sm:$0xff] }
 0x20b   : > { %13453 = vst [vmem:[#allocation67_spill] sm:$0xff] %v9462_v31  ;;  %v9481_v62 = vadd.f32 %v2850_v49, %v2800_v25  ;;  %v1781_v46 = vmul.f32 %v9066_v2, %v1674_v4  ;;  %v9486_v24 = vadd.f32 %v13083_v22, %v2528_v32  ;;  %v2272_v39 = vmul.f32 %v9132_v26, %v1674_v4  ;;  %v9503_v25 = vld [vmem:[#allocation2 + $0x1d0] sm:$0xff] }
 0x20c   : > { %13454 = vst [vmem:[#allocation68_spill] sm:$0xff] %v9467_v47  ;;  %v9491_v8 = vmul.f32 %v9342_v18, %v1674_v4  ;;  %v9497_v43 = vadd.f32 %v13082_v19, %v2897_v14  ;;  %v2222_v45 = vadd.f32 %v2110_v53, %v1948_v12  ;;  %v2801_v44 = vadd.f32 %v2687_v0, %v2527_v52  ;;  %v1677_v14 = vld [vmem:[#allocation2 + $0x128] sm:$0xff]  ;;  %v9515_v52 = vld [vmem:[#allocation2 + $0x120] sm:$0xff] }
 0x20d   : > { %13455 = vst [vmem:[#allocation69_spill] sm:$0xff] %v9477_v3  ;;  %v9501_v38 = vmul.f32 %v9066_v2, %v9467_v47  ;;  %v9506_v49 = vmul.f32 %v9123_v6, %v1674_v4  ;;  %v9509_v32 = vmul.f32 %v9240_v21, %v1674_v4  ;;  %v2851_v34 = vmul.f32 %v9159_v63, %v1674_v4 }
 0x20e   : > { %13456 = vst [vmem:[#allocation70_spill] sm:$0xff] %v9479_v48  ;;  %v9513_v7 = vmul.f32 %v9249_v61, %v1674_v4  ;;  %v1854_v12 = vrot.slane %v1781_v46, 1  ;;  %v9519_v53 = vmul.f32 %v9151_v15, %v9493_v33  ;;  %v9523_v0 = vmul.f32 %v9151_v15, %v9467_v47 }
 0x20f   : > { %13457 = vst [vmem:[#allocation71_spill] sm:$0xff] %v9481_v62  ;;  %v9527_v19 = vmul.f32 %v9151_v15, %v9503_v25  ;;  %v2320_v22 = vadd.f32 %v2272_v39, %v2222_v45  ;;  %v9531_v54 = vmul.f32 %v9292_v27, %v1674_v4  ;;  %v1741_v46 = vmul.f32 %v9151_v15, %v9515_v52  ;;  %v9563_v39 = vld [vmem:[#allocation2 + $0x130] sm:$0xff] }
 0x210   : > { %13458 = vst [vmem:[#allocation72_spill] sm:$0xff] %v9486_v24  ;;  %v1740_v40 = vmul.f32 %v9151_v15, %v1674_v4  ;;  %v9537_v57 = vmul.f32 %v9066_v2, %v1677_v14  ;;  %v9541_v23 = vmul.f32 %v9066_v2, %v9503_v25  ;;  %v9546_v50 = vadd.f32 %v2851_v34, %v2801_v44  ;;  %v9565_v34 = vld [vmem:[#allocation2 + $0x1e8] sm:$0xff] }
 0x211   : > { %13459 = vst [vmem:[#allocation73_spill] sm:$0xff] %v9491_v8  ;;  %v13468_v60 = vrot.slane %v9416_v56, 1  ;;  %v9555_v5 = vmul.f32 %v9123_v6, %v1677_v14  ;;  %v9558_v28 = vmul.f32 %v9342_v18, %v1677_v14  ;;  %v9561_v51 = vmul.f32 %v9240_v21, %v1677_v14 }
 0x212   : > { %13460 = vst [vmem:[#allocation74_spill] sm:$0xff] %v9493_v33  ;;  %v9567_v44 = vadd.f32 %v1854_v12, %v1740_v40  ;;  %v13473_v56 = vrot.slane %v9491_v8, 1  ;;  %v9575_v45 = vmul.f32 %v9249_v61, %v1677_v14  ;;  %v1856_v16 = vrot.slane %v9537_v57, 1 }
 0x213   : > { %13461 = vst [vmem:[#allocation75_spill] sm:$0xff] %v9497_v43  ;;  %v9552_v4 = vsel %vm1828_vm15, %v13468_v60, %v1854_v12  ;;  %v9586_v40 = vmul.f32 %v9151_v15, %v9577_v9  ;;  %v9594_v61 = vmul.f32 %v9151_v15, %v9565_v34  ;;  %v1742_v12 = vmul.f32 %v9151_v15, %v1677_v14 }
 0x214   : > { %13462 = vst [vmem:[#allocation76_spill] sm:$0xff] %v9503_v25  ;;  %v9571_v29 = vadd.f32 %v13473_v56, %v2320_v22  ;;  %v9590_v22 = vmul.f32 %v9151_v15, %v9579_v58  ;;  %v9598_v56 = vmul.f32 %v9132_v26, %v1677_v14  ;;  %v9601_v57 = vmul.f32 %v9159_v63, %v1677_v14 }
 0x215   : > { %13463 = vst [vmem:[#allocation77_spill] sm:$0xff] %v9509_v32  ;;  %v1783_v60 = vmul.f32 %v9066_v2, %v9563_v39  ;;  %v9612_v31 = vmul.f32 %v9123_v6, %v9563_v39  ;;  %v9621_v11 = vmul.f32 %v9342_v18, %v9563_v39  ;;  %v9625_v35 = vmul.f32 %v9240_v21, %v9563_v39  ;;  %v9665_v32 = vld [vmem:[#allocation2 + $0x160] sm:$0xff] }
 0x216   : > { %13464 = vst [vmem:[#allocation78_spill] sm:$0xff] %v9513_v7  ;;  %v1785_v43 = vmul.f32 %v9066_v2, %v9582_v41  ;;  %v9631_v20 = vadd.f32 %v1856_v16, %v1741_v46  ;;  %v1794_v14 = vmul.f32 %v9066_v2, %v9565_v34  ;;  %v1743_v21 = vmul.f32 %v9151_v15, %v9563_v39 }
 0x217   : > { %13465 = vst [vmem:[#allocation79_spill] sm:$0xff] %v9515_v52  ;;  %v1857_v59 = vrot.slane %v1783_v60, 1  ;;  %v9643_v17 = vmul.f32 %v9132_v26, %v9563_v39  ;;  %v1787_v46 = vmul.f32 %v9066_v2, %v9614_v1  ;;  %v9650_v13 = vmul.f32 %v9159_v63, %v9563_v39 }
 0x218   : > { %13466 = vst [vmem:[#allocation80_spill] sm:$0xff] %v9531_v54  ;;  %v9616_v54 = vld [vmem:[#allocation2 + $0x1f0] sm:$0xff]  ;;  %v9654_v7 = vmul.f32 %v9292_v27, %v9563_v39  ;;  %v1786_v60 = vmul.f32 %v9066_v2, %v9627_v55  ;;  %v1874_v63 = vrot.slane %v1794_v14, 1  ;;  %v1745_v27 = vmul.f32 %v9151_v15, %v9605_v36 }
 0x219   : > { %13467 = vst [vmem:[#allocation81_spill] sm:$0xff] %v9546_v50  ;;  %v1784_v50 = vmul.f32 %v9066_v2, %v9605_v36  ;;  %v1795_v62 = vmul.f32 %v9066_v2, %v9616_v54  ;;  %v1858_v24 = vsel %vm1828_vm15, %v1856_v16, %v1857_v59  ;;  %v1748_v14 = vmul.f32 %v9151_v15, %v9627_v55 }
 0x21a   : > { %13469 = vst [vmem:[#allocation82_spill] sm:$0xff] %v9558_v28  ;;  %v13494_v28 = vrot.slane %v9501_v38, 1  ;;  %v9697_v8 = vadd.f32 %v9552_v4, %v9470_v10  ;;  %v9701_v18 = vadd.f32 %v1857_v59, %v1743_v21  ;;  %v9715_v10 = vld [vmem:[#allocation2 + $0x138] sm:$0xff]  ;;  %v13498_v21 = vrot.slane %v9501_v38, 1 }
 0x21b   : > { %13470 = vst [vmem:[#allocation83_spill] sm:$0xff] %v9561_v51  ;;  %v1872_v51 = vrot.slane %v9541_v23, 1  ;;  %v1859_v37 = vrot.slane %v1784_v50, 1  ;;  %v9674_v23 = vld [vmem:[#allocation2 + $0x180] sm:$0xff]  ;;  %v9747_v38 = vld [vmem:[#allocation2 + $0x1b8] sm:$0xff] }
 0x21c   : > { %13471 = vst [vmem:[#allocation84_spill] sm:$0xff] %v9563_v39  ;;  %v9676_v50 = vld [vmem:[#allocation2 + $0x1a0] sm:$0xff]  ;;  %v1761_v39 = vmul.f32 %v9151_v15, %v9616_v54  ;;  %v1750_v16 = vmul.f32 %v9151_v15, %v9674_v23  ;;  %v9728_v33 = vadd.f32 %v13498_v21, %v9519_v53  ;;  %v2018_v21 = vmul.f32 %v9123_v6, %v9503_v25 }
 0x21d   : > { %13472 = vst [vmem:[#allocation85_spill] sm:$0xff] %v9565_v34  ;;  %v9713_v58 = vadd.f32 %v1859_v37, %v9586_v40  ;;  %v9738_v40 = vadd.f32 %v1872_v51, %v9527_v19  ;;  %v2021_v25 = vmul.f32 %v9123_v6, %v9616_v54 }
 0x21e   : > { %13474 = vst [vmem:[#allocation86_spill] sm:$0xff] %v9571_v29  ;;  %v1860_v29 = vrot.slane %v1785_v43, 1  ;;  %v1863_v43 = vrot.slane %v1787_v46, 1  ;;  %v9688_v46 = vmul.f32 %v9151_v15, %v9676_v50 }
 0x21f   : > { %13475 = vst [vmem:[#allocation87_spill] sm:$0xff] %v9575_v45  ;;  %v9663_v45 = vmul.f32 %v9123_v6, %v9582_v41 }
 0x220   : > { %13479 = vst [vmem:[#allocation91_spill] sm:$0xff] %v9598_v56  ;;  %v1861_v48 = vsel %vm1828_vm15, %v1859_v37, %v1860_v29  ;;  %v1749_v56 = vmul.f32 %v9151_v15, %v9614_v1 }
 0x221   : > { %13480 = vst [vmem:[#allocation92_spill] sm:$0xff] %v9601_v57  ;;  %v1746_v57 = vmul.f32 %v9151_v15, %v9582_v41  ;;  %v9719_v59 = vadd.f32 %v1861_v48, %v1745_v27  ;;  %v9745_v48 = vld [vmem:[#allocation2 + $0x198] sm:$0xff]  ;;  %v13511_v41 = vrot.slane %v9506_v49, 2 }
 0x222   : > { %13482 = vst [vmem:[#allocation94_spill] sm:$0xff] %v9614_v1 }
 0x223   : > { %13483 = vst [vmem:[#allocation95_spill] sm:$0xff] %v9616_v54  ;;  %v9721_v4 = vadd.f32 %v1860_v29, %v1746_v57  ;;  %v9741_v29 = vadd.f32 %v1874_v63, %v9590_v22  ;;  %v9765_v22 = vmul.f32 %v9123_v6, %v9605_v36 }
 0x224   : > { %13484 = vst [vmem:[#allocation96_spill] sm:$0xff] %v9621_v11  ;;  %v1873_v11 = vsel %vm1828_vm15, %v13494_v28, %v1872_v51 }
 0x225   : > { %13485 = vst [vmem:[#allocation97_spill] sm:$0xff] %v9625_v35  ;;  %v1862_v35 = vrot.slane %v1786_v60, 1  ;;  %v9699_v60 = vadd.f32 %v1858_v24, %v1742_v12  ;;  %v9717_v24 = vld [vmem:[#allocation2 + $0x158] sm:$0xff]  ;;  %v9735_v37 = vadd.f32 %v1873_v11, %v9523_v0  ;;  %v2004_v0 = vmul.f32 %v9123_v6, %v9715_v10 }
 0x226   : > { %13487 = vst [vmem:[#allocation99_spill] sm:$0xff] %v9643_v17  ;;  %v9703_v17 = vld [vmem:[#allocation2 + $0x118] sm:$0xff] }
 0x227   : > { %13488 = vst [vmem:[#allocation100_spill] sm:$0xff] %v9650_v13  ;;  %v1875_v13 = vrot.slane %v1795_v62, 1  ;;  %v1747_v62 = vmul.f32 %v9151_v15, %v9665_v32  ;;  %v1864_v28 = vsel %vm1828_vm15, %v1862_v35, %v1863_v43  ;;  %v2001_v51 = vmul.f32 %v9123_v6, %v9703_v17  ;;  %v9758_v11 = vld [vmem:[#allocation2 + $0x1d8] sm:$0xff] }
 0x228   : > { %13489 = vst [vmem:[#allocation101_spill] sm:$0xff] %v9654_v7  ;;  %v9672_v7 = vld [vmem:[#allocation2 + $0x188] sm:$0xff]  ;;  %v9749_v53 = vadd.f32 %v1864_v28, %v1748_v14  ;;  %v9791_v14 = vld [vmem:[#allocation2 + $0x1b0] sm:$0xff]  ;;  %v9795_v28 = vmul.f32 %v9123_v6, %v9467_v47  ;;  %v2122_v47 = vrot.slane %v9663_v45, 2  ;;  %v2121_v45 = vrot.slane %v9765_v22, 2 }
 0x229   : > { %13490 = vst [vmem:[#allocation102_spill] sm:$0xff] %v9665_v32  ;;  %v1876_v42 = vsel %vm1828_vm15, %v1874_v63, %v1875_v13  ;;  %v9709_v3 = vmul.f32 %v9066_v2, %v9672_v7  ;;  %v9723_v12 = vadd.f32 %v1862_v35, %v1747_v62  ;;  %v9743_v35 = vld [vmem:[#allocation2 + $0x190] sm:$0xff]  ;;  %v9754_v57 = vadd.f32 %v1875_v13, %v1761_v39 }
 0x22a   : > { %13491 = vst [vmem:[#allocation103_spill] sm:$0xff] %v9672_v7  ;;  %v1751_v13 = vmul.f32 %v9151_v15, %v9672_v7  ;;  %v9773_v39 = vmul.f32 %v9123_v6, %v9627_v55  ;;  %v1789_v63 = vmul.f32 %v9066_v2, %v9743_v35  ;;  %v9783_v27 = vmul.f32 %v9123_v6, %v9672_v7 }
 0x22b   : > { %13492 = vst [vmem:[#allocation104_spill] sm:$0xff] %v9674_v23  ;;  %v9732_v23 = vadd.f32 %v1863_v43, %v1749_v56  ;;  %v9752_v56 = vadd.f32 %v1876_v42, %v9594_v61  ;;  %v1865_v19 = vrot.slane %v9709_v3, 1  ;;  %v2007_v42 = vmul.f32 %v9123_v6, %v9717_v24 }
 0x22c   : > { %13493 = vst [vmem:[#allocation105_spill] sm:$0xff] %v9676_v50  ;;  %v9730_v50 = vld [vmem:[#allocation2 + $0x178] sm:$0xff]  ;;  %v2009_v3 = vmul.f32 %v9123_v6, %v9614_v1  ;;  %v2013_v43 = vmul.f32 %v9123_v6, %v9745_v48  ;;  %v9789_v62 = vmul.f32 %v9123_v6, %v9747_v38  ;;  %v2119_v7 = vrot.slane %v2004_v0, 2 }
 0x22d   : > { %13495 = vst [vmem:[#allocation106_spill] sm:$0xff] %v9703_v17  ;;  %v2010_v61 = vmul.f32 %v9123_v6, %v9730_v50  ;;  %v2114_v17 = vrot.slane %v2001_v51, 2  ;;  %v2124_v1 = vrot.slane %v2007_v42, 2  ;;  %v1866_v32 = vrot.slane %v1789_v63, 1 }
 0x22e   : > { %13496 = vst [vmem:[#allocation107_spill] sm:$0xff] %v9715_v10  ;;  %v9809_v10 = vadd.f32 %v1865_v19, %v1750_v16  ;;  %v2127_v55 = vrot.slane %v2009_v3, 2  ;;  %v13512_v16 = vrot.slane %v9439_v30, 2  ;;  %v13513_v42 = vrot.slane %v9612_v31, 2 }
 0x22f   : > { %13497 = vst [vmem:[#allocation108_spill] sm:$0xff] %v9717_v24  ;;  %v9803_v24 = vmul.f32 %v9123_v6, %v9565_v34  ;;  %v1791_v34 = vmul.f32 %v9066_v2, %v9791_v14  ;;  %v13514_v3 = vrot.slane %v9555_v5, 2  ;;  %v2126_v54 = vrot.slane %v9773_v39, 2 }
 0x230   : > { %13499 = vst [vmem:[#allocation109_spill] sm:$0xff] %v9730_v50  ;;  %v2019_v50 = vmul.f32 %v9123_v6, %v9758_v11  ;;  %v2113_v51 = vsel %vm727_vm1, %v13512_v16, %v13511_v41  ;;  %v1752_v30 = vmul.f32 %v9151_v15, %v9743_v35  ;;  %v2115_v22 = vsel %vm727_vm1, %v13511_v41, %v2114_v17 }
 0x231   : > { %13500 = vst [vmem:[#allocation110_spill] sm:$0xff] %v9738_v40  ;;  %v2118_v63 = vsel %vm727_vm1, %v13514_v3, %v13513_v42  ;;  %v2123_v36 = vsel %vm727_vm1, %v2121_v45, %v2122_v47  ;;  %v2125_v39 = vsel %vm727_vm1, %v2122_v47, %v2124_v1  ;;  %v2128_v3 = vsel %vm727_vm1, %v2126_v54, %v2127_v55 }
 0x232   : > { %13501 = vst [vmem:[#allocation111_spill] sm:$0xff] %v9741_v29  ;;  %v1867_v17 = vsel %vm1828_vm15, %v1865_v19, %v1866_v32  ;;  %v1869_v31 = vrot.slane %v1791_v34, 1  ;;  %v2129_v41 = vrot.slane %v2010_v61, 2  ;;  %v2134_v26 = vrot.slane %v2013_v43, 2 }
 0x233   : > { %13502 = vst [vmem:[#allocation112_spill] sm:$0xff] %v9743_v35  ;;  %v1963_v52 = vadd.f32 %v1866_v32, %v1752_v30  ;;  %v1962_v1 = vadd.f32 %v1867_v17, %v1751_v13  ;;  %v2139_v40 = vrot.slane %v9789_v62, 2  ;;  %v2146_v34 = vrot.slane %v9803_v24, 2  ;;  %v13531_v17 = vld [vmem:[#allocation98_spill] sm:$0xff] }
 0x234   : > { %13503 = vst [vmem:[#allocation113_spill] sm:$0xff] %v9745_v48  ;;  %v9805_v48 = vld [vmem:[#allocation2 + $0x1a8] sm:$0xff]  ;;  %v2147_v19 = vrot.slane %v2021_v25, 2  ;;  %v2130_v32 = vsel %vm727_vm1, %v2127_v55, %v2129_v41  ;;  %v2224_v62 = vadd.f32 %v2113_v51, %v9697_v8  ;;  %v2233_v51 = vadd.f32 %v2128_v3, %v9749_v53  ;;  %v13530_v3 = vld [vmem:[#allocation102_spill] sm:$0xff] }
 0x235   : > { %13504 = vst [vmem:[#allocation114_spill] sm:$0xff] %v9747_v38  ;;  %v9807_v38 = vld [vmem:[#allocation2 + $0x1f8] sm:$0xff]  ;;  %v1790_v0 = vmul.f32 %v9066_v2, %v9805_v48  ;;  %v13515_v2 = vmov %v13513_v42  ;;  %v2014_v9 = vmul.f32 %v9123_v6, %v9805_v48  ;;  %v2015_v42 = vmul.f32 %v9123_v6, %v9791_v14 }
 0x236   : > { %13505 = vst [vmem:[#allocation115_spill] sm:$0xff] %v9752_v56  ;;  %v2120_v16 = vsel %vm727_vm1, %v13515_v2, %v2119_v7  ;;  %v1754_v49 = vmul.f32 %v9151_v15, %v9805_v48  ;;  %v2131_v2 = vrot.slane %v9783_v27, 2  ;;  %v2144_v56 = vrot.slane %v2019_v50, 2  ;;  %v13532_v41 = vld [vmem:[#allocation94_spill] sm:$0xff] }
 0x237   : > { %13506 = vst [vmem:[#allocation116_spill] sm:$0xff] %v9754_v57  ;;  %v1868_v7 = vrot.slane %v1790_v0, 1  ;;  %v2141_v57 = vrot.slane %v9795_v28, 2  ;;  %v2136_v47 = vrot.slane %v2014_v9, 2  ;;  %v2137_v29 = vrot.slane %v2015_v42, 2  ;;  %v13529_v42 = vld [vmem:[#allocation90_spill] sm:$0xff] }
 0x238   : > { %13507 = vst [vmem:[#allocation117_spill] sm:$0xff] %v9758_v11  ;;  %v2022_v11 = vmul.f32 %v9123_v6, %v9807_v38  ;;  %v2148_v55 = vsel %vm727_vm1, %v2146_v34, %v2147_v19  ;;  %v2228_v8 = vadd.f32 %v2120_v16, %v9701_v18  ;;  %v2235_v0 = vadd.f32 %v2131_v2, %v9809_v10  ;;  %v13527_v16 = vld [vmem:[#allocation88_spill] sm:$0xff] }
 0x239   : > { %13508 = vst [vmem:[#allocation118_spill] sm:$0xff] %v9791_v14  ;;  %v1964_v9 = vadd.f32 %v1868_v7, %v9688_v46  ;;  %v13516_v46 = vrot.slane %v9555_v5, 2  ;;  %v2241_v18 = vadd.f32 %v2141_v57, %v9728_v33 }
 0x23a   : > { %13509 = vst [vmem:[#allocation119_spill] sm:$0xff] %v9805_v48  ;;  %v1870_v48 = vsel %vm1828_vm15, %v1868_v7, %v1869_v31  ;;  %v2149_v61 = vrot.slane %v2022_v11, 2  ;;  %v2138_v11 = vsel %vm727_vm1, %v2136_v47, %v2137_v29 }
 0x23b   : > { %13510 = vst [vmem:[#allocation120_spill] sm:$0xff] %v9807_v38  ;;  %v2012_v38 = vmul.f32 %v9123_v6, %v9743_v35  ;;  %v2142_v6 = vrot.slane %v2018_v21, 2  ;;  %v1965_v24 = vadd.f32 %v1870_v48, %v1754_v49  ;;  %v2229_v48 = vadd.f32 %v2121_v45, %v9713_v58  ;;  %v13526_v45 = vld [vmem:[#allocation27_spill] sm:$0xff] }
 0x23c   : > { %v2150_v28 = vsel %vm727_vm1, %v2147_v19, %v2149_v61  ;;  %v2230_v21 = vadd.f32 %v2123_v36, %v9719_v59  ;;  %v2238_v30 = vadd.f32 %v2136_v47, %v1964_v9  ;;  %v13517_v36 = vld [vmem:[#allocation110_spill] sm:$0xff]  ;;  %v2276_v33 = vmul.f32 %v13526_v45, %v13527_v16  ;;  %v13536_v61 = vld [vmem:[#allocation105_spill] sm:$0xff] }
 0x23d   : > { %v2132_v35 = vrot.slane %v2012_v38, 2  ;;  %v1755_v38 = vmul.f32 %v9151_v15, %v9791_v14  ;;  %v2143_v13 = vsel %vm727_vm1, %v2141_v57, %v2142_v6  ;;  %v2145_v43 = vsel %vm727_vm1, %v2142_v6, %v2144_v56  ;;  %v13528_v57 = vld [vmem:[#allocation93_spill] sm:$0xff] }
 0x23e   : > { %v2140_v15 = vsel %vm727_vm1, %v2137_v29, %v2139_v40  ;;  %v2227_v56 = vadd.f32 %v2118_v63, %v9699_v60  ;;  %v2231_v40 = vadd.f32 %v2125_v39, %v9721_v4  ;;  %v2232_v29 = vadd.f32 %v2126_v54, %v9723_v12  ;;  %v13519_v4 = vld [vmem:[#allocation111_spill] sm:$0xff] }
 0x23f   : > { %v2133_v27 = vsel %vm727_vm1, %v2131_v2, %v2132_v35  ;;  %v2135_v50 = vsel %vm727_vm1, %v2132_v35, %v2134_v26  ;;  %v1966_v25 = vadd.f32 %v1869_v31, %v1755_v38  ;;  %v2225_v26 = vadd.f32 %v2115_v22, %v9567_v44  ;;  %v13521_v12 = vld [vmem:[#allocation115_spill] sm:$0xff]  ;;  %v13533_v2 = vld [vmem:[#allocation104_spill] sm:$0xff] }
 0x240   : > { %v2226_v35 = vadd.f32 %v13516_v46, %v9631_v20  ;;  %v2234_v44 = vadd.f32 %v2130_v32, %v9732_v23  ;;  %v2236_v5 = vadd.f32 %v2133_v27, %v1962_v1  ;;  %v2237_v20 = vadd.f32 %v2135_v50, %v1963_v52  ;;  %v13523_v23 = vld [vmem:[#allocation116_spill] sm:$0xff]  ;;  %v13525_v52 = vld [vmem:[#allocation79_spill] sm:$0xff]  ;;  %v13544_v46 = vld [vmem:[#allocation89_spill] sm:$0xff] }
 0x241   : > { %v2239_v60 = vadd.f32 %v2138_v11, %v1965_v24  ;;  %v2240_v63 = vadd.f32 %v2140_v15, %v1966_v25  ;;  %v2242_v58 = vadd.f32 %v2143_v13, %v9735_v37  ;;  %v9886_v59 = vadd.f32 %v2145_v43, %v13517_v36  ;;  %v13534_v1 = vld [vmem:[#allocation103_spill] sm:$0xff]  ;;  %v13539_v13 = vld [vmem:[#allocation74_spill] sm:$0xff]  ;;  %v13540_v24 = vld [vmem:[#allocation68_spill] sm:$0xff] }
 0x242   : > { %v9889_v54 = vadd.f32 %v2146_v34, %v13519_v4  ;;  %v9892_v53 = vadd.f32 %v2148_v55, %v13521_v12  ;;  %v9895_v10 = vadd.f32 %v2150_v28, %v13523_v23  ;;  %v2273_v22 = vmul.f32 %v13526_v45, %v13525_v52  ;;  %v13535_v34 = vld [vmem:[#allocation112_spill] sm:$0xff]  ;;  %v13537_v32 = vld [vmem:[#allocation119_spill] sm:$0xff]  ;;  %v9933_v28 = vld [vmem:[#allocation2 + $0x210] sm:$0xff] }
 0x243   : > { %13518 = vst [vmem:[#allocation110_spill] sm:$0xff] %v9886_v59  ;;  %v2277_v37 = vmul.f32 %v13526_v45, %v13528_v57  ;;  %v2278_v39 = vmul.f32 %v13526_v45, %v13529_v42  ;;  %v2279_v49 = vmul.f32 %v13526_v45, %v13530_v3  ;;  %v2280_v31 = vmul.f32 %v13526_v45, %v13531_v17  ;;  %v9921_v50 = vld [vmem:[#allocation2 + $0x200] sm:$0xff]  ;;  %v13541_v11 = vld [vmem:[#allocation76_spill] sm:$0xff]  ;;  %v13545_v4 = vld [vmem:[#allocation85_spill] sm:$0xff] }
 0x244   : > { %13520 = vst [vmem:[#allocation111_spill] sm:$0xff] %v9889_v54  ;;  %v2281_v7 = vmul.f32 %v13526_v45, %v13532_v41  ;;  %v2282_v6 = vmul.f32 %v13526_v45, %v13533_v2  ;;  %v2283_v47 = vmul.f32 %v13526_v45, %v13534_v1  ;;  %v2284_v19 = vmul.f32 %v13526_v45, %v13535_v34  ;;  %v9931_v55 = vld [vmem:[#allocation2 + $0x208] sm:$0xff]  ;;  %v13546_v23 = vld [vmem:[#allocation95_spill] sm:$0xff]  ;;  %v13547_v52 = vld [vmem:[#allocation69_spill] sm:$0xff] }
 0x245   : > { %13522 = vst [vmem:[#allocation115_spill] sm:$0xff] %v9892_v53  ;;  %v2285_v38 = vmul.f32 %v13526_v45, %v13536_v61  ;;  %v2286_v27 = vmul.f32 %v13526_v45, %v13537_v32  ;;  %v2287_v9 = vmul.f32 %v13526_v45, %v9791_v14  ;;  %v2288_v43 = vmul.f32 %v13526_v45, %v13539_v13  ;;  %v6879_v13 = vld [vmem:[%s12986_s4 + $0x3] ss:$0 sm:$0xff] }
 0x246   : > { %13524 = vst [vmem:[#allocation116_spill] sm:$0xff] %v9895_v10  ;;  %v2289_v25 = vmul.f32 %v13526_v45, %v13540_v24  ;;  %v2290_v15 = vmul.f32 %v13526_v45, %v13541_v11  ;;  %v2291_v36 = vmul.f32 %v13526_v45, %v13544_v46  ;;  %v2292_v12 = vmul.f32 %v13526_v45, %v13545_v4  ;;  %v13548_v53 = vld [vmem:[#allocation91_spill] sm:$0xff] }
 0x247   : > { %13538 = vst [vmem:[#allocation27_spill] sm:$0xff] %v9921_v50  ;;  %v2293_v61 = vmul.f32 %v13526_v45, %v13546_v23  ;;  %v2294_v2 = vmul.f32 %v6879_v13, %v9921_v50  ;;  %v2295_v3 = vmul.f32 %v6879_v13, %v9931_v55  ;;  %v2296_v16 = vmul.f32 %v6879_v13, %v9933_v28  ;;  %v13549_v54 = vld [vmem:[#allocation99_spill] sm:$0xff] }
 0x248   : > { %13542 = vst [vmem:[#allocation121_spill] sm:$0xff] %v9931_v55  ;;  %v2321_v10 = vadd.f32 %v2273_v22, %v13547_v52  ;;  %v9949_v46 = vadd.f32 %v13548_v53, %v2224_v62  ;;  %v2323_v59 = vadd.f32 %v13549_v54, %v2225_v26  ;;  %v2324_v32 = vadd.f32 %v2276_v33, %v2226_v35  ;;  %v13550_v53 = vld [vmem:[#allocation55_spill] sm:$0xff] }
 0x249   : > { %13543 = vst [vmem:[#allocation122_spill] sm:$0xff] %v9933_v28  ;;  %v2325_v1 = vadd.f32 %v2277_v37, %v2227_v56  ;;  %v2326_v45 = vadd.f32 %v2278_v39, %v2228_v8  ;;  %v2327_v23 = vadd.f32 %v2279_v49, %v2229_v48  ;;  %v2328_v4 = vadd.f32 %v2280_v31, %v2230_v21  ;;  %v13551_v8 = vld [vmem:[#allocation94_spill] sm:$0xff]  ;;  %v13552_v21 = vld [vmem:[#allocation112_spill] sm:$0xff]  ;;  %v13559_v33 = vld [vmem:[#allocation119_spill] sm:$0xff] }
 0x24a   : > { %v2329_v11 = vadd.f32 %v2281_v7, %v2231_v40  ;;  %v2330_v24 = vadd.f32 %v2282_v6, %v2232_v29  ;;  %v2331_v14 = vadd.f32 %v2283_v47, %v2233_v51  ;;  %v2332_v50 = vadd.f32 %v2284_v19, %v2234_v44  ;;  %v13553_v29 = vld [vmem:[#allocation118_spill] sm:$0xff]  ;;  %v13554_v44 = vld [vmem:[#allocation68_spill] sm:$0xff]  ;;  %v13563_v19 = vld [vmem:[#allocation73_spill] sm:$0xff] }
 0x24b   : > { %v2333_v34 = vadd.f32 %v2285_v38, %v2235_v0  ;;  %v2334_v55 = vadd.f32 %v2286_v27, %v2236_v5  ;;  %v2335_v41 = vadd.f32 %v2287_v9, %v2237_v20  ;;  %v2336_v13 = vadd.f32 %v2288_v43, %v2238_v30  ;;  %v13555_v5 = vld [vmem:[#allocation76_spill] sm:$0xff]  ;;  %v13556_v30 = vld [vmem:[#allocation85_spill] sm:$0xff]  ;;  %v13562_v6 = vld [vmem:[#allocation110_spill] sm:$0xff] }
 0x24c   : > { %v2337_v28 = vadd.f32 %v2289_v25, %v2239_v60  ;;  %v2338_v52 = vadd.f32 %v2290_v15, %v2240_v63  ;;  %v2339_v22 = vadd.f32 %v2291_v36, %v2241_v18  ;;  %v2340_v62 = vadd.f32 %v2292_v12, %v2242_v58  ;;  %v13557_v63 = vld [vmem:[#allocation95_spill] sm:$0xff]  ;;  %v13565_v27 = vld [vmem:[#allocation60_spill] sm:$0xff] }
 0x24d   : > { %v2365_v26 = vmul.f32 %v13550_v53, %v13528_v57  ;;  %v2366_v35 = vmul.f32 %v13550_v53, %v13529_v42  ;;  %v2367_v56 = vmul.f32 %v13550_v53, %v13531_v17  ;;  %v2368_v48 = vmul.f32 %v13550_v53, %v13551_v8  ;;  %v13558_v58 = vld [vmem:[#allocation103_spill] sm:$0xff] }
 0x24e   : > { %v2370_v40 = vmul.f32 %v13550_v53, %v13552_v21  ;;  %v2372_v51 = vmul.f32 %v13550_v53, %v13553_v29  ;;  %v2373_v0 = vmul.f32 %v13550_v53, %v13554_v44  ;;  %v2374_v20 = vmul.f32 %v13550_v53, %v13555_v5  ;;  %v13568_v21 = vld [vmem:[#allocation115_spill] sm:$0xff] }
 0x24f   : > { %v2375_v60 = vmul.f32 %v13550_v53, %v13556_v30  ;;  %v2376_v18 = vmul.f32 %v13550_v53, %v13557_v63  ;;  %v2369_v54 = vmul.f32 %v13550_v53, %v13558_v58  ;;  %v2371_v37 = vmul.f32 %v13550_v53, %v13559_v33  ;;  %v13560_v39 = vld [vmem:[#allocation121_spill] sm:$0xff]  ;;  %v13569_v58 = vld [vmem:[#allocation116_spill] sm:$0xff] }
 0x250   : > { %v2377_v49 = vmul.f32 %v13550_v53, %v13560_v39  ;;  %v13561_v31 = vld [vmem:[#allocation122_spill] sm:$0xff]  ;;  %v2341_v47 = vadd.f32 %v2293_v61, %v13562_v6  ;;  %v13564_v38 = vrot.slane %v13563_v19, 1  ;;  %v13566_v9 = vrot.slane %v13565_v27, 1  ;;  %v13567_v6 = vld [vmem:[#allocation111_spill] sm:$0xff] }
 0x251   : > { %v2378_v7 = vmul.f32 %v13550_v53, %v13561_v31  ;;  %v2438_v25 = vrot.slane %v2365_v26, 1  ;;  %v2439_v15 = vrot.slane %v2366_v35, 1  ;;  %v2441_v36 = vrot.slane %v2367_v56, 1  ;;  %v13570_v26 = vld [vmem:[#allocation96_spill] sm:$0xff]  ;;  %v13572_v56 = vld [vmem:[#allocation82_spill] sm:$0xff] }
 0x252   : > { %v2434_v43 = vsel %vm1828_vm15, %v13566_v9, %v13564_v38  ;;  %v2442_v12 = vrot.slane %v2368_v48, 1  ;;  %v2445_v63 = vrot.slane %v2370_v40, 1  ;;  %v2448_v30 = vrot.slane %v2372_v51, 1 }
 0x253   : > { %v2450_v5 = vrot.slane %v2373_v0, 1  ;;  %v2451_v44 = vrot.slane %v2374_v20, 1  ;;  %v2453_v39 = vrot.slane %v2375_v60, 1  ;;  %v2454_v29 = vrot.slane %v2376_v18, 1 }
 0x254   : > { %v2444_v33 = vrot.slane %v2369_v54, 1  ;;  %v2447_v53 = vrot.slane %v2371_v37, 1  ;;  %v2456_v31 = vrot.slane %v2377_v49, 1  ;;  %v2457_v61 = vrot.slane %v2378_v7, 1 }
 0x255   : > { %v2342_v19 = vadd.f32 %v2294_v2, %v13567_v6  ;;  %v2343_v27 = vadd.f32 %v2295_v3, %v13568_v21  ;;  %v2344_v38 = vadd.f32 %v2296_v16, %v13569_v58  ;;  %v13571_v35 = vrot.slane %v13570_v26, 1  ;;  %v13574_v21 = vld [vmem:[#allocation70_spill] sm:$0xff] }
 0x256   : > { %v13573_v48 = vrot.slane %v13572_v56, 1  ;;  %v2440_v51 = vsel %vm1828_vm15, %v2438_v25, %v2439_v15  ;;  %v2443_v0 = vsel %vm1828_vm15, %v2441_v36, %v2442_v12  ;;  %v2446_v20 = vsel %vm1828_vm15, %v2444_v33, %v2445_v63 }
 0x257   : > { %v2449_v60 = vsel %vm1828_vm15, %v2447_v53, %v2448_v30  ;;  %v2452_v2 = vsel %vm1828_vm15, %v2450_v5, %v2451_v44  ;;  %v2455_v3 = vsel %vm1828_vm15, %v2453_v39, %v2454_v29  ;;  %v10001_v16 = vadd.f32 %v2434_v43, %v13574_v21 }
 0x258   : > { %v2437_v40 = vsel %vm1828_vm15, %v13573_v48, %v13571_v35  ;;  %v13575_v18 = vmov %v13573_v48  ;;  %v2458_v54 = vsel %vm1828_vm15, %v2456_v31, %v2457_v61  ;;  %v13576_v49 = vmov %v13571_v35 }
 0x259   : > { %v10005_v58 = vadd.f32 %v13575_v18, %v2321_v10  ;;  %v10009_v37 = vadd.f32 %v2437_v40, %v9949_v46  ;;  %v10013_v7 = vadd.f32 %v13576_v49, %v2323_v59  ;;  %v10015_v9 = vadd.f32 %v2438_v25, %v2324_v32  ;;  %v13586_v25 = vld [vmem:[#allocation112_spill] sm:$0xff]  ;;  %v13594_v18 = vld [vmem:[#allocation85_spill] sm:$0xff] }
 0x25a   : > { %v10017_v6 = vadd.f32 %v2440_v51, %v2325_v1  ;;  %v10019_v35 = vadd.f32 %v2439_v15, %v2326_v45  ;;  %v10021_v43 = vadd.f32 %v2441_v36, %v2327_v23  ;;  %v10023_v56 = vadd.f32 %v2443_v0, %v2328_v4  ;;  %v13587_v36 = vld [vmem:[#allocation113_spill] sm:$0xff]  ;;  %v13591_v51 = vld [vmem:[#allocation68_spill] sm:$0xff] }
 0x25b   : > { %v10025_v10 = vadd.f32 %v2442_v12, %v2329_v11  ;;  %v10027_v48 = vadd.f32 %v2444_v33, %v2330_v24  ;;  %v10029_v46 = vadd.f32 %v2446_v20, %v2331_v14  ;;  %v10031_v40 = vadd.f32 %v2445_v63, %v2332_v50  ;;  %v13584_v33 = vld [vmem:[#allocation109_spill] sm:$0xff] }
 0x25c   : > { %v10033_v59 = vadd.f32 %v2447_v53, %v2333_v34  ;;  %v10035_v32 = vadd.f32 %v2449_v60, %v2334_v55  ;;  %v10037_v1 = vadd.f32 %v2448_v30, %v2335_v41  ;;  %v10039_v45 = vadd.f32 %v2450_v5, %v2336_v13  ;;  %v6880_v41 = vld [vmem:[%s12986_s4 + $0x5] ss:$0 sm:$0xff]  ;;  %v13580_v55 = vld [vmem:[#allocation106_spill] sm:$0xff]  ;;  %v13592_v60 = vld [vmem:[#allocation76_spill] sm:$0xff] }
 0x25d   : > { %v10041_v23 = vadd.f32 %v2452_v2, %v2337_v28  ;;  %v10043_v4 = vadd.f32 %v2451_v44, %v2338_v52  ;;  %v10045_v11 = vadd.f32 %v2453_v39, %v2339_v22  ;;  %v10047_v24 = vadd.f32 %v2455_v3, %v2340_v62  ;;  %v13582_v52 = vld [vmem:[#allocation107_spill] sm:$0xff]  ;;  %v13593_v3 = vld [vmem:[#allocation117_spill] sm:$0xff] }
 0x25e   : > { %v10049_v14 = vadd.f32 %v2454_v29, %v2341_v47  ;;  %v10051_v50 = vadd.f32 %v2456_v31, %v2342_v19  ;;  %v10053_v34 = vadd.f32 %v2458_v54, %v2343_v27  ;;  %v2580_v13 = vmul.f32 %v6880_v41, %v13580_v55  ;;  %v13583_v29 = vld [vmem:[#allocation108_spill] sm:$0xff]  ;;  %v13585_v31 = vld [vmem:[#allocation103_spill] sm:$0xff]  ;;  %v13589_v19 = vld [vmem:[#allocation118_spill] sm:$0xff] }
 0x25f   : > { %v10059_v28 = vadd.f32 %v2457_v61, %v2344_v38  ;;  %v2583_v44 = vmul.f32 %v6880_v41, %v13582_v52  ;;  %v10063_v22 = vmul.f32 %v6880_v41, %v13528_v57  ;;  %v2585_v62 = vmul.f32 %v6880_v41, %v13529_v42  ;;  %v13588_v53 = vld [vmem:[#allocation119_spill] sm:$0xff]  ;;  %v13590_v38 = vld [vmem:[#allocation114_spill] sm:$0xff]  ;;  %v13597_v52 = vld [vmem:[#allocation120_spill] sm:$0xff] }
 0x260   : > { %13577 = vst [vmem:[#allocation69_spill] sm:$0xff] %v10049_v14  ;;  %v2586_v5 = vmul.f32 %v6880_v41, %v13583_v29  ;;  %v10068_v30 = vmul.f32 %v6880_v41, %v13531_v17  ;;  %v2588_v63 = vmul.f32 %v6880_v41, %v13551_v8  ;;  %v2589_v39 = vmul.f32 %v6880_v41, %v13584_v33  ;;  %v13596_v33 = vld [vmem:[#allocation95_spill] sm:$0xff] }
 0x261   : > { %13578 = vst [vmem:[#allocation91_spill] sm:$0xff] %v10051_v50  ;;  %v10073_v47 = vmul.f32 %v6880_v41, %v13585_v31  ;;  %v2591_v15 = vmul.f32 %v6880_v41, %v13586_v25  ;;  %v2592_v12 = vmul.f32 %v6880_v41, %v13587_v36  ;;  %v10078_v61 = vmul.f32 %v6880_v41, %v13588_v53  ;;  %v10090_v36 = vld [vmem:[#allocation2 + $0x218] sm:$0xff]  ;;  %v13606_v17 = vld [vmem:[#allocation83_spill] sm:$0xff] }
 0x262   : > { %13579 = vst [vmem:[#allocation99_spill] sm:$0xff] %v10053_v34  ;;  %v2594_v27 = vmul.f32 %v6880_v41, %v13589_v19  ;;  %v2595_v26 = vmul.f32 %v6880_v41, %v13590_v38  ;;  %v10083_v0 = vmul.f32 %v6880_v41, %v13591_v51  ;;  %v2691_v20 = vrot.slane %v2580_v13, 2  ;;  %v13598_v19 = vld [vmem:[#allocation121_spill] sm:$0xff]  ;;  %v13599_v51 = vld [vmem:[#allocation122_spill] sm:$0xff] }
 0x263   : > { %13581 = vst [vmem:[#allocation55_spill] sm:$0xff] %v10059_v28  ;;  %v2597_v2 = vmul.f32 %v6880_v41, %v13592_v60  ;;  %v2598_v21 = vmul.f32 %v6880_v41, %v13593_v3  ;;  %v10088_v54 = vmul.f32 %v6880_v41, %v13594_v18  ;;  %v2696_v49 = vrot.slane %v2583_v44, 2  ;;  %v13600_v60 = vld [vmem:[#allocation77_spill] sm:$0xff]  ;;  %v13602_v3 = vld [vmem:[#allocation64_spill] sm:$0xff] }
 0x264   : > { %13595 = vst [vmem:[#allocation110_spill] sm:$0xff] %v10090_v36  ;;  %v2600_v29 = vmul.f32 %v6880_v41, %v13596_v33  ;;  %v2601_v55 = vmul.f32 %v6880_v41, %v13597_v52  ;;  %v10095_v38 = vmul.f32 %v6880_v41, %v13598_v19  ;;  %v2603_v53 = vmul.f32 %v6880_v41, %v13599_v51  ;;  %v13604_v44 = vld [vmem:[#allocation97_spill] sm:$0xff] }
 0x265   : > { %v2604_v13 = vmul.f32 %v6880_v41, %v10090_v36  ;;  %v13601_v25 = vrot.slane %v13600_v60, 2  ;;  %v13603_v31 = vrot.slane %v13602_v3, 2  ;;  %v13605_v8 = vrot.slane %v13604_v44, 2 }
 0x266   : > { %v13607_v42 = vrot.slane %v13606_v17, 2  ;;  %v2698_v52 = vrot.slane %v10063_v22, 2  ;;  %v2699_v57 = vrot.slane %v2585_v62, 2  ;;  %v2701_v41 = vrot.slane %v2586_v5, 2 }
 0x267   : > { %v2690_v18 = vsel %vm727_vm1, %v13603_v31, %v13601_v25  ;;  %v13608_v19 = vmov %v13601_v25  ;;  %v2703_v36 = vrot.slane %v10068_v30, 2  ;;  %v13609_v3 = vmov %v13605_v8 }
 0x268   : > { %v2695_v33 = vsel %vm727_vm1, %v13607_v42, %v13605_v8  ;;  %v2692_v51 = vsel %vm727_vm1, %v13608_v19, %v2691_v20  ;;  %v2697_v31 = vsel %vm727_vm1, %v13609_v3, %v2696_v49  ;;  %v2704_v25 = vrot.slane %v2588_v63, 2 }
 0x269   : > { %v2706_v28 = vrot.slane %v2589_v39, 2  ;;  %v2708_v34 = vrot.slane %v10073_v47, 2  ;;  %v2709_v50 = vrot.slane %v2591_v15, 2  ;;  %v2711_v42 = vrot.slane %v2592_v12, 2 }
 0x26a   : > { %v2714_v8 = vrot.slane %v2594_v27, 2  ;;  %v2716_v22 = vrot.slane %v2595_v26, 2  ;;  %v2718_v60 = vrot.slane %v10083_v0, 2  ;;  %v2719_v14 = vrot.slane %v2597_v2, 2 }
 0x26b   : > { %v2721_v19 = vrot.slane %v2598_v21, 2  ;;  %v2723_v62 = vrot.slane %v10088_v54, 2  ;;  %v2724_v5 = vrot.slane %v2600_v29, 2  ;;  %v2726_v30 = vrot.slane %v2601_v55, 2  ;;  %v13610_v54 = vld [vmem:[#allocation86_spill] sm:$0xff] }
 0x26c   : > { %v2728_v20 = vrot.slane %v10095_v38, 2  ;;  %v2729_v44 = vrot.slane %v2603_v53, 2  ;;  %v2700_v63 = vsel %vm727_vm1, %v2698_v52, %v2699_v57  ;;  %v2702_v39 = vsel %vm727_vm1, %v2699_v57, %v2701_v41 }
 0x26d   : > { %v2713_v47 = vrot.slane %v10078_v61, 2  ;;  %v2731_v15 = vrot.slane %v2604_v13, 2  ;;  %v2705_v12 = vsel %vm727_vm1, %v2703_v36, %v2704_v25  ;;  %v2707_v27 = vsel %vm727_vm1, %v2704_v25, %v2706_v28 }
 0x26e   : > { %v2710_v26 = vsel %vm727_vm1, %v2708_v34, %v2709_v50  ;;  %v2712_v0 = vsel %vm727_vm1, %v2709_v50, %v2711_v42  ;;  %v2717_v29 = vsel %vm727_vm1, %v2714_v8, %v2716_v22  ;;  %v2720_v53 = vsel %vm727_vm1, %v2718_v60, %v2719_v14 }
 0x26f   : > { %v2715_v55 = vsel %vm727_vm1, %v2713_v47, %v2714_v8  ;;  %v2722_v38 = vsel %vm727_vm1, %v2719_v14, %v2721_v19  ;;  %v2725_v57 = vsel %vm727_vm1, %v2723_v62, %v2724_v5  ;;  %v2727_v61 = vsel %vm727_vm1, %v2724_v5, %v2726_v30  ;;  %v13623_v30 = vld [vmem:[#allocation94_spill] sm:$0xff] }
 0x270   : > { %v2730_v2 = vsel %vm727_vm1, %v2728_v20, %v2729_v44  ;;  %v2803_v28 = vadd.f32 %v2690_v18, %v10001_v16  ;;  %v2732_v21 = vsel %vm727_vm1, %v2729_v44, %v2731_v15  ;;  %v2804_v50 = vadd.f32 %v2692_v51, %v13610_v54  ;;  %v13624_v44 = vld [vmem:[#allocation104_spill] sm:$0xff] }
 0x271   : > { %v13611_v49 = vrot.slane %v13606_v17, 2  ;;  %v2806_v41 = vadd.f32 %v2695_v33, %v10009_v37  ;;  %v2807_v14 = vadd.f32 %v2697_v31, %v10013_v7  ;;  %v2808_v3 = vadd.f32 %v2698_v52, %v10015_v9  ;;  %v13614_v52 = vld [vmem:[#allocation99_spill] sm:$0xff]  ;;  %v13626_v15 = vld [vmem:[#allocation112_spill] sm:$0xff] }
 0x272   : > { %v2809_v25 = vadd.f32 %v2700_v63, %v10017_v6  ;;  %v2810_v42 = vadd.f32 %v2702_v39, %v10019_v35  ;;  %v2811_v16 = vadd.f32 %v2703_v36, %v10021_v43  ;;  %v2812_v18 = vadd.f32 %v2705_v12, %v10023_v56  ;;  %v13615_v33 = vld [vmem:[#allocation55_spill] sm:$0xff]  ;;  %v13633_v54 = vld [vmem:[#allocation68_spill] sm:$0xff] }
 0x273   : > { %v2805_v13 = vadd.f32 %v13611_v49, %v10005_v58  ;;  %v2813_v51 = vadd.f32 %v2707_v27, %v10025_v10  ;;  %v2814_v8 = vadd.f32 %v2708_v34, %v10027_v48  ;;  %v2815_v17 = vadd.f32 %v2710_v26, %v10029_v46  ;;  %v13612_v48 = vld [vmem:[#allocation69_spill] sm:$0xff]  ;;  %v13613_v34 = vld [vmem:[#allocation91_spill] sm:$0xff]  ;;  %v10179_v26 = vld [vmem:[#allocation2 + $0x228] sm:$0xff] }
 0x274   : > { %v2816_v58 = vadd.f32 %v2712_v0, %v10031_v40  ;;  %v2817_v37 = vadd.f32 %v2713_v47, %v10033_v59  ;;  %v2818_v7 = vadd.f32 %v2715_v55, %v10035_v32  ;;  %v2819_v9 = vadd.f32 %v2717_v29, %v10037_v1  ;;  %v6881_v1 = vld [vmem:[%s12986_s4 + $0x6] ss:$0 sm:$0xff]  ;;  %13627 = vst [vmem:[#allocation60_spill] sm:$0xff] %v10179_v26  ;;  %v10181_v0 = vld [vmem:[#allocation2 + $0x230] sm:$0xff] }
 0x275   : > { %v2820_v6 = vadd.f32 %v2718_v60, %v10039_v45  ;;  %v2821_v35 = vadd.f32 %v2720_v53, %v10041_v23  ;;  %v2822_v43 = vadd.f32 %v2722_v38, %v10043_v4  ;;  %v2823_v56 = vadd.f32 %v2723_v62, %v10045_v11  ;;  %v13617_v45 = vld [vmem:[#allocation79_spill] sm:$0xff]  ;;  %v13618_v4 = vld [vmem:[#allocation88_spill] sm:$0xff]  ;;  %v13619_v11 = vld [vmem:[#allocation93_spill] sm:$0xff]  ;;  %13628 = vst [vmem:[#allocation111_spill] sm:$0xff] %v10181_v0 }
 0x276   : > { %v2824_v10 = vadd.f32 %v2725_v57, %v10047_v24  ;;  %v2825_v46 = vadd.f32 %v2727_v61, %v13612_v48  ;;  %v2826_v40 = vadd.f32 %v2728_v20, %v13613_v34  ;;  %v2827_v59 = vadd.f32 %v2730_v2, %v13614_v52  ;;  %v13620_v24 = vld [vmem:[#allocation90_spill] sm:$0xff]  ;;  %v13625_v39 = vld [vmem:[#allocation103_spill] sm:$0xff]  ;;  %v13629_v55 = vld [vmem:[#allocation105_spill] sm:$0xff] }
 0x277   : > { %v10164_v32 = vadd.f32 %v2732_v21, %v13615_v33  ;;  %v2852_v23 = vmul.f32 %v6881_v1, %v13617_v45  ;;  %v2855_v36 = vmul.f32 %v6881_v1, %v13618_v4  ;;  %v2856_v31 = vmul.f32 %v6881_v1, %v13619_v11  ;;  %v13621_v60 = vld [vmem:[#allocation102_spill] sm:$0xff]  ;;  %v1708_v27 = vld [vmem:[#allocation2 + $0x220] sm:$0xff]  ;;  %v13634_v48 = vld [vmem:[#allocation76_spill] sm:$0xff] }
 0x278   : > { %v2857_v22 = vmul.f32 %v6881_v1, %v13620_v24  ;;  %v2858_v19 = vmul.f32 %v6881_v1, %v13621_v60  ;;  %v13622_v62 = vld [vmem:[#allocation98_spill] sm:$0xff]  ;;  %v2860_v20 = vmul.f32 %v6881_v1, %v13623_v30  ;;  %v2861_v63 = vmul.f32 %v6881_v1, %v13624_v44  ;;  %v13630_v53 = vld [vmem:[#allocation119_spill] sm:$0xff]  ;;  %v13635_v52 = vld [vmem:[#allocation89_spill] sm:$0xff] }
 0x279   : > { %13616 = vst [vmem:[#allocation73_spill] sm:$0xff] %v10164_v32  ;;  %v2859_v5 = vmul.f32 %v6881_v1, %v13622_v62  ;;  %v2862_v47 = vmul.f32 %v6881_v1, %v13625_v39  ;;  %v2863_v12 = vmul.f32 %v6881_v1, %v13626_v15  ;;  %v2864_v29 = vmul.f32 %v6881_v1, %v13629_v55  ;;  %v13631_v57 = vld [vmem:[#allocation118_spill] sm:$0xff]  ;;  %v13636_v45 = vld [vmem:[#allocation85_spill] sm:$0xff]  ;;  %v13637_v60 = vld [vmem:[#allocation95_spill] sm:$0xff] }
 0x27a   : > { %v2865_v38 = vmul.f32 %v6881_v1, %v13630_v53  ;;  %v2866_v61 = vmul.f32 %v6881_v1, %v13631_v57  ;;  %v13632_v2 = vld [vmem:[#allocation74_spill] sm:$0xff]  ;;  %v2868_v49 = vmul.f32 %v6881_v1, %v13633_v54  ;;  %v2869_v34 = vmul.f32 %v6881_v1, %v13634_v48  ;;  %v13638_v32 = vld [vmem:[#allocation27_spill] sm:$0xff]  ;;  %v13639_v15 = vld [vmem:[#allocation121_spill] sm:$0xff] }
 0x27b   : > { %v2867_v21 = vmul.f32 %v6881_v1, %v13632_v2  ;;  %v2870_v33 = vmul.f32 %v6881_v1, %v13635_v52  ;;  %v2871_v4 = vmul.f32 %v6881_v1, %v13636_v45  ;;  %v2872_v44 = vmul.f32 %v6881_v1, %v13637_v60  ;;  %v13640_v30 = vld [vmem:[#allocation122_spill] sm:$0xff]  ;;  %v13641_v54 = vld [vmem:[#allocation72_spill] sm:$0xff] }
 0x27c   : > { %v2873_v39 = vmul.f32 %v6881_v1, %v13638_v32  ;;  %v2874_v55 = vmul.f32 %v6881_v1, %v13639_v15  ;;  %v2875_v53 = vmul.f32 %v6881_v1, %v13640_v30  ;;  %v2876_v62 = vmul.f32 %v6881_v1, %v1708_v27  ;;  %v13642_v52 = vld [vmem:[#allocation92_spill] sm:$0xff] }
 0x27d   : > { %v2877_v57 = vmul.f32 %v6881_v1, %v10179_v26  ;;  %v10197_v2 = vmul.f32 %v6881_v1, %v10181_v0  ;;  %v10200_v48 = vadd.f32 %v2852_v23, %v13641_v54  ;;  %v10203_v24 = vadd.f32 %v13642_v52, %v2803_v28  ;;  %v13643_v45 = vld [vmem:[#allocation100_spill] sm:$0xff] }
 0x27e   : > { %v10206_v60 = vadd.f32 %v13643_v45, %v2804_v50  ;;  %v10208_v32 = vadd.f32 %v2855_v36, %v2805_v13  ;;  %v10210_v15 = vadd.f32 %v2856_v31, %v2806_v41  ;;  %v10212_v30 = vadd.f32 %v2857_v22, %v2807_v14  ;;  %v13661_v45 = vld [vmem:[#allocation60_spill] sm:$0xff] }
 0x27f   : > { %v10214_v27 = vadd.f32 %v2858_v19, %v2808_v3  ;;  %v10216_v26 = vadd.f32 %v2859_v5, %v2809_v25  ;;  %v10218_v1 = vadd.f32 %v2860_v20, %v2810_v42  ;;  %v10220_v23 = vadd.f32 %v2861_v63, %v2811_v16  ;;  %v13654_v20 = vld [vmem:[#allocation76_spill] sm:$0xff] }
 0x280   : > { %v10222_v54 = vadd.f32 %v2862_v47, %v2812_v18  ;;  %v10224_v28 = vadd.f32 %v2863_v12, %v2813_v51  ;;  %v10226_v50 = vadd.f32 %v2864_v29, %v2814_v8  ;;  %v10228_v13 = vadd.f32 %v2865_v38, %v2815_v17  ;;  %v13656_v12 = vld [vmem:[#allocation95_spill] sm:$0xff] }
 0x281   : > { %v10230_v41 = vadd.f32 %v2866_v61, %v2816_v58  ;;  %v10232_v14 = vadd.f32 %v2867_v21, %v2817_v37  ;;  %v10234_v3 = vadd.f32 %v2868_v49, %v2818_v7  ;;  %v10236_v25 = vadd.f32 %v2869_v34, %v2819_v9  ;;  %v6882_v7 = vld [vmem:[%s12986_s4 + $0x7] ss:$0 sm:$0xff]  ;;  %v13647_v9 = vld [vmem:[#allocation84_spill] sm:$0xff]  ;;  %v13659_v21 = vld [vmem:[#allocation121_spill] sm:$0xff] }
 0x282   : > { %v10238_v42 = vadd.f32 %v2870_v33, %v2820_v6  ;;  %v10240_v16 = vadd.f32 %v2871_v4, %v2821_v35  ;;  %v10242_v18 = vadd.f32 %v2872_v44, %v2822_v43  ;;  %v10244_v51 = vadd.f32 %v2873_v39, %v2823_v56  ;;  %v13648_v43 = vld [vmem:[#allocation90_spill] sm:$0xff]  ;;  %v13655_v39 = vld [vmem:[#allocation85_spill] sm:$0xff] }
 0x283   : > { %v10246_v8 = vadd.f32 %v2874_v55, %v2824_v10  ;;  %v10248_v17 = vadd.f32 %v2875_v53, %v2825_v46  ;;  %v10250_v58 = vadd.f32 %v2876_v62, %v2826_v40  ;;  %v10252_v37 = vadd.f32 %v2877_v57, %v2827_v59  ;;  %v13649_v56 = vld [vmem:[#allocation98_spill] sm:$0xff]  ;;  %v13651_v46 = vld [vmem:[#allocation112_spill] sm:$0xff]  ;;  %v13657_v53 = vld [vmem:[#allocation103_spill] sm:$0xff] }
 0x284   : > { %v2944_v6 = vmul.f32 %v6882_v7, %v13647_v9  ;;  %v2945_v35 = vmul.f32 %v6882_v7, %v13619_v11  ;;  %v2946_v36 = vmul.f32 %v6882_v7, %v13648_v43  ;;  %v2947_v31 = vmul.f32 %v6882_v7, %v13649_v56  ;;  %v13650_v10 = vld [vmem:[#allocation94_spill] sm:$0xff]  ;;  %v13653_v59 = vld [vmem:[#allocation68_spill] sm:$0xff]  ;;  %v13658_v57 = vld [vmem:[#allocation119_spill] sm:$0xff] }
 0x285   : > { %13644 = vst [vmem:[#allocation115_spill] sm:$0xff] %v10248_v17  ;;  %v2948_v22 = vmul.f32 %v6882_v7, %v13650_v10  ;;  %v2950_v19 = vmul.f32 %v6882_v7, %v13651_v46  ;;  %v13652_v40 = vld [vmem:[#allocation118_spill] sm:$0xff]  ;;  %v2953_v5 = vmul.f32 %v6882_v7, %v13653_v59  ;;  %v2954_v63 = vmul.f32 %v6882_v7, %v13654_v20  ;;  %v13664_v9 = vld [vmem:[#allocation63_spill] sm:$0xff] }
 0x286   : > { %13645 = vst [vmem:[#allocation116_spill] sm:$0xff] %v10250_v58  ;;  %v2952_v62 = vmul.f32 %v6882_v7, %v13652_v40  ;;  %v2955_v47 = vmul.f32 %v6882_v7, %v13655_v39  ;;  %v2956_v29 = vmul.f32 %v6882_v7, %v13656_v12  ;;  %v2949_v38 = vmul.f32 %v6882_v7, %v13657_v53  ;;  %v13660_v34 = vld [vmem:[#allocation122_spill] sm:$0xff] }
 0x287   : > { %13646 = vst [vmem:[#allocation96_spill] sm:$0xff] %v10252_v37  ;;  %v2951_v61 = vmul.f32 %v6882_v7, %v13658_v57  ;;  %v2957_v49 = vmul.f32 %v6882_v7, %v13659_v21  ;;  %v2958_v33 = vmul.f32 %v6882_v7, %v13660_v34  ;;  %v2959_v4 = vmul.f32 %v6882_v7, %v13661_v45  ;;  %v13662_v55 = vld [vmem:[#allocation78_spill] sm:$0xff] }
 0x288   : > { %v2960_v44 = vmul.f32 %v6882_v7, %v10181_v0  ;;  %v13663_v52 = vrot.slane %v13662_v55, 1  ;;  %v13665_v43 = vrot.slane %v13664_v9, 1  ;;  %v3015_v20 = vrot.slane %v2944_v6, 1  ;;  %v13666_v9 = vld [vmem:[#allocation73_spill] sm:$0xff]  ;;  %v13667_v6 = vld [vmem:[#allocation87_spill] sm:$0xff] }
 0x289   : > { %v3018_v39 = vrot.slane %v2946_v36, 1  ;;  %v3021_v12 = vrot.slane %v2948_v22, 1  ;;  %v3024_v40 = vrot.slane %v2950_v19, 1  ;;  %v3027_v46 = vrot.slane %v2952_v62, 1 }
 0x28a   : > { %v3013_v59 = vsel %vm1828_vm15, %v13665_v43, %v13663_v52  ;;  %v3029_v57 = vrot.slane %v2953_v5, 1  ;;  %v3030_v53 = vrot.slane %v2954_v63, 1  ;;  %v3032_v21 = vrot.slane %v2955_v47, 1 }
 0x28b   : > { %v3033_v10 = vrot.slane %v2956_v29, 1  ;;  %v3017_v34 = vrot.slane %v2945_v35, 1  ;;  %v3020_v56 = vrot.slane %v2947_v31, 1  ;;  %v3035_v45 = vrot.slane %v2957_v49, 1  ;;  %v13669_v29 = vld [vmem:[#allocation59_spill] sm:$0xff] }
 0x28c   : > { %v3036_v11 = vrot.slane %v2958_v33, 1  ;;  %v3023_v7 = vrot.slane %v2949_v38, 1  ;;  %v3026_v0 = vrot.slane %v2951_v61, 1  ;;  %v3038_v37 = vrot.slane %v2959_v4, 1  ;;  %v13671_v61 = vld [vmem:[#allocation71_spill] sm:$0xff]  ;;  %v13672_v33 = vld [vmem:[#allocation81_spill] sm:$0xff] }
 0x28d   : > { %v3039_v58 = vrot.slane %v2960_v44, 1  ;;  %v2926_v52 = vadd.f32 %v10197_v2, %v13666_v9  ;;  %v13668_v36 = vrot.slane %v13667_v6, 1  ;;  %v3019_v19 = vsel %vm1828_vm15, %v3017_v34, %v3018_v39  ;;  %v13670_v2 = vld [vmem:[#allocation65_spill] sm:$0xff] }
 0x28e   : > { %v3022_v62 = vsel %vm1828_vm15, %v3020_v56, %v3021_v12  ;;  %v3025_v35 = vsel %vm1828_vm15, %v3023_v7, %v3024_v40  ;;  %v3028_v31 = vsel %vm1828_vm15, %v3026_v0, %v3027_v46  ;;  %v3031_v5 = vsel %vm1828_vm15, %v3029_v57, %v3030_v53 }
 0x28f   : > { %v3016_v22 = vsel %vm1828_vm15, %v13668_v36, %v3015_v20  ;;  %v3034_v63 = vsel %vm1828_vm15, %v3032_v21, %v3033_v10  ;;  %v3037_v47 = vsel %vm1828_vm15, %v3035_v45, %v3036_v11  ;;  %v10293_v38 = vadd.f32 %v13670_v2, %v13669_v29 }
 0x290   : > { %v10296_v49 = vadd.f32 %v3013_v59, %v13671_v61  ;;  %v13673_v4 = vrot.slane %v13662_v55, 1  ;;  %v3040_v43 = vsel %vm1828_vm15, %v3038_v37, %v3039_v58  ;;  %v13674_v9 = vmov %v13668_v36 }
 0x291   : > { %v10307_v36 = vadd.f32 %v13674_v9, %v10200_v48  ;;  %v10310_v17 = vadd.f32 %v3016_v22, %v10203_v24  ;;  %v10313_v29 = vadd.f32 %v3015_v20, %v10206_v60  ;;  %v10316_v59 = vadd.f32 %v3017_v34, %v10208_v32  ;;  %v13696_v22 = vld [vmem:[#allocation109_spill] sm:$0xff] }
 0x292   : > { %v10301_v44 = vadd.f32 %v13673_v4, %v13672_v33  ;;  %v10319_v55 = vadd.f32 %v3019_v19, %v10210_v15  ;;  %v10322_v2 = vadd.f32 %v3018_v39, %v10212_v30  ;;  %v10325_v61 = vadd.f32 %v3020_v56, %v10214_v27  ;;  %v13700_v33 = vld [vmem:[#allocation119_spill] sm:$0xff] }
 0x293   : > { %v10328_v48 = vadd.f32 %v3022_v62, %v10216_v26  ;;  %v10331_v24 = vadd.f32 %v3021_v12, %v10218_v1  ;;  %v10334_v60 = vadd.f32 %v3023_v7, %v10220_v23  ;;  %v10337_v32 = vadd.f32 %v3025_v35, %v10222_v54  ;;  %v13694_v12 = vld [vmem:[#allocation98_spill] sm:$0xff]  ;;  %v13697_v62 = vld [vmem:[#allocation103_spill] sm:$0xff] }
 0x294   : > { %v10340_v15 = vadd.f32 %v3024_v40, %v10224_v28  ;;  %v10343_v30 = vadd.f32 %v3026_v0, %v10226_v50  ;;  %v10346_v27 = vadd.f32 %v3028_v31, %v10228_v13  ;;  %v10349_v26 = vadd.f32 %v3027_v46, %v10230_v41  ;;  %v13690_v40 = vld [vmem:[#allocation106_spill] sm:$0xff]  ;;  %v13698_v31 = vld [vmem:[#allocation112_spill] sm:$0xff] }
 0x295   : > { %v10352_v1 = vadd.f32 %v3029_v57, %v10232_v14  ;;  %v10355_v23 = vadd.f32 %v3031_v5, %v10234_v3  ;;  %v10358_v54 = vadd.f32 %v3030_v53, %v10236_v25  ;;  %v10361_v28 = vadd.f32 %v3032_v21, %v10238_v42  ;;  %v13683_v14 = vld [vmem:[#allocation115_spill] sm:$0xff]  ;;  %v13685_v25 = vld [vmem:[#allocation116_spill] sm:$0xff] }
 0x296   : > { %v10364_v0 = vadd.f32 %v3034_v63, %v10240_v16  ;;  %v10367_v50 = vadd.f32 %v3033_v10, %v10242_v18  ;;  %v10370_v13 = vadd.f32 %v3035_v45, %v10244_v51  ;;  %v10373_v41 = vadd.f32 %v3037_v47, %v10246_v8  ;;  %v13687_v42 = vld [vmem:[#allocation96_spill] sm:$0xff]  ;;  %v6884_v51 = vld [vmem:[#allocation2 + $0xf8] sm:$0xff]  ;;  %v6886_v45 = vld [vmem:[#allocation2 + $0x150] sm:$0xff] }
 0x297   : > { %13675 = vst [vmem:[#allocation82_spill] sm:$0xff] %v10352_v1  ;;  %v10376_v3 = vadd.f32 %v3036_v11, %v13683_v14  ;;  %v10379_v56 = vadd.f32 %v3038_v37, %v13685_v25  ;;  %v10382_v46 = vadd.f32 %v3040_v43, %v13687_v42  ;;  %v10384_v16 = vadd.f32 %v3039_v58, %v2926_v52  ;;  %v6883_v18 = vld [vmem:[%s12986_s4 + $0x8] ss:$0 sm:$0xff]  ;;  %v13691_v11 = vld [vmem:[#allocation107_spill] sm:$0xff]  ;;  %v13692_v37 = vld [vmem:[#allocation93_spill] sm:$0xff] }
 0x298   : > { %13676 = vst [vmem:[#allocation70_spill] sm:$0xff] %v10355_v23  ;;  %v3156_v10 = vmul.f32 %v6884_v51, %v6883_v18  ;;  %v3159_v8 = vmul.f32 %v6883_v18, %v13690_v40  ;;  %v6885_v53 = vld [vmem:[#allocation2 + $0x128] sm:$0xff]  ;;  %v3162_v21 = vmul.f32 %v6883_v18, %v13691_v11  ;;  %v10394_v34 = vmul.f32 %v6883_v18, %v13692_v37  ;;  %v13695_v52 = vld [vmem:[#allocation94_spill] sm:$0xff]  ;;  %v13699_v63 = vld [vmem:[#allocation113_spill] sm:$0xff] }
 0x299   : > { %13677 = vst [vmem:[#allocation77_spill] sm:$0xff] %v10358_v54  ;;  %v10390_v57 = vmul.f32 %v6885_v53, %v6883_v18  ;;  %v3164_v20 = vmul.f32 %v6886_v45, %v6883_v18  ;;  %v13693_v58 = vld [vmem:[#allocation108_spill] sm:$0xff]  ;;  %v10398_v7 = vmul.f32 %v6883_v18, %v13694_v12  ;;  %v10401_v6 = vmul.f32 %v6883_v18, %v13695_v52  ;;  %v13701_v43 = vld [vmem:[#allocation118_spill] sm:$0xff]  ;;  %v6888_v40 = vld [vmem:[#allocation2 + $0x1d0] sm:$0xff] }
 0x29a   : > { %13678 = vst [vmem:[#allocation64_spill] sm:$0xff] %v10361_v28  ;;  %v3165_v39 = vmul.f32 %v6883_v18, %v13693_v58  ;;  %v10404_v19 = vmul.f32 %v6883_v18, %v13696_v22  ;;  %v10407_v35 = vmul.f32 %v6883_v18, %v13697_v62  ;;  %v10410_v5 = vmul.f32 %v6883_v18, %v13698_v31  ;;  %v13702_v14 = vld [vmem:[#allocation114_spill] sm:$0xff]  ;;  %v6887_v42 = vld [vmem:[#allocation2 + $0x1c8] sm:$0xff]  ;;  %v13703_v11 = vld [vmem:[#allocation117_spill] sm:$0xff] }
 0x29b   : > { %13679 = vst [vmem:[#allocation97_spill] sm:$0xff] %v10364_v0  ;;  %v10413_v47 = vmul.f32 %v6883_v18, %v13699_v63  ;;  %v10416_v4 = vmul.f32 %v6883_v18, %v13700_v33  ;;  %v10419_v9 = vmul.f32 %v6883_v18, %v13701_v43  ;;  %v3174_v25 = vmul.f32 %v6883_v18, %v13702_v14  ;;  %v6889_v45 = vld [vmem:[#allocation2 + $0x1e8] sm:$0xff]  ;;  %v1711_v12 = vld [vmem:[#allocation2 + $0x238] sm:$0xff]  ;;  %v6890_v52 = vld [vmem:[#allocation2 + $0x1f0] sm:$0xff] }
 0x29c   : > { %13680 = vst [vmem:[#allocation83_spill] sm:$0xff] %v10367_v50  ;;  %v10422_v51 = vmul.f32 %v6887_v42, %v6883_v18  ;;  %v3176_v53 = vmul.f32 %v6888_v40, %v6883_v18  ;;  %v3177_v37 = vmul.f32 %v6883_v18, %v13703_v11  ;;  %v10425_v58 = vmul.f32 %v6889_v45, %v6883_v18  ;;  %v13704_v62 = vld [vmem:[#allocation120_spill] sm:$0xff]  ;;  %v13705_v43 = vld [vmem:[#allocation121_spill] sm:$0xff]  ;;  %v13707_v40 = vld [vmem:[#allocation122_spill] sm:$0xff] }
 0x29d   : > { %13681 = vst [vmem:[#allocation86_spill] sm:$0xff] %v10370_v13  ;;  %v3179_v22 = vmul.f32 %v6890_v52, %v6883_v18  ;;  %v3180_v31 = vmul.f32 %v6883_v18, %v13704_v62  ;;  %v3263_v63 = vrot.slane %v3156_v10, 2  ;;  %v3268_v33 = vrot.slane %v3159_v8, 2  ;;  %v13706_v14 = vld [vmem:[#allocation101_spill] sm:$0xff]  ;;  %v13708_v11 = vld [vmem:[#allocation110_spill] sm:$0xff]  ;;  %v13709_v45 = vld [vmem:[#allocation60_spill] sm:$0xff] }
 0x29e   : > { %13682 = vst [vmem:[#allocation69_spill] sm:$0xff] %v10373_v41  ;;  %v3271_v42 = vrot.slane %v13706_v14, 2  ;;  %v3183_v41 = vmul.f32 %v6883_v18, %v13708_v11  ;;  %v10435_v13 = vmul.f32 %v6883_v18, %v13709_v45  ;;  %v3278_v50 = vrot.slane %v3165_v39, 2  ;;  %v13710_v52 = vld [vmem:[#allocation111_spill] sm:$0xff]  ;;  %v13713_v14 = vld [vmem:[#allocation58_spill] sm:$0xff]  ;;  %v13716_v45 = vld [vmem:[#allocation80_spill] sm:$0xff] }
 0x29f   : > { %13684 = vst [vmem:[#allocation91_spill] sm:$0xff] %v10376_v3  ;;  %v3182_v3 = vmul.f32 %v6883_v18, %v13707_v40  ;;  %v3185_v0 = vmul.f32 %v6883_v18, %v13710_v52  ;;  %v3186_v62 = vmul.f32 %v6883_v18, %v1711_v12  ;;  %v3270_v10 = vrot.slane %v10390_v57, 2  ;;  %v13718_v39 = vld [vmem:[#allocation66_spill] sm:$0xff] }
 0x2a0   : > { %13686 = vst [vmem:[#allocation99_spill] sm:$0xff] %v10379_v56  ;;  %v3276_v56 = vrot.slane %v3164_v20, 2  ;;  %v3275_v8 = vrot.slane %v10394_v34, 2  ;;  %v13717_v54 = vrot.slane %v13716_v45, 2  ;;  %v13719_v23 = vrot.slane %v13718_v39, 2 }
 0x2a1   : > { %13688 = vst [vmem:[#allocation55_spill] sm:$0xff] %v10382_v46  ;;  %v3273_v46 = vrot.slane %v3162_v21, 2  ;;  %v13714_v21 = vrot.slane %v13713_v14, 2  ;;  %v3272_v12 = vsel %vm727_vm1, %v3270_v10, %v3271_v42  ;;  %v3281_v14 = vrot.slane %v10401_v6, 2 }
 0x2a2   : > { %13689 = vst [vmem:[#allocation79_spill] sm:$0xff] %v10384_v16  ;;  %v10429_v16 = vmul.f32 %v6883_v18, %v13705_v43  ;;  %v13711_v43 = vld [vmem:[#allocation62_spill] sm:$0xff]  ;;  %v3267_v18 = vsel %vm727_vm1, %v13719_v23, %v13717_v54  ;;  %v13720_v57 = vmov %v13717_v54  ;;  %v3285_v23 = vrot.slane %v10407_v35, 2 }
 0x2a3   : > { %v13712_v28 = vrot.slane %v13711_v43, 2  ;;  %v3269_v34 = vsel %vm727_vm1, %v13720_v57, %v3268_v33  ;;  %v3274_v52 = vsel %vm727_vm1, %v3271_v42, %v3273_v46  ;;  %v3280_v43 = vrot.slane %v10398_v7, 2 }
 0x2a4   : > { %v3286_v54 = vrot.slane %v10410_v5, 2  ;;  %v3288_v33 = vrot.slane %v10413_v47, 2  ;;  %v3293_v45 = vrot.slane %v3174_v25, 2  ;;  %v3295_v46 = vrot.slane %v10422_v51, 2 }
 0x2a5   : > { %v3262_v20 = vsel %vm727_vm1, %v13714_v21, %v13712_v28  ;;  %v13715_v40 = vmov %v13712_v28  ;;  %v3277_v28 = vsel %vm727_vm1, %v3275_v8, %v3276_v56  ;;  %v3283_v21 = vrot.slane %v10404_v19, 2 }
 0x2a6   : > { %v3264_v11 = vsel %vm727_vm1, %v13715_v40, %v3263_v63  ;;  %v3279_v63 = vsel %vm727_vm1, %v3276_v56, %v3278_v50  ;;  %v3291_v40 = vrot.slane %v10419_v9, 2  ;;  %v3296_v42 = vrot.slane %v3176_v53, 2 }
 0x2a7   : > { %v3298_v57 = vrot.slane %v3177_v37, 2  ;;  %v3300_v7 = vrot.slane %v10425_v58, 2  ;;  %v3301_v50 = vrot.slane %v3179_v22, 2  ;;  %v3303_v56 = vrot.slane %v3180_v31, 2 }
 0x2a8   : > { %v3305_v6 = vrot.slane %v10429_v16, 2  ;;  %v3306_v19 = vrot.slane %v3182_v3, 2  ;;  %v3290_v35 = vrot.slane %v10416_v4, 2  ;;  %v3308_v1 = vrot.slane %v3183_v41, 2 }
 0x2a9   : > { %v3310_v5 = vrot.slane %v10435_v13, 2  ;;  %v3311_v47 = vrot.slane %v3185_v0, 2  ;;  %v3282_v9 = vsel %vm727_vm1, %v3280_v43, %v3281_v14  ;;  %v3284_v25 = vsel %vm727_vm1, %v3281_v14, %v3283_v21  ;;  %v13721_v14 = vld [vmem:[#allocation67_spill] sm:$0xff] }
 0x2aa   : > { %v3287_v51 = vsel %vm727_vm1, %v3285_v23, %v3286_v54  ;;  %v3313_v53 = vrot.slane %v3186_v62, 2  ;;  %v3289_v37 = vsel %vm727_vm1, %v3286_v54, %v3288_v33  ;;  %v3292_v58 = vsel %vm727_vm1, %v3290_v35, %v3291_v40  ;;  %v13722_v33 = vld [vmem:[#allocation75_spill] sm:$0xff] }
 0x2ab   : > { %v3294_v16 = vsel %vm727_vm1, %v3291_v40, %v3293_v45  ;;  %v3297_v3 = vsel %vm727_vm1, %v3295_v46, %v3296_v42  ;;  %v3299_v41 = vsel %vm727_vm1, %v3296_v42, %v3298_v57  ;;  %v3302_v13 = vsel %vm727_vm1, %v3300_v7, %v3301_v50 }
 0x2ac   : > { %v3304_v0 = vsel %vm727_vm1, %v3301_v50, %v3303_v56  ;;  %v3307_v4 = vsel %vm727_vm1, %v3305_v6, %v3306_v19  ;;  %v3309_v22 = vsel %vm727_vm1, %v3306_v19, %v3308_v1  ;;  %v3312_v31 = vsel %vm727_vm1, %v3310_v5, %v3311_v47 }
 0x2ad   : > { %v3379_v62 = vadd.f32 %v3262_v20, %v10293_v38  ;;  %v3380_v21 = vadd.f32 %v3264_v11, %v13721_v14  ;;  %v3314_v54 = vsel %vm727_vm1, %v3311_v47, %v3313_v53  ;;  %v13723_v40 = vrot.slane %v13718_v39, 2  ;;  %v13735_v47 = vld [vmem:[#allocation79_spill] sm:$0xff]  ;;  %v13737_v53 = vld [vmem:[#allocation56_spill] sm:$0xff] }
 0x2ae   : > { %v3382_v42 = vadd.f32 %v3267_v18, %v10296_v49  ;;  %v3383_v57 = vadd.f32 %v3269_v34, %v10301_v44  ;;  %v3384_v50 = vadd.f32 %v3270_v10, %v10307_v36  ;;  %v3385_v1 = vadd.f32 %v3272_v12, %v10310_v17  ;;  %v13724_v10 = vld [vmem:[#allocation82_spill] sm:$0xff]  ;;  %v13726_v18 = vld [vmem:[#allocation77_spill] sm:$0xff]  ;;  %v13727_v34 = vld [vmem:[#allocation64_spill] sm:$0xff] }
 0x2af   : > { %v3381_v45 = vadd.f32 %v13723_v40, %v13722_v33  ;;  %v3386_v56 = vadd.f32 %v3274_v52, %v10313_v29  ;;  %v3387_v38 = vadd.f32 %v3275_v8, %v10316_v59  ;;  %v3388_v20 = vadd.f32 %v3277_v28, %v10319_v55  ;;  %v13725_v8 = vld [vmem:[#allocation70_spill] sm:$0xff]  ;;  %v13728_v12 = vld [vmem:[#allocation97_spill] sm:$0xff]  ;;  %v13729_v52 = vld [vmem:[#allocation83_spill] sm:$0xff] }
 0x2b0   : > { %v3389_v11 = vadd.f32 %v3279_v63, %v10322_v2  ;;  %v3390_v19 = vadd.f32 %v3280_v43, %v10325_v61  ;;  %v3391_v39 = vadd.f32 %v3282_v9, %v10328_v48  ;;  %v3392_v49 = vadd.f32 %v3284_v25, %v10331_v24  ;;  %v13730_v28 = vld [vmem:[#allocation86_spill] sm:$0xff]  ;;  %v13731_v43 = vld [vmem:[#allocation69_spill] sm:$0xff]  ;;  %v13732_v63 = vld [vmem:[#allocation91_spill] sm:$0xff] }
 0x2b1   : > { %v3393_v44 = vadd.f32 %v3285_v23, %v10334_v60  ;;  %v3394_v36 = vadd.f32 %v3287_v51, %v10337_v32  ;;  %v3395_v17 = vadd.f32 %v3289_v37, %v10340_v15  ;;  %v3396_v29 = vadd.f32 %v3290_v35, %v10343_v30  ;;  %v13733_v23 = vld [vmem:[#allocation99_spill] sm:$0xff]  ;;  %v13736_v25 = vld [vmem:[#allocation53_spill] sm:$0xff] }
 0x2b2   : > { %v3397_v59 = vadd.f32 %v3292_v58, %v10346_v27  ;;  %v3398_v55 = vadd.f32 %v3294_v16, %v10349_v26  ;;  %v3399_v2 = vadd.f32 %v3295_v46, %v13724_v10  ;;  %v3400_v61 = vadd.f32 %v3297_v3, %v13725_v8  ;;  %v13734_v35 = vld [vmem:[#allocation55_spill] sm:$0xff]  ;;  %v13738_v58 = vld [vmem:[#allocation61_spill] sm:$0xff]  ;;  %v13739_v8 = vld [vmem:[#allocation52_spill] sm:$0xff] }
 0x2b3   : > { %v3401_v48 = vadd.f32 %v3299_v41, %v13726_v18  ;;  %v3402_v24 = vadd.f32 %v3300_v7, %v13727_v34  ;;  %v3403_v60 = vadd.f32 %v3302_v13, %v13728_v12  ;;  %v3404_v32 = vadd.f32 %v3304_v0, %v13729_v52  ;;  %v6891_v7 = vld [vmem:[%s12987_s5] ss:$0 sm:$0xff] }
 0x2b4   : > { %v3405_v15 = vadd.f32 %v3305_v6, %v13730_v28  ;;  %v3406_v30 = vadd.f32 %v3307_v4, %v13731_v43  ;;  %v3407_v27 = vadd.f32 %v3309_v22, %v13732_v63  ;;  %v3408_v26 = vadd.f32 %v3310_v5, %v13733_v23  ;;  %v10529_v10 = vld [vmem:[%s12988_s6] ss:$0 sm:$0xff] }
 0x2b5   : > { %v3409_v46 = vadd.f32 %v3312_v31, %v13734_v35  ;;  %v3410_v9 = vadd.f32 %v3314_v54, %v13735_v47  ;;  %v3428_v51 = vmul.f32 %v6891_v7, %v13736_v25  ;;  %v3429_v37 = vmul.f32 %v6891_v7, %v13737_v53 }
 0x2b6   : > { %v3430_v6 = vmul.f32 %v6891_v7, %v13738_v58  ;;  %v3431_v16 = vmul.f32 %v6891_v7, %v3379_v62  ;;  %v3432_v3 = vmul.f32 %v6891_v7, %v3380_v21  ;;  %v3433_v41 = vmul.f32 %v6891_v7, %v3381_v45 }
 0x2b7   : > { %v3434_v13 = vmul.f32 %v6891_v7, %v3382_v42  ;;  %v3435_v0 = vmul.f32 %v6891_v7, %v3383_v57  ;;  %v3436_v5 = vmul.f32 %v6891_v7, %v3384_v50  ;;  %v3437_v4 = vmul.f32 %v6891_v7, %v3385_v1  ;;  %v13741_v57 = vld [vmem:[#allocation51_spill] sm:$0xff] }
 0x2b8   : > { %v3438_v22 = vmul.f32 %v6891_v7, %v3386_v56  ;;  %v3439_v31 = vmul.f32 %v6891_v7, %v3387_v38  ;;  %v3440_v14 = vmul.f32 %v6891_v7, %v3388_v20  ;;  %v3441_v54 = vmul.f32 %v6891_v7, %v3389_v11  ;;  %v13743_v20 = vld [vmem:[#allocation40_spill] sm:$0xff] }
 0x2b9   : > { %v3442_v33 = vmul.f32 %v6891_v7, %v3390_v19  ;;  %v3443_v40 = vmul.f32 %v6891_v7, %v3391_v39  ;;  %v10533_v62 = vadd.f32 %v10529_v10, %v13739_v8  ;;  %v3444_v21 = vmul.f32 %v6891_v7, %v3392_v49 }
 0x2ba   : > { %v3445_v45 = vmul.f32 %v6891_v7, %v3393_v44  ;;  %v3446_v42 = vmul.f32 %v6891_v7, %v3394_v36  ;;  %v10537_v50 = vadd.f32 %v10529_v10, %v13741_v57  ;;  %v3447_v1 = vmul.f32 %v6891_v7, %v3395_v17 }
 0x2bb   : > { %13740 = vst [vmem:[#allocation88_spill] sm:$0xff] %v10533_v62  ;;  %v3448_v56 = vmul.f32 %v6891_v7, %v3396_v29  ;;  %v3449_v38 = vmul.f32 %v6891_v7, %v3397_v59  ;;  %v10541_v11 = vadd.f32 %v10529_v10, %v13743_v20  ;;  %v3450_v19 = vmul.f32 %v6891_v7, %v3398_v55 }
 0x2bc   : > { %13742 = vst [vmem:[#allocation102_spill] sm:$0xff] %v10537_v50  ;;  %v10543_v39 = vmul.f32 %v6891_v7, %v3399_v2  ;;  %v10545_v18 = vmul.f32 %v6891_v7, %v3400_v61  ;;  %v10548_v49 = vadd.f32 %v10529_v10, %v3428_v51  ;;  %v10550_v44 = vmul.f32 %v6891_v7, %v3401_v48 }
 0x2bd   : > { %13744 = vst [vmem:[#allocation104_spill] sm:$0xff] %v10541_v11  ;;  %v10552_v36 = vmul.f32 %v6891_v7, %v3402_v24  ;;  %v10555_v17 = vadd.f32 %v10529_v10, %v3429_v37  ;;  %v6225_v29 = vmul.f32 -1.442695, %v10533_v62  ;;  %v10558_v59 = vmul.f32 %v6891_v7, %v3403_v60 }
 0x2be   : > { %13745 = vst [vmem:[#allocation105_spill] sm:$0xff] %v10548_v49  ;;  %v10560_v34 = vmul.f32 %v6891_v7, %v3404_v32  ;;  %v10563_v55 = vadd.f32 %v10529_v10, %v3430_v6  ;;  %v6226_v2 = vmul.f32 -1.442695, %v10537_v50  ;;  %v10566_v61 = vmul.f32 %v6891_v7, %v3405_v15 }
 0x2bf   : > { %13746 = vst [vmem:[#allocation74_spill] sm:$0xff] %v10555_v17  ;;  %v10568_v48 = vmul.f32 %v6891_v7, %v3406_v30  ;;  %v10571_v24 = vadd.f32 %v10529_v10, %v3431_v16  ;;  %v6227_v12 = vmul.f32 -1.442695, %v10541_v11  ;;  %v10574_v52 = vmul.f32 %v6891_v7, %v3407_v27 }
 0x2c0   : > { %13747 = vst [vmem:[#allocation89_spill] sm:$0xff] %v10563_v55  ;;  %v10576_v60 = vmul.f32 %v6891_v7, %v3408_v26  ;;  %v10579_v32 = vadd.f32 %v10529_v10, %v3432_v3  ;;  %v6228_v28 = vmul.f32 -1.442695, %v10548_v49  ;;  %v10582_v43 = vmul.f32 %v6891_v7, %v3409_v46 }
 0x2c1   : > { %13748 = vst [vmem:[#allocation27_spill] sm:$0xff] %v10571_v24  ;;  %v10585_v15 = vadd.f32 %v10529_v10, %v3433_v41  ;;  %6567 = vpow2.f32 %v6225_v29  ;;  %v6229_v30 = vmul.f32 -1.442695, %v10555_v17  ;;  %v10588_v63 = vmul.f32 %v6891_v7, %v3410_v9 }
 0x2c2   : > { %13749 = vst [vmem:[#allocation72_spill] sm:$0xff] %v10579_v32  ;;  %v10591_v27 = vadd.f32 %v10529_v10, %v3434_v13  ;;  %6569 = vpow2.f32 %v6226_v2  ;;  %v6230_v23 = vmul.f32 -1.442695, %v10563_v55  ;;  %v10595_v26 = vadd.f32 %v10529_v10, %v3435_v0 }
 0x2c3   : > { %13750 = vst [vmem:[#allocation92_spill] sm:$0xff] %v10585_v15  ;;  %v10598_v35 = vadd.f32 %v10529_v10, %v3436_v5  ;;  %6571 = vpow2.f32 %v6227_v12  ;;  %v6231_v46 = vmul.f32 -1.442695, %v10571_v24  ;;  %v10602_v47 = vadd.f32 %v10529_v10, %v3437_v4 }
 0x2c4   : > { %13751 = vst [vmem:[#allocation100_spill] sm:$0xff] %v10591_v27  ;;  %v10605_v9 = vadd.f32 %v10529_v10, %v3438_v22  ;;  %6573 = vpow2.f32 %v6228_v28  ;;  %v6232_v7 = vmul.f32 -1.442695, %v10579_v32  ;;  %v10609_v25 = vadd.f32 %v10529_v10, %v3439_v31 }
 0x2c5   : > { %13752 = vst [vmem:[#allocation84_spill] sm:$0xff] %v10595_v26  ;;  %v10612_v51 = vadd.f32 %v10529_v10, %v3440_v14  ;;  %6575 = vpow2.f32 %v6229_v30  ;;  %v6233_v53 = vmul.f32 -1.442695, %v10585_v15  ;;  %v10616_v37 = vadd.f32 %v10529_v10, %v3441_v54 }
 0x2c6   : > { %13753 = vst [vmem:[#allocation90_spill] sm:$0xff] %v10598_v35  ;;  %v10619_v58 = vadd.f32 %v10529_v10, %v3442_v33  ;;  %6577 = vpow2.f32 %v6230_v23  ;;  %v6234_v6 = vmul.f32 -1.442695, %v10591_v27  ;;  %v10625_v3 = vadd.f32 %v10529_v10, %v3443_v40 }
 0x2c7   : > { %13754 = vst [vmem:[#allocation68_spill] sm:$0xff] %v10602_v47  ;;  %v10622_v16 = vpop.eup %6567  ;;  %v10628_v41 = vadd.f32 %v10529_v10, %v3444_v21  ;;  %6579 = vpow2.f32 %v6231_v46  ;;  %v6235_v13 = vmul.f32 -1.442695, %v10595_v26  ;;  %v10634_v5 = vadd.f32 %v10529_v10, %v3445_v45  ;;  %v13777_v46 = vld [vmem:[#allocation37_spill] sm:$0xff] }
 0x2c8   : > { %13755 = vst [vmem:[#allocation76_spill] sm:$0xff] %v10605_v9  ;;  %v10631_v0 = vpop.eup %6569  ;;  %v10637_v4 = vadd.f32 %v10529_v10, %v3446_v42  ;;  %6581 = vpow2.f32 %v6232_v7  ;;  %v6236_v22 = vmul.f32 -1.442695, %v10598_v35  ;;  %v10643_v14 = vadd.f32 %v10529_v10, %v3447_v1  ;;  %v13778_v7 = vld [vmem:[#allocation42_spill] sm:$0xff] }
 0x2c9   : > { %13756 = vst [vmem:[#allocation85_spill] sm:$0xff] %v10609_v25  ;;  %v10640_v31 = vpop.eup %6571  ;;  %v10646_v54 = vadd.f32 %v10529_v10, %v3448_v56  ;;  %6583 = vpow2.f32 %v6233_v53  ;;  %v6237_v33 = vmul.f32 -1.442695, %v10602_v47  ;;  %v10652_v8 = vadd.f32 %v10529_v10, %v3449_v38 }
 0x2ca   : > { %13757 = vst [vmem:[#allocation95_spill] sm:$0xff] %v10612_v51  ;;  %v10649_v40 = vpop.eup %6573  ;;  %v10655_v21 = vadd.f32 %v10529_v10, %v3450_v19  ;;  %6585 = vpow2.f32 %v6234_v6  ;;  %v6238_v45 = vmul.f32 -1.442695, %v10605_v9  ;;  %v10662_v57 = vadd.f32 %v10529_v10, %v10543_v39 }
 0x2cb   : > { %13758 = vst [vmem:[#allocation78_spill] sm:$0xff] %v10616_v37  ;;  %v10658_v42 = vpop.eup %6575  ;;  %v10666_v1 = vadd.f32 %v10529_v10, %v10545_v18  ;;  %6587 = vpow2.f32 %v6235_v13  ;;  %v6239_v56 = vmul.f32 -1.442695, %v10609_v25  ;;  %v10673_v20 = vadd.f32 %v10529_v10, %v10550_v44 }
 0x2cc   : > { %13759 = vst [vmem:[#allocation63_spill] sm:$0xff] %v10619_v58  ;;  %v10669_v38 = vpop.eup %6577  ;;  %v10677_v19 = vadd.f32 %v10529_v10, %v10552_v36  ;;  %6589 = vpow2.f32 %v6236_v22  ;;  %v6240_v39 = vmul.f32 -1.442695, %v10612_v51  ;;  %v10684_v18 = vadd.f32 %v10529_v10, %v10558_v59 }
 0x2cd   : > { %13760 = vst [vmem:[#allocation73_spill] sm:$0xff] %v10625_v3  ;;  %v10680_v29 = vpop.eup %6579  ;;  %v10688_v2 = vadd.f32 %v10529_v10, %v10560_v34  ;;  %6591 = vpow2.f32 %v6237_v33  ;;  %v6241_v44 = vmul.f32 -1.442695, %v10616_v37  ;;  %v10695_v36 = vadd.f32 %v10529_v10, %v10566_v61 }
 0x2ce   : > { %13761 = vst [vmem:[#allocation87_spill] sm:$0xff] %v10628_v41  ;;  %v10691_v12 = vpop.eup %6581  ;;  %v10699_v28 = vadd.f32 %v10529_v10, %v10568_v48  ;;  %6593 = vpow2.f32 %v6238_v45  ;;  %v6242_v59 = vmul.f32 -1.442695, %v10619_v58  ;;  %v10706_v34 = vadd.f32 %v10529_v10, %v10574_v52  ;;  %v13783_v58 = vld [vmem:[#allocation43_spill] sm:$0xff] }
 0x2cf   : > { %13762 = vst [vmem:[#allocation59_spill] sm:$0xff] %v10634_v5  ;;  %v10702_v30 = vpop.eup %6583  ;;  %6595 = vpow2.f32 %v6239_v56  ;;  %v6243_v23 = vmul.f32 -1.442695, %v10625_v3  ;;  %v3813_v61 = vmul.f32 %v13778_v7, %v13777_v46  ;;  %v10715_v48 = vadd.f32 %v10529_v10, %v10576_v60 }
 0x2d0   : > { %13763 = vst [vmem:[#allocation65_spill] sm:$0xff] %v10637_v4  ;;  %v10711_v53 = vpop.eup %6585  ;;  %v10719_v6 = vadd.f32 %v10529_v10, %v10582_v43  ;;  %6597 = vpow2.f32 %v6240_v39  ;;  %v6244_v52 = vmul.f32 -1.442695, %v10628_v41  ;;  %v10726_v22 = vadd.f32 %v10529_v10, %v10588_v63 }
 0x2d1   : > { %13764 = vst [vmem:[#allocation71_spill] sm:$0xff] %v10643_v14  ;;  %v10722_v13 = vpop.eup %6587  ;;  %6599 = vpow2.f32 %v6241_v44  ;;  %v6245_v33 = vmul.f32 -1.442695, %v10634_v5  ;;  %v6246_v45 = vmul.f32 -1.442695, %v10637_v4  ;;  %v3814_v44 = vsub.f32 1.0, %v3813_v61 }
 0x2d2   : > { %13765 = vst [vmem:[#allocation81_spill] sm:$0xff] %v10646_v54  ;;  %v10730_v60 = vpop.eup %6589  ;;  %6601 = vpow2.f32 %v6242_v59  ;;  %v6247_v43 = vmul.f32 -1.442695, %v10643_v14  ;;  %v6248_v56 = vmul.f32 -1.442695, %v10646_v54  ;;  %v13782_v14 = vld [vmem:[#allocation39_spill] sm:$0xff]  ;;  %vm3818_vm1 = vweird.f32 %v13778_v7 }
 0x2d3   : > { %13766 = vst [vmem:[#allocation115_spill] sm:$0xff] %v10652_v8  ;;  %v6249_v39 = vmul.f32 -1.442695, %v10652_v8  ;;  %v10735_v41 = vpop.eup %6591  ;;  %6603 = vpow2.f32 %v6243_v23  ;;  %v6250_v10 = vmul.f32 -1.442695, %v10655_v21  ;;  %v3828_v54 = vmul.f32 %v13783_v58, %v13782_v14 }
 0x2d4   : > { %13767 = vst [vmem:[#allocation116_spill] sm:$0xff] %v10655_v21  ;;  %v6251_v63 = vmul.f32 -1.442695, %v10662_v57  ;;  %v10739_v5 = vpop.eup %6593  ;;  %6605 = vpow2.f32 %v6244_v52  ;;  %v6252_v4 = vmul.f32 -1.442695, %v10666_v1  ;;  %vm3817_vm15 = vweird.f32 %v13777_v46 }
 0x2d5   : > { %13768 = vst [vmem:[#allocation96_spill] sm:$0xff] %v10662_v57  ;;  %v6253_v59 = vmul.f32 -1.442695, %v10673_v20  ;;  %v10745_v3 = vpop.eup %6595  ;;  %6607 = vpow2.f32 %v6245_v33  ;;  %v6254_v23 = vmul.f32 -1.442695, %v10677_v19  ;;  %vm10823_vm6 = vmor %vm3817_vm15, %vm3818_vm1  ;;  %vm3833_vm5 = vweird.f32 %v13783_v58 }
 0x2d6   : > { %13769 = vst [vmem:[#allocation106_spill] sm:$0xff] %v10666_v1  ;;  %v6255_v21 = vmul.f32 -1.442695, %v10684_v18  ;;  %v6256_v57 = vmul.f32 -1.442695, %v10688_v2  ;;  %v10750_v61 = vpop.eup %6597  ;;  %6609 = vpow2.f32 %v6246_v45  ;;  %vm3832_vm10 = vweird.f32 %v13782_v14 }
 0x2d7   : > { %13770 = vst [vmem:[#allocation107_spill] sm:$0xff] %v10673_v20  ;;  %v6257_v52 = vmul.f32 -1.442695, %v10695_v36  ;;  %v6258_v1 = vmul.f32 -1.442695, %v10699_v28  ;;  %v10757_v8 = vpop.eup %6599  ;;  %6611 = vpow2.f32 %v6247_v43  ;;  %v10777_v43 = vadd.f32 1.0, %v10631_v0  ;;  %vm10870_vm12 = vmor %vm3832_vm10, %vm3833_vm5 }
 0x2d8   : > { %13771 = vst [vmem:[#allocation93_spill] sm:$0xff] %v10677_v19  ;;  %v10755_v20 = vmul.f32 -1.442695, %v10706_v34  ;;  %v10760_v33 = vmul.f32 -1.442695, %v10715_v48  ;;  %6613 = vpow2.f32 %v6248_v56 }
 0x2d9   : > { %13772 = vst [vmem:[#allocation108_spill] sm:$0xff] %v10684_v18  ;;  %v10763_v19 = vmul.f32 -1.442695, %v10719_v6  ;;  %v10766_v18 = vpop.eup %6601  ;;  %v10769_v45 = vmul.f32 -1.442695, %v10726_v22  ;;  %6615 = vpow2.f32 %v6249_v39  ;;  %vm3877_vm2 = vweird.f32 %v10777_v43 }
 0x2da   : > { %13773 = vst [vmem:[#allocation98_spill] sm:$0xff] %v10688_v2  ;;  %v3815_v2 = vmul.f32 %v13778_v7, %v3814_v44  ;;  %v13784_v44 = vld [vmem:[#allocation25_spill] sm:$0xff]  ;;  %6617 = vpow2.f32 %v6250_v10 }
 0x2db   : > { %13774 = vst [vmem:[#allocation94_spill] sm:$0xff] %v10695_v36  ;;  %v10774_v36 = vpop.eup %6603  ;;  %6619 = vpow2.f32 %v6251_v63  ;;  %vm3847_vm9 = vweird.f32 %v13784_v44 }
 0x2dc   : > { %13775 = vst [vmem:[#allocation109_spill] sm:$0xff] %v10699_v28  ;;  %v3829_v28 = vsub.f32 1.0, %v3828_v54  ;;  %v10784_v56 = vpop.eup %6605  ;;  %v3821_v54 = vand.u32 2147483647, %v13777_v46  ;;  %v3816_v0 = vadd.f32 %v13778_v7, %v3815_v2  ;;  %6621 = vpow2.f32 %v6252_v4 }
 0x2dd   : > { %13776 = vst [vmem:[#allocation103_spill] sm:$0xff] %v10706_v34  ;;  %v10772_v34 = vadd.f32 1.0, %v10622_v16  ;;  %v10790_v16 = vadd.f32 1.0, %v10658_v42  ;;  %v10793_v39 = vpop.eup %6607  ;;  %v10804_v42 = vadd.f32 1.0, %v10680_v29  ;;  %6623 = vpow2.f32 %v6253_v59 }
 0x2de   : > { %13779 = vst [vmem:[#allocation112_spill] sm:$0xff] %v10715_v48  ;;  %v13785_v48 = vld [vmem:[#allocation22_spill] sm:$0xff]  ;;  %v10798_v25 = vpop.eup %6609  ;;  %v3830_v10 = vmul.f32 %v13783_v58, %v3829_v28  ;;  %v10810_v2 = vadd.f32 1.0, %v10691_v12  ;;  %6625 = vpow2.f32 %v6254_v23  ;;  %v10816_v4 = vadd.f32 1.0, %v10702_v30 }
 0x2df   : > { %13780 = vst [vmem:[#allocation113_spill] sm:$0xff] %v10719_v6  ;;  %v10780_v6 = vadd.f32 1.0, %v10640_v31  ;;  %v3843_v37 = vmul.f32 %v13785_v48, %v13784_v44  ;;  %v3823_v31 = vand.u32 2147483648, %v13777_v46  ;;  %v10807_v51 = vpop.eup %6611  ;;  %vm10827_vm4 = vcmp.eq.f32.partialorder %v3821_v54, 8.507059e+37 }
 0x2e0   : > { %13781 = vst [vmem:[#allocation119_spill] sm:$0xff] %v10726_v22  ;;  %v10787_v22 = vadd.f32 1.0, %v10649_v40  ;;  %v10801_v40 = vadd.f32 1.0, %v10669_v38  ;;  %v10813_v9 = vpop.eup %6613  ;;  %v10819_v38 = vadd.f32 1.0, %v10711_v53  ;;  %6627 = vpow2.f32 %v6255_v21 }
 0x2e1   : > { %v3844_v63 = vsub.f32 1.0, %v3843_v37  ;;  %v10831_v37 = vpop.eup %6615  ;;  %v3820_v28 = vsel %vm10823_vm6, %v13778_v7, %v3816_v0  ;;  %v3824_v30 = vor.u32 1.1754944e-38, %v3823_v31  ;;  %6629 = vpow2.f32 %v6256_v57 }
 0x2e2   : > { %v10837_v46 = vpop.eup %6617  ;;  %v3831_v53 = vadd.f32 %v13783_v58, %v3830_v10  ;;  %v3836_v59 = vand.u32 2147483647, %v13782_v14  ;;  %v3838_v23 = vand.u32 2147483648, %v13782_v14  ;;  %6631 = vpow2.f32 %v6257_v52 }
 0x2e3   : > { %v10842_v54 = vpop.eup %6619  ;;  %v10845_v21 = vadd.f32 1.0, %v10722_v13  ;;  %v10848_v7 = vadd.f32 1.0, %v10730_v60  ;;  %v3845_v0 = vmul.f32 %v13785_v48, %v3844_v63  ;;  %6633 = vpow2.f32 %v6258_v1 }
 0x2e4   : > { %v6622_v31 = vpop.eup %6621  ;;  %v10852_v57 = vadd.f32 1.0, %v10735_v41  ;;  %v10856_v10 = vsel %vm10827_vm4, %v3824_v30, %v3820_v28  ;;  %v10860_v13 = vadd.f32 1.0, %v10739_v5  ;;  %v10863_v60 = vadd.f32 1.0, %v10745_v3 }
 0x2e5   : > { %13790 = vst [vmem:[#allocation118_spill] sm:$0xff] %v10856_v10  ;;  %v6624_v52 = vpop.eup %6623  ;;  %v10866_v63 = vadd.f32 1.0, %v10750_v61  ;;  %6635 = vrcp.f32 %v10772_v34  ;;  %v3835_v5 = vsel %vm10870_vm12, %v13783_v58, %v3831_v53  ;;  %vm3837_vm8 = vcmp.eq.f32.partialorder %v3836_v59, 8.507059e+37 }
 0x2e6   : > { %v6626_v1 = vpop.eup %6625  ;;  %v3839_v14 = vor.u32 1.1754944e-38, %v3838_v23  ;;  %6637 = vrcp.f32 %v10777_v43  ;;  %v3846_v61 = vadd.f32 %v13785_v48, %v3845_v0  ;;  %vm3848_vm7 = vweird.f32 %v13785_v48 }
 0x2e7   : > { %v6628_v3 = vpop.eup %6627  ;;  %6639 = vpow2.f32 %v10755_v20  ;;  %v3851_v29 = vand.u32 2147483647, %v13784_v44  ;;  %v10884_v28 = vadd.f32 1.0, %v10757_v8  ;;  %v10887_v30 = vadd.f32 1.0, %v10766_v18  ;;  %vm10909_vm11 = vmor %vm3847_vm9, %vm3848_vm7 }
 0x2e8   : > { %v6630_v12 = vpop.eup %6629  ;;  %v3853_v58 = vand.u32 2147483648, %v13784_v44  ;;  %6641 = vrcp.f32 %v10780_v6  ;;  %v10892_v20 = vadd.f32 1.0, %v10774_v36  ;;  %v10894_v59 = vsel %vm3837_vm8, %v3839_v14, %v3835_v5 }
 0x2e9   : > { %v6632_v53 = vpop.eup %6631  ;;  %13793 = vst [vmem:[#allocation114_spill] sm:$0xff] %v10894_v59  ;;  %6643 = vrcp.f32 %v10787_v22  ;;  %v10899_v8 = vadd.f32 1.0, %v10784_v56  ;;  %v10902_v18 = vadd.f32 1.0, %v10793_v39  ;;  %v10905_v0 = vadd.f32 1.0, %v10798_v25 }
 0x2ea   : > { %v6634_v23 = vpop.eup %6633  ;;  %6645 = vrcp.f32 %v10790_v16  ;;  %v3850_v56 = vsel %vm10909_vm11, %v13785_v48, %v3846_v61  ;;  %vm10919_vm13 = vcmp.eq.f32.partialorder %v3851_v29, 8.507059e+37  ;;  %v3868_v25 = vand.u32 2147483648, %v10772_v34 }
 0x2eb   : > { %v10914_v44 = vpop.eup %6635  ;;  %6647 = vrcp.f32 %v10801_v40  ;;  %v10928_v5 = vadd.f32 1.0, %v10807_v51  ;;  %v3854_v14 = vor.u32 1.1754944e-38, %v3853_v58  ;;  %v10934_v48 = vadd.f32 1.0, %v10813_v9 }
 0x2ec   : > { %v10925_v41 = vpop.eup %6637  ;;  %6649 = vrcp.f32 %v10804_v42  ;;  %v10937_v61 = vadd.f32 1.0, %v10831_v37  ;;  %v3883_v29 = vand.u32 2147483648, %v10777_v43  ;;  %v10944_v51 = vadd.f32 1.0, %v10837_v46 }
 0x2ed   : > { %v6640_v36 = vpop.eup %6639  ;;  %6651 = vpow2.f32 %v10760_v33  ;;  %v10948_v58 = vsel %vm10919_vm13, %v3854_v14, %v3850_v56  ;;  %v3858_v9 = vmul.f32 %v10914_v44, %v10772_v34  ;;  %v10956_v37 = vadd.f32 1.0, %v10842_v54 }
 0x2ee   : > { %v10940_v47 = vpop.eup %6641  ;;  %6653 = vpow2.f32 %v10763_v19  ;;  %13798 = vst [vmem:[#allocation117_spill] sm:$0xff] %v10948_v58  ;;  %v10958_v35 = vor.u32 1.1754944e-38, %v3868_v25  ;;  %v3873_v19 = vmul.f32 %v10925_v41, %v10777_v43  ;;  %v10964_v39 = vadd.f32 1.0, %v6622_v31 }
 0x2ef   : > { %v10952_v33 = vpop.eup %6643  ;;  %6655 = vpow2.f32 %v10769_v45  ;;  %v3881_v56 = vand.u32 2147483647, %v10777_v43  ;;  %v3898_v14 = vand.u32 2147483648, %v10780_v6  ;;  %v10971_v45 = vadd.f32 1.0, %v6624_v52 }
 0x2f0   : > { %v10962_v46 = vpop.eup %6645  ;;  %13799 = vst [vmem:[#allocation120_spill] sm:$0xff] %v10964_v39  ;;  %6657 = vrcp.f32 %v10810_v2  ;;  %v10973_v54 = vor.u32 1.1754944e-38, %v3883_v29  ;;  %v3896_v25 = vand.u32 2147483647, %v10780_v6  ;;  %v3913_v15 = vand.u32 2147483648, %v10787_v22 }
 0x2f1   : > { %v10969_v26 = vpop.eup %6647  ;;  %13800 = vst [vmem:[#allocation121_spill] sm:$0xff] %v10971_v45  ;;  %v10979_v31 = vadd.f32 1.0, %v6626_v1  ;;  %v10981_v32 = vadd.f32 1.0, %v6628_v3  ;;  %v3859_v55 = vsub.f32 1.0, %v3858_v9  ;;  %v3888_v24 = vmul.f32 %v10940_v47, %v10780_v6 }
 0x2f2   : > { %v10977_v27 = vpop.eup %6649  ;;  %v3874_v11 = vsub.f32 1.0, %v3873_v19  ;;  %v3903_v52 = vmul.f32 %v10952_v33, %v10787_v22  ;;  %v3911_v29 = vand.u32 2147483647, %v10787_v22  ;;  %v3918_v49 = vmul.f32 %v10962_v46, %v10790_v16 }
 0x2f3   : > { %13801 = vst [vmem:[#allocation101_spill] sm:$0xff] %v10979_v31  ;;  %v6652_v17 = vpop.eup %6651  ;;  %v10990_v58 = vadd.f32 1.0, %v6630_v12  ;;  %vm3862_vm14 = vweird.f32 %v10772_v34  ;;  %v10993_v1 = vor.u32 1.1754944e-38, %v3898_v14  ;;  %v3928_v3 = vand.u32 2147483648, %v10790_v16 }
 0x2f4   : > { %13802 = vst [vmem:[#allocation122_spill] sm:$0xff] %v10981_v32  ;;  %v6654_v50 = vpop.eup %6653  ;;  %v3933_v9 = vmul.f32 %v10969_v26, %v10801_v40  ;;  %v10998_v62 = vadd.f32 1.0, %v6632_v53  ;;  %v11000_v59 = vadd.f32 1.0, %v6634_v23  ;;  %v11003_v10 = vor.u32 1.1754944e-38, %v3913_v15 }
 0x2f5   : > { %13803 = vst [vmem:[#allocation110_spill] sm:$0xff] %v10990_v58  ;;  %v6656_v19 = vpop.eup %6655  ;;  %v3948_v12 = vmul.f32 %v10977_v27, %v10804_v42  ;;  %v11009_v14 = vadd.f32 1.0, %v6640_v36  ;;  %v3860_v32 = vmul.f32 %v10914_v44, %v3859_v55  ;;  %v3889_v31 = vsub.f32 1.0, %v3888_v24 }
 0x2f6   : > { %13804 = vst [vmem:[#allocation60_spill] sm:$0xff] %v10998_v62  ;;  %v11007_v58 = vpop.eup %6657  ;;  %v3926_v45 = vand.u32 2147483647, %v10790_v16  ;;  %v11013_v53 = vadd.f32 1.0, %v6652_v17  ;;  %v3875_v23 = vmul.f32 %v10925_v41, %v3874_v11  ;;  %vm3892_vm0 = vweird.f32 %v10780_v6 }
 0x2f7   : > { %13805 = vst [vmem:[#allocation111_spill] sm:$0xff] %v11000_v59  ;;  %v3904_v15 = vsub.f32 1.0, %v3903_v52  ;;  %v3919_v59 = vsub.f32 1.0, %v3918_v49  ;;  %v11017_v62 = vadd.f32 1.0, %v6654_v50  ;;  %vm3907_vm1 = vweird.f32 %v10787_v22 }
 0x2f8   : > { %13806 = vst [vmem:[#allocation62_spill] sm:$0xff] %v11013_v53  ;;  %v11020_v39 = vor.u32 1.1754944e-38, %v3928_v3  ;;  %v3934_v36 = vsub.f32 1.0, %v3933_v9  ;;  %v3941_v55 = vand.u32 2147483647, %v10801_v40  ;;  %v11023_v24 = vadd.f32 1.0, %v6656_v19 }
 0x2f9   : > { %v13808_v17 = vand.u32 2147483647, %v10772_v34  ;;  %vm11031_vm6 = vcmp.eq.f32.partialorder %v3881_v56, 8.507059e+37  ;;  %vm3922_vm4 = vweird.f32 %v10790_v16  ;;  %v3943_v50 = vand.u32 2147483648, %v10801_v40 }
 0x2fa   : > { %13807 = vst [vmem:[#allocation58_spill] sm:$0xff] %v11023_v24  ;;  %v3949_v49 = vsub.f32 1.0, %v3948_v12  ;;  %v3963_v52 = vmul.f32 %v11007_v58, %v10810_v2  ;;  %v3861_v3 = vadd.f32 %v10914_v44, %v3860_v32  ;;  %vm3863_vm5 = vweird.f32 %v10914_v44 }
 0x2fb   : > { %vm11027_vm15 = vcmp.eq.f32.partialorder %v13808_v17, 8.507059e+37  ;;  %vm3878_vm10 = vweird.f32 %v10925_v41  ;;  %v3890_v9 = vmul.f32 %v10940_v47, %v3889_v31  ;;  %v3876_v56 = vadd.f32 %v10925_v41, %v3875_v23  ;;  %vm11054_vm8 = vmor %vm3862_vm14, %vm3863_vm5 }
 0x2fc   : > { %v3905_v19 = vmul.f32 %v10952_v33, %v3904_v15  ;;  %v3920_v17 = vmul.f32 %v10962_v46, %v3919_v59  ;;  %6659 = vrcp.f32 %v10816_v4  ;;  %v3935_v12 = vmul.f32 %v10969_v26, %v3934_v36  ;;  %vm11076_vm13 = vmor %vm3877_vm2, %vm3878_vm10 }
 0x2fd   : > { %v3956_v32 = vand.u32 2147483647, %v10804_v42  ;;  %v3958_v24 = vand.u32 2147483648, %v10804_v42  ;;  %6661 = vrcp.f32 %v10819_v38  ;;  %vm3893_vm7 = vweird.f32 %v10940_v47 }
 0x2fe   : > { %vm11059_vm9 = vcmp.eq.f32.partialorder %v3896_v25, 8.507059e+37  ;;  %vm11063_vm11 = vcmp.eq.f32.partialorder %v3911_v29, 8.507059e+37  ;;  %v3950_v15 = vmul.f32 %v10977_v27, %v3949_v49  ;;  %v3964_v36 = vsub.f32 1.0, %v3963_v52  ;;  %vm11101_vm2 = vmor %vm3892_vm0, %vm3893_vm7 }
 0x2ff   : > { %6663 = vrcp.f32 %v10845_v21  ;;  %v3865_v34 = vsel %vm11054_vm8, %v10914_v44, %v3861_v3  ;;  %v3891_v29 = vadd.f32 %v10940_v47, %v3890_v9  ;;  %vm3908_vm14 = vweird.f32 %v10952_v33 }
 0x300   : > { %vm3923_vm5 = vweird.f32 %v10962_v46  ;;  %vm11083_vm3 = vcmp.eq.f32.partialorder %v3926_v45, 8.507059e+37  ;;  %vm11087_vm12 = vcmp.eq.f32.partialorder %v3941_v55, 8.507059e+37  ;;  %v3880_v43 = vsel %vm11076_vm13, %v10925_v41, %v3876_v56  ;;  %vm11112_vm13 = vmor %vm3907_vm1, %vm3908_vm14 }
 0x301   : > { %v3906_v52 = vadd.f32 %v10952_v33, %v3905_v19  ;;  %v3921_v3 = vadd.f32 %v10962_v46, %v3920_v17  ;;  %6665 = vrcp.f32 %v10848_v7  ;;  %v3936_v55 = vadd.f32 %v10969_v26, %v3935_v12  ;;  %vm11136_vm1 = vmor %vm3922_vm4, %vm3923_vm5 }
 0x302   : > { %vm3938_vm10 = vweird.f32 %v10969_v26  ;;  %v3944_v9 = vor.u32 1.1754944e-38, %v3943_v50  ;;  %vm3952_vm8 = vweird.f32 %v10804_v42  ;;  %v11108_v41 = vpop.eup %6659  ;;  %v3951_v6 = vadd.f32 %v10977_v27, %v3950_v15 }
 0x303   : > { %vm3953_vm0 = vweird.f32 %v10977_v27  ;;  %v3965_v19 = vmul.f32 %v11007_v58, %v3964_v36  ;;  %6667 = vrcp.f32 %v10852_v57  ;;  %v11120_v17 = vpop.eup %6661  ;;  %v11125_v50 = vsel %vm11027_vm15, %v10958_v35, %v3865_v34 }
 0x304   : > { %v11130_v22 = vsel %vm11031_vm6, %v10973_v54, %v3880_v43  ;;  %vm11140_vm7 = vcmp.eq.f32.partialorder %v3956_v32, 8.507059e+37  ;;  %v3959_v53 = vor.u32 1.1754944e-38, %v3958_v24  ;;  %v3895_v54 = vsel %vm11101_vm2, %v10940_v47, %v3891_v29  ;;  %vm11171_vm4 = vmor %vm3952_vm8, %vm3953_vm0 }
 0x305   : > { %v11144_v35 = vpop.eup %6663  ;;  %v3910_v11 = vsel %vm11112_vm13, %v10952_v33, %v3906_v52  ;;  %v3925_v16 = vsel %vm11136_vm1, %v10962_v46, %v3921_v3  ;;  %vm13833_vm15 = vweird.f32 %v10801_v40  ;;  %6669 = vrcp.f32 %v10860_v13 }
 0x306   : > { %vm11159_vm6 = vmor %vm13833_vm15, %vm3938_vm10  ;;  %vm3968_vm14 = vweird.f32 %v11007_v58  ;;  %v3971_v40 = vand.u32 2147483647, %v10810_v2  ;;  %v3978_v46 = vmul.f32 %v11108_v41, %v10816_v4  ;;  %v3966_v15 = vadd.f32 %v11007_v58, %v3965_v19 }
 0x307   : > { %v3940_v47 = vsel %vm11159_vm6, %v10969_v26, %v3936_v55  ;;  %v11179_v32 = vpop.eup %6665  ;;  %v3955_v26 = vsel %vm11171_vm4, %v10977_v27, %v3951_v6  ;;  %v3973_v42 = vand.u32 2147483648, %v10810_v2  ;;  %v3993_v36 = vmul.f32 %v11120_v17, %v10819_v38 }
 0x308   : > { %v11191_v34 = vsel %vm11059_vm9, %v10993_v1, %v3895_v54  ;;  %v11196_v25 = vsel %vm11063_vm11, %v11003_v10, %v3910_v11  ;;  %vm3967_vm5 = vweird.f32 %v10810_v2  ;;  %v4008_v27 = vmul.f32 %v11144_v35, %v10845_v21 }
 0x309   : > { %v11201_v29 = vpop.eup %6667  ;;  %v11206_v43 = vsel %vm11083_vm3, %v11020_v39, %v3925_v16  ;;  %v11210_v1 = vsel %vm11087_vm12, %v3944_v9, %v3940_v47  ;;  %v3988_v59 = vand.u32 2147483648, %v10816_v4  ;;  %6671 = vrcp.f32 %v10863_v60  ;;  %vm11220_vm9 = vmor %vm3967_vm5, %vm3968_vm14 }
 0x30a   : > { %v11216_v2 = vsel %vm11140_vm7, %v3959_v53, %v3955_v26  ;;  %vm11224_vm3 = vcmp.eq.f32.partialorder %v3971_v40, 8.507059e+37  ;;  %v3979_v23 = vsub.f32 1.0, %v3978_v46  ;;  %v4023_v49 = vmul.f32 %v11179_v32, %v10848_v7 }
 0x30b   : > { %v11230_v44 = vpop.eup %6669  ;;  %v3970_v52 = vsel %vm11220_vm9, %v11007_v58, %v3966_v15  ;;  %v3974_v3 = vor.u32 1.1754944e-38, %v3973_v42  ;;  %v3994_v45 = vsub.f32 1.0, %v3993_v36  ;;  %v4003_v55 = vand.u32 2147483648, %v10819_v38 }
 0x30c   : > { %vm3982_vm12 = vweird.f32 %v10816_v4  ;;  %v3986_v9 = vand.u32 2147483647, %v10816_v4  ;;  %v4009_v56 = vsub.f32 1.0, %v4008_v27  ;;  %v4018_v6 = vand.u32 2147483648, %v10845_v21 }
 0x30d   : > { %v4038_v19 = vmul.f32 %v11201_v29, %v10852_v57  ;;  %v11241_v12 = vor.u32 1.1754944e-38, %v3988_v59  ;;  %vm3997_vm11 = vweird.f32 %v10819_v38  ;;  %v4001_v58 = vand.u32 2147483647, %v10819_v38 }
 0x30e   : > { %v4016_v31 = vand.u32 2147483647, %v10845_v21  ;;  %v4033_v53 = vand.u32 2147483648, %v10848_v7  ;;  %v11249_v54 = vsel %vm11224_vm3, %v3974_v3, %v3970_v52  ;;  %v3980_v11 = vmul.f32 %v11108_v41, %v3979_v23 }
 0x30f   : > { %vm4012_vm2 = vweird.f32 %v10845_v21  ;;  %v4024_v16 = vsub.f32 1.0, %v4023_v49  ;;  %v4053_v24 = vmul.f32 %v11230_v44, %v10860_v13  ;;  %v11255_v47 = vpop.eup %6671  ;;  %v3995_v33 = vmul.f32 %v11120_v17, %v3994_v45 }
 0x310   : > { %v11258_v40 = vor.u32 1.1754944e-38, %v4003_v55  ;;  %v4031_v46 = vand.u32 2147483647, %v10848_v7  ;;  %6673 = vrcp.f32 %v10866_v63  ;;  %vm3983_vm10 = vweird.f32 %v11108_v41 }
 0x311   : > { %vm11263_vm8 = vcmp.eq.f32.partialorder %v3986_v9, 8.507059e+37  ;;  %v4010_v15 = vmul.f32 %v11144_v35, %v4009_v56  ;;  %v4019_v42 = vor.u32 1.1754944e-38, %v4018_v6  ;;  %vm4027_vm13 = vweird.f32 %v10848_v7  ;;  %vm11302_vm4 = vmor %vm3982_vm12, %vm3983_vm10 }
 0x312   : > { %v4039_v36 = vsub.f32 1.0, %v4038_v19  ;;  %vm3998_vm0 = vweird.f32 %v11120_v17  ;;  %v4034_v27 = vor.u32 1.1754944e-38, %v4033_v53  ;;  %v4046_v59 = vand.u32 2147483647, %v10852_v57 }
 0x313   : > { %v4048_v10 = vand.u32 2147483648, %v10852_v57  ;;  %v3981_v39 = vadd.f32 %v11108_v41, %v3980_v11  ;;  %vm11273_vm1 = vcmp.eq.f32.partialorder %v4001_v58, 8.507059e+37  ;;  %vm11277_vm7 = vcmp.eq.f32.partialorder %v4016_v31, 8.507059e+37  ;;  %vm11316_vm9 = vmor %vm3997_vm11, %vm3998_vm0 }
 0x314   : > { %v4025_v52 = vmul.f32 %v11179_v32, %v4024_v16  ;;  %v4054_v3 = vsub.f32 1.0, %v4053_v24  ;;  %v4068_v45 = vmul.f32 %v11255_v47, %v10863_v60  ;;  %v3996_v55 = vadd.f32 %v11120_v17, %v3995_v33 }
 0x315   : > { %vm4013_vm15 = vweird.f32 %v11144_v35  ;;  %v4063_v9 = vand.u32 2147483648, %v10860_v13  ;;  %6675 = vrcp.f32 %v10884_v28  ;;  %v4011_v56 = vadd.f32 %v11144_v35, %v4010_v15 }
 0x316   : > { %vm11289_vm6 = vcmp.eq.f32.partialorder %v4031_v46, 8.507059e+37  ;;  %v4040_v19 = vmul.f32 %v11201_v29, %v4039_v36  ;;  %v4061_v58 = vand.u32 2147483647, %v10860_v13  ;;  %6677 = vrcp.f32 %v10887_v30  ;;  %v11296_v31 = vpop.eup %6673  ;;  %vm11333_vm12 = vmor %vm4012_vm2, %vm4013_vm15 }
 0x317   : > { %vm4028_vm14 = vweird.f32 %v11179_v32  ;;  %vm4042_vm5 = vweird.f32 %v10852_v57  ;;  %v4049_v11 = vor.u32 1.1754944e-38, %v4048_v10  ;;  %6679 = vrcp.f32 %v10892_v20 }
 0x318   : > { %v3985_v16 = vsel %vm11302_vm4, %v11108_v41, %v3981_v39  ;;  %v4026_v24 = vadd.f32 %v11179_v32, %v4025_v52  ;;  %vm11321_vm3 = vcmp.eq.f32.partialorder %v4046_v59, 8.507059e+37  ;;  %v4055_v46 = vmul.f32 %v11230_v44, %v4054_v3  ;;  %vm11361_vm2 = vmor %vm4027_vm13, %vm4028_vm14 }
 0x319   : > { %v4069_v15 = vsub.f32 1.0, %v4068_v45  ;;  %v4000_v41 = vsel %vm11316_vm9, %v11120_v17, %v3996_v55  ;;  %vm4043_vm11 = vweird.f32 %v11201_v29  ;;  %vm4057_vm10 = vweird.f32 %v10860_v13 }
 0x31a   : > { %v4064_v36 = vor.u32 1.1754944e-38, %v4063_v9  ;;  %v4015_v59 = vsel %vm11333_vm12, %v11144_v35, %v4011_v56  ;;  %v4041_v10 = vadd.f32 %v11201_v29, %v4040_v19  ;;  %vm11343_vm0 = vcmp.eq.f32.partialorder %v4061_v58, 8.507059e+37  ;;  %vm11391_vm13 = vmor %vm4042_vm5, %vm4043_vm11 }
 0x31b   : > { %v4083_v21 = vmul.f32 %v11296_v31, %v10866_v63  ;;  %6681 = vrcp.f32 %v10899_v8  ;;  %v11350_v39 = vpop.eup %6675  ;;  %v11355_v52 = vsel %vm11263_vm8, %v11241_v12, %v3985_v16  ;;  %vm4058_vm15 = vweird.f32 %v11230_v44 }
 0x31c   : > { %v4076_v3 = vand.u32 2147483647, %v10863_v60  ;;  %6683 = vrcp.f32 %v10902_v18  ;;  %v11368_v45 = vpop.eup %6677  ;;  %v4030_v12 = vsel %vm11361_vm2, %v11179_v32, %v4026_v24  ;;  %v4056_v26 = vadd.f32 %v11230_v44, %v4055_v46 }
 0x31d   : > { %v4070_v7 = vmul.f32 %v11255_v47, %v4069_v15  ;;  %vm4072_vm8 = vweird.f32 %v10863_v60  ;;  %v11376_v55 = vpop.eup %6679  ;;  %v11381_v9 = vsel %vm11273_vm1, %v11258_v40, %v4000_v41  ;;  %v11385_v56 = vsel %vm11277_vm7, %v4019_v42, %v4015_v59  ;;  %vm11411_vm1 = vmor %vm4057_vm10, %vm4058_vm15 }
 0x31e   : > { %vm4073_vm4 = vweird.f32 %v11255_v47  ;;  %v4078_v19 = vand.u32 2147483648, %v10863_v60  ;;  %v4045_v40 = vsel %vm11391_vm13, %v11201_v29, %v4041_v10  ;;  %v4084_v23 = vsub.f32 1.0, %v4083_v21 }
 0x31f   : > { %v4093_v42 = vand.u32 2147483648, %v10866_v63  ;;  %v4098_v49 = vmul.f32 %v11350_v39, %v10884_v28  ;;  %v11405_v57 = vsel %vm11289_vm6, %v4034_v27, %v4030_v12  ;;  %vm11415_vm7 = vcmp.eq.f32.partialorder %v4076_v3, 8.507059e+37  ;;  %vm11449_vm14 = vmor %vm4072_vm8, %vm4073_vm4 }
 0x320   : > { %v4091_v53 = vand.u32 2147483647, %v10866_v63  ;;  %v4113_v16 = vmul.f32 %v11368_v45, %v10887_v30  ;;  %v4060_v27 = vsel %vm11411_vm1, %v11230_v44, %v4056_v26  ;;  %v4071_v13 = vadd.f32 %v11255_v47, %v4070_v7 }
 0x321   : > { %v11422_v6 = vpop.eup %6681  ;;  %v4128_v4 = vmul.f32 %v11376_v55, %v10892_v20  ;;  %6685 = vrcp.f32 %v10905_v0  ;;  %v11435_v46 = vsel %vm11321_vm3, %v4049_v11, %v4045_v40  ;;  %v4079_v15 = vor.u32 1.1754944e-38, %v4078_v19 }
 0x322   : > { %v11431_v24 = vpop.eup %6683  ;;  %vm4087_vm6 = vweird.f32 %v10866_v63  ;;  %v4108_v41 = vand.u32 2147483648, %v10884_v28  ;;  %v4085_v44 = vmul.f32 %v11296_v31, %v4084_v23  ;;  %v4094_v38 = vor.u32 1.1754944e-38, %v4093_v42 }
 0x323   : > { %v4099_v59 = vsub.f32 1.0, %v4098_v49  ;;  %v4106_v10 = vand.u32 2147483647, %v10884_v28  ;;  %v11443_v21 = vsel %vm11343_vm0, %v4064_v36, %v4060_v27  ;;  %v4114_v33 = vsub.f32 1.0, %v4113_v16 }
 0x324   : > { %v4123_v35 = vand.u32 2147483648, %v10887_v30  ;;  %v4143_v3 = vmul.f32 %v11422_v6, %v10899_v8  ;;  %v4075_v17 = vsel %vm11449_vm14, %v11255_v47, %v4071_v13  ;;  %vm11459_vm5 = vcmp.eq.f32.partialorder %v4091_v53, 8.507059e+37 }
 0x325   : > { %vm4102_vm9 = vweird.f32 %v10884_v28  ;;  %v4129_v60 = vsub.f32 1.0, %v4128_v4  ;;  %v4158_v12 = vmul.f32 %v11431_v24, %v10902_v18  ;;  %6687 = vrcp.f32 %v10928_v5 }
 0x326   : > { %v11467_v26 = vor.u32 1.1754944e-38, %v4108_v41  ;;  %vm4117_vm3 = vweird.f32 %v10887_v30  ;;  %v4121_v7 = vand.u32 2147483647, %v10887_v30  ;;  %v4138_v47 = vand.u32 2147483648, %v10892_v20 }
 0x327   : > { %v11472_v32 = vpop.eup %6685  ;;  %v4086_v19 = vadd.f32 %v11296_v31, %v4085_v44  ;;  %vm4088_vm12 = vweird.f32 %v11296_v31  ;;  %v4100_v40 = vmul.f32 %v11350_v39, %v4099_v59  ;;  %vm4132_vm11 = vweird.f32 %v10892_v20 }
 0x328   : > { %v4136_v23 = vand.u32 2147483647, %v10892_v20  ;;  %v11481_v42 = vsel %vm11415_vm7, %v4079_v15, %v4075_v17  ;;  %v4115_v49 = vmul.f32 %v11368_v45, %v4114_v33  ;;  %v4144_v58 = vsub.f32 1.0, %v4143_v3  ;;  %vm11493_vm2 = vmor %vm4087_vm6, %vm4088_vm12 }
 0x329   : > { %v4153_v53 = vand.u32 2147483648, %v10899_v8  ;;  %vm4103_vm10 = vweird.f32 %v11350_v39  ;;  %vm11486_vm0 = vcmp.eq.f32.partialorder %v4106_v10, 8.507059e+37  ;;  %v4124_v27 = vor.u32 1.1754944e-38, %v4123_v35 }
 0x32a   : > { %v4130_v13 = vmul.f32 %v11376_v55, %v4129_v60  ;;  %v4159_v4 = vsub.f32 1.0, %v4158_v12  ;;  %vm11497_vm15 = vcmp.eq.f32.partialorder %v4121_v7, 8.507059e+37  ;;  %v4139_v41 = vor.u32 1.1754944e-38, %v4138_v47  ;;  %vm11533_vm6 = vmor %vm4102_vm9, %vm4103_vm10 }
 0x32b   : > { %vm4147_vm8 = vweird.f32 %v10899_v8  ;;  %v4151_v44 = vand.u32 2147483647, %v10899_v8  ;;  %v4173_v59 = vmul.f32 %v11472_v32, %v10905_v0  ;;  %6689 = vrcp.f32 %v10934_v48  ;;  %v11506_v10 = vpop.eup %6687 }
 0x32c   : > { %v4090_v63 = vsel %vm11493_vm2, %v11296_v31, %v4086_v19  ;;  %v4101_v11 = vadd.f32 %v11350_v39, %v4100_v40  ;;  %vm11512_vm13 = vcmp.eq.f32.partialorder %v4136_v23, 8.507059e+37  ;;  %v4166_v35 = vand.u32 2147483647, %v10902_v18 }
 0x32d   : > { %6691 = vrcp.f32 %v10937_v61  ;;  %v4116_v3 = vadd.f32 %v11368_v45, %v4115_v49  ;;  %vm4118_vm4 = vweird.f32 %v11368_v45  ;;  %v4145_v17 = vmul.f32 %v11422_v6, %v4144_v58 }
 0x32e   : > { %v4154_v60 = vor.u32 1.1754944e-38, %v4153_v53  ;;  %v4131_v12 = vadd.f32 %v11376_v55, %v4130_v13  ;;  %vm4133_vm1 = vweird.f32 %v11376_v55  ;;  %v4160_v31 = vmul.f32 %v11431_v24, %v4159_v4 }
 0x32f   : > { %vm4162_vm7 = vweird.f32 %v10902_v18  ;;  %v11527_v7 = vsel %vm11459_vm5, %v4094_v38, %v4090_v63  ;;  %vm11537_vm14 = vcmp.eq.f32.partialorder %v4151_v44, 8.507059e+37  ;;  %v4168_v40 = vand.u32 2147483648, %v10902_v18  ;;  %vm11549_vm5 = vmor %vm4117_vm3, %vm4118_vm4  ;;  %v13890_v44 = vld [vmem:[#allocation120_spill] sm:$0xff] }
 0x330   : > { %v4174_v23 = vsub.f32 1.0, %v4173_v59  ;;  %v4188_v36 = vmul.f32 %v11506_v10, %v10928_v5  ;;  %v4105_v38 = vsel %vm11533_vm6, %v11350_v39, %v4101_v11  ;;  %vm4148_vm9 = vweird.f32 %v11422_v6  ;;  %vm11569_vm3 = vmor %vm4132_vm11, %vm4133_vm1 }
 0x331   : > { %vm4163_vm12 = vweird.f32 %v11431_v24  ;;  %vm11555_vm10 = vcmp.eq.f32.partialorder %v4166_v35, 8.507059e+37  ;;  %6693 = vrcp.f32 %v10944_v51  ;;  %v11560_v58 = vpop.eup %6689  ;;  %v4120_v30 = vsel %vm11549_vm5, %v11368_v45, %v4116_v3  ;;  %vm11598_vm11 = vmor %vm4147_vm8, %vm4148_vm9 }
 0x332   : > { %v4146_v53 = vadd.f32 %v11422_v6, %v4145_v17  ;;  %v4181_v13 = vand.u32 2147483647, %v10905_v0  ;;  %6695 = vrcp.f32 %v10956_v37  ;;  %v4135_v45 = vsel %vm11569_vm3, %v11376_v55, %v4131_v12  ;;  %v13897_v12 = vld [vmem:[#allocation121_spill] sm:$0xff] }
 0x333   : > { %v11576_v4 = vpop.eup %6691  ;;  %v4161_v29 = vadd.f32 %v11431_v24, %v4160_v31  ;;  %v4183_v20 = vand.u32 2147483648, %v10905_v0  ;;  %6697 = vrcp.f32 %v13890_v44  ;;  %v11587_v59 = vsel %vm11486_vm0, %v11467_v26, %v4105_v38 }
 0x334   : > { %v4169_v63 = vor.u32 1.1754944e-38, %v4168_v40  ;;  %v4175_v11 = vmul.f32 %v11472_v32, %v4174_v23  ;;  %v4189_v35 = vsub.f32 1.0, %v4188_v36  ;;  %v11592_v3 = vsel %vm11497_vm15, %v4124_v27, %v4120_v30  ;;  %vm11617_vm15 = vmor %vm4162_vm7, %vm4163_vm12  ;;  %v13898_v30 = vld [vmem:[#allocation101_spill] sm:$0xff] }
 0x335   : > { %vm4177_vm2 = vweird.f32 %v10905_v0  ;;  %vm4178_vm0 = vweird.f32 %v11472_v32  ;;  %v4203_v26 = vmul.f32 %v11560_v58, %v10934_v48  ;;  %v11608_v16 = vsel %vm11512_vm13, %v4139_v41, %v4135_v45 }
 0x336   : > { %v4150_v27 = vsel %vm11598_vm11, %v11422_v6, %v4146_v53  ;;  %v4196_v15 = vand.u32 2147483647, %v10928_v5  ;;  %v4218_v17 = vmul.f32 %v11576_v4, %v10937_v61  ;;  %v4165_v41 = vsel %vm11617_vm15, %v11431_v24, %v4161_v29  ;;  %vm11663_vm1 = vmor %vm4177_vm2, %vm4178_vm0 }
 0x337   : > { %v11624_v33 = vpop.eup %6693  ;;  %vm11629_vm8 = vcmp.eq.f32.partialorder %v4181_v13, 8.507059e+37  ;;  %v4184_v18 = vor.u32 1.1754944e-38, %v4183_v20  ;;  %6699 = vrcp.f32 %v13897_v12  ;;  %v4176_v47 = vadd.f32 %v11472_v32, %v4175_v11  ;;  %v13903_v20 = vld [vmem:[#allocation122_spill] sm:$0xff] }
 0x338   : > { %v11634_v31 = vpop.eup %6695  ;;  %v4190_v40 = vmul.f32 %v11506_v10, %v4189_v35  ;;  %vm4192_vm13 = vweird.f32 %v10928_v5  ;;  %v4198_v23 = vand.u32 2147483648, %v10928_v5  ;;  %v11644_v24 = vsel %vm11537_vm14, %v4154_v60, %v4150_v27 }
 0x339   : > { %v11640_v36 = vpop.eup %6697  ;;  %v4204_v38 = vsub.f32 1.0, %v4203_v26  ;;  %v4213_v28 = vand.u32 2147483648, %v10934_v48  ;;  %6701 = vrcp.f32 %v13898_v30  ;;  %v11650_v39 = vsel %vm11555_vm10, %v4169_v63, %v4165_v41 }
 0x33a   : > { %vm11652_vm4 = vcmp.eq.f32.partialorder %v4196_v15, 8.507059e+37  ;;  %v4211_v13 = vand.u32 2147483647, %v10934_v48  ;;  %v4219_v45 = vsub.f32 1.0, %v4218_v17  ;;  %v4233_v60 = vmul.f32 %v11624_v33, %v10944_v51 }
 0x33b   : > { %vm4193_vm7 = vweird.f32 %v11506_v10  ;;  %vm4207_vm6 = vweird.f32 %v10934_v48  ;;  %v4226_v49 = vand.u32 2147483647, %v10937_v61  ;;  %v4248_v29 = vmul.f32 %v11634_v31, %v10956_v37 }
 0x33c   : > { %6703 = vrcp.f32 %v13903_v20  ;;  %v4180_v63 = vsel %vm11663_vm1, %v11472_v32, %v4176_v47  ;;  %v4191_v0 = vadd.f32 %v11506_v10, %v4190_v40  ;;  %v4228_v11 = vand.u32 2147483648, %v10937_v61  ;;  %vm11697_vm5 = vmor %vm4192_vm13, %vm4193_vm7 }
 0x33d   : > { %v4263_v35 = vmul.f32 %v11640_v36, %v13890_v44  ;;  %v11680_v55 = vpop.eup %6699  ;;  %v4199_v26 = vor.u32 1.1754944e-38, %v4198_v23  ;;  %v4205_v27 = vmul.f32 %v11560_v58, %v4204_v38  ;;  %v4214_v8 = vor.u32 1.1754944e-38, %v4213_v28 }
 0x33e   : > { %v4243_v15 = vand.u32 2147483648, %v10944_v51  ;;  %v4220_v17 = vmul.f32 %v11576_v4, %v4219_v45  ;;  %vm4222_vm14 = vweird.f32 %v10937_v61  ;;  %v4234_v32 = vsub.f32 1.0, %v4233_v60 }
 0x33f   : > { %v4258_v41 = vand.u32 2147483648, %v10956_v37  ;;  %v11687_v47 = vpop.eup %6701  ;;  %v11691_v40 = vsel %vm11629_vm8, %v4184_v18, %v4180_v63  ;;  %vm4208_vm9 = vweird.f32 %v11560_v58  ;;  %v4241_v38 = vand.u32 2147483647, %v10944_v51 }
 0x340   : > { %v4249_v28 = vsub.f32 1.0, %v4248_v29  ;;  %v4195_v45 = vsel %vm11697_vm5, %v11506_v10, %v4191_v0  ;;  %vm11706_vm12 = vcmp.eq.f32.partialorder %v4211_v13, 8.507059e+37  ;;  %vm11710_vm10 = vcmp.eq.f32.partialorder %v4226_v49, 8.507059e+37  ;;  %vm11738_vm15 = vmor %vm4207_vm6, %vm4208_vm9 }
 0x341   : > { %v4229_v5 = vor.u32 1.1754944e-38, %v4228_v11  ;;  %vm4237_vm3 = vweird.f32 %v10944_v51  ;;  %v4264_v60 = vsub.f32 1.0, %v4263_v35  ;;  %v4278_v19 = vmul.f32 %v11680_v55, %v13897_v12 }
 0x342   : > { %v11717_v29 = vpop.eup %6703  ;;  %v4206_v63 = vadd.f32 %v11560_v58, %v4205_v27  ;;  %vm4223_vm11 = vweird.f32 %v11576_v4  ;;  %v4244_v10 = vor.u32 1.1754944e-38, %v4243_v15  ;;  %vm4252_vm2 = vweird.f32 %v10956_v37 }
 0x343   : > { %v4256_v13 = vand.u32 2147483647, %v10956_v37  ;;  %v4221_v49 = vadd.f32 %v11576_v4, %v4220_v17  ;;  %v4235_v0 = vmul.f32 %v11624_v33, %v4234_v32  ;;  %v4259_v11 = vor.u32 1.1754944e-38, %v4258_v41  ;;  %vm11757_vm13 = vmor %vm4222_vm14, %vm4223_vm11 }
 0x344   : > { %v4293_v35 = vmul.f32 %v11687_v47, %v13898_v30  ;;  %v11729_v23 = vsel %vm11652_vm4, %v4199_v26, %v4195_v45  ;;  %vm4238_vm0 = vweird.f32 %v11624_v33  ;;  %v4250_v27 = vmul.f32 %v11634_v31, %v4249_v28  ;;  %v13915_v28 = vld [vmem:[#allocation110_spill] sm:$0xff] }
 0x345   : > { %13910 = vst [vmem:[#allocation80_spill] sm:$0xff] %v11729_v23  ;;  %v4271_v15 = vand.u32 2147483647, %v13890_v44  ;;  %vm11742_vm8 = vcmp.eq.f32.partialorder %v4241_v38, 8.507059e+37  ;;  %v4265_v53 = vmul.f32 %v11640_v36, %v4264_v60  ;;  %v4279_v26 = vsub.f32 1.0, %v4278_v19  ;;  %vm11796_vm9 = vmor %vm4237_vm3, %vm4238_vm0 }
 0x346   : > { %v4308_v41 = vmul.f32 %v11717_v29, %v13903_v20  ;;  %6705 = vrcp.f32 %v13915_v28  ;;  %v4210_v48 = vsel %vm11738_vm15, %v11560_v58, %v4206_v63  ;;  %vm11761_vm4 = vcmp.eq.f32.partialorder %v4256_v13, 8.507059e+37 }
 0x347   : > { %vm4267_vm1 = vweird.f32 %v13890_v44  ;;  %v4273_v60 = vand.u32 2147483648, %v13890_v44  ;;  %v4286_v19 = vand.u32 2147483647, %v13897_v12  ;;  %v4225_v58 = vsel %vm11757_vm13, %v11576_v4, %v4221_v49 }
 0x348   : > { %v4236_v61 = vadd.f32 %v11624_v33, %v4235_v0  ;;  %vm4282_vm7 = vweird.f32 %v13897_v12  ;;  %v4288_v63 = vand.u32 2147483648, %v13897_v12  ;;  %v4294_v13 = vsub.f32 1.0, %v4293_v35  ;;  %v13922_v0 = vld [vmem:[#allocation60_spill] sm:$0xff] }
 0x349   : > { %v4251_v17 = vadd.f32 %v11634_v31, %v4250_v27  ;;  %vm4253_vm6 = vweird.f32 %v11634_v31  ;;  %vm4268_vm14 = vweird.f32 %v11640_v36  ;;  %vm11777_vm5 = vcmp.eq.f32.partialorder %v4271_v15, 8.507059e+37 }
 0x34a   : > { %v4266_v38 = vadd.f32 %v11640_v36, %v4265_v53  ;;  %v4280_v4 = vmul.f32 %v11680_v55, %v4279_v26  ;;  %v4309_v49 = vsub.f32 1.0, %v4308_v41  ;;  %6707 = vrcp.f32 %v13922_v0  ;;  %vm11825_vm11 = vmor %vm4267_vm1, %vm4268_vm14 }
 0x34b   : > { %v11786_v35 = vsel %vm11706_vm12, %v4214_v8, %v4210_v48  ;;  %v11790_v27 = vsel %vm11710_vm10, %v4229_v5, %v4225_v58  ;;  %v4274_v53 = vor.u32 1.1754944e-38, %v4273_v60  ;;  %v4301_v26 = vand.u32 2147483647, %v13898_v30  ;;  %vm11808_vm12 = vmor %vm4252_vm2, %vm4253_vm6 }
 0x34c   : > { %v11801_v41 = vpop.eup %6705  ;;  %v4240_v8 = vsel %vm11796_vm9, %v11624_v33, %v4236_v61  ;;  %vm11812_vm10 = vcmp.eq.f32.partialorder %v4286_v19, 8.507059e+37  ;;  %v4289_v18 = vor.u32 1.1754944e-38, %v4288_v63  ;;  %v4295_v5 = vmul.f32 %v11687_v47, %v4294_v13  ;;  %v13931_v61 = vld [vmem:[#allocation111_spill] sm:$0xff] }
 0x34d   : > { %vm4297_vm3 = vweird.f32 %v13898_v30  ;;  %v4255_v48 = vsel %vm11808_vm12, %v11634_v31, %v4251_v17  ;;  %vm4283_vm2 = vweird.f32 %v11680_v55  ;;  %v4303_v33 = vand.u32 2147483648, %v13898_v30 }
 0x34e   : > { %v4316_v60 = vand.u32 2147483647, %v13903_v20  ;;  %v4270_v19 = vsel %vm11825_vm11, %v11640_v36, %v4266_v38  ;;  %v4281_v31 = vadd.f32 %v11680_v55, %v4280_v4  ;;  %v4310_v58 = vmul.f32 %v11717_v29, %v4309_v49  ;;  %vm11866_vm13 = vmor %vm4282_vm7, %vm4283_vm2 }
 0x34f   : > { %6709 = vrcp.f32 %v13931_v61  ;;  %v11840_v44 = vsel %vm11742_vm8, %v4244_v10, %v4240_v8  ;;  %vm11842_vm0 = vcmp.eq.f32.partialorder %v4301_v26, 8.507059e+37  ;;  %v4318_v13 = vand.u32 2147483648, %v13903_v20 }
 0x350   : > { %v4323_v17 = vmul.f32 %v11801_v41, %v13915_v28  ;;  %v11849_v36 = vpop.eup %6707  ;;  %v11853_v38 = vsel %vm11761_vm4, %v4259_v11, %v4255_v48  ;;  %v4296_v4 = vadd.f32 %v11687_v47, %v4295_v5  ;;  %vm4298_vm15 = vweird.f32 %v11687_v47 }
 0x351   : > { %13934 = vst [vmem:[#allocation66_spill] sm:$0xff] %v11853_v38  ;;  %vm4312_vm8 = vweird.f32 %v13903_v20  ;;  %v11860_v10 = vsel %vm11777_vm5, %v4274_v53, %v4270_v19  ;;  %v4304_v11 = vor.u32 1.1754944e-38, %v4303_v33  ;;  %vm11870_vm4 = vcmp.eq.f32.partialorder %v4316_v60, 8.507059e+37  ;;  %vm11883_vm7 = vmor %vm4297_vm3, %vm4298_vm15  ;;  %v13947_v20 = vld [vmem:[#allocation24_spill] sm:$0xff] }
 0x352   : > { %13935 = vst [vmem:[#allocation67_spill] sm:$0xff] %v11860_v10  ;;  %v4333_v49 = vand.u32 2147483648, %v13915_v28  ;;  %v4285_v23 = vsel %vm11866_vm13, %v11680_v55, %v4281_v31  ;;  %v4311_v15 = vadd.f32 %v11717_v29, %v4310_v58  ;;  %vm4313_vm1 = vweird.f32 %v11717_v29  ;;  %v13946_v31 = vld [vmem:[#allocation118_spill] sm:$0xff] }
 0x353   : > { %6711 = vrcp.f32 %v11009_v14  ;;  %v4319_v53 = vor.u32 1.1754944e-38, %v4318_v13  ;;  %v4324_v26 = vsub.f32 1.0, %v4323_v17  ;;  %v4331_v8 = vand.u32 2147483647, %v13915_v28  ;;  %vm11904_vm6 = vmor %vm4312_vm8, %vm4313_vm1 }
 0x354   : > { %v4338_v6 = vmul.f32 %v11849_v36, %v13922_v0  ;;  %v4300_v5 = vsel %vm11883_vm7, %v11687_v47, %v4296_v4  ;;  %v4346_v48 = vand.u32 2147483647, %v13922_v0  ;;  %v4348_v30 = vand.u32 2147483648, %v13922_v0 }
 0x355   : > { %v11890_v55 = vpop.eup %6709  ;;  %v4363_v37 = vand.u32 2147483648, %v13931_v61  ;;  %v11900_v33 = vsel %vm11812_vm10, %v4289_v18, %v4285_v23  ;;  %vm4327_vm14 = vweird.f32 %v13915_v28  ;;  %vm4328_vm5 = vweird.f32 %v11801_v41  ;;  %v13945_v18 = vld [vmem:[#allocation31_spill] sm:$0xff] }
 0x356   : > { %13942 = vst [vmem:[#allocation75_spill] sm:$0xff] %v11900_v33  ;;  %v11910_v47 = vor.u32 1.1754944e-38, %v4333_v49  ;;  %v4315_v51 = vsel %vm11904_vm6, %v11717_v29, %v4311_v15  ;;  %v4434_v58 = vmul.f32 %v13946_v31, %v13945_v18  ;;  %vm4523_vm9 = vcmask 1040384   ;;  %v13955_v18 = vld [vmem:[#allocation13_spill] sm:$0xff]  ;;  %v13961_v15 = vld [vmem:[#allocation15_spill] sm:$0xff]  ;;  %vm11992_vm15 = vmor %vm4327_vm14, %vm4328_vm5 }
 0x357   : > { %v4530_v13 = vrot.slane %v13947_v20, 7  ;;  %v11921_v17 = vsel %vm11842_vm0, %v4304_v11, %v4300_v5  ;;  %v4325_v4 = vmul.f32 %v11801_v41, %v4324_v26  ;;  %v4339_v32 = vsub.f32 1.0, %v4338_v6  ;;  %v13950_v11 = vld [vmem:[#allocation62_spill] sm:$0xff]  ;;  %v13951_v26 = vld [vmem:[#allocation32_spill] sm:$0xff] }
 0x358   : > { %13948 = vst [vmem:[#allocation82_spill] sm:$0xff] %v11921_v17  ;;  %v4353_v49 = vmul.f32 %v11890_v55, %v13931_v61  ;;  %v11928_v12 = vor.u32 1.1754944e-38, %v4348_v30  ;;  %v11930_v29 = vor.u32 1.1754944e-38, %v4363_v37  ;;  %v4378_v60 = vand.u32 2147483648, %v11009_v14  ;;  %v13952_v6 = vld [vmem:[#allocation114_spill] sm:$0xff] }
 0x359   : > { %v11926_v23 = vpop.eup %6711  ;;  %v11936_v63 = vsel %vm11870_vm4, %v4319_v53, %v4315_v51  ;;  %vm4342_vm12 = vweird.f32 %v13922_v0  ;;  %vm4343_vm10 = vweird.f32 %v11849_v36  ;;  %6713 = vrcp.f32 %v13950_v11  ;;  %v13953_v30 = vld [vmem:[#allocation14_spill] sm:$0xff]  ;;  %v13960_v53 = vld [vmem:[#allocation88_spill] sm:$0xff] }
 0x35a   : > { %13949 = vst [vmem:[#allocation70_spill] sm:$0xff] %v11936_v63  ;;  %v4435_v5 = vmul.f32 %v13952_v6, %v13951_v26  ;;  %v13954_v37 = vrot.slane %v13953_v30, 7  ;;  %v13956_v31 = vrot.slane %v13955_v18, 7  ;;  %vm11950_vm3 = vcmp.eq.f32.partialorder %v4331_v8, 8.507059e+37  ;;  %v13965_v6 = vld [vmem:[#allocation17_spill] sm:$0xff]  ;;  %v13968_v30 = vld [vmem:[#allocation38_spill] sm:$0xff]  ;;  %vm12048_vm6 = vmor %vm4342_vm12, %vm4343_vm10 }
 0x35b   : > { %v4437_v51 = vmul.f32 %v11125_v50, %v13960_v53  ;;  %v13962_v19 = vrot.slane %v13961_v15, 7  ;;  %v13966_v63 = vrot.slane %v13965_v6, 7  ;;  %v4326_v8 = vadd.f32 %v11801_v41, %v4325_v4  ;;  %v13969_v53 = vld [vmem:[#allocation117_spill] sm:$0xff] }
 0x35c   : > { %v11948_v20 = vsel %vm4523_vm9, %v13956_v31, %v13954_v37  ;;  %v13963_v17 = vmov %v13954_v37  ;;  %v4535_v37 = vrot.slane %v4434_v58, 7  ;;  %v4340_v31 = vmul.f32 %v11849_v36, %v4339_v32  ;;  %v13972_v58 = vld [vmem:[#allocation105_spill] sm:$0xff] }
 0x35d   : > { %13957 = vst [vmem:[#allocation77_spill] sm:$0xff] %v11948_v20  ;;  %v11961_v26 = vsel %vm4523_vm9, %v13963_v17, %v13962_v19  ;;  %v11966_v18 = vsel %vm4523_vm9, %v13966_v63, %v4530_v13  ;;  %v4354_v33 = vsub.f32 1.0, %v4353_v49  ;;  %v4368_v50 = vmul.f32 %v11926_v23, %v11009_v14  ;;  %v13970_v17 = vld [vmem:[#allocation102_spill] sm:$0xff] }
 0x35e   : > { %13964 = vst [vmem:[#allocation64_spill] sm:$0xff] %v11961_v26  ;;  %v11972_v15 = vor.u32 1.1754944e-38, %v4378_v60  ;;  %v4436_v19 = vmul.f32 %v13969_v53, %v13968_v30  ;;  %v4438_v6 = vmul.f32 %v11130_v22, %v13970_v17  ;;  %vm13971_vm11 = vcmask 130048   ;;  %v13977_v30 = vld [vmem:[#allocation21_spill] sm:$0xff] }
 0x35f   : > { %13967 = vst [vmem:[#allocation97_spill] sm:$0xff] %v11966_v18  ;;  %v4636_v63 = vsel %vm13971_vm11, %v11948_v20, 0.0  ;;  %v11982_v4 = vmul.f32 %v11196_v25, %v13972_v58  ;;  %v4537_v32 = vrot.slane %v4435_v5, 7  ;;  %vm13973_vm2 = vmmov %vm13971_vm11  ;;  %v13978_v53 = vrot.slane %v13977_v30, 7  ;;  %v13979_v5 = vld [vmem:[#allocation35_spill] sm:$0xff]  ;;  %v12006_v20 = vpop.eup %6713 }
 0x360   : > { %v4637_v49 = vsel %vm13973_vm2, %v11961_v26, 0.0  ;;  %vm13974_vm0 = vmmov %vm13973_vm2  ;;  %v13980_v17 = vrot.slane %v13979_v5, 7  ;;  %v4540_v26 = vrot.slane %v4437_v51, 7  ;;  %v4330_v28 = vsel %vm11992_vm15, %v11801_v41, %v4326_v8  ;;  %v13983_v5 = vld [vmem:[#allocation104_spill] sm:$0xff]  ;;  %v13985_v41 = vld [vmem:[#allocation27_spill] sm:$0xff] }
 0x361   : > { %v4639_v60 = vsel %vm13974_vm0, %v11966_v18, 0.0  ;;  %v11999_v25 = vsel %vm4523_vm9, %v4530_v13, %v13978_v53  ;;  %v4638_v18 = vadd.f32 %v4637_v49, %v4636_v63  ;;  %v4341_v38 = vadd.f32 %v11849_v36, %v4340_v31  ;;  %v13984_v63 = vld [vmem:[#allocation74_spill] sm:$0xff]  ;;  %vm13986_vm1 = vmmov %vm13974_vm0  ;;  %v14007_v53 = vld [vmem:[#allocation76_spill] sm:$0xff] }
 0x362   : > { %v12004_v58 = vsel %vm4523_vm9, %v13980_v17, %v4535_v37  ;;  %v4391_v30 = vand.u32 2147483647, %v13950_v11  ;;  %v4393_v13 = vand.u32 2147483648, %v13950_v11  ;;  %vm12014_vm8 = vcmp.eq.f32.partialorder %v4346_v48, 8.507059e+37  ;;  %vm13987_vm7 = vmmov %vm13974_vm0 }
 0x363   : > { %v4439_v51 = vmul.f32 %v11191_v34, %v13983_v5  ;;  %v4441_v49 = vmul.f32 %v11206_v43, %v13984_v63  ;;  %v4539_v17 = vrot.slane %v4436_v19, 7  ;;  %v4640_v10 = vadd.f32 %v4639_v60, %v4638_v18  ;;  %vm13993_vm12 = vmmov %vm13974_vm0 }
 0x364   : > { %vm4357_vm13 = vweird.f32 %v13931_v61  ;;  %vm4358_vm4 = vweird.f32 %v11890_v55  ;;  %v4443_v8 = vmul.f32 %v11216_v2, %v13985_v41  ;;  %v12027_v48 = vsel %vm4523_vm9, %v4535_v37, %v4537_v32  ;;  %vm13994_vm10 = vmmov %vm13974_vm0 }
 0x365   : > { %v4641_v31 = vsel %vm13986_vm1, %v11999_v25, 0.0  ;;  %v4643_v34 = vsel %vm13987_vm7, %v12004_v58, 0.0  ;;  %v12034_v43 = vsel %vm4523_vm9, %v4539_v17, %v4540_v26  ;;  %v4542_v18 = vrot.slane %v4438_v6, 7  ;;  %v13990_v6 = vld [vmem:[#allocation89_spill] sm:$0xff]  ;;  %vm14001_vm11 = vmmov %vm13974_vm0 }
 0x366   : > { %v4545_v19 = vrot.slane %v11982_v4, 7  ;;  %v4642_v60 = vadd.f32 %v4641_v31, %v4640_v10  ;;  %v12040_v2 = vsel %vm11950_vm3, %v11910_v47, %v4330_v28  ;;  %v4355_v37 = vmul.f32 %v11890_v55, %v4354_v33  ;;  %v13991_v4 = vld [vmem:[#allocation72_spill] sm:$0xff]  ;;  %vm14002_vm2 = vmmov %vm13974_vm0 }
 0x367   : > { %v4369_v32 = vsub.f32 1.0, %v4368_v50  ;;  %6715 = vrcp.f32 %v11017_v62  ;;  %v4442_v10 = vmul.f32 %v11210_v1, %v13990_v6  ;;  %v4444_v47 = vmul.f32 %v11249_v54, %v13991_v4  ;;  %v13992_v33 = vld [vmem:[#allocation100_spill] sm:$0xff]  ;;  %vm12116_vm0 = vmor %vm4357_vm13, %vm4358_vm4 }
 0x368   : > { %v4544_v45 = vrot.slane %v4439_v51, 7  ;;  %v4644_v28 = vadd.f32 %v4643_v34, %v4642_v60  ;;  %vm4372_vm14 = vweird.f32 %v11009_v14  ;;  %vm4373_vm5 = vweird.f32 %v11926_v23  ;;  %v13999_v60 = vld [vmem:[#allocation84_spill] sm:$0xff]  ;;  %vm14009_vm15 = vmmov %vm13986_vm1 }
 0x369   : > { %v4446_v50 = vmul.f32 %v11381_v9, %v13992_v33  ;;  %v4547_v0 = vrot.slane %v4441_v49, 7  ;;  %v4645_v5 = vsel %vm13993_vm12, %v12027_v48, 0.0  ;;  %v4647_v63 = vsel %vm13994_vm10, %v12034_v43, 0.0  ;;  %v14000_v6 = vld [vmem:[#allocation68_spill] sm:$0xff]  ;;  %vm12146_vm13 = vmor %vm4372_vm14, %vm4373_vm5 }
 0x36a   : > { %v12065_v1 = vsel %vm4523_vm9, %v4540_v26, %v4542_v18  ;;  %v12068_v54 = vsel %vm4523_vm9, %v4544_v45, %v4545_v19  ;;  %v4550_v51 = vrot.slane %v4443_v8, 7  ;;  %v4646_v17 = vadd.f32 %v4645_v5, %v4644_v28  ;;  %v13998_v8 = vld [vmem:[#allocation92_spill] sm:$0xff]  ;;  %vm14019_vm7 = vmmov %vm13986_vm1 }
 0x36b   : > { %v4345_v41 = vsel %vm12048_vm6, %v11849_v36, %v4341_v38  ;;  %v4370_v9 = vmul.f32 %v11926_v23, %v4369_v32  ;;  %v12076_v49 = vmul.f32 %v12006_v20, %v13950_v11  ;;  %v12078_v31 = vor.u32 1.1754944e-38, %v4393_v13  ;;  %vm14023_vm5 = vmmov %vm13986_vm1 }
 0x36c   : > { %v13995_v26 = vand.u32 2147483647, %v13931_v61  ;;  %v4445_v18 = vmul.f32 %v11355_v52, %v13998_v8  ;;  %v4447_v36 = vmul.f32 %v11385_v56, %v13999_v60  ;;  %v4549_v38 = vrot.slane %v4442_v10, 7  ;;  %vm14024_vm12 = vmmov %vm13986_vm1 }
 0x36d   : > { %v4648_v32 = vadd.f32 %v4647_v63, %v4646_v17  ;;  %v12090_v22 = vpop.eup %6715  ;;  %v4449_v13 = vmul.f32 %v11435_v46, %v14000_v6  ;;  %v4552_v4 = vrot.slane %v4444_v47, 7  ;;  %v4649_v45 = vsel %vm14001_vm11, %v12065_v1, 0.0  ;;  %v14003_v63 = vld [vmem:[#allocation58_spill] sm:$0xff]  ;;  %vm14029_vm11 = vmmov %vm13986_vm1 }
 0x36e   : > { %vm12082_vm3 = vcmp.eq.f32.partialorder %v13995_v26, 8.507059e+37  ;;  %v4651_v28 = vsel %vm14002_vm2, %v12068_v54, 0.0  ;;  %v12099_v33 = vsel %vm4523_vm9, %v4545_v19, %v4547_v0  ;;  %v12102_v52 = vsel %vm4523_vm9, %v4549_v38, %v4550_v51  ;;  %v14018_v19 = vld [vmem:[#allocation73_spill] sm:$0xff]  ;;  %vm14030_vm2 = vmmov %vm13986_vm1 }
 0x36f   : > { %v4555_v56 = vrot.slane %v4446_v50, 7  ;;  %v4650_v10 = vadd.f32 %v4649_v45, %v4648_v32  ;;  %v12107_v5 = vsel %vm12014_vm8, %v11928_v12, %v4345_v41  ;;  %v4356_v46 = vadd.f32 %v11890_v55, %v4355_v37  ;;  %v14006_v50 = vld [vmem:[#allocation90_spill] sm:$0xff]  ;;  %v14008_v41 = vld [vmem:[#allocation95_spill] sm:$0xff]  ;;  %vm14010_vm8 = vmmov %vm13986_vm1 }
 0x370   : > { %v4406_v47 = vand.u32 2147483647, %v11017_v62  ;;  %6717 = vrcp.f32 %v14003_v63  ;;  %v4448_v0 = vmul.f32 %v11405_v57, %v14006_v50  ;;  %v4450_v12 = vmul.f32 %v11443_v21, %v14007_v53 }
 0x371   : > { %v4554_v17 = vrot.slane %v4445_v18, 7  ;;  %v4652_v37 = vadd.f32 %v4651_v28, %v4650_v10  ;;  %v4452_v26 = vmul.f32 %v11527_v7, %v14008_v41  ;;  %v4557_v8 = vrot.slane %v4447_v36, 7 }
 0x372   : > { %v4653_v60 = vsel %vm14009_vm15, %v12099_v33, 0.0  ;;  %v4655_v61 = vsel %vm14010_vm8, %v12102_v52, 0.0  ;;  %v12131_v38 = vsel %vm4523_vm9, %v4550_v51, %v4552_v4  ;;  %v4560_v32 = vrot.slane %v4449_v13, 7  ;;  %v14036_v4 = vld [vmem:[#allocation116_spill] sm:$0xff] }
 0x373   : > { %v12134_v57 = vsel %vm4523_vm9, %v4554_v17, %v4555_v56  ;;  %v4654_v21 = vadd.f32 %v4653_v60, %v4652_v37  ;;  %v4360_v18 = vsel %vm12116_vm0, %v11890_v55, %v4356_v46  ;;  %v4371_v7 = vadd.f32 %v11926_v23, %v4370_v9  ;;  %v14016_v55 = vld [vmem:[#allocation85_spill] sm:$0xff]  ;;  %v14020_v60 = vld [vmem:[#allocation63_spill] sm:$0xff] }
 0x374   : > { %v4384_v36 = vsub.f32 1.0, %v12076_v49  ;;  %v4408_v6 = vand.u32 2147483648, %v11017_v62  ;;  %v14013_v13 = vand.u32 2147483647, %v11009_v14  ;;  %v4451_v9 = vmul.f32 %v11481_v42, %v14016_v55  ;;  %v14017_v49 = vld [vmem:[#allocation78_spill] sm:$0xff] }
 0x375   : > { %v4453_v45 = vmul.f32 %v11587_v59, %v14017_v49  ;;  %v4559_v28 = vrot.slane %v4448_v0, 7  ;;  %v4656_v10 = vadd.f32 %v4655_v61, %v4654_v21  ;;  %v4455_v50 = vmul.f32 %v11608_v16, %v14018_v19  ;;  %v14026_v19 = vld [vmem:[#allocation71_spill] sm:$0xff] }
 0x376   : > { %vm12152_vm4 = vcmp.eq.f32.partialorder %v14013_v13, 8.507059e+37  ;;  %v12160_v46 = vpop.eup %6717  ;;  %v12165_v53 = vsel %vm4523_vm9, %v4555_v56, %v4557_v8  ;;  %v4657_v14 = vsel %vm13986_vm1, %v12131_v38, 0.0  ;;  %v4659_v17 = vsel %vm14019_vm7, %v12134_v57, 0.0 }
 0x377   : > { %v12172_v42 = vsel %vm4523_vm9, %v4559_v28, %v4560_v32  ;;  %v4562_v59 = vrot.slane %v4450_v12, 7  ;;  %v4565_v0 = vrot.slane %v4452_v26, 7  ;;  %v4658_v37 = vadd.f32 %v4657_v14, %v4656_v10  ;;  %v14021_v12 = vld [vmem:[#allocation87_spill] sm:$0xff]  ;;  %v14027_v14 = vld [vmem:[#allocation80_spill] sm:$0xff] }
 0x378   : > { %v12177_v41 = vsel %vm12082_vm3, %v11930_v29, %v4360_v18  ;;  %v4375_v16 = vsel %vm12146_vm13, %v11926_v23, %v4371_v7  ;;  %v4398_v56 = vmul.f32 %v12090_v22, %v11017_v62  ;;  %v4421_v8 = vand.u32 2147483647, %v14003_v63  ;;  %v14022_v29 = vld [vmem:[#allocation65_spill] sm:$0xff]  ;;  %v14025_v28 = vld [vmem:[#allocation59_spill] sm:$0xff]  ;;  %vm14039_vm13 = vmmov %vm13986_vm1 }
 0x379   : > { %v4454_v61 = vmul.f32 %v11592_v3, %v14020_v60  ;;  %v4456_v26 = vmul.f32 %v11644_v24, %v14021_v12  ;;  %v4564_v21 = vrot.slane %v4451_v9, 7  ;;  %v4660_v13 = vadd.f32 %v4659_v17, %v4658_v37 }
 0x37a   : > { %vm4387_vm6 = vweird.f32 %v13950_v11  ;;  %vm4388_vm14 = vweird.f32 %v12006_v20  ;;  %v4458_v23 = vmul.f32 %v11691_v40, %v14022_v29  ;;  %v4567_v34 = vrot.slane %v4453_v45, 7  ;;  %v14035_v29 = vld [vmem:[#allocation81_spill] sm:$0xff]  ;;  %v14049_v11 = vld [vmem:[#allocation108_spill] sm:$0xff] }
 0x37b   : > { %v4661_v18 = vsel %vm14023_vm5, %v12165_v53, 0.0  ;;  %v4663_v7 = vsel %vm14024_vm12, %v12172_v42, 0.0  ;;  %vm4402_vm10 = vweird.f32 %v11017_v62  ;;  %v12199_v3 = vsel %vm4523_vm9, %v4560_v32, %v4562_v59  ;;  %vm12267_vm7 = vmor %vm4387_vm6, %vm4388_vm14 }
 0x37c   : > { %v12202_v24 = vsel %vm4523_vm9, %v4564_v21, %v4565_v0  ;;  %v4570_v51 = vrot.slane %v4455_v50, 7  ;;  %v4662_v55 = vadd.f32 %v4661_v18, %v4660_v13  ;;  %v4385_v9 = vmul.f32 %v12006_v20, %v4384_v36  ;;  %v14028_v50 = vld [vmem:[#allocation115_spill] sm:$0xff]  ;;  %v14037_v18 = vld [vmem:[#allocation106_spill] sm:$0xff]  ;;  %vm14051_vm6 = vmmov %vm14030_vm2 }
 0x37d   : > { %v4399_v40 = vsub.f32 1.0, %v4398_v56  ;;  %v12205_v49 = vor.u32 1.1754944e-38, %v4408_v6  ;;  %v4413_v45 = vmul.f32 %v12160_v46, %v14003_v63  ;;  %v4457_v10 = vmul.f32 %v11650_v39, %v14025_v28  ;;  %vm14052_vm14 = vmmov %vm14030_vm2 }
 0x37e   : > { %v4459_v32 = vmul.f32 %v14027_v14, %v14026_v19  ;;  %v4569_v17 = vrot.slane %v4454_v61, 7  ;;  %v4664_v59 = vadd.f32 %v4663_v7, %v4662_v55  ;;  %vm4417_vm3 = vweird.f32 %v14003_v63  ;;  %v14038_v7 = vld [vmem:[#allocation67_spill] sm:$0xff] }
 0x37f   : > { %v4461_v37 = vmul.f32 %v11790_v27, %v14028_v50  ;;  %v4572_v36 = vrot.slane %v4456_v26, 7  ;;  %v4665_v6 = vsel %vm14029_vm11, %v12199_v3, 0.0  ;;  %v4667_v56 = vsel %vm14030_vm2, %v12202_v24, 0.0  ;;  %v14045_v50 = vld [vmem:[#allocation107_spill] sm:$0xff]  ;;  %vm14060_vm11 = vmmov %vm14030_vm2 }
 0x380   : > { %v12221_v60 = vsel %vm4523_vm9, %v4565_v0, %v4567_v34  ;;  %v12224_v39 = vsel %vm4523_vm9, %v4569_v17, %v4570_v51  ;;  %v4575_v61 = vrot.slane %v4458_v23, 7  ;;  %v4666_v12 = vadd.f32 %v4665_v6, %v4664_v59  ;;  %v14044_v17 = vld [vmem:[#allocation66_spill] sm:$0xff] }
 0x381   : > { %v4380_v21 = vsel %vm12152_vm4, %v11972_v15, %v4375_v16  ;;  %v4400_v27 = vmul.f32 %v12090_v22, %v4399_v40  ;;  %vm4403_vm0 = vweird.f32 %v12090_v22  ;;  %v4414_v26 = vsub.f32 1.0, %v4413_v45  ;;  %vm14040_vm4 = vmmov %vm13986_vm1 }
 0x382   : > { %vm12233_vm15 = vcmp.eq.f32.partialorder %v4391_v30, 8.507059e+37  ;;  %vm12239_vm8 = vcmp.eq.f32.partialorder %v4406_v47, 8.507059e+37  ;;  %v4460_v15 = vmul.f32 %v11786_v35, %v14035_v29  ;;  %v4462_v16 = vmul.f32 %v11840_v44, %v14036_v4  ;;  %vm12279_vm5 = vmor %vm4402_vm10, %vm4403_vm0 }
 0x383   : > { %v4574_v23 = vrot.slane %v4457_v10, 7  ;;  %v4668_v34 = vadd.f32 %v4667_v56, %v4666_v12  ;;  %v4464_v30 = vmul.f32 %v14038_v7, %v14037_v18  ;;  %v4577_v55 = vrot.slane %v4459_v32, 7  ;;  %v14043_v32 = vld [vmem:[#allocation96_spill] sm:$0xff]  ;;  %v14050_v12 = vld [vmem:[#allocation70_spill] sm:$0xff]  ;;  %vm14065_vm0 = vmmov %vm14030_vm2 }
 0x384   : > { %v4669_v40 = vsel %vm14039_vm13, %v12221_v60, 0.0  ;;  %v4671_v47 = vsel %vm14040_vm4, %v12224_v39, 0.0  ;;  %v12254_v45 = vsel %vm4523_vm9, %v4570_v51, %v4572_v36  ;;  %v4580_v28 = vrot.slane %v4461_v37, 7  ;;  %v14046_v37 = vld [vmem:[#allocation75_spill] sm:$0xff]  ;;  %vm14069_vm13 = vmmov %vm14065_vm0 }
 0x385   : > { %v12257_v35 = vsel %vm4523_vm9, %v4574_v23, %v4575_v61  ;;  %v4670_v44 = vadd.f32 %v4669_v40, %v4668_v34  ;;  %v4386_v10 = vadd.f32 %v12006_v20, %v4385_v9  ;;  %v4401_v19 = vadd.f32 %v12090_v22, %v4400_v27  ;;  %v14058_v40 = vld [vmem:[#allocation82_spill] sm:$0xff]  ;;  %vm14071_vm4 = vmmov %vm14065_vm0 }
 0x386   : > { %v4415_v14 = vmul.f32 %v12160_v46, %v4414_v26  ;;  %vm4418_vm1 = vweird.f32 %v12160_v46  ;;  %v4463_v59 = vmul.f32 %v14044_v17, %v14043_v32  ;;  %v4465_v9 = vmul.f32 %v14046_v37, %v14045_v50 }
 0x387   : > { %v4579_v36 = vrot.slane %v4460_v15, 7  ;;  %v4672_v6 = vadd.f32 %v4671_v47, %v4670_v44  ;;  %v4467_v27 = vmul.f32 %v14050_v12, %v14049_v11  ;;  %v12286_v26 = vsel %vm4523_vm9, %v4575_v61, %v4577_v55  ;;  %vm12313_vm10 = vmor %vm4417_vm3, %vm4418_vm1 }
 0x388   : > { %v4673_v29 = vsel %vm14051_vm6, %v12254_v45, 0.0  ;;  %v4675_v15 = vsel %vm14052_vm14, %v12257_v35, 0.0  ;;  %v4582_v62 = vrot.slane %v4462_v16, 7  ;;  %v4585_v23 = vrot.slane %v4464_v30, 7  ;;  %v14057_v30 = vld [vmem:[#allocation93_spill] sm:$0xff]  ;;  %vm14064_vm3 = vmmov %vm14030_vm2 }
 0x389   : > { %v12293_v4 = vsel %vm4523_vm9, %v4579_v36, %v4580_v28  ;;  %v4674_v34 = vadd.f32 %v4673_v29, %v4672_v6  ;;  %v4390_v18 = vsel %vm12267_vm7, %v12006_v20, %v4386_v10  ;;  %v4416_v7 = vadd.f32 %v12160_v46, %v4415_v14  ;;  %v14059_v10 = vld [vmem:[#allocation98_spill] sm:$0xff]  ;;  %v14062_v6 = vld [vmem:[#allocation109_spill] sm:$0xff]  ;;  %vm14072_vm1 = vmmov %vm14065_vm0 }
 0x38a   : > { %vm12301_vm12 = vcmp.eq.f32.partialorder %v4421_v8, 8.507059e+37  ;;  %v4423_v55 = vand.u32 2147483648, %v14003_v63  ;;  %v4405_v16 = vsel %vm12279_vm5, %v12090_v22, %v4401_v19  ;;  %v4466_v8 = vmul.f32 %v14058_v40, %v14057_v30  ;;  %v14070_v30 = vld [vmem:[#allocation119_spill] sm:$0xff]  ;;  %vm14073_vm7 = vmmov %vm14065_vm0 }
 0x38b   : > { %v4584_v47 = vrot.slane %v4463_v59, 7  ;;  %v4676_v44 = vadd.f32 %v4675_v15, %v4674_v34  ;;  %v4468_v14 = vmul.f32 %v12040_v2, %v14059_v10  ;;  %v4587_v51 = vrot.slane %v4465_v9, 7  ;;  %v14066_v15 = vld [vmem:[#allocation112_spill] sm:$0xff]  ;;  %vm14074_vm5 = vmmov %vm14065_vm0 }
 0x38c   : > { %v4677_v22 = vsel %vm14060_vm11, %v12286_v26, 0.0  ;;  %v4679_v19 = vsel %vm14030_vm2, %v12293_v4, 0.0  ;;  %v12326_v63 = vsel %vm4523_vm9, %v4580_v28, %v4582_v62  ;;  %v4590_v17 = vrot.slane %v4467_v27, 7  ;;  %v14061_v28 = vld [vmem:[#allocation94_spill] sm:$0xff]  ;;  %v14063_v27 = vld [vmem:[#allocation103_spill] sm:$0xff]  ;;  %vm14075_vm6 = vmmov %vm14065_vm0 }
 0x38d   : > { %v12329_v32 = vsel %vm4523_vm9, %v4584_v47, %v4585_v23  ;;  %v4678_v50 = vadd.f32 %v4677_v22, %v4676_v44  ;;  %v4395_v59 = vsel %vm12233_vm15, %v12078_v31, %v4390_v18  ;;  %v4410_v2 = vsel %vm12239_vm8, %v12205_v49, %v4405_v16  ;;  %vm14068_vm8 = vmmov %vm14065_vm0 }
 0x38e   : > { %v4420_v37 = vsel %vm12313_vm10, %v12160_v46, %v4416_v7  ;;  %v4424_v9 = vor.u32 1.1754944e-38, %v4423_v55  ;;  %v4469_v36 = vmul.f32 %v12107_v5, %v14061_v28  ;;  %v4470_v56 = vmul.f32 %v12177_v41, %v14062_v6  ;;  %vm14076_vm14 = vmmov %vm14065_vm0 }
 0x38f   : > { %v4589_v11 = vrot.slane %v4466_v8, 7  ;;  %v4680_v12 = vadd.f32 %v4679_v19, %v4678_v50  ;;  %v4471_v13 = vmul.f32 %v4380_v21, %v14063_v27  ;;  %v4681_v31 = vsel %vm14064_vm3, %v12326_v63, 0.0  ;;  %v14067_v21 = vld [vmem:[#allocation113_spill] sm:$0xff] }
 0x390   : > { %v4683_v49 = vsel %vm14065_vm0, %v12329_v32, 0.0  ;;  %v12350_v0 = vsel %vm4523_vm9, %v4585_v23, %v4587_v51  ;;  %v4592_v5 = vrot.slane %v4468_v14, 7  ;;  %v4425_v41 = vsel %vm12301_vm12, %v4424_v9, %v4420_v37  ;;  %v4753_v23 = vld [vmem:[%s12991_s9] sm:$0x3] }
 0x391   : > { %v12353_v46 = vsel %vm4523_vm9, %v4589_v11, %v4590_v17  ;;  %v4682_v29 = vadd.f32 %v4681_v31, %v4680_v12  ;;  %v4472_v62 = vmul.f32 %v4395_v59, %v14066_v15  ;;  %v4473_v34 = vmul.f32 %v4410_v2, %v14067_v21  ;;  %v4709_v21 = vld [vmem:[%s12990_s8] sm:$0x1] }
 0x392   : > { %v4594_v18 = vrot.slane %v4469_v36, 7  ;;  %v4595_v7 = vrot.slane %v4470_v56, 7  ;;  %vm4759_vm15 = vcmask 1041408   ;;  %v4685_v16 = vsel %vm14068_vm8, %v12350_v0, 0.0 }
 0x393   : > { %v4684_v55 = vadd.f32 %v4683_v49, %v4682_v29  ;;  %v4687_v20 = vsel %vm14069_vm13, %v12353_v46, 0.0  ;;  %v4761_v61 = vsel %vm4759_vm15, %v4753_v23, 0  ;;  %v4474_v40 = vmul.f32 %v4425_v41, %v14070_v30  ;;  %vm14079_vm13 = vmmov %vm14072_vm1 }
 0x394   : > { %v12368_v8 = vsel %vm4523_vm9, %v4590_v17, %v4592_v5  ;;  %v4597_v47 = vrot.slane %v4471_v13, 7  ;;  %4770 = vmatpush.bf16.msrb.mxu2 %v4761_v61  ;;  %v12371_v10 = vsel %vm4523_vm9, %v4594_v18, %v4595_v7  ;;  %v4599_v14 = vrot.slane %v4472_v62, 7 }
 0x395   : > { %v4686_v44 = vadd.f32 %v4685_v16, %v4684_v55  ;;  %v4600_v51 = vrot.slane %v4473_v34, 7  ;;  %v4689_v19 = vsel %vm14071_vm4, %v12368_v8, 0.0  ;;  %v4602_v59 = vrot.slane %v4474_v40, 7  ;;  %vm14080_vm4 = vmmov %vm14072_vm1 }
 0x396   : > { %v12376_v50 = vsel %vm4523_vm9, %v4595_v7, %v4597_v47  ;;  %v4691_v17 = vsel %vm14072_vm1, %v12371_v10, 0.0  ;;  %vm4755_vm2 = vcmask 31744  }
 0x397   : > { %v4688_v22 = vadd.f32 %v4687_v20, %v4686_v44  ;;  %v12381_v37 = vsel %vm4523_vm9, %v4599_v14, %v4600_v51  ;;  %v4693_v28 = vsel %vm14073_vm7, %v12376_v50, 0.0  ;;  %v12386_v36 = vsel %vm4523_vm9, %v4600_v51, %v4602_v59  ;;  %vm14082_vm7 = vmmov %vm14072_vm1 }
 0x398   : > { %v4695_v56 = vsel %vm14074_vm5, %v12381_v37, 0.0  ;;  %v4697_v12 = vsel %vm14075_vm6, %v12386_v36, 0.0  ;;  %vm14083_vm5 = vmmov %vm14072_vm1 }
 0x399   : > { %v4690_v2 = vadd.f32 %v4689_v19, %v4688_v22  ;;  %vm14084_vm6 = vmmov %vm14072_vm1 }
 0x39b   : > { %v4692_v9 = vadd.f32 %v4691_v17, %v4690_v2  ;;  %v4754_v17 = vld [vmem:[%s12992_s10] sm:$0x1] }
 0x39d   : > { %v4694_v6 = vadd.f32 %v4693_v28, %v4692_v9  ;;  %v6366_v9 = vld [vmem:[%s12993_s11] sm:$0xff] }
 0x39e   : > { %4907 = vmatpush.bf16.msra.mxu2 %v6366_v9  ;;  %6370 = vmatpush.bf16.msra.mxu3 %v6366_v9 }
 0x39f   : > { %v4696_v11 = vadd.f32 %v4695_v56, %v4694_v6 }
 0x3a1   : > { %v4698_v27 = vadd.f32 %v4697_v12, %v4696_v11 }
 0x3a3   : > { %v4699_v13 = vrot.slane %v4698_v27, 4 }
 0x3a5   : > { %v4700_v31 = vadd.f32 %v4699_v13, %v4698_v27 }
 0x3a7   : > { %v4701_v49 = vrot.slane %v4700_v31, 2 }
 0x3a9   : > { %v4702_v5 = vadd.f32 %v4701_v49, %v4700_v31 }
 0x3ab   : > { %v4703_v29 = vrot.slane %v4702_v5, 1 }
 0x3ad   : > { %v4704_v41 = vadd.f32 %v4703_v29, %v4702_v5 }
 0x3af   : > { %v4705_v15 = vmul.f32 0.00390625, %v4704_v41 }
 0x3b1   : > { %v4706_v62 = vpack.c.bf16 %v4705_v15, %v4705_v15 }
 0x3b3   : > { %6267 = vmatmul.msk.bf16.vlgmr.msra.gmra.mxu1 %vm14076_vm14, %v4706_v62  ;;  %vm14085_vm14 = vmmov %vm14072_vm1 }
 0x430   : > { %v4728_v34 = vpop.f32.mrf.mxu1 }
 0x431   : > { %v4729_v18 = vadd.f32 %v4728_v34, %v4709_v21 }
 0x433   : > { %v6268_v7 = vmul.f32 -1.442695, %v4729_v18 }
 0x435   : > { %6719 = vpow2.f32 %v6268_v7  ;;  %v14077_v7 = vld [vmem:[#allocation77_spill] sm:$0xff] }
 0x438   : > { %v4730_v55 = vpop.f32.mrf.mxu1 }
 0x43b   : > { %v6720_v23 = vpop.eup %6719 }
 0x43c   : > { %v4735_v16 = vadd.f32 1.0, %v6720_v23  ;;  %v14078_v23 = vld [vmem:[#allocation64_spill] sm:$0xff] }
 0x43e   : > { %6721 = vrcp.f32 %v4735_v16  ;;  %v4747_v40 = vand.u32 2147483648, %v4735_v16  ;;  %v4745_v44 = vand.u32 2147483647, %v4735_v16  ;;  %vm4741_vm12 = vweird.f32 %v4735_v16 }
 0x440   : > { %v4748_v51 = vor.u32 1.1754944e-38, %v4747_v40  ;;  %vm4746_vm11 = vcmp.eq.f32.partialorder %v4745_v44, 8.507059e+37 }
 0x444   : > { %v6722_v20 = vpop.eup %6721 }
 0x445   : > { %v4737_v61 = vmul.f32 %v6722_v20, %v4735_v16  ;;  %vm4742_vm9 = vweird.f32 %v6722_v20 }
 0x446   : > { %vm4743_vm10 = vmor %vm4741_vm12, %vm4742_vm9 }
 0x447   : > { %v4738_v30 = vsub.f32 1.0, %v4737_v61  ;;  %vm14086_vm9 = vmmov %vm14072_vm1 }
 0x448   : > { %vm14087_vm12 = vmmov %vm14072_vm1 }
 0x449   : > { %v4739_v47 = vmul.f32 %v6722_v20, %v4738_v30 }
 0x44b   : > { %v4740_v14 = vadd.f32 %v6722_v20, %v4739_v47  ;;  %v14081_v47 = vld [vmem:[#allocation97_spill] sm:$0xff] }
 0x44d   : > { %v4744_v22 = vsel %vm4743_vm10, %v6722_v20, %v4740_v14  ;;  %vm14088_vm10 = vmmov %vm14072_vm1 }
 0x44e   : > { %v4749_v19 = vsel %vm4746_vm11, %v4748_v51, %v4744_v22  ;;  %vm14089_vm11 = vmmov %vm14072_vm1 }
 0x44f   : > { %v4751_v59 = vmul.f32 %v4749_v19, %v4729_v18 }
 0x451   : > { %v4752_v2 = vpack.c.bf16 %v4751_v59, %v4751_v59 }
 0x453   : > { %6269 = vmatmul.msk.bf16.vlgmr.msrb.gmra.mxu2 %vm4755_vm2, %v4752_v2  ;;  %vm14090_vm2 = vmmov %vm14072_vm1 }
 0x4d6   : > { %v4772_v28 = vpop.f32.mrf.mxu2 }
 0x4d7   : > { %v4773_v6 = vadd.f32 %v4772_v28, %v4754_v17 }
 0x4d9   : > { %v6270_v56 = vmul.f32 -1.442695, %v4773_v6 }
 0x4db   : > { %6723 = vpow2.f32 %v6270_v56 }
 0x4de   : > { %v4774_v11 = vpop.f32.mrf.mxu2 }
 0x4e1   : > { %v6724_v12 = vpop.eup %6723 }
 0x4e2   : > { %v4779_v27 = vadd.f32 1.0, %v6724_v12 }
 0x4e4   : > { %6725 = vrcp.f32 %v4779_v27  ;;  %v4791_v5 = vand.u32 2147483648, %v4779_v27  ;;  %v4789_v41 = vand.u32 2147483647, %v4779_v27  ;;  %vm4785_vm0 = vweird.f32 %v4779_v27 }
 0x4e6   : > { %v4792_v62 = vor.u32 1.1754944e-38, %v4791_v5  ;;  %vm4790_vm8 = vcmp.eq.f32.partialorder %v4789_v41, 8.507059e+37 }
 0x4ea   : > { %v6726_v13 = vpop.eup %6725 }
 0x4eb   : > { %v4781_v31 = vmul.f32 %v6726_v13, %v4779_v27  ;;  %vm4786_vm3 = vweird.f32 %v6726_v13  ;;  %v12470_v27 = vld [vmem:[%s12994_s12] ss:$0 sm:$0xff] }
 0x4ec   : > { %vm4787_vm15 = vmor %vm4785_vm0, %vm4786_vm3 }
 0x4ed   : > { %v4782_v49 = vsub.f32 1.0, %v4781_v31  ;;  %v12476_v31 = vld [vmem:[%s12995_s13] ss:$0 sm:$0xff]  ;;  %vm14093_vm3 = vmmov %vm14072_vm1 }
 0x4ee   : > { %vm14094_vm0 = vmmov %vm14072_vm1 }
 0x4ef   : > { %v4783_v29 = vmul.f32 %v6726_v13, %v4782_v49 }
 0x4f1   : > { %v4784_v15 = vadd.f32 %v6726_v13, %v4783_v29 }
 0x4f3   : > { %v4788_v21 = vsel %vm4787_vm15, %v6726_v13, %v4784_v15  ;;  %vm14097_vm15 = vmmov %vm14094_vm0 }
 0x4f4   : > { %v4793_v34 = vsel %vm4790_vm8, %v4792_v62, %v4788_v21  ;;  %v14091_v21 = vld [vmem:[#allocation3_spill] sm:$0xff]  ;;  %vm14098_vm8 = vmmov %vm14094_vm0 }
 0x4f5   : > { %v12402_v18 = vperm.slane %v4793_v34, 0 }
 0x4f7   : > { %v4796_v55 = vmul.f32 %v12402_v18, %v14077_v7  ;;  %v4797_v16 = vmul.f32 %v12402_v18, %v14078_v23  ;;  %v4802_v20 = vmul.f32 %v12402_v18, %v12034_v43  ;;  %v4803_v61 = vmul.f32 %v12402_v18, %v12065_v1  ;;  %v14092_v7 = vld [vmem:[#allocation4_spill] sm:$0xff] }
 0x4f8   : > { %v4798_v44 = vmul.f32 %v12402_v18, %v14081_v47  ;;  %v4799_v14 = vmul.f32 %v12402_v18, %v11999_v25  ;;  %v4804_v51 = vmul.f32 %v12402_v18, %v12068_v54  ;;  %v4805_v43 = vmul.f32 %v12402_v18, %v12099_v33 }
 0x4f9   : > { %v4828_v30 = vpack.c.bf16 %v4797_v16, %v4796_v55  ;;  %v4831_v40 = vpack.c.bf16 %v4803_v61, %v4802_v20  ;;  %v4800_v19 = vmul.f32 %v12402_v18, %v12004_v58  ;;  %v4801_v59 = vmul.f32 %v12402_v18, %v12027_v48 }
 0x4fa   : > { %v4829_v22 = vpack.c.bf16 %v4799_v14, %v4798_v44  ;;  %v4832_v1 = vpack.c.bf16 %v4805_v43, %v4804_v51  ;;  %v4806_v25 = vmul.f32 %v12402_v18, %v12102_v52  ;;  %v4807_v54 = vmul.f32 %v12402_v18, %v12131_v38  ;;  %v14095_v43 = vld [vmem:[#allocation5_spill] sm:$0xff] }
 0x4fb   : > { %6275 = vmatmul.msk.bf16.vlgmr.msra.gmra.mxu2 %vm14079_vm13, %v4828_v30  ;;  %6278 = vmatmul.msk.bf16.vlgmr.msra.gmra.mxu3 %vm14080_vm4, %v4831_v40  ;;  %v4830_v2 = vpack.c.bf16 %v4801_v59, %v4800_v19  ;;  %v4808_v17 = vmul.f32 %v12402_v18, %v12134_v57  ;;  %v4809_v58 = vmul.f32 %v12402_v18, %v12165_v53  ;;  %vm14101_vm13 = vmmov %vm14094_vm0 }
 0x4fc   : > { %v4833_v33 = vpack.c.bf16 %v4807_v54, %v4806_v25  ;;  %v4810_v48 = vmul.f32 %v12402_v18, %v12172_v42  ;;  %v4811_v52 = vmul.f32 %v12402_v18, %v12199_v3  ;;  %v4812_v28 = vmul.f32 %v12402_v18, %v12202_v24  ;;  %vm14102_vm4 = vmmov %vm14094_vm0 }
 0x4fd   : > { %v4834_v9 = vpack.c.bf16 %v4809_v58, %v4808_v17  ;;  %v4813_v57 = vmul.f32 %v12402_v18, %v12221_v60  ;;  %v4814_v53 = vmul.f32 %v12402_v18, %v12224_v39  ;;  %v4815_v42 = vmul.f32 %v12402_v18, %v12254_v45  ;;  %v6367_v60 = vld [vmem:[%s12996_s14] sm:$0xff] }
 0x4fe   : > { %v4835_v38 = vpack.c.bf16 %v4811_v52, %v4810_v48  ;;  %v4816_v3 = vmul.f32 %v12402_v18, %v12257_v35  ;;  %v4817_v24 = vmul.f32 %v12402_v18, %v12286_v26  ;;  %5172 = vmatpush.bf16.msrb.mxu1 %v6367_v60  ;;  %6371 = vmatpush.bf16.msrb.mxu2 %v6367_v60 }
 0x4ff   : > { %v4836_v6 = vpack.c.bf16 %v4813_v57, %v4812_v28  ;;  %v4837_v56 = vpack.c.bf16 %v4815_v42, %v4814_v53  ;;  %v4818_v39 = vmul.f32 %v12402_v18, %v12293_v4  ;;  %v4819_v45 = vmul.f32 %v12402_v18, %v12326_v63  ;;  %v14100_v57 = vld [vmem:[#allocation8_spill] sm:$0xff] }
 0x500   : > { %v4838_v11 = vpack.c.bf16 %v4817_v24, %v4816_v3  ;;  %v4820_v4 = vmul.f32 %v12402_v18, %v12329_v32  ;;  %v4821_v63 = vmul.f32 %v12402_v18, %v12350_v0  ;;  %v4822_v20 = vmul.f32 %v12402_v18, %v12353_v46 }
 0x501   : > { %v4839_v12 = vpack.c.bf16 %v4819_v45, %v4818_v39  ;;  %v4823_v61 = vmul.f32 %v12402_v18, %v12368_v8  ;;  %v4824_v54 = vmul.f32 %v12402_v18, %v12371_v10  ;;  %v4826_v3 = vmul.f32 %v12402_v18, %v12381_v37  ;;  %v14103_v39 = vld [vmem:[#allocation10_spill] sm:$0xff] }
 0x502   : > { %v4840_v62 = vpack.c.bf16 %v4821_v63, %v4820_v4  ;;  %v4827_v24 = vmul.f32 %v12402_v18, %v12386_v36 }
 0x503   : > { %v4841_v51 = vpack.c.bf16 %v4823_v61, %v4822_v20  ;;  %v14111_v20 = vld [vmem:[#allocation16_spill] sm:$0xff] }
 0x50b   : > { %6276 = vmatmul.msk.bf16.gmra.mxu2 %vm14072_vm1, %v4829_v22  ;;  %6279 = vmatmul.msk.bf16.gmra.mxu3 %vm14082_vm7, %v4832_v1  ;;  %v14096_v1 = vld [vmem:[#allocation6_spill] sm:$0xff]  ;;  %vm14105_vm1 = vmmov %vm14094_vm0 }
 0x50c   : > { %vm14106_vm7 = vmmov %vm14094_vm0 }
 0x51b   : > { %6277 = vmatmul.msk.bf16.gmra.mxu2 %vm14083_vm5, %v4830_v2  ;;  %6280 = vmatmul.msk.bf16.gmra.mxu3 %vm14084_vm6, %v4833_v33  ;;  %v4825_v2 = vmul.f32 %v12402_v18, %v12376_v50  ;;  %vm14109_vm5 = vmmov %vm14094_vm0 }
 0x51c   : > { %vm14112_vm6 = vmmov %vm14094_vm0 }
 0x51d   : > { %v4842_v52 = vpack.c.bf16 %v4825_v2, %v4824_v54 }
 0x52b   : > { %6281 = vmatmul.msk.bf16.gmra.mxu3 %vm14085_vm14, %v4834_v9  ;;  %vm14115_vm14 = vmmov %vm14094_vm0 }
 0x53b   : > { %6282 = vmatmul.msk.bf16.gmra.mxu3 %vm14086_vm9, %v4835_v38  ;;  %v14099_v38 = vld [vmem:[#allocation7_spill] sm:$0xff]  ;;  %vm14118_vm9 = vmmov %vm14094_vm0 }
 0x54b   : > { %6283 = vmatmul.msk.bf16.gmra.mxu3 %vm14087_vm12, %v4836_v6  ;;  %vm14121_vm12 = vmmov %vm14094_vm0 }
 0x55b   : > { %6284 = vmatmul.msk.bf16.gmra.mxu3 %vm14088_vm10, %v4837_v56  ;;  %vm14126_vm10 = vmmov %vm14094_vm0 }
 0x56b   : > { %6285 = vmatmul.msk.bf16.gmra.mxu3 %vm14089_vm11, %v4838_v11  ;;  %vm14127_vm11 = vmmov %vm14094_vm0 }
 0x57b   : > { %6286 = vmatmul.msk.bf16.gmra.mxu3 %vm14090_vm2, %v4839_v12  ;;  %v4843_v12 = vpack.c.bf16 %v4827_v24, %v4826_v3  ;;  %v14119_v24 = vld [vmem:[#allocation47_spill] sm:$0xff] }
 0x57e   : > { %v4909_v35 = vpop.f32.mrf.mxu2  ;;  %v4924_v26 = vpop.f32.mrf.mxu3 }
 0x57f   : > { %v4993_v13 = vmul.f32 %v12470_v27, %v4909_v35  ;;  %v4999_v42 = vmul.f32 %v12470_v27, %v4924_v26  ;;  %v14104_v35 = vld [vmem:[#allocation9_spill] sm:$0xff] }
 0x581   : > { %v5029_v29 = vadd.f32 %v12476_v31, %v4993_v13  ;;  %v5035_v60 = vadd.f32 %v12476_v31, %v4999_v42 }
 0x583   : > { %v5061_v34 = vadd.f32 %v5029_v29, %v14091_v21  ;;  %v5067_v13 = vadd.f32 %v5035_v60, %v14104_v35 }
 0x586   : > { %v4911_v49 = vpop.f32.mrf.mxu2  ;;  %v4926_v5 = vpop.f32.mrf.mxu3 }
 0x587   : > { %v4994_v41 = vmul.f32 %v12470_v27, %v4911_v49  ;;  %v5000_v50 = vmul.f32 %v12470_v27, %v4926_v5  ;;  %v14107_v5 = vld [vmem:[#allocation12_spill] sm:$0xff] }
 0x589   : > { %v5030_v15 = vadd.f32 %v12476_v31, %v4994_v41  ;;  %v5036_v56 = vadd.f32 %v12476_v31, %v5000_v50  ;;  %v14108_v41 = vld [vmem:[#allocation11_spill] sm:$0xff] }
 0x58a   : > { %v12565_v50 = vld [vmem:[%s12997_s15] ss:$0 sm:$0xff] }
 0x58b   : > { %v5062_v55 = vadd.f32 %v5030_v15, %v14092_v7  ;;  %6287 = vmatmul.msk.bf16.gmra.mxu3 %vm14093_vm3, %v4840_v62  ;;  %v5068_v45 = vadd.f32 %v5036_v56, %v14103_v39  ;;  %v12571_v56 = vld [vmem:[%s12998_s16] ss:$0 sm:$0xff]  ;;  %v14120_v39 = vld [vmem:[#allocation46_spill] sm:$0xff] }
 0x58d   : > { %v5093_v23 = vpack.c.bf16 %v5062_v55, %v5061_v34  ;;  %v5096_v4 = vpack.c.bf16 %v5068_v45, %v5067_v13 }
 0x58e   : > { %v4914_v32 = vpop.f32.mrf.mxu2  ;;  %v4929_v16 = vpop.f32.mrf.mxu3 }
 0x58f   : > { %6295 = vmatmul.msk.bf16.vlgmr.msrb.gmra.mxu1 %vm14094_vm0, %v5093_v23  ;;  %v4995_v0 = vmul.f32 %v12470_v27, %v4914_v32  ;;  %v5001_v37 = vmul.f32 %v12470_v27, %v4929_v16  ;;  %v14110_v16 = vld [vmem:[#allocation19_spill] sm:$0xff] }
 0x591   : > { %v5031_v47 = vadd.f32 %v12476_v31, %v4995_v0  ;;  %v5037_v49 = vadd.f32 %v12476_v31, %v5001_v37 }
 0x593   : > { %v5063_v22 = vadd.f32 %v5031_v47, %v14095_v43  ;;  %v5069_v15 = vadd.f32 %v5037_v49, %v14108_v41 }
 0x596   : > { %v4916_v30 = vpop.f32.mrf.mxu2  ;;  %v4931_v40 = vpop.f32.mrf.mxu3 }
 0x597   : > { %v4996_v44 = vmul.f32 %v12470_v27, %v4916_v30  ;;  %v5002_v63 = vmul.f32 %v12470_v27, %v4931_v40 }
 0x599   : > { %v5032_v14 = vadd.f32 %v12476_v31, %v4996_v44  ;;  %v5038_v36 = vadd.f32 %v12476_v31, %v5002_v63 }
 0x59b   : > { %v5064_v19 = vadd.f32 %v5032_v14, %v14096_v1  ;;  %6288 = vmatmul.msk.bf16.gmra.mxu3 %vm14097_vm15, %v4841_v51  ;;  %v5070_v29 = vadd.f32 %v5038_v36, %v14107_v5 }
 0x59d   : > { %v5094_v59 = vpack.c.bf16 %v5064_v19, %v5063_v22  ;;  %v5097_v62 = vpack.c.bf16 %v5070_v29, %v5069_v15  ;;  %v14113_v22 = vld [vmem:[#allocation29_spill] sm:$0xff]  ;;  %v14114_v19 = vld [vmem:[#allocation28_spill] sm:$0xff] }
 0x59e   : > { %v4919_v46 = vpop.f32.mrf.mxu2  ;;  %v4934_v25 = vpop.f32.mrf.mxu3 }
 0x59f   : > { %6296 = vmatmul.msk.bf16.gmra.mxu1 %vm14098_vm8, %v5094_v59  ;;  %v4997_v8 = vmul.f32 %v12470_v27, %v4919_v46  ;;  %v5003_v7 = vmul.f32 %v12470_v27, %v4934_v25  ;;  %vm5998_vm8 = vcmask 519168  }
 0x5a1   : > { %v5033_v58 = vadd.f32 %v12476_v31, %v4997_v8  ;;  %v5039_v32 = vadd.f32 %v12476_v31, %v5003_v7 }
 0x5a3   : > { %v5065_v28 = vadd.f32 %v5033_v58, %v14099_v38  ;;  %v5071_v61 = vadd.f32 %v5039_v32, %v14111_v20  ;;  %v14116_v58 = vld [vmem:[#allocation30_spill] sm:$0xff]  ;;  %v14123_v20 = vld [vmem:[#allocation48_spill] sm:$0xff] }
 0x5a6   : > { %v4921_v33 = vpop.f32.mrf.mxu2  ;;  %v4936_v17 = vpop.f32.mrf.mxu3 }
 0x5a7   : > { %v4998_v9 = vmul.f32 %v12470_v27, %v4921_v33  ;;  %v5004_v34 = vmul.f32 %v12470_v27, %v4936_v17 }
 0x5a9   : > { %v5034_v48 = vadd.f32 %v12476_v31, %v4998_v9  ;;  %v5040_v55 = vadd.f32 %v12476_v31, %v5004_v34 }
 0x5ab   : > { %v5066_v6 = vadd.f32 %v5034_v48, %v14100_v57  ;;  %6289 = vmatmul.msk.bf16.gmra.mxu3 %vm14101_vm13, %v4842_v52  ;;  %v5072_v0 = vadd.f32 %v5040_v55, %v14110_v16  ;;  %v14117_v48 = vld [vmem:[#allocation33_spill] sm:$0xff] }
 0x5ad   : > { %v5095_v53 = vpack.c.bf16 %v5066_v6, %v5065_v28  ;;  %v5098_v30 = vpack.c.bf16 %v5072_v0, %v5071_v61 }
 0x5ae   : > { %v4939_v10 = vpop.f32.mrf.mxu3 }
 0x5af   : > { %6297 = vmatmul.msk.bf16.gmra.mxu1 %vm14102_vm4, %v5095_v53  ;;  %v5005_v44 = vmul.f32 %v12470_v27, %v4939_v10 }
 0x5b1   : > { %v5041_v43 = vadd.f32 %v12476_v31, %v5005_v44 }
 0x5b3   : > { %v5073_v59 = vadd.f32 %v5041_v43, %v14114_v19 }
 0x5b6   : > { %v4941_v11 = vpop.f32.mrf.mxu3 }
 0x5b7   : > { %v5006_v47 = vmul.f32 %v12470_v27, %v4941_v11 }
 0x5b9   : > { %v5042_v14 = vadd.f32 %v12476_v31, %v5006_v47  ;;  %v14125_v47 = vld [vmem:[#allocation57_spill] sm:$0xff] }
 0x5bb   : > { %6290 = vmatmul.msk.bf16.gmra.mxu3 %vm14105_vm1, %v4843_v12  ;;  %v5074_v1 = vadd.f32 %v5042_v14, %v14113_v22 }
 0x5bd   : > { %v5099_v46 = vpack.c.bf16 %v5074_v1, %v5073_v59 }
 0x5be   : > { %v4944_v26 = vpop.f32.mrf.mxu3 }
 0x5bf   : > { %6298 = vmatmul.msk.bf16.gmra.mxu1 %vm14106_vm7, %v5096_v4  ;;  %v5007_v54 = vmul.f32 %v12470_v27, %v4944_v26 }
 0x5c1   : > { %v5043_v17 = vadd.f32 %v12476_v31, %v5007_v54 }
 0x5c3   : > { %v5075_v52 = vadd.f32 %v5043_v17, %v14117_v48 }
 0x5c6   : > { %v4946_v18 = vpop.f32.mrf.mxu3 }
 0x5c7   : > { %v5008_v8 = vmul.f32 %v12470_v27, %v4946_v18 }
 0x5c9   : > { %v5044_v2 = vadd.f32 %v12476_v31, %v5008_v8 }
 0x5cb   : > { %v5076_v9 = vadd.f32 %v5044_v2, %v14116_v58 }
 0x5cd   : > { %v5100_v38 = vpack.c.bf16 %v5076_v9, %v5075_v52 }
 0x5ce   : > { %v4949_v21 = vpop.f32.mrf.mxu3 }
 0x5cf   : > { %6299 = vmatmul.msk.bf16.gmra.mxu1 %vm14109_vm5, %v5097_v62  ;;  %v5009_v6 = vmul.f32 %v12470_v27, %v4949_v21 }
 0x5d1   : > { %v5045_v42 = vadd.f32 %v12476_v31, %v5009_v6 }
 0x5d3   : > { %v5077_v45 = vadd.f32 %v5045_v42, %v14120_v39 }
 0x5d6   : > { %v4951_v23 = vpop.f32.mrf.mxu3 }
 0x5d7   : > { %v5010_v57 = vmul.f32 %v12470_v27, %v4951_v23  ;;  %v14122_v23 = vld [vmem:[#allocation49_spill] sm:$0xff] }
 0x5d9   : > { %v5046_v10 = vadd.f32 %v12476_v31, %v5010_v57 }
 0x5db   : > { %v5078_v11 = vadd.f32 %v5046_v10, %v14119_v24 }
 0x5dd   : > { %v5101_v4 = vpack.c.bf16 %v5078_v11, %v5077_v45 }
 0x5de   : > { %v4954_v40 = vpop.f32.mrf.mxu3 }
 0x5df   : > { %6300 = vmatmul.msk.bf16.gmra.mxu1 %vm14112_vm6, %v5098_v30  ;;  %v5011_v36 = vmul.f32 %v12470_v27, %v4954_v40  ;;  %v14124_v30 = vld [vmem:[#allocation54_spill] sm:$0xff] }
 0x5e1   : > { %v5047_v34 = vadd.f32 %v12476_v31, %v5011_v36 }
 0x5e3   : > { %v5079_v61 = vadd.f32 %v5047_v34, %v14123_v20 }
 0x5e6   : > { %v4956_v51 = vpop.f32.mrf.mxu3 }
 0x5e7   : > { %v5012_v63 = vmul.f32 %v12470_v27, %v4956_v51 }
 0x5e9   : > { %v5048_v29 = vadd.f32 %v12476_v31, %v5012_v63  ;;  %v14128_v63 = vld [vmem:[#allocation23_spill] sm:$0xff] }
 0x5eb   : > { %v5080_v32 = vadd.f32 %v5048_v29, %v14122_v23 }
 0x5ed   : > { %v5102_v19 = vpack.c.bf16 %v5080_v32, %v5079_v61 }
 0x5ee   : > { %v12545_v25 = vpop.f32.mrf.mxu3 }
 0x5ef   : > { %6301 = vmatmul.msk.bf16.gmra.mxu1 %vm14115_vm14, %v5099_v46  ;;  %v5013_v57 = vmul.f32 %v12470_v27, %v12545_v25  ;;  %vm14132_vm14 = vmmov %vm14109_vm5 }
 0x5f6   : > { %v4961_v33 = vpop.f32.mrf.mxu3 }
 0x5f7   : > { %v5014_v2 = vmul.f32 %v12470_v27, %v4961_v33 }
 0x5f9   : > { %v5050_v10 = vadd.f32 %v12476_v31, %v5014_v2 }
 0x5fe   : > { %v12554_v28 = vpop.f32.mrf.mxu3 }
 0x5ff   : > { %6302 = vmatmul.msk.bf16.gmra.mxu1 %vm14118_vm9, %v5100_v38 }
 0x606   : > { %v12559_v53 = vpop.f32.mrf.mxu3 }
 0x607   : > { %v5016_v32 = vmul.f32 %v12470_v27, %v12559_v53 }
 0x609   : > { %v5052_v2 = vadd.f32 %v12476_v31, %v5016_v32 }
 0x60c   : > { %v5174_v3 = vpop.f32.mrf.mxu1 }
 0x60d   : > { %v5258_v60 = vmul.f32 %v12565_v50, %v5174_v3 }
 0x60e   : > { %v4969_v13 = vpop.f32.mrf.mxu3 }
 0x60f   : > { %v12577_v12 = vadd.f32 %v12571_v56, %v5258_v60  ;;  %6303 = vmatmul.msk.bf16.gmra.mxu1 %vm14121_vm12, %v5101_v4  ;;  %v5017_v18 = vmul.f32 %v12470_v27, %v4969_v13 }
 0x611   : > { %v6311_v35 = vmul.f32 -1.442695, %v12577_v12  ;;  %v5053_v7 = vadd.f32 %v12476_v31, %v5017_v18 }
 0x613   : > { %6727 = vpow2.f32 %v6311_v35  ;;  %v5085_v40 = vadd.f32 %v5053_v7, %v14124_v30  ;;  %v14130_v30 = vld [vmem:[#allocation26_spill] sm:$0xff] }
 0x614   : > { %v5176_v26 = vpop.f32.mrf.mxu1 }
 0x615   : > { %v5259_v37 = vmul.f32 %v12565_v50, %v5176_v26  ;;  %v5049_v26 = vadd.f32 %v12476_v31, %v5013_v57 }
 0x616   : > { %v4971_v15 = vpop.f32.mrf.mxu3 }
 0x617   : > { %v12586_v49 = vadd.f32 %v12571_v56, %v5259_v37  ;;  %v5018_v21 = vmul.f32 %v12470_v27, %v4971_v15  ;;  %v5082_v37 = vadd.f32 %v5050_v10, %v14128_v63 }
 0x619   : > { %v6728_v5 = vpop.eup %6727  ;;  %v6312_v41 = vmul.f32 -1.442695, %v12586_v49  ;;  %v5054_v16 = vadd.f32 %v12476_v31, %v5018_v21 }
 0x61a   : > { %v5422_v62 = vadd.f32 1.0, %v6728_v5 }
 0x61b   : > { %6729 = vpow2.f32 %v6312_v41  ;;  %v5086_v44 = vadd.f32 %v5054_v16, %v14125_v47 }
 0x61c   : > { %6731 = vrcp.f32 %v5422_v62  ;;  %v5179_v55 = vpop.f32.mrf.mxu1  ;;  %v5465_v9 = vand.u32 2147483648, %v5422_v62  ;;  %v5463_v52 = vand.u32 2147483647, %v5422_v62  ;;  %vm5459_vm3 = vweird.f32 %v5422_v62 }
 0x61d   : > { %v5260_v0 = vmul.f32 %v12565_v50, %v5179_v55  ;;  %v5105_v43 = vpack.c.bf16 %v5086_v44, %v5085_v40  ;;  %v14129_v55 = vld [vmem:[#allocation50_spill] sm:$0xff] }
 0x61e   : > { %v4974_v1 = vpop.f32.mrf.mxu3  ;;  %v5466_v11 = vor.u32 1.1754944e-38, %v5465_v9  ;;  %vm5464_vm15 = vcmp.eq.f32.partialorder %v5463_v52, 8.507059e+37  ;;  %v5081_v23 = vadd.f32 %v5049_v26, %v14129_v55  ;;  %v14135_v55 = vld [vmem:[#allocation36_spill] sm:$0xff] }
 0x61f   : > { %v12600_v14 = vadd.f32 %v12571_v56, %v5260_v0  ;;  %6304 = vmatmul.msk.bf16.gmra.mxu1 %vm14126_vm10, %v5102_v19  ;;  %6307 = vmatmul.msk.bf16.vlgmr.msrb.gmra.mxu2 %vm14127_vm11, %v5105_v43  ;;  %v5019_v13 = vmul.f32 %v12470_v27, %v4974_v1  ;;  %v14131_v1 = vld [vmem:[#allocation20_spill] sm:$0xff] }
 0x620   : > { %v5103_v53 = vpack.c.bf16 %v5082_v37, %v5081_v23 }
 0x621   : > { %v6730_v51 = vpop.eup %6729  ;;  %v6313_v22 = vmul.f32 -1.442695, %v12600_v14  ;;  %v5055_v21 = vadd.f32 %v12476_v31, %v5019_v13 }
 0x622   : > { %v6732_v59 = vpop.eup %6731  ;;  %v12603_v46 = vadd.f32 1.0, %v6730_v51 }
 0x623   : > { %v5455_v8 = vmul.f32 %v6732_v59, %v5422_v62  ;;  %6733 = vpow2.f32 %v6313_v22  ;;  %vm5460_vm2 = vweird.f32 %v6732_v59  ;;  %v5087_v19 = vadd.f32 %v5055_v21, %v14131_v1 }
 0x624   : > { %6735 = vrcp.f32 %v12603_v46  ;;  %v5181_v54 = vpop.f32.mrf.mxu1  ;;  %vm5461_vm0 = vmor %vm5459_vm3, %vm5460_vm2  ;;  %v5480_v5 = vand.u32 2147483648, %v12603_v46  ;;  %vm5474_vm4 = vweird.f32 %v12603_v46 }
 0x625   : > { %v5456_v17 = vsub.f32 1.0, %v5455_v8  ;;  %v5261_v58 = vmul.f32 %v12565_v50, %v5181_v54 }
 0x626   : > { %v4976_v3 = vpop.f32.mrf.mxu3  ;;  %v5481_v20 = vor.u32 1.1754944e-38, %v5480_v5 }
 0x627   : > { %v5457_v48 = vmul.f32 %v6732_v59, %v5456_v17  ;;  %v12611_v38 = vadd.f32 %v12571_v56, %v5261_v58  ;;  %v5020_v39 = vmul.f32 %v12470_v27, %v4976_v3 }
 0x629   : > { %v6734_v6 = vpop.eup %6733  ;;  %v5458_v42 = vadd.f32 %v6732_v59, %v5457_v48  ;;  %v6314_v33 = vmul.f32 -1.442695, %v12611_v38  ;;  %v5056_v29 = vadd.f32 %v12476_v31, %v5020_v39 }
 0x62a   : > { %v6736_v24 = vpop.eup %6735  ;;  %v12617_v60 = vadd.f32 1.0, %v6734_v6 }
 0x62b   : > { %v5462_v45 = vsel %vm5461_vm0, %v6732_v59, %v5458_v42  ;;  %v5470_v25 = vmul.f32 %v6736_v24, %v12603_v46  ;;  %6737 = vpow2.f32 %v6314_v33  ;;  %vm5475_vm13 = vweird.f32 %v6736_v24 }
 0x62c   : > { %v5467_v35 = vsel %vm5464_vm15, %v5466_v11, %v5462_v45  ;;  %6739 = vrcp.f32 %v12617_v60  ;;  %v5184_v4 = vpop.f32.mrf.mxu1  ;;  %vm5476_vm1 = vmor %vm5474_vm4, %vm5475_vm13  ;;  %v5088_v40 = vadd.f32 %v5056_v29, %v14130_v30  ;;  %v5495_v17 = vand.u32 2147483648, %v12617_v60  ;;  %v14133_v11 = vld [vmem:[#allocation44_spill] sm:$0xff]  ;;  %v14136_v30 = vld [vmem:[#allocation34_spill] sm:$0xff] }
 0x62d   : > { %v5934_v36 = vmul.f32 %v5467_v35, %v12577_v12  ;;  %v5471_v18 = vsub.f32 1.0, %v5470_v25  ;;  %v5262_v41 = vmul.f32 %v12565_v50, %v5184_v4  ;;  %v5478_v12 = vand.u32 2147483647, %v12603_v46  ;;  %vm14137_vm15 = vmmov %vm14109_vm5 }
 0x62e   : > { %v4979_v43 = vpop.f32.mrf.mxu3  ;;  %v5015_v46 = vmul.f32 %v12470_v27, %v12554_v28  ;;  %v5106_v58 = vpack.c.bf16 %v5088_v40, %v5087_v19  ;;  %v5493_v57 = vand.u32 2147483647, %v12617_v60  ;;  %vm5489_vm9 = vweird.f32 %v12617_v60  ;;  %vm14138_vm13 = vmmov %vm14109_vm5 }
 0x62f   : > { %v5966_v15 = vpack.c.bf16 %v5934_v36, %v5934_v36  ;;  %v5472_v62 = vmul.f32 %v6736_v24, %v5471_v18  ;;  %v12639_v34 = vadd.f32 %v12571_v56, %v5262_v41  ;;  %vm5479_vm7 = vcmp.eq.f32.partialorder %v5478_v12, 8.507059e+37  ;;  %6305 = vmatmul.msk.bf16.gmra.mxu1 %vm14109_vm5, %v5103_v53 }
 0x630   : > { %6308 = vmatmul.msk.bf16.gmra.mxu2 %vm14132_vm14, %v5106_v58  ;;  %v5051_v10 = vadd.f32 %v12476_v31, %v5015_v46  ;;  %v5496_v42 = vor.u32 1.1754944e-38, %v5495_v17  ;;  %v5021_v33 = vmul.f32 %v12470_v27, %v4979_v43  ;;  %v5084_v39 = vadd.f32 %v5052_v2, %v14133_v11 }
 0x631   : > { %v6738_v7 = vpop.eup %6737  ;;  %5999 = vst.msk [vmem:[%s12631_s26] sm:$0xf] %vm5998_vm8, %v5966_v15  ;;  %v5473_v16 = vadd.f32 %v6736_v24, %v5472_v62  ;;  %v6315_v47 = vmul.f32 -1.442695, %v12639_v34  ;;  %vm5494_vm10 = vcmp.eq.f32.partialorder %v5493_v57, 8.507059e+37 }
 0x632   : > { %v6740_v0 = vpop.eup %6739  ;;  %v12647_v61 = vadd.f32 1.0, %v6738_v7  ;;  %v5057_v29 = vadd.f32 %v12476_v31, %v5021_v33 }
 0x633   : > { %v5477_v44 = vsel %vm5476_vm1, %v6736_v24, %v5473_v16  ;;  %v5485_v51 = vmul.f32 %v6740_v0, %v12617_v60  ;;  %vm5490_vm6 = vweird.f32 %v6740_v0 }
 0x634   : > { %v5482_v22 = vsel %vm5479_vm7, %v5481_v20, %v5477_v44  ;;  %6741 = vrcp.f32 %v12647_v61  ;;  %v5186_v59 = vpop.f32.mrf.mxu1  ;;  %vm5491_vm12 = vmor %vm5489_vm9, %vm5490_vm6  ;;  %v5508_v36 = vand.u32 2147483647, %v12647_v61  ;;  %v5510_v5 = vand.u32 2147483648, %v12647_v61 }
 0x635   : > { %v5935_v8 = vmul.f32 %v5482_v22, %v12586_v49  ;;  %v5486_v54 = vsub.f32 1.0, %v5485_v51  ;;  %6743 = vpow2.f32 %v6315_v47  ;;  %v5263_v9 = vmul.f32 %v12565_v50, %v5186_v59 }
 0x636   : > { %v4981_v35 = vpop.f32.mrf.mxu3  ;;  %vm5504_vm2 = vweird.f32 %v12647_v61  ;;  %v5511_v20 = vor.u32 1.1754944e-38, %v5510_v5  ;;  %v5089_v40 = vadd.f32 %v5057_v29, %v14136_v30  ;;  %vm5509_vm0 = vcmp.eq.f32.partialorder %v5508_v36, 8.507059e+37  ;;  %v14139_v5 = vld [vmem:[#allocation18_spill] sm:$0xff]  ;;  %v14140_v29 = vld [vmem:[#allocation45_spill] sm:$0xff] }
 0x637   : > { %v5967_v48 = vpack.c.bf16 %v5935_v8, %v5935_v8  ;;  %v5487_v52 = vmul.f32 %v6740_v0, %v5486_v54  ;;  %v12664_v28 = vadd.f32 %v12571_v56, %v5263_v9  ;;  %v5022_v60 = vmul.f32 %v12470_v27, %v4981_v35 }
 0x639   : > { %6000 = vst.msk [vmem:[%s12631_s26 + $0x4] sm:$0xf] %vm5998_vm8, %v5967_v48  ;;  %v5488_v49 = vadd.f32 %v6740_v0, %v5487_v52  ;;  %v6316_v3 = vmul.f32 -1.442695, %v12664_v28  ;;  %v5058_v62 = vadd.f32 %v12476_v31, %v5022_v60 }
 0x63a   : > { %v6742_v6 = vpop.eup %6741 }
 0x63b   : > { %v6744_v24 = vpop.eup %6743  ;;  %v5492_v45 = vsel %vm5491_vm12, %v6740_v0, %v5488_v49  ;;  %v5500_v25 = vmul.f32 %v6742_v6, %v12647_v61  ;;  %6745 = vpow2.f32 %v6316_v3  ;;  %vm5505_vm11 = vweird.f32 %v6742_v6 }
 0x63c   : > { %v5497_v13 = vsel %vm5494_vm10, %v5496_v42, %v5492_v45  ;;  %v12674_v4 = vadd.f32 1.0, %v6744_v24  ;;  %v5189_v26 = vpop.f32.mrf.mxu1  ;;  %v5090_v23 = vadd.f32 %v5058_v62, %v14135_v55  ;;  %vm5506_vm3 = vmor %vm5504_vm2, %vm5505_vm11 }
 0x63d   : > { %v5936_v63 = vmul.f32 %v5497_v13, %v12600_v14  ;;  %v5501_v37 = vsub.f32 1.0, %v5500_v25  ;;  %v5264_v18 = vmul.f32 %v12565_v50, %v5189_v26  ;;  %v14134_v14 = vld [vmem:[#allocation41_spill] sm:$0xff]  ;;  %vm14141_vm11 = vmmov %vm14138_vm13 }
 0x63e   : > { %6747 = vrcp.f32 %v12674_v4  ;;  %v5083_v21 = vadd.f32 %v5051_v10, %v14134_v14  ;;  %v4984_v51 = vpop.f32.mrf.mxu3  ;;  %v5107_v61 = vpack.c.bf16 %v5090_v23, %v5089_v40  ;;  %v5523_v54 = vand.u32 2147483647, %v12674_v4 }
 0x63f   : > { %v5968_v41 = vpack.c.bf16 %v5936_v63, %v5936_v63  ;;  %v5502_v15 = vmul.f32 %v6742_v6, %v5501_v37  ;;  %v12685_v12 = vadd.f32 %v12571_v56, %v5264_v18  ;;  %v5525_v2 = vand.u32 2147483648, %v12674_v4 }
 0x640   : > { %v5104_v0 = vpack.c.bf16 %v5084_v39, %v5083_v21  ;;  %6309 = vmatmul.msk.bf16.gmra.mxu2 %vm14138_vm13, %v5107_v61  ;;  %vm5519_vm1 = vweird.f32 %v12674_v4  ;;  %vm5524_vm5 = vcmp.eq.f32.partialorder %v5523_v54, 8.507059e+37 }
 0x641   : > { %6001 = vst.msk [vmem:[%s12631_s26 + $0x8] sm:$0xf] %vm5998_vm8, %v5968_v41  ;;  %v5503_v7 = vadd.f32 %v6742_v6, %v5502_v15  ;;  %v6317_v32 = vmul.f32 -1.442695, %v12685_v12  ;;  %v6746_v16 = vpop.eup %6745  ;;  %v5526_v10 = vor.u32 1.1754944e-38, %v5525_v2 }
 0x642   : > { %v5427_v44 = vadd.f32 1.0, %v6746_v16  ;;  %6306 = vmatmul.msk.bf16.gmra.mxu1 %vm14137_vm15, %v5104_v0 }
 0x643   : > { %v5507_v47 = vsel %vm5506_vm3, %v6742_v6, %v5503_v7  ;;  %6749 = vpow2.f32 %v6317_v32 }
 0x644   : > { %v6748_v43 = vpop.eup %6747  ;;  %v5512_v53 = vsel %vm5509_vm0, %v5511_v20, %v5507_v47  ;;  %v5191_v22 = vpop.f32.mrf.mxu1  ;;  %6751 = vrcp.f32 %v5427_v44  ;;  %v5538_v13 = vand.u32 2147483647, %v5427_v44  ;;  %vm5534_vm14 = vweird.f32 %v5427_v44 }
 0x645   : > { %v5937_v1 = vmul.f32 %v5512_v53, %v12611_v38  ;;  %v5515_v19 = vmul.f32 %v6748_v43, %v12674_v4  ;;  %v5265_v8 = vmul.f32 %v12565_v50, %v5191_v22  ;;  %vm5520_vm4 = vweird.f32 %v6748_v43 }
 0x646   : > { %v5023_v38 = vmul.f32 %v12470_v27, %v4984_v51  ;;  %v4986_v6 = vpop.f32.mrf.mxu3  ;;  %vm5521_vm7 = vmor %vm5519_vm1, %vm5520_vm4  ;;  %v5540_v4 = vand.u32 2147483648, %v5427_v44  ;;  %vm5539_vm12 = vcmp.eq.f32.partialorder %v5538_v13, 8.507059e+37 }
 0x647   : > { %v5969_v59 = vpack.c.bf16 %v5937_v1, %v5937_v1  ;;  %v5516_v46 = vsub.f32 1.0, %v5515_v19  ;;  %v12706_v9 = vadd.f32 %v12571_v56, %v5265_v8  ;;  %v5024_v45 = vmul.f32 %v12470_v27, %v4986_v6 }
 0x648   : > { %v5059_v24 = vadd.f32 %v12476_v31, %v5023_v38  ;;  %v5541_v62 = vor.u32 1.1754944e-38, %v5540_v4 }
 0x649   : > { %v6750_v17 = vpop.eup %6749  ;;  %6002 = vst.msk [vmem:[%s12631_s26 + $0xc] sm:$0xf] %vm5998_vm8, %v5969_v59  ;;  %v5517_v58 = vmul.f32 %v6748_v43, %v5516_v46  ;;  %v6318_v49 = vmul.f32 -1.442695, %v12706_v9  ;;  %v5060_v26 = vadd.f32 %v12476_v31, %v5024_v45 }
 0x64a   : > { %v12708_v48 = vadd.f32 1.0, %v6750_v17  ;;  %v6752_v52 = vpop.eup %6751  ;;  %v5091_v27 = vadd.f32 %v5059_v24, %v14139_v5 }
 0x64b   : > { %v5518_v57 = vadd.f32 %v6748_v43, %v5517_v58  ;;  %v5530_v42 = vmul.f32 %v6752_v52, %v5427_v44  ;;  %vm5535_vm6 = vweird.f32 %v6752_v52  ;;  %v5092_v41 = vadd.f32 %v5060_v26, %v14140_v29 }
 0x64c   : > { %6753 = vrcp.f32 %v12708_v48  ;;  %v5194_v33 = vpop.f32.mrf.mxu1  ;;  %vm5536_vm9 = vmor %vm5534_vm14, %vm5535_vm6  ;;  %v5555_v20 = vand.u32 2147483648, %v12708_v48  ;;  %v5553_v40 = vand.u32 2147483647, %v12708_v48  ;;  %vm5549_vm2 = vweird.f32 %v12708_v48 }
 0x64d   : > { %v5522_v3 = vsel %vm5521_vm7, %v6748_v43, %v5518_v57  ;;  %6755 = vpow2.f32 %v6318_v49  ;;  %v5531_v39 = vsub.f32 1.0, %v5530_v42  ;;  %v5266_v25 = vmul.f32 %v12565_v50, %v5194_v33 }
 0x64e   : > { %v5527_v11 = vsel %vm5524_vm5, %v5526_v10, %v5522_v3  ;;  %v5108_v7 = vpack.c.bf16 %v5092_v41, %v5091_v27  ;;  %vm5554_vm0 = vcmp.eq.f32.partialorder %v5553_v40, 8.507059e+37 }
 0x64f   : > { %v5938_v35 = vmul.f32 %v5527_v11, %v12639_v34  ;;  %v5532_v60 = vmul.f32 %v6752_v52, %v5531_v39  ;;  %v12719_v63 = vadd.f32 %v12571_v56, %v5266_v25 }
 0x650   : > { %6310 = vmatmul.msk.bf16.gmra.mxu2 %vm14141_vm11, %v5108_v7 }
 0x651   : > { %v5970_v37 = vpack.c.bf16 %v5938_v35, %v5938_v35  ;;  %v5533_v18 = vadd.f32 %v6752_v52, %v5532_v60  ;;  %v6319_v15 = vmul.f32 -1.442695, %v12719_v63 }
 0x652   : > { %v6754_v36 = vpop.eup %6753 }
 0x653   : > { %v6756_v34 = vpop.eup %6755  ;;  %6003 = vst.msk [vmem:[%s12631_s26 + $0x10] sm:$0xf] %vm5998_vm8, %v5970_v37  ;;  %v5545_v31 = vmul.f32 %v6754_v36, %v12708_v48  ;;  %v5537_v14 = vsel %vm5536_vm9, %v6752_v52, %v5533_v18  ;;  %6757 = vpow2.f32 %v6319_v15  ;;  %vm5550_vm10 = vweird.f32 %v6754_v36 }
 0x654   : > { %v5429_v21 = vadd.f32 1.0, %v6756_v34  ;;  %v5196_v55 = vpop.f32.mrf.mxu1  ;;  %v5542_v23 = vsel %vm5539_vm12, %v5541_v62, %v5537_v14  ;;  %vm5551_vm3 = vmor %vm5549_vm2, %vm5550_vm10 }
 0x655   : > { %v5546_v32 = vsub.f32 1.0, %v5545_v31  ;;  %v5267_v16 = vmul.f32 %v12565_v50, %v5196_v55  ;;  %v5939_v0 = vmul.f32 %v5542_v23, %v12664_v28  ;;  %v5556_v28 = vor.u32 1.1754944e-38, %v5555_v20 }
 0x656   : > { %6759 = vrcp.f32 %v5429_v21  ;;  %v5570_v58 = vand.u32 2147483648, %v5429_v21  ;;  %v5568_v57 = vand.u32 2147483647, %v5429_v21  ;;  %vm5564_vm13 = vweird.f32 %v5429_v21 }
 0x657   : > { %v5547_v30 = vmul.f32 %v6754_v36, %v5546_v32  ;;  %v12732_v47 = vadd.f32 %v12571_v56, %v5267_v16  ;;  %v5971_v44 = vpack.c.bf16 %v5939_v0, %v5939_v0 }
 0x658   : > { %v5571_v42 = vor.u32 1.1754944e-38, %v5570_v58  ;;  %vm5569_vm1 = vcmp.eq.f32.partialorder %v5568_v57, 8.507059e+37 }
 0x659   : > { %v5548_v51 = vadd.f32 %v6754_v36, %v5547_v30  ;;  %v6320_v43 = vmul.f32 -1.442695, %v12732_v47  ;;  %v6758_v53 = vpop.eup %6757  ;;  %6004 = vst.msk [vmem:[%s12631_s26 + $0x14] sm:$0xf] %vm5998_vm8, %v5971_v44 }
 0x65a   : > { %v5430_v22 = vadd.f32 1.0, %v6758_v53 }
 0x65b   : > { %v5552_v61 = vsel %vm5551_vm3, %v6754_v36, %v5548_v51  ;;  %6761 = vpow2.f32 %v6320_v43 }
 0x65c   : > { %v6760_v1 = vpop.eup %6759  ;;  %v5557_v19 = vsel %vm5554_vm0, %v5556_v28, %v5552_v61  ;;  %v5199_v59 = vpop.f32.mrf.mxu1  ;;  %6763 = vrcp.f32 %v5430_v22  ;;  %v5585_v35 = vand.u32 2147483648, %v5430_v22  ;;  %v5583_v4 = vand.u32 2147483647, %v5430_v22 }
 0x65d   : > { %v5940_v46 = vmul.f32 %v5557_v19, %v12685_v12  ;;  %v5560_v8 = vmul.f32 %v6760_v1, %v5429_v21  ;;  %v5268_v54 = vmul.f32 %v12565_v50, %v5199_v59  ;;  %vm5565_vm15 = vweird.f32 %v6760_v1 }
 0x65e   : > { %vm5566_vm4 = vmor %vm5564_vm13, %vm5565_vm15  ;;  %vm5579_vm5 = vweird.f32 %v5430_v22  ;;  %v5586_v27 = vor.u32 1.1754944e-38, %v5585_v35  ;;  %vm5584_vm14 = vcmp.eq.f32.partialorder %v5583_v4, 8.507059e+37 }
 0x65f   : > { %v5972_v2 = vpack.c.bf16 %v5940_v46, %v5940_v46  ;;  %v5561_v17 = vsub.f32 1.0, %v5560_v8  ;;  %v12742_v38 = vadd.f32 %v12571_v56, %v5268_v54 }
 0x661   : > { %v6762_v48 = vpop.eup %6761  ;;  %6005 = vst.msk [vmem:[%s12631_s26 + $0x18] sm:$0xf] %vm5998_vm8, %v5972_v2  ;;  %v5562_v52 = vmul.f32 %v6760_v1, %v5561_v17  ;;  %v6321_v6 = vmul.f32 -1.442695, %v12742_v38 }
 0x662   : > { %v5431_v49 = vadd.f32 1.0, %v6762_v48  ;;  %v6764_v12 = vpop.eup %6763 }
 0x663   : > { %v5563_v10 = vadd.f32 %v6760_v1, %v5562_v52  ;;  %v5575_v33 = vmul.f32 %v6764_v12, %v5430_v22  ;;  %vm5580_vm7 = vweird.f32 %v6764_v12 }
 0x664   : > { %6765 = vrcp.f32 %v5431_v49  ;;  %v5201_v3 = vpop.f32.mrf.mxu1  ;;  %vm5581_vm6 = vmor %vm5579_vm5, %vm5580_vm7  ;;  %v5600_v21 = vand.u32 2147483648, %v5431_v49  ;;  %v5598_v55 = vand.u32 2147483647, %v5431_v49  ;;  %vm5594_vm12 = vweird.f32 %v5431_v49 }
 0x665   : > { %v5567_v24 = vsel %vm5566_vm4, %v6760_v1, %v5563_v10  ;;  %6767 = vpow2.f32 %v6321_v6  ;;  %v5576_v39 = vsub.f32 1.0, %v5575_v33  ;;  %v5269_v45 = vmul.f32 %v12565_v50, %v5201_v3 }
 0x666   : > { %v5572_v11 = vsel %vm5569_vm1, %v5571_v42, %v5567_v24  ;;  %v5601_v30 = vor.u32 1.1754944e-38, %v5600_v21  ;;  %vm5599_vm11 = vcmp.eq.f32.partialorder %v5598_v55, 8.507059e+37 }
 0x667   : > { %v5941_v25 = vmul.f32 %v5572_v11, %v12706_v9  ;;  %v5577_v13 = vmul.f32 %v6764_v12, %v5576_v39  ;;  %v12750_v60 = vadd.f32 %v12571_v56, %v5269_v45 }
 0x669   : > { %v5973_v26 = vpack.c.bf16 %v5941_v25, %v5941_v25  ;;  %v5578_v36 = vadd.f32 %v6764_v12, %v5577_v13  ;;  %v6322_v18 = vmul.f32 -1.442695, %v12750_v60 }
 0x66a   : > { %v6766_v37 = vpop.eup %6765 }
 0x66b   : > { %v6768_v5 = vpop.eup %6767  ;;  %6006 = vst.msk [vmem:[%s12631_s26 + $0x1c] sm:$0xf] %vm5998_vm8, %v5973_v26  ;;  %v5590_v29 = vmul.f32 %v6766_v37, %v5431_v49  ;;  %v5582_v9 = vsel %vm5581_vm6, %v6764_v12, %v5578_v36  ;;  %6769 = vpow2.f32 %v6322_v18  ;;  %vm5595_vm9 = vweird.f32 %v6766_v37 }
 0x66c   : > { %v5432_v41 = vadd.f32 1.0, %v6768_v5  ;;  %v5204_v15 = vpop.f32.mrf.mxu1  ;;  %v5587_v34 = vsel %vm5584_vm14, %v5586_v27, %v5582_v9  ;;  %vm5596_vm10 = vmor %vm5594_vm12, %vm5595_vm9 }
 0x66d   : > { %v5591_v62 = vsub.f32 1.0, %v5590_v29  ;;  %v5270_v31 = vmul.f32 %v12565_v50, %v5204_v15  ;;  %v5942_v14 = vmul.f32 %v5587_v34, %v12719_v63 }
 0x66e   : > { %6771 = vrcp.f32 %v5432_v41  ;;  %v5615_v19 = vand.u32 2147483648, %v5432_v41  ;;  %v5613_v54 = vand.u32 2147483647, %v5432_v41  ;;  %vm5609_vm3 = vweird.f32 %v5432_v41 }
 0x66f   : > { %v5592_v7 = vmul.f32 %v6766_v37, %v5591_v62  ;;  %v12758_v23 = vadd.f32 %v12571_v56, %v5270_v31  ;;  %v5974_v32 = vpack.c.bf16 %v5942_v14, %v5942_v14 }
 0x670   : > { %v5616_v48 = vor.u32 1.1754944e-38, %v5615_v19  ;;  %vm5614_vm15 = vcmp.eq.f32.partialorder %v5613_v54, 8.507059e+37 }
 0x671   : > { %v5593_v16 = vadd.f32 %v6766_v37, %v5592_v7  ;;  %v6323_v0 = vmul.f32 -1.442695, %v12758_v23  ;;  %v6770_v20 = vpop.eup %6769  ;;  %6007 = vst.msk [vmem:[%s12631_s26 + $0x20] sm:$0xf] %vm5998_vm8, %v5974_v32 }
 0x672   : > { %v5433_v63 = vadd.f32 1.0, %v6770_v20 }
 0x673   : > { %v5597_v40 = vsel %vm5596_vm10, %v6766_v37, %v5593_v16  ;;  %6773 = vpow2.f32 %v6323_v0 }
 0x674   : > { %v6772_v44 = vpop.eup %6771  ;;  %v5602_v51 = vsel %vm5599_vm11, %v5601_v30, %v5597_v40  ;;  %v5206_v43 = vpop.f32.mrf.mxu1  ;;  %6775 = vrcp.f32 %v5433_v63  ;;  %v5630_v33 = vand.u32 2147483648, %v5433_v63  ;;  %v5628_v24 = vand.u32 2147483647, %v5433_v63 }
 0x675   : > { %v5943_v53 = vmul.f32 %v5602_v51, %v12732_v47  ;;  %v5605_v28 = vmul.f32 %v6772_v44, %v5432_v41  ;;  %v5271_v61 = vmul.f32 %v12565_v50, %v5206_v43  ;;  %vm5610_vm2 = vweird.f32 %v6772_v44 }
 0x676   : > { %vm5611_vm0 = vmor %vm5609_vm3, %vm5610_vm2  ;;  %vm5624_vm4 = vweird.f32 %v5433_v63  ;;  %v5631_v4 = vor.u32 1.1754944e-38, %v5630_v33  ;;  %vm5629_vm7 = vcmp.eq.f32.partialorder %v5628_v24, 8.507059e+37 }
 0x677   : > { %v5975_v22 = vpack.c.bf16 %v5943_v53, %v5943_v53  ;;  %v5606_v1 = vsub.f32 1.0, %v5605_v28  ;;  %v12766_v59 = vadd.f32 %v12571_v56, %v5271_v61 }
 0x679   : > { %v6774_v46 = vpop.eup %6773  ;;  %6008 = vst.msk [vmem:[%s12631_s26 + $0x24] sm:$0xf] %vm5998_vm8, %v5975_v22  ;;  %v5607_v8 = vmul.f32 %v6772_v44, %v5606_v1  ;;  %v6324_v17 = vmul.f32 -1.442695, %v12766_v59 }
 0x67a   : > { %v5434_v2 = vadd.f32 1.0, %v6774_v46  ;;  %v6776_v47 = vpop.eup %6775 }
 0x67b   : > { %v5608_v58 = vadd.f32 %v6772_v44, %v5607_v8  ;;  %v5620_v52 = vmul.f32 %v6776_v47, %v5433_v63  ;;  %vm5625_vm13 = vweird.f32 %v6776_v47 }
 0x67c   : > { %6777 = vrcp.f32 %v5434_v2  ;;  %v5209_v57 = vpop.f32.mrf.mxu1  ;;  %vm5626_vm1 = vmor %vm5624_vm4, %vm5625_vm13  ;;  %v5645_v9 = vand.u32 2147483648, %v5434_v2  ;;  %v5643_v15 = vand.u32 2147483647, %v5434_v2  ;;  %vm5639_vm6 = vweird.f32 %v5434_v2 }
 0x67d   : > { %v5612_v49 = vsel %vm5611_vm0, %v6772_v44, %v5608_v58  ;;  %6779 = vpow2.f32 %v6324_v17  ;;  %v5621_v12 = vsub.f32 1.0, %v5620_v52  ;;  %v5272_v10 = vmul.f32 %v12565_v50, %v5209_v57 }
 0x67e   : > { %v5617_v6 = vsel %vm5614_vm15, %v5616_v48, %v5612_v49  ;;  %v5646_v7 = vor.u32 1.1754944e-38, %v5645_v9  ;;  %vm5644_vm9 = vcmp.eq.f32.partialorder %v5643_v15, 8.507059e+37 }
 0x67f   : > { %v5944_v42 = vmul.f32 %v5617_v6, %v12742_v38  ;;  %v5622_v3 = vmul.f32 %v6776_v47, %v5621_v12  ;;  %v12774_v11 = vadd.f32 %v12571_v56, %v5272_v10 }
 0x681   : > { %v5976_v39 = vpack.c.bf16 %v5944_v42, %v5944_v42  ;;  %v5623_v25 = vadd.f32 %v6776_v47, %v5622_v3  ;;  %v6325_v35 = vmul.f32 -1.442695, %v12774_v11 }
 0x682   : > { %v6778_v45 = vpop.eup %6777 }
 0x683   : > { %v6780_v13 = vpop.eup %6779  ;;  %6009 = vst.msk [vmem:[%s12631_s26 + $0x28] sm:$0xf] %vm5998_vm8, %v5976_v39  ;;  %v5635_v26 = vmul.f32 %v6778_v45, %v5434_v2  ;;  %v5627_v38 = vsel %vm5626_vm1, %v6776_v47, %v5623_v25  ;;  %6781 = vpow2.f32 %v6325_v35  ;;  %vm5640_vm5 = vweird.f32 %v6778_v45 }
 0x684   : > { %v5435_v37 = vadd.f32 1.0, %v6780_v13  ;;  %v5211_v36 = vpop.f32.mrf.mxu1  ;;  %v5632_v18 = vsel %vm5629_vm7, %v5631_v4, %v5627_v38  ;;  %vm5641_vm14 = vmor %vm5639_vm6, %vm5640_vm5 }
 0x685   : > { %v5636_v5 = vsub.f32 1.0, %v5635_v26  ;;  %v5273_v27 = vmul.f32 %v12565_v50, %v5211_v36  ;;  %v5945_v29 = vmul.f32 %v5632_v18, %v12750_v60 }
 0x686   : > { %6783 = vrcp.f32 %v5435_v37  ;;  %v5660_v63 = vand.u32 2147483648, %v5435_v37  ;;  %v5658_v53 = vand.u32 2147483647, %v5435_v37  ;;  %vm5654_vm10 = vweird.f32 %v5435_v37 }
 0x687   : > { %v5637_v41 = vmul.f32 %v6778_v45, %v5636_v5  ;;  %v12782_v34 = vadd.f32 %v12571_v56, %v5273_v27  ;;  %v5977_v62 = vpack.c.bf16 %v5945_v29, %v5945_v29 }
 0x688   : > { %v5661_v19 = vor.u32 1.1754944e-38, %v5660_v63  ;;  %vm5659_vm2 = vcmp.eq.f32.partialorder %v5658_v53, 8.507059e+37 }
 0x689   : > { %v5638_v31 = vadd.f32 %v6778_v45, %v5637_v41  ;;  %v6326_v14 = vmul.f32 -1.442695, %v12782_v34  ;;  %v6782_v21 = vpop.eup %6781  ;;  %6010 = vst.msk [vmem:[%s12631_s26 + $0x2c] sm:$0xf] %vm5998_vm8, %v5977_v62 }
 0x68a   : > { %v5436_v55 = vadd.f32 1.0, %v6782_v21 }
 0x68b   : > { %v5642_v60 = vsel %vm5641_vm14, %v6778_v45, %v5638_v31  ;;  %6785 = vpow2.f32 %v6326_v14 }
 0x68c   : > { %v6784_v32 = vpop.eup %6783  ;;  %v5647_v16 = vsel %vm5644_vm9, %v5646_v7, %v5642_v60  ;;  %6787 = vrcp.f32 %v5436_v55  ;;  %v5214_v44 = vpop.f32.mrf.mxu1  ;;  %v5675_v58 = vand.u32 2147483648, %v5436_v55  ;;  %v5673_v52 = vand.u32 2147483647, %v5436_v55 }
 0x68d   : > { %v5946_v0 = vmul.f32 %v5647_v16, %v12758_v23  ;;  %v5650_v20 = vmul.f32 %v6784_v32, %v5435_v37  ;;  %vm5655_vm12 = vweird.f32 %v6784_v32  ;;  %v5274_v28 = vmul.f32 %v12565_v50, %v5214_v44 }
 0x68e   : > { %vm5656_vm11 = vmor %vm5654_vm10, %vm5655_vm12  ;;  %vm5669_vm0 = vweird.f32 %v5436_v55  ;;  %v5676_v42 = vor.u32 1.1754944e-38, %v5675_v58  ;;  %vm5674_vm13 = vcmp.eq.f32.partialorder %v5673_v52, 8.507059e+37 }
 0x68f   : > { %v5978_v30 = vpack.c.bf16 %v5946_v0, %v5946_v0  ;;  %v5651_v40 = vsub.f32 1.0, %v5650_v20  ;;  %v12792_v23 = vadd.f32 %v12571_v56, %v5274_v28 }
 0x691   : > { %v6786_v51 = vpop.eup %6785  ;;  %6011 = vst.msk [vmem:[%s12631_s26 + $0x30] sm:$0xf] %vm5998_vm8, %v5978_v30  ;;  %v5652_v43 = vmul.f32 %v6784_v32, %v5651_v40  ;;  %v6327_v54 = vmul.f32 -1.442695, %v12792_v23 }
 0x692   : > { %v5437_v61 = vadd.f32 1.0, %v6786_v51  ;;  %v6788_v22 = vpop.eup %6787 }
 0x693   : > { %v5653_v1 = vadd.f32 %v6784_v32, %v5652_v43  ;;  %v5665_v46 = vmul.f32 %v6788_v22, %v5436_v55  ;;  %vm5670_vm3 = vweird.f32 %v6788_v22 }
 0x694   : > { %6789 = vrcp.f32 %v5437_v61  ;;  %v5216_v57 = vpop.f32.mrf.mxu1  ;;  %vm5671_vm15 = vmor %vm5669_vm0, %vm5670_vm3  ;;  %v5690_v13 = vand.u32 2147483648, %v5437_v61  ;;  %v5688_v38 = vand.u32 2147483647, %v5437_v61  ;;  %vm5684_vm1 = vweird.f32 %v5437_v61 }
 0x695   : > { %v5657_v8 = vsel %vm5656_vm11, %v6784_v32, %v5653_v1  ;;  %v5666_v17 = vsub.f32 1.0, %v5665_v46  ;;  %6791 = vpow2.f32 %v6327_v54  ;;  %v5275_v6 = vmul.f32 %v12565_v50, %v5216_v57  ;;  %v12829_v46 = vld [vmem:[%s12998_s16] ss:$0 sm:$0xff] }
 0x696   : > { %v5662_v2 = vsel %vm5659_vm2, %v5661_v19, %v5657_v8  ;;  %v5691_v27 = vor.u32 1.1754944e-38, %v5690_v13  ;;  %vm5689_vm5 = vcmp.eq.f32.partialorder %v5688_v38, 8.507059e+37 }
 0x697   : > { %v5947_v47 = vmul.f32 %v5662_v2, %v12766_v59  ;;  %v5667_v48 = vmul.f32 %v6788_v22, %v5666_v17  ;;  %v12800_v3 = vadd.f32 %v12571_v56, %v5275_v6 }
 0x699   : > { %v5979_v49 = vpack.c.bf16 %v5947_v47, %v5947_v47  ;;  %v5668_v10 = vadd.f32 %v6788_v22, %v5667_v48  ;;  %v6328_v25 = vmul.f32 -1.442695, %v12800_v3 }
 0x69a   : > { %v6790_v12 = vpop.eup %6789 }
 0x69b   : > { %6012 = vst.msk [vmem:[%s12631_s26 + $0x34] sm:$0xf] %vm5998_vm8, %v5979_v49  ;;  %v5680_v33 = vmul.f32 %v6790_v12, %v5437_v61  ;;  %v5672_v59 = vsel %vm5671_vm15, %v6788_v22, %v5668_v10  ;;  %v6792_v24 = vpop.eup %6791  ;;  %vm5685_vm4 = vweird.f32 %v6790_v12  ;;  %6793 = vpow2.f32 %v6328_v25 }
 0x69c   : > { %v5677_v39 = vsel %vm5674_vm13, %v5676_v42, %v5672_v59  ;;  %v5438_v4 = vadd.f32 1.0, %v6792_v24  ;;  %v5219_v36 = vpop.f32.mrf.mxu1  ;;  %vm5686_vm7 = vmor %vm5684_vm1, %vm5685_vm4 }
 0x69d   : > { %v5681_v45 = vsub.f32 1.0, %v5680_v33  ;;  %v5948_v35 = vmul.f32 %v5677_v39, %v12774_v11  ;;  %v5276_v5 = vmul.f32 %v12565_v50, %v5219_v36 }
 0x69e   : > { %6795 = vrcp.f32 %v5438_v4  ;;  %v5705_v16 = vand.u32 2147483648, %v5438_v4  ;;  %v5703_v20 = vand.u32 2147483647, %v5438_v4  ;;  %vm5699_vm14 = vweird.f32 %v5438_v4 }
 0x69f   : > { %v5682_v26 = vmul.f32 %v6790_v12, %v5681_v45  ;;  %v5980_v37 = vpack.c.bf16 %v5948_v35, %v5948_v35  ;;  %v12808_v11 = vadd.f32 %v12571_v56, %v5276_v5 }
 0x6a0   : > { %v5706_v43 = vor.u32 1.1754944e-38, %v5705_v16  ;;  %vm5704_vm12 = vcmp.eq.f32.partialorder %v5703_v20, 8.507059e+37 }
 0x6a1   : > { %v5683_v18 = vadd.f32 %v6790_v12, %v5682_v26  ;;  %6013 = vst.msk [vmem:[%s12631_s26 + $0x38] sm:$0xf] %vm5998_vm8, %v5980_v37  ;;  %v6794_v41 = vpop.eup %6793  ;;  %v6329_v62 = vmul.f32 -1.442695, %v12808_v11 }
 0x6a2   : > { %v5439_v14 = vadd.f32 1.0, %v6794_v41  ;;  %v5234_v21 = vpop.f32.mrf.mxu2 }
 0x6a3   : > { %v5687_v29 = vsel %vm5686_vm7, %v6790_v12, %v5683_v18  ;;  %6797 = vpow2.f32 %v6329_v62  ;;  %v5282_v32 = vmul.f32 %v12565_v50, %v5234_v21  ;;  %v12822_v50 = vld [vmem:[%s12997_s15] ss:$0 sm:$0xff] }
 0x6a4   : > { %v5692_v9 = vsel %vm5689_vm5, %v5691_v27, %v5687_v29  ;;  %v6796_v31 = vpop.eup %6795  ;;  %6799 = vrcp.f32 %v5439_v14  ;;  %v5221_v44 = vpop.f32.mrf.mxu1  ;;  %v5718_v54 = vand.u32 2147483647, %v5439_v14  ;;  %v5720_v2 = vand.u32 2147483648, %v5439_v14 }
 0x6a5   : > { %v5949_v15 = vmul.f32 %v5692_v9, %v12782_v34  ;;  %v5695_v60 = vmul.f32 %v6796_v31, %v5438_v4  ;;  %vm5700_vm6 = vweird.f32 %v6796_v31  ;;  %v12816_v34 = vadd.f32 %v12571_v56, %v5282_v32 }
 0x6a6   : > { %vm5701_vm9 = vmor %vm5699_vm14, %vm5700_vm6  ;;  %v5277_v28 = vmul.f32 %v12822_v50, %v5221_v44  ;;  %vm5714_vm11 = vweird.f32 %v5439_v14  ;;  %v5721_v6 = vor.u32 1.1754944e-38, %v5720_v2  ;;  %vm5719_vm3 = vcmp.eq.f32.partialorder %v5718_v54, 8.507059e+37 }
 0x6a7   : > { %v5981_v7 = vpack.c.bf16 %v5949_v15, %v5949_v15  ;;  %v5696_v55 = vsub.f32 1.0, %v5695_v60  ;;  %v6335_v63 = vmul.f32 -1.442695, %v12816_v34 }
 0x6a8   : > { %v12832_v8 = vadd.f32 %v12829_v46, %v5277_v28 }
 0x6a9   : > { %6014 = vst.msk [vmem:[%s12631_s26 + $0x3c] sm:$0xf] %vm5998_vm8, %v5981_v7  ;;  %v5697_v0 = vmul.f32 %v6796_v31, %v5696_v55  ;;  %v6798_v30 = vpop.eup %6797  ;;  %6801 = vpow2.f32 %v6335_v63 }
 0x6aa   : > { %v6800_v51 = vpop.eup %6799  ;;  %v5440_v53 = vadd.f32 1.0, %v6798_v30  ;;  %v6330_v58 = vmul.f32 -1.442695, %v12832_v8  ;;  %v5236_v48 = vpop.f32.mrf.mxu2 }
 0x6ab   : > { %v5698_v40 = vadd.f32 %v6796_v31, %v5697_v0  ;;  %v5710_v56 = vmul.f32 %v6800_v51, %v5439_v14  ;;  %vm5715_vm10 = vweird.f32 %v6800_v51  ;;  %v5283_v52 = vmul.f32 %v12822_v50, %v5236_v48 }
 0x6ac   : > { %6803 = vrcp.f32 %v5440_v53  ;;  %vm5716_vm2 = vmor %vm5714_vm11, %vm5715_vm10  ;;  %v5224_v25 = vpop.f32.mrf.mxu1  ;;  %v5733_v35 = vand.u32 2147483647, %v5440_v53  ;;  %v5735_v13 = vand.u32 2147483648, %v5440_v53  ;;  %vm5729_vm15 = vweird.f32 %v5440_v53 }
 0x6ad   : > { %v5702_v61 = vsel %vm5701_vm9, %v6796_v31, %v5698_v40  ;;  %v5711_v19 = vsub.f32 1.0, %v5710_v56  ;;  %6805 = vpow2.f32 %v6330_v58  ;;  %v12839_v10 = vadd.f32 %v12829_v46, %v5283_v52 }
 0x6ae   : > { %v5707_v22 = vsel %vm5704_vm12, %v5706_v43, %v5702_v61  ;;  %v5278_v4 = vmul.f32 %v12822_v50, %v5224_v25  ;;  %v5736_v27 = vor.u32 1.1754944e-38, %v5735_v13  ;;  %vm5734_vm4 = vcmp.eq.f32.partialorder %v5733_v35, 8.507059e+37 }
 0x6af   : > { %v5950_v1 = vmul.f32 %v5707_v22, %v12792_v23  ;;  %v5712_v47 = vmul.f32 %v6800_v51, %v5711_v19  ;;  %v6802_v23 = vpop.eup %6801  ;;  %v6336_v45 = vmul.f32 -1.442695, %v12839_v10 }
 0x6b0   : > { %v5446_v12 = vadd.f32 1.0, %v6802_v23  ;;  %v12847_v18 = vadd.f32 %v12829_v46, %v5278_v4 }
 0x6b1   : > { %v5982_v17 = vpack.c.bf16 %v5950_v1, %v5950_v1  ;;  %v5713_v57 = vadd.f32 %v6800_v51, %v5712_v47 }
 0x6b2   : > { %v6804_v49 = vpop.eup %6803  ;;  %6807 = vrcp.f32 %v5446_v12  ;;  %v6331_v41 = vmul.f32 -1.442695, %v12847_v18  ;;  %v5825_v60 = vand.u32 2147483648, %v5446_v12  ;;  %v5823_v20 = vand.u32 2147483647, %v5446_v12 }
 0x6b3   : > { %6015 = vst.msk [vmem:[%s12631_s26 + $0x40] sm:$0xf] %vm5998_vm8, %v5982_v17  ;;  %v5717_v42 = vsel %vm5716_vm2, %v6800_v51, %v5713_v57  ;;  %v5725_v33 = vmul.f32 %v6804_v49, %v5440_v53  ;;  %v6806_v26 = vpop.eup %6805  ;;  %vm5730_vm0 = vweird.f32 %v6804_v49  ;;  %6809 = vpow2.f32 %v6336_v45  ;;  %v5239_v15 = vpop.f32.mrf.mxu2 }
 0x6b4   : > { %v5722_v59 = vsel %vm5719_vm3, %v5721_v6, %v5717_v42  ;;  %v12844_v36 = vadd.f32 1.0, %v6806_v26  ;;  %vm5731_vm13 = vmor %vm5729_vm15, %vm5730_vm0  ;;  %v5284_v31 = vmul.f32 %v12822_v50, %v5239_v15  ;;  %vm5819_vm7 = vweird.f32 %v5446_v12  ;;  %v5226_v44 = vpop.f32.mrf.mxu1 }
 0x6b5   : > { %v5951_v24 = vmul.f32 %v5722_v59, %v12800_v3  ;;  %v5726_v39 = vsub.f32 1.0, %v5725_v33  ;;  %v5826_v51 = vor.u32 1.1754944e-38, %v5825_v60  ;;  %v5279_v43 = vmul.f32 %v12822_v50, %v5226_v44 }
 0x6b6   : > { %6811 = vrcp.f32 %v12844_v36  ;;  %v12858_v32 = vadd.f32 %v12829_v46, %v5284_v31  ;;  %vm5824_vm6 = vcmp.eq.f32.partialorder %v5823_v20, 8.507059e+37  ;;  %v5750_v22 = vand.u32 2147483648, %v12844_v36 }
 0x6b7   : > { %v5983_v38 = vpack.c.bf16 %v5951_v24, %v5951_v24  ;;  %v5727_v37 = vmul.f32 %v6804_v49, %v5726_v39  ;;  %6813 = vpow2.f32 %v6331_v41  ;;  %v12870_v19 = vadd.f32 %v12829_v46, %v5279_v43 }
 0x6b8   : > { %v6808_v5 = vpop.eup %6807  ;;  %v6337_v63 = vmul.f32 -1.442695, %v12858_v32  ;;  %v5748_v17 = vand.u32 2147483647, %v12844_v36  ;;  %vm5744_vm9 = vweird.f32 %v12844_v36  ;;  %v5751_v23 = vor.u32 1.1754944e-38, %v5750_v22 }
 0x6b9   : > { %6016 = vst.msk [vmem:[%s12631_s26 + $0x44] sm:$0xf] %vm5998_vm8, %v5983_v38  ;;  %v5728_v3 = vadd.f32 %v6804_v49, %v5727_v37  ;;  %v5815_v9 = vmul.f32 %v6808_v5, %v5446_v12  ;;  %v6810_v14 = vpop.eup %6809  ;;  %vm5820_vm1 = vweird.f32 %v6808_v5  ;;  %v6332_v57 = vmul.f32 -1.442695, %v12870_v19 }
 0x6ba   : > { %v12855_v55 = vadd.f32 1.0, %v6810_v14  ;;  %vm5821_vm5 = vmor %vm5819_vm7, %vm5820_vm1  ;;  %vm5749_vm10 = vcmp.eq.f32.partialorder %v5748_v17, 8.507059e+37 }
 0x6bb   : > { %v5732_v29 = vsel %vm5731_vm13, %v6804_v49, %v5728_v3  ;;  %v5816_v7 = vsub.f32 1.0, %v5815_v9  ;;  %v5241_v42 = vpop.f32.mrf.mxu2 }
 0x6bc   : > { %v5737_v62 = vsel %vm5734_vm4, %v5736_v27, %v5732_v29  ;;  %v6812_v30 = vpop.eup %6811  ;;  %6815 = vrcp.f32 %v12855_v55  ;;  %v5840_v12 = vand.u32 2147483648, %v12855_v55  ;;  %v5285_v24 = vmul.f32 %v12822_v50, %v5241_v42 }
 0x6bd   : > { %v5952_v21 = vmul.f32 %v5737_v62, %v12808_v11  ;;  %v5817_v0 = vmul.f32 %v6808_v5, %v5816_v7  ;;  %v5740_v11 = vmul.f32 %v6812_v30, %v12844_v36  ;;  %v6814_v53 = vpop.eup %6813  ;;  %6817 = vpow2.f32 %v6337_v63 }
 0x6be   : > { %v12867_v1 = vadd.f32 1.0, %v6814_v53  ;;  %vm5745_vm14 = vweird.f32 %v6812_v30  ;;  %v5838_v25 = vand.u32 2147483647, %v12855_v55  ;;  %vm5834_vm2 = vweird.f32 %v12855_v55 }
 0x6bf   : > { %v5984_v16 = vpack.c.bf16 %v5952_v21, %v5952_v21  ;;  %v5818_v40 = vadd.f32 %v6808_v5, %v5817_v0  ;;  %v5741_v61 = vsub.f32 1.0, %v5740_v11  ;;  %vm5746_vm12 = vmor %vm5744_vm9, %vm5745_vm14  ;;  %v5841_v38 = vor.u32 1.1754944e-38, %v5840_v12  ;;  %v5229_v41 = vpop.f32.mrf.mxu1 }
 0x6c0   : > { %6819 = vrcp.f32 %v12867_v1  ;;  %v12890_v37 = vadd.f32 %v12829_v46, %v5285_v24  ;;  %vm5839_vm0 = vcmp.eq.f32.partialorder %v5838_v25, 8.507059e+37  ;;  %v5763_v3 = vand.u32 2147483647, %v12867_v1 }
 0x6c1   : > { %6017 = vst.msk [vmem:[%s12631_s26 + $0x48] sm:$0xf] %vm5998_vm8, %v5984_v16  ;;  %v5822_v28 = vsel %vm5821_vm5, %v6808_v5, %v5818_v40  ;;  %v5742_v2 = vmul.f32 %v6812_v30, %v5741_v61  ;;  %6821 = vpow2.f32 %v6332_v57  ;;  %v5765_v29 = vand.u32 2147483648, %v12867_v1 }
 0x6c2   : > { %v5827_v56 = vsel %vm5824_vm6, %v5826_v51, %v5822_v28  ;;  %v6816_v47 = vpop.eup %6815  ;;  %v6338_v9 = vmul.f32 -1.442695, %v12890_v37  ;;  %v5280_v14 = vmul.f32 %v12822_v50, %v5229_v41  ;;  %vm5759_vm13 = vweird.f32 %v12867_v1 }
 0x6c3   : > { %v5958_v54 = vmul.f32 %v5827_v56, %v12816_v34  ;;  %v5743_v48 = vadd.f32 %v6812_v30, %v5742_v2  ;;  %v5830_v52 = vmul.f32 %v6816_v47, %v12855_v55  ;;  %v6818_v49 = vpop.eup %6817  ;;  %vm5835_vm11 = vweird.f32 %v6816_v47  ;;  %v5244_v43 = vpop.f32.mrf.mxu2 }
 0x6c4   : > { %v12881_v59 = vadd.f32 1.0, %v6818_v49  ;;  %vm5836_vm3 = vmor %vm5834_vm2, %vm5835_vm11  ;;  %v5766_v16 = vor.u32 1.1754944e-38, %v5765_v29  ;;  %vm5764_vm1 = vcmp.eq.f32.partialorder %v5763_v3, 8.507059e+37  ;;  %v12907_v20 = vadd.f32 %v12829_v46, %v5280_v14 }
 0x6c5   : > { %v5990_v58 = vpack.c.bf16 %v5958_v54, %v5958_v54  ;;  %v5747_v34 = vsel %vm5746_vm12, %v6812_v30, %v5743_v48  ;;  %v5831_v6 = vsub.f32 1.0, %v5830_v52  ;;  %v5286_v28 = vmul.f32 %v12822_v50, %v5244_v43 }
 0x6c6   : > { %v5752_v33 = vsel %vm5749_vm10, %v5751_v23, %v5747_v34  ;;  %v6820_v35 = vpop.eup %6819  ;;  %6823 = vrcp.f32 %v12881_v59  ;;  %v5853_v40 = vand.u32 2147483647, %v12881_v59  ;;  %v5855_v11 = vand.u32 2147483648, %v12881_v59 }
 0x6c7   : > { %6023 = vst.msk [vmem:[%s12631_s26 + $0x60] sm:$0xf] %vm5998_vm8, %v5990_v58  ;;  %v5953_v39 = vmul.f32 %v5752_v33, %v12832_v8  ;;  %v5832_v45 = vmul.f32 %v6816_v47, %v5831_v6  ;;  %v5755_v26 = vmul.f32 %v6820_v35, %v12867_v1  ;;  %v6822_v5 = vpop.eup %6821  ;;  %vm5760_vm15 = vweird.f32 %v6820_v35  ;;  %v5231_v23 = vpop.f32.mrf.mxu1 }
 0x6c8   : > { %v12898_v31 = vadd.f32 1.0, %v6822_v5  ;;  %6825 = vpow2.f32 %v6338_v9  ;;  %vm5761_vm4 = vmor %vm5759_vm13, %vm5760_vm15  ;;  %v6333_v51 = vmul.f32 -1.442695, %v12907_v20  ;;  %vm5849_vm5 = vweird.f32 %v12881_v59 }
 0x6c9   : > { %v5985_v13 = vpack.c.bf16 %v5953_v39, %v5953_v39  ;;  %v5833_v4 = vadd.f32 %v6816_v47, %v5832_v45  ;;  %v5756_v36 = vsub.f32 1.0, %v5755_v26  ;;  %v5856_v54 = vor.u32 1.1754944e-38, %v5855_v11 }
 0x6ca   : > { %6827 = vrcp.f32 %v12898_v31  ;;  %vm5854_vm14 = vcmp.eq.f32.partialorder %v5853_v40, 8.507059e+37  ;;  %v5778_v57 = vand.u32 2147483647, %v12898_v31  ;;  %v5780_v49 = vand.u32 2147483648, %v12898_v31 }
 0x6cb   : > { %6018 = vst.msk [vmem:[%s12631_s26 + $0x4c] sm:$0xf] %vm5998_vm8, %v5985_v13  ;;  %v5837_v8 = vsel %vm5836_vm3, %v6816_v47, %v5833_v4  ;;  %v5757_v62 = vmul.f32 %v6820_v35, %v5756_v36  ;;  %6829 = vpow2.f32 %v6333_v51  ;;  %v5281_v34 = vmul.f32 %v12822_v50, %v5231_v23  ;;  %v5246_v13 = vpop.f32.mrf.mxu2 }
 0x6cc   : > { %v5842_v27 = vsel %vm5839_vm0, %v5841_v38, %v5837_v8  ;;  %v6824_v21 = vpop.eup %6823  ;;  %vm5774_vm12 = vweird.f32 %v12898_v31  ;;  %v5781_v39 = vor.u32 1.1754944e-38, %v5780_v49  ;;  %vm5779_vm11 = vcmp.eq.f32.partialorder %v5778_v57, 8.507059e+37 }
 0x6cd   : > { %v5959_v15 = vmul.f32 %v5842_v27, %v12839_v10  ;;  %v5758_v60 = vadd.f32 %v6820_v35, %v5757_v62  ;;  %v5845_v55 = vmul.f32 %v6824_v21, %v12881_v59  ;;  %vm5850_vm7 = vweird.f32 %v6824_v21 }
 0x6ce   : > { %v6826_v53 = vpop.eup %6825  ;;  %vm5851_vm6 = vmor %vm5849_vm5, %vm5850_vm7  ;;  %v12929_v59 = vadd.f32 %v12829_v46, %v5281_v34  ;;  %v5287_v38 = vmul.f32 %v12822_v50, %v5246_v13 }
 0x6cf   : > { %v5991_v7 = vpack.c.bf16 %v5959_v15, %v5959_v15  ;;  %v5762_v10 = vsel %vm5761_vm4, %v6820_v35, %v5758_v60  ;;  %v5846_v0 = vsub.f32 1.0, %v5845_v55  ;;  %v5449_v22 = vadd.f32 1.0, %v6826_v53 }
 0x6d0   : > { %v5767_v30 = vsel %vm5764_vm1, %v5766_v16, %v5762_v10  ;;  %v6828_v1 = vpop.eup %6827  ;;  %v6334_v35 = vmul.f32 -1.442695, %v12929_v59  ;;  %v12939_v9 = vadd.f32 %v12829_v46, %v5287_v38 }
 0x6d1   : > { %6024 = vst.msk [vmem:[%s12631_s26 + $0x64] sm:$0xf] %vm5998_vm8, %v5991_v7  ;;  %v5954_v63 = vmul.f32 %v5767_v30, %v12847_v18  ;;  %v5847_v44 = vmul.f32 %v6824_v21, %v5846_v0  ;;  %v12916_v18 = vadd.f32 %v12829_v46, %v5286_v28  ;;  %v5770_v17 = vmul.f32 %v6828_v1, %v12898_v31  ;;  %v6830_v6 = vpop.eup %6829 }
 0x6d2   : > { %6831 = vrcp.f32 %v5449_v22  ;;  %vm5775_vm9 = vweird.f32 %v6828_v1  ;;  %v12926_v33 = vadd.f32 1.0, %v6830_v6  ;;  %v5868_v3 = vand.u32 2147483647, %v5449_v22 }
 0x6d3   : > { %v5986_v61 = vpack.c.bf16 %v5954_v63, %v5954_v63  ;;  %v5848_v56 = vadd.f32 %v6824_v21, %v5847_v44  ;;  %v5771_v48 = vsub.f32 1.0, %v5770_v17  ;;  %v6339_v52 = vmul.f32 -1.442695, %v12916_v18  ;;  %vm5776_vm10 = vmor %vm5774_vm12, %vm5775_vm9  ;;  %v5249_v16 = vpop.f32.mrf.mxu2 }
 0x6d4   : > { %v5870_v5 = vand.u32 2147483648, %v5449_v22  ;;  %vm5864_vm3 = vweird.f32 %v5449_v22  ;;  %v6340_v14 = vmul.f32 -1.442695, %v12939_v9  ;;  %vm5869_vm15 = vcmp.eq.f32.partialorder %v5868_v3, 8.507059e+37 }
 0x6d5   : > { %6019 = vst.msk [vmem:[%s12631_s26 + $0x50] sm:$0xf] %vm5998_vm8, %v5986_v61  ;;  %v5852_v2 = vsel %vm5851_vm6, %v6824_v21, %v5848_v56  ;;  %v5772_v42 = vmul.f32 %v6828_v1, %v5771_v48  ;;  %6833 = vpow2.f32 %v6339_v52  ;;  %v5795_v0 = vand.u32 2147483648, %v12926_v33 }
 0x6d6   : > { %v5857_v47 = vsel %vm5854_vm14, %v5856_v54, %v5852_v2  ;;  %6835 = vrcp.f32 %v12926_v33  ;;  %v5871_v31 = vor.u32 1.1754944e-38, %v5870_v5  ;;  %v5288_v40 = vmul.f32 %v12822_v50, %v5249_v16 }
 0x6d7   : > { %v5960_v58 = vmul.f32 %v5857_v47, %v12858_v32  ;;  %v5773_v24 = vadd.f32 %v6828_v1, %v5772_v42  ;;  %6837 = vpow2.f32 %v6334_v35  ;;  %v5793_v63 = vand.u32 2147483647, %v12926_v33 }
 0x6d8   : > { %v6832_v32 = vpop.eup %6831  ;;  %vm5789_vm4 = vweird.f32 %v12926_v33  ;;  %v12953_v28 = vadd.f32 %v12829_v46, %v5288_v40 }
 0x6d9   : > { %v5992_v12 = vpack.c.bf16 %v5960_v58, %v5960_v58  ;;  %v5860_v45 = vmul.f32 %v6832_v32, %v5449_v22  ;;  %v5777_v25 = vsel %vm5776_vm10, %v6828_v1, %v5773_v24  ;;  %vm5865_vm2 = vweird.f32 %v6832_v32 }
 0x6da   : > { %v5782_v4 = vsel %vm5779_vm11, %v5781_v39, %v5777_v25  ;;  %vm5866_vm0 = vmor %vm5864_vm3, %vm5865_vm2  ;;  %vm5794_vm7 = vcmp.eq.f32.partialorder %v5793_v63, 8.507059e+37  ;;  %v6341_v17 = vmul.f32 -1.442695, %v12953_v28 }
 0x6db   : > { %6025 = vst.msk [vmem:[%s12631_s26 + $0x68] sm:$0xf] %vm5998_vm8, %v5992_v12  ;;  %v5861_v26 = vsub.f32 1.0, %v5860_v45  ;;  %v6834_v8 = vpop.eup %6833  ;;  %v5955_v36 = vmul.f32 %v5782_v4, %v12870_v19  ;;  %v5251_v23 = vpop.f32.mrf.mxu2 }
 0x6dc   : > { %v5450_v29 = vadd.f32 1.0, %v6834_v8  ;;  %v6836_v15 = vpop.eup %6835  ;;  %v5289_v12 = vmul.f32 %v12822_v50, %v5251_v23 }
 0x6dd   : > { %v5862_v27 = vmul.f32 %v6832_v32, %v5861_v26  ;;  %v5987_v41 = vpack.c.bf16 %v5955_v36, %v5955_v36  ;;  %v5785_v19 = vmul.f32 %v6836_v15, %v12926_v33  ;;  %v6838_v7 = vpop.eup %6837  ;;  %vm5790_vm13 = vweird.f32 %v6836_v15 }
 0x6de   : > { %6839 = vrcp.f32 %v5450_v29  ;;  %v5445_v30 = vadd.f32 1.0, %v6838_v7  ;;  %vm5791_vm1 = vmor %vm5789_vm4, %vm5790_vm13  ;;  %v5885_v54 = vand.u32 2147483648, %v5450_v29  ;;  %v5883_v48 = vand.u32 2147483647, %v5450_v29 }
 0x6df   : > { %v5863_v62 = vadd.f32 %v6832_v32, %v5862_v27  ;;  %6020 = vst.msk [vmem:[%s12631_s26 + $0x54] sm:$0xf] %vm5998_vm8, %v5987_v41  ;;  %v5786_v55 = vsub.f32 1.0, %v5785_v19  ;;  %6841 = vpow2.f32 %v6340_v14  ;;  %vm5879_vm6 = vweird.f32 %v5450_v29 }
 0x6e0   : > { %6843 = vrcp.f32 %v5445_v30  ;;  %v5886_v6 = vor.u32 1.1754944e-38, %v5885_v54  ;;  %vm5884_vm9 = vcmp.eq.f32.partialorder %v5883_v48, 8.507059e+37  ;;  %v12961_v24 = vadd.f32 %v12829_v46, %v5289_v12 }
 0x6e1   : > { %v5867_v21 = vsel %vm5866_vm0, %v6832_v32, %v5863_v62  ;;  %v5787_v11 = vmul.f32 %v6836_v15, %v5786_v55  ;;  %v5810_v32 = vand.u32 2147483648, %v5445_v30  ;;  %v5808_v25 = vand.u32 2147483647, %v5445_v30 }
 0x6e2   : > { %v5872_v60 = vsel %vm5869_vm15, %v5871_v31, %v5867_v21  ;;  %v6342_v13 = vmul.f32 -1.442695, %v12961_v24  ;;  %vm5804_vm10 = vweird.f32 %v5445_v30 }
 0x6e3   : > { %v5961_v10 = vmul.f32 %v5872_v60, %v12890_v37  ;;  %v5788_v43 = vadd.f32 %v6836_v15, %v5787_v11  ;;  %v5796_v37 = vor.u32 1.1754944e-38, %v5795_v0  ;;  %v5811_v8 = vor.u32 1.1754944e-38, %v5810_v32 }
 0x6e4   : > { %v6840_v44 = vpop.eup %6839  ;;  %vm5809_vm2 = vcmp.eq.f32.partialorder %v5808_v25, 8.507059e+37 }
 0x6e5   : > { %v5993_v51 = vpack.c.bf16 %v5961_v10, %v5961_v10  ;;  %v5875_v53 = vmul.f32 %v6840_v44, %v5450_v29  ;;  %v6842_v61 = vpop.eup %6841  ;;  %v5792_v56 = vsel %vm5791_vm1, %v6836_v15, %v5788_v43  ;;  %vm5880_vm5 = vweird.f32 %v6840_v44 }
 0x6e6   : > { %v5797_v1 = vsel %vm5794_vm7, %v5796_v37, %v5792_v56  ;;  %v5451_v2 = vadd.f32 1.0, %v6842_v61  ;;  %v6844_v52 = vpop.eup %6843  ;;  %vm5881_vm14 = vmor %vm5879_vm6, %vm5880_vm5 }
 0x6e7   : > { %6026 = vst.msk [vmem:[%s12631_s26 + $0x6c] sm:$0xf] %vm5998_vm8, %v5993_v51  ;;  %v5876_v22 = vsub.f32 1.0, %v5875_v53  ;;  %v5956_v47 = vmul.f32 %v5797_v1, %v12907_v20  ;;  %v5800_v34 = vmul.f32 %v6844_v52, %v5445_v30  ;;  %vm5805_vm12 = vweird.f32 %v6844_v52 }
 0x6e8   : > { %6845 = vrcp.f32 %v5451_v2  ;;  %vm5806_vm11 = vmor %vm5804_vm10, %vm5805_vm12  ;;  %v5898_v5 = vand.u32 2147483647, %v5451_v2  ;;  %v5900_v27 = vand.u32 2147483648, %v5451_v2  ;;  %vm5894_vm0 = vweird.f32 %v5451_v2 }
 0x6e9   : > { %v5877_v58 = vmul.f32 %v6840_v44, %v5876_v22  ;;  %v5988_v57 = vpack.c.bf16 %v5956_v47, %v5956_v47  ;;  %6847 = vpow2.f32 %v6341_v17  ;;  %v5801_v20 = vsub.f32 1.0, %v5800_v34 }
 0x6ea   : > { %6849 = vpow2.f32 %v6342_v13  ;;  %v5901_v19 = vor.u32 1.1754944e-38, %v5900_v27  ;;  %vm5899_vm13 = vcmp.eq.f32.partialorder %v5898_v5, 8.507059e+37 }
 0x6eb   : > { %v5878_v49 = vadd.f32 %v6840_v44, %v5877_v58  ;;  %6021 = vst.msk [vmem:[%s12631_s26 + $0x58] sm:$0xf] %vm5998_vm8, %v5988_v57  ;;  %v5802_v45 = vmul.f32 %v6844_v52, %v5801_v20 }
 0x6ed   : > { %v5882_v42 = vsel %vm5881_vm14, %v6840_v44, %v5878_v49  ;;  %v5803_v4 = vadd.f32 %v6844_v52, %v5802_v45 }
 0x6ee   : > { %v5887_v33 = vsel %vm5884_vm9, %v5886_v6, %v5882_v42  ;;  %v6846_v35 = vpop.eup %6845 }
 0x6ef   : > { %v5962_v39 = vmul.f32 %v5887_v33, %v12916_v18  ;;  %v5890_v26 = vmul.f32 %v6846_v35, %v5451_v2  ;;  %v6848_v38 = vpop.eup %6847  ;;  %v5807_v46 = vsel %vm5806_vm11, %v6844_v52, %v5803_v4  ;;  %vm5895_vm3 = vweird.f32 %v6846_v35 }
 0x6f0   : > { %v5452_v36 = vadd.f32 1.0, %v6848_v38  ;;  %v5812_v3 = vsel %vm5809_vm2, %v5811_v8, %v5807_v46  ;;  %v6850_v31 = vpop.eup %6849  ;;  %vm5896_vm15 = vmor %vm5894_vm0, %vm5895_vm3 }
 0x6f1   : > { %v5994_v50 = vpack.c.bf16 %v5962_v39, %v5962_v39  ;;  %v5891_v18 = vsub.f32 1.0, %v5890_v26  ;;  %v5957_v29 = vmul.f32 %v5812_v3, %v12929_v59  ;;  %v5453_v21 = vadd.f32 1.0, %v6850_v31 }
 0x6f2   : > { %6851 = vrcp.f32 %v5452_v36  ;;  %v5915_v0 = vand.u32 2147483648, %v5452_v36  ;;  %v5913_v40 = vand.u32 2147483647, %v5452_v36  ;;  %vm5909_vm1 = vweird.f32 %v5452_v36 }
 0x6f3   : > { %6027 = vst.msk [vmem:[%s12631_s26 + $0x70] sm:$0xf] %vm5998_vm8, %v5994_v50  ;;  %v5892_v41 = vmul.f32 %v6846_v35, %v5891_v18  ;;  %v5989_v15 = vpack.c.bf16 %v5957_v29, %v5957_v29  ;;  %6853 = vrcp.f32 %v5453_v21  ;;  %v5930_v37 = vand.u32 2147483648, %v5453_v21 }
 0x6f4   : > { %v5916_v51 = vor.u32 1.1754944e-38, %v5915_v0  ;;  %vm5914_vm5 = vcmp.eq.f32.partialorder %v5913_v40, 8.507059e+37  ;;  %v5928_v22 = vand.u32 2147483647, %v5453_v21  ;;  %vm5924_vm14 = vweird.f32 %v5453_v21 }
 0x6f5   : > { %v5893_v62 = vadd.f32 %v6846_v35, %v5892_v41  ;;  %6022 = vst.msk [vmem:[%s12631_s26 + $0x5c] sm:$0xf] %vm5998_vm8, %v5989_v15  ;;  %v5931_v2 = vor.u32 1.1754944e-38, %v5930_v37 }
 0x6f6   : > { %vm5929_vm12 = vcmp.eq.f32.partialorder %v5928_v22, 8.507059e+37 }
 0x6f7   : > { %v5897_v14 = vsel %vm5896_vm15, %v6846_v35, %v5893_v62 }
 0x6f8   : > { %v5902_v7 = vsel %vm5899_vm13, %v5901_v19, %v5897_v14  ;;  %v6852_v60 = vpop.eup %6851 }
 0x6f9   : > { %v5963_v55 = vmul.f32 %v5902_v7, %v12939_v9  ;;  %v5905_v59 = vmul.f32 %v6852_v60, %v5452_v36  ;;  %vm5910_vm4 = vweird.f32 %v6852_v60  ;;  %v6854_v11 = vpop.eup %6853 }
 0x6fa   : > { %v5920_v44 = vmul.f32 %v6854_v11, %v5453_v21  ;;  %vm5911_vm7 = vmor %vm5909_vm1, %vm5910_vm4  ;;  %vm5925_vm6 = vweird.f32 %v6854_v11 }
 0x6fb   : > { %v5995_v16 = vpack.c.bf16 %v5963_v55, %v5963_v55  ;;  %v5906_v10 = vsub.f32 1.0, %v5905_v59  ;;  %vm5926_vm9 = vmor %vm5924_vm14, %vm5925_vm6 }
 0x6fc   : > { %v5921_v9 = vsub.f32 1.0, %v5920_v44 }
 0x6fd   : > { %6028 = vst.msk [vmem:[%s12631_s26 + $0x74] sm:$0xf] %vm5998_vm8, %v5995_v16  ;;  %v5907_v30 = vmul.f32 %v6852_v60, %v5906_v10 }
 0x6fe   : > { %v5922_v56 = vmul.f32 %v6854_v11, %v5921_v9 }
 0x6ff   : > { %v5908_v63 = vadd.f32 %v6852_v60, %v5907_v30 }
 0x700   : > { %v5923_v54 = vadd.f32 %v6854_v11, %v5922_v56 }
 0x701   : > { %v5912_v43 = vsel %vm5911_vm7, %v6852_v60, %v5908_v63 }
 0x702   : > { %v5917_v53 = vsel %vm5914_vm5, %v5916_v51, %v5912_v43  ;;  %v5927_v17 = vsel %vm5926_vm9, %v6854_v11, %v5923_v54 }
 0x703   : > { %v5964_v61 = vmul.f32 %v5917_v53, %v12953_v28  ;;  %v5932_v47 = vsel %vm5929_vm12, %v5931_v2, %v5927_v17 }
 0x704   : > { %v5965_v58 = vmul.f32 %v5932_v47, %v12961_v24 }
 0x705   : > { %v5996_v1 = vpack.c.bf16 %v5964_v61, %v5964_v61 }
 0x706   : > { %v5997_v48 = vpack.c.bf16 %v5965_v58, %v5965_v58 }
 0x707   : > { %6029 = vst.msk [vmem:[%s12631_s26 + $0x78] sm:$0xf] %vm5998_vm8, %v5996_v1 }
 0x708   : > { %6030 = vst.msk [vmem:[%s12631_s26 + $0x7c] sm:$0xf] %vm5998_vm8, %v5997_v48 }
 0x709 PF: > { %s27_s24 = sadd.s32 1, %s6901_s24  }
 0x70a   : > { %p24_p4 = scmp.ge.s32.totalorder %s27_s24, 4  }
 0x70c   :  { %26 = sbr.rel (!%p24_p4) target bundleno = 3 (0x3), region = 119 }

</bundles_post_ra>
